<compile_context>
chip_gen: v6e
topology: v6e:2x2x1
jax: 0.10.0
libtpu: 0.0.40
codegen_flags: <defaults>
</compile_context>

<pallas_src>
import functools
import math

import jax
import jax.numpy as jnp
from jax.experimental import pallas as pl
from jax.experimental.pallas import tpu as pltpu


# ---------------------------------------------------------------------------
# math helpers (used both inside the kernel and in the pure-JAX reference)
# ---------------------------------------------------------------------------
def _artanh(x):
    # matches Artanh.forward: clamp then 0.5*(log(1+x) - log(1-x))
    x = jnp.clip(x, -1.0 + 1e-5, 1.0 - 1e-5)
    return 0.5 * (jnp.log(1.0 + x) - jnp.log(1.0 - x))


def _tanh_clamped(x, clamp=15.0):
    return jnp.tanh(jnp.clip(x, -clamp, clamp))


def _row_norm(x):
    return jnp.sqrt(jnp.sum(x * x, axis=-1, keepdims=True))


# ---------------------------------------------------------------------------
# Pallas kernel: one (chunk, row-tile) block per grid step
# ---------------------------------------------------------------------------
def _adapter_kernel(x_ref, wg_ref, o_ref, *, curvature):
    c = jnp.float32(curvature)
    sqrt_c = jnp.sqrt(c)
    inv_sqrt_c = 1.0 / sqrt_c
    n_groups, gs, _ = wg_ref.shape

    x = x_ref[...].astype(jnp.float32)                       # (TM, H)

    # ---- expmap0: g = tanh(sc*|u|) * u / (sc*|u|) ---------------------------
    u_norm = jnp.maximum(_row_norm(x), 1e-5)                 # row reduction 1
    scu = sqrt_c * u_norm
    tanh_scu = _tanh_clamped(scu)
    g = (tanh_scu * pl.reciprocal(scu, approx=False)) * x    # broadcast mult 1
    # analytic |g|: tanh(scu)/sqrt_c; identical to the reference's clamped
    # numeric norm (both clamp to 1e-5 in the degenerate tiny-row case).
    x_norm = jnp.maximum(tanh_scu * inv_sqrt_c, 1e-5)

    # ---- mobius_matvec: block-diagonal M.T as per-lane-group MXU matmuls ----
    mx_parts = []
    mx_sq = jnp.zeros((x.shape[0], 1), jnp.float32)
    for j in range(n_groups):
        gj = g[:, j * gs:(j + 1) * gs]                       # lane-aligned slice
        mj = jnp.dot(gj, wg_ref[j], preferred_element_type=jnp.float32)
        mx_parts.append(mj)
        mx_sq = mx_sq + jnp.sum(mj * mj, axis=-1, keepdims=True)
    mx_norm = jnp.sqrt(mx_sq)                                # row reduction 2

    # ---- fused per-row scale chain: mobius * project * logmap0 --------------
    t = _tanh_clamped(mx_norm * pl.reciprocal(x_norm, approx=False)
                      * _artanh(sqrt_c * x_norm))            # >= 0
    res_norm = t * inv_sqrt_c                                 # analytic |res|
    safe_mx_norm = jnp.where(mx_norm == 0.0, 1.0, mx_norm)
    mv_scale = t * pl.reciprocal(safe_mx_norm * sqrt_c, approx=False)

    norm = jnp.maximum(res_norm, 1e-5)
    maxnorm = (1.0 - 1e-3) * inv_sqrt_c                       # assumed >= 1e-5
    over = norm > maxnorm
    proj_scale = jnp.where(over, maxnorm * pl.reciprocal(norm, approx=False), 1.0)
    y_norm = jnp.where(over, maxnorm, norm)
    log_scale = (_artanh(sqrt_c * y_norm)
                 * pl.reciprocal(y_norm * sqrt_c, approx=False))

    # a row of mx is all-zero <=> mx_norm == 0 (documented f32-underflow caveat)
    final = jnp.where(mx_norm == 0.0, 0.0, mv_scale * proj_scale * log_scale)

    # ---- single broadcast multiply on mx, written per lane group ------------
    for j in range(n_groups):
        o_ref[:, j * gs:(j + 1) * gs] = (final * mx_parts[j]).astype(o_ref.dtype)


# ---------------------------------------------------------------------------
# host-side: lane-group weight packing, tiling choice, pallas_call wrapper
# ---------------------------------------------------------------------------
def _pick_group_size(hidden, dim):
    """Lane-group width for the block-diagonal matmul (multiple of both the
    block size and 128 so slices stay lane-aligned and the MXU RHS is wide)."""
    for gs in (256, 128):
        if hidden % gs == 0 and gs % dim == 0:
            return gs
    if dim % 128 == 0 and hidden % dim == 0:
        return dim
    return hidden  # dense fallback: one group covering the whole feature dim


def _pack_grouped_weights(blocks, group_size):
    """blocks: (3, r, dim, dim) in the PyTorch convention mx = x @ block_diag(blocks).T
    -> (3, H//GS, GS, GS): for each lane group, the block-diagonal of the
    transposed blocks that live in that group (so mx[:, grp] = g[:, grp] @ slab)."""
    three, r, d, _ = blocks.shape
    hidden = r * d
    bpg = group_size // d
    ng = hidden // group_size
    bt = jnp.swapaxes(blocks, -1, -2).reshape(three, ng, bpg, d, d)
    eye = jnp.eye(bpg, dtype=blocks.dtype)
    wg = jnp.einsum('cgpab,pq->cgpaqb', bt, eye)
    return wg.reshape(three, ng, group_size, group_size)


def _vmem_budget_bytes():
    cap = 64 << 20                       # conservative default (v7x physical)
    try:
        cap = int(getattr(pltpu.get_tpu_info(), "vmem_capacity_bytes", cap))
    except Exception:
        pass
    return max(int(cap * 0.85), 32 << 20)


def _pick_row_tile(hidden, weight_bytes, vmem_budget):
    """Largest multiple-of-128 divisor of `hidden` whose working set fits:
    double-buffered weight slab + double-buffered in/out row tiles + ~3 live
    (TM, H) f32 kernel temporaries + fixed headroom.  Never below 128."""
    cands = [t for t in (512, 384, 256, 128) if hidden % t == 0]
    if not cands:
        cands = [hidden]                 # small / irregular hidden: one tile
    for tm in cands:
        need = 2 * weight_bytes + 7 * tm * hidden * 4 + (8 << 20)
        if need <= vmem_budget:
            return tm
    return cands[-1]


def adapter_init_forward(attn, weight_blocks, curvature=1.0, row_tile=None):
    """attn: (3*H, H) fused q/k/v projection weight.
    weight_blocks: (3, r, dim, dim) adapter blocks (module parameter layout)."""
    three_h, hidden = attn.shape
    assert three_h == 3 * hidden
    three, r, d, d2 = weight_blocks.shape
    assert three == 3 and d == d2 and r * d == hidden

    gs = _pick_group_size(hidden, d)
    wg = _pack_grouped_weights(weight_blocks, gs)
    n_groups = hidden // gs
    weight_bytes = n_groups * gs * gs * 4

    budget = _vmem_budget_bytes()
    tm = row_tile if row_tile is not None else _pick_row_tile(hidden, weight_bytes, budget)
    assert hidden % tm == 0 and tm % 8 == 0
    n_row_tiles = hidden // tm

    kernel = functools.partial(_adapter_kernel, curvature=float(curvature))

    return pl.pallas_call(
        kernel,
        out_shape=jax.ShapeDtypeStruct((3 * hidden, hidden), attn.dtype),
        grid_spec=pltpu.PrefetchScalarGridSpec(
            num_scalar_prefetch=0,
            grid=(3, n_row_tiles),                    # (chunk, row-tile), rows fastest
            in_specs=[
                # (TM, H) row tile of the current q/k/v chunk.
                pl.BlockSpec((tm, hidden), lambda c, i: (c * n_row_tiles + i, 0)),
                # Chunk's lane-group weight slabs; constant along the row axis
                # so they stay VMEM-resident across row tiles of one chunk.
                pl.BlockSpec((pl.Squeezed(), n_groups, gs, gs),
                             lambda c, i: (c, 0, 0, 0)),
            ],
            out_specs=pl.BlockSpec((tm, hidden), lambda c, i: (c * n_row_tiles + i, 0)),
        ),
        compiler_params=pltpu.CompilerParams(
            # chunk axis 'arbitrary' so v7x megacore splits along rows, not the
            # size-3 chunk axis (no 2-vs-1 imbalance); no effect on v5e/v6e.
            dimension_semantics=("arbitrary", "parallel"),
            vmem_limit_bytes=int(budget),
        ),
    )(attn, wg)


# ---------------------------------------------------------------------------
# pure-JAX reference mirroring the PyTorch module exactly
# ---------------------------------------------------------------------------
def _block_diag(blocks):
    r, d, _ = blocks.shape
    hidden = r * d
    M = jnp.zeros((hidden, hidden), blocks.dtype)
    for i in range(r):
        M = M.at[i * d:(i + 1) * d, i * d:(i + 1) * d].set(blocks[i])
    return M


def _ref_block(x, M, c):
    sqrt_c = math.sqrt(c)
    u_norm = jnp.maximum(_row_norm(x), 1e-5)
    g = _tanh_clamped(sqrt_c * u_norm) * x / (sqrt_c * u_norm)
    x_norm = jnp.maximum(_row_norm(g), 1e-5)
    mx = g @ M.T
    mx_norm = _row_norm(mx)
    res_c = (_tanh_clamped(mx_norm / x_norm * _artanh(sqrt_c * x_norm))
             * mx / (mx_norm * sqrt_c))
    cond = jnp.all(mx == 0.0, axis=-1, keepdims=True)
    res = jnp.where(cond, 0.0, res_c)
    norm = jnp.maximum(_row_norm(res), 1e-5)
    maxnorm = (1.0 - 1e-3) / sqrt_c
    res = jnp.where(norm > maxnorm, res / norm * maxnorm, res)
    y_norm = jnp.maximum(_row_norm(res), 1e-5)
    return res / y_norm / sqrt_c * _artanh(sqrt_c * y_norm)


def _ref_forward(attn, weight_blocks, curvature):
    hidden = attn.shape[1]
    outs = []
    for i in range(3):
        M = _block_diag(weight_blocks[i])
        outs.append(_ref_block(attn[i * hidden:(i + 1) * hidden], M, curvature))
    return jnp.concatenate(outs, axis=0)


# ---------------------------------------------------------------------------
if __name__ == "__main__":
    hidden_size = 384      # 3 lane groups of 128 with dim=32 (r = 12 blocks)
    dim = 32
    curvature_ratio = 1.0

    key = jax.random.PRNGKey(0)
    k_attn, k_q, k_k, k_v = jax.random.split(key, 4)

    # `attn` plays the role of a fused in_proj weight: (3*hidden, hidden)
    attn = jax.random.normal(k_attn, (3 * hidden_size, hidden_size), jnp.float32) * 0.1

    r = hidden_size // dim

    def adapter_blocks(k):
        # BlockDiagonalLinear init is a stack of identity blocks; add a small
        # perturbation so the matmul path is exercised non-trivially.
        return (jnp.eye(dim, dtype=jnp.float32)[None]
                + 0.05 * jax.random.normal(k, (r, dim, dim), jnp.float32))

    weight_blocks = jnp.stack(
        [adapter_blocks(k_q), adapter_blocks(k_k), adapter_blocks(k_v)], axis=0)

    ref = _ref_forward(attn, weight_blocks, curvature_ratio)

    # 1) auto tiling (one (H, H) row tile per chunk at this small H)
    out = jax.block_until_ready(
        adapter_init_forward(attn, weight_blocks, curvature=curvature_ratio))
    # 2) forced small row tile: exercises the multi-row-tile grid path (3x3 grid)
    out_tiled = jax.block_until_ready(
        adapter_init_forward(attn, weight_blocks, curvature=curvature_ratio,
                             row_tile=128))

    assert out.shape == attn.shape and out.dtype == attn.dtype
    for o in (out, out_tiled):
        max_err = float(jnp.max(jnp.abs(o - ref)))
        assert jnp.allclose(o, ref, atol=1e-5, rtol=1e-5), (
            f"mismatch vs reference: max abs diff {max_err}")

    print("KERNEL_OK")
</pallas_src>

<mosaic_0001>
module attributes {stable_mosaic.version = 11 : i64} {
  func.func @_adapter_kernel(%arg0: i32, %arg1: i32, %arg2: memref<384x384xf32, #tpu.memory_space<vmem>>, %arg3: memref<1x3x128x128xf32, #tpu.memory_space<vmem>>, %arg4: memref<384x384xf32, #tpu.memory_space<vmem>>) attributes {dimension_semantics = [#tpu.dimension_semantics<arbitrary>, #tpu.dimension_semantics<parallel>], iteration_bounds = array<i64: 3, 1>, scalar_prefetch = 0 : i64, scratch_operands = 0 : i64, tpu.core_type = #tpu.core_type<tc>, window_params = [{transform_indices = @transform_0, window_bounds = array<i64: 384, 384>}, {transform_indices = @transform_1, window_bounds = array<i64: 1, 3, 128, 128>}, {transform_indices = @transform_2, window_bounds = array<i64: 384, 384>}]} {
    %cst = arith.constant 1.000000e+00 : f32
    %0 = math.sqrt %cst : f32
    %cst_0 = arith.constant 1.000000e+00 : f32
    %1 = arith.divf %cst_0, %0 : f32
    %c0 = arith.constant 0 : index
    %c0_1 = arith.constant 0 : index
    %2 = vector.load %arg2[%c0, %c0_1] : memref<384x384xf32, #tpu.memory_space<vmem>>, vector<384x384xf32>
    %3 = arith.mulf %2, %2 : vector<384x384xf32>
    %cst_2 = arith.constant dense<0.000000e+00> : vector<384xf32>
    %4 = vector.multi_reduction <add>, %3, %cst_2 [1] : vector<384x384xf32> to vector<384xf32>
    %5 = vector.shape_cast %4 : vector<384xf32> to vector<384x1xf32>
    %6 = math.sqrt %5 : vector<384x1xf32>
    %cst_3 = arith.constant 9.99999974E-6 : f32
    %7 = vector.broadcast %cst_3 : f32 to vector<384x1xf32>
    %8 = arith.maximumf %6, %7 : vector<384x1xf32>
    %9 = vector.broadcast %0 : f32 to vector<384x1xf32>
    %10 = arith.mulf %9, %8 : vector<384x1xf32>
    %cst_4 = arith.constant -1.500000e+01 : f32
    %cst_5 = arith.constant 1.500000e+01 : f32
    %11 = vector.broadcast %cst_4 : f32 to vector<384x1xf32>
    %12 = arith.maximumf %11, %10 : vector<384x1xf32>
    %13 = vector.broadcast %cst_5 : f32 to vector<384x1xf32>
    %14 = arith.minimumf %13, %12 : vector<384x1xf32>
    %15 = math.tanh %14 : vector<384x1xf32>
    %16 = tpu.reciprocal %10 : vector<384x1xf32> -> vector<384x1xf32>
    %17 = arith.mulf %15, %16 : vector<384x1xf32>
    %18 = vector.broadcast %17 : vector<384x1xf32> to vector<384x384xf32>
    %19 = arith.mulf %18, %2 : vector<384x384xf32>
    %20 = vector.broadcast %1 : f32 to vector<384x1xf32>
    %21 = arith.mulf %15, %20 : vector<384x1xf32>
    %cst_6 = arith.constant 9.99999974E-6 : f32
    %22 = vector.broadcast %cst_6 : f32 to vector<384x1xf32>
    %23 = arith.maximumf %21, %22 : vector<384x1xf32>
    %cst_7 = arith.constant 0.000000e+00 : f32
    %24 = vector.broadcast %cst_7 : f32 to vector<384x1xf32>
    %25 = vector.extract_strided_slice %19 {offsets = [0, 0], sizes = [384, 128], strides = [1, 1]} : vector<384x384xf32> to vector<384x128xf32>
    %c0_8 = arith.constant 0 : index
    %c0_9 = arith.constant 0 : index
    %c0_10 = arith.constant 0 : index
    %c0_11 = arith.constant 0 : index
    %26 = vector.load %arg3[%c0_8, %c0_9, %c0_10, %c0_11] : memref<1x3x128x128xf32, #tpu.memory_space<vmem>>, vector<1x1x128x128xf32>
    %27 = vector.shape_cast %26 : vector<1x1x128x128xf32> to vector<128x128xf32>
    %cst_12 = arith.constant dense<0.000000e+00> : vector<384x128xf32>
    %28 = tpu.matmul %25, %27, %cst_12 {dimension_numbers = #tpu.dot_dimension_numbers<[1], [0], [0], [1], [0, 0, 1, 1], [], []>} : vector<384x128xf32>, vector<128x128xf32>, vector<384x128xf32> -> vector<384x128xf32>
    %29 = arith.mulf %28, %28 : vector<384x128xf32>
    %cst_13 = arith.constant dense<0.000000e+00> : vector<384xf32>
    %30 = vector.multi_reduction <add>, %29, %cst_13 [1] : vector<384x128xf32> to vector<384xf32>
    %31 = vector.shape_cast %30 : vector<384xf32> to vector<384x1xf32>
    %32 = arith.addf %24, %31 : vector<384x1xf32>
    %33 = vector.extract_strided_slice %19 {offsets = [0, 128], sizes = [384, 128], strides = [1, 1]} : vector<384x384xf32> to vector<384x128xf32>
    %c0_14 = arith.constant 0 : index
    %c1 = arith.constant 1 : index
    %c0_15 = arith.constant 0 : index
    %c0_16 = arith.constant 0 : index
    %34 = vector.load %arg3[%c0_14, %c1, %c0_15, %c0_16] : memref<1x3x128x128xf32, #tpu.memory_space<vmem>>, vector<1x1x128x128xf32>
    %35 = vector.shape_cast %34 : vector<1x1x128x128xf32> to vector<128x128xf32>
    %cst_17 = arith.constant dense<0.000000e+00> : vector<384x128xf32>
    %36 = tpu.matmul %33, %35, %cst_17 {dimension_numbers = #tpu.dot_dimension_numbers<[1], [0], [0], [1], [0, 0, 1, 1], [], []>} : vector<384x128xf32>, vector<128x128xf32>, vector<384x128xf32> -> vector<384x128xf32>
    %37 = arith.mulf %36, %36 : vector<384x128xf32>
    %cst_18 = arith.constant dense<0.000000e+00> : vector<384xf32>
    %38 = vector.multi_reduction <add>, %37, %cst_18 [1] : vector<384x128xf32> to vector<384xf32>
    %39 = vector.shape_cast %38 : vector<384xf32> to vector<384x1xf32>
    %40 = arith.addf %32, %39 : vector<384x1xf32>
    %41 = vector.extract_strided_slice %19 {offsets = [0, 256], sizes = [384, 128], strides = [1, 1]} : vector<384x384xf32> to vector<384x128xf32>
    %c0_19 = arith.constant 0 : index
    %c2 = arith.constant 2 : index
    %c0_20 = arith.constant 0 : index
    %c0_21 = arith.constant 0 : index
    %42 = vector.load %arg3[%c0_19, %c2, %c0_20, %c0_21] : memref<1x3x128x128xf32, #tpu.memory_space<vmem>>, vector<1x1x128x128xf32>
    %43 = vector.shape_cast %42 : vector<1x1x128x128xf32> to vector<128x128xf32>
    %cst_22 = arith.constant dense<0.000000e+00> : vector<384x128xf32>
    %44 = tpu.matmul %41, %43, %cst_22 {dimension_numbers = #tpu.dot_dimension_numbers<[1], [0], [0], [1], [0, 0, 1, 1], [], []>} : vector<384x128xf32>, vector<128x128xf32>, vector<384x128xf32> -> vector<384x128xf32>
    %45 = arith.mulf %44, %44 : vector<384x128xf32>
    %cst_23 = arith.constant dense<0.000000e+00> : vector<384xf32>
    %46 = vector.multi_reduction <add>, %45, %cst_23 [1] : vector<384x128xf32> to vector<384xf32>
    %47 = vector.shape_cast %46 : vector<384xf32> to vector<384x1xf32>
    %48 = arith.addf %40, %47 : vector<384x1xf32>
    %49 = math.sqrt %48 : vector<384x1xf32>
    %50 = tpu.reciprocal %23 : vector<384x1xf32> -> vector<384x1xf32>
    %51 = arith.mulf %49, %50 : vector<384x1xf32>
    %52 = vector.broadcast %0 : f32 to vector<384x1xf32>
    %53 = arith.mulf %52, %23 : vector<384x1xf32>
    %cst_24 = arith.constant -0.999989986 : f32
    %cst_25 = arith.constant 0.999989986 : f32
    %54 = vector.broadcast %cst_24 : f32 to vector<384x1xf32>
    %55 = arith.maximumf %54, %53 : vector<384x1xf32>
    %56 = vector.broadcast %cst_25 : f32 to vector<384x1xf32>
    %57 = arith.minimumf %56, %55 : vector<384x1xf32>
    %cst_26 = arith.constant 1.000000e+00 : f32
    %58 = vector.broadcast %cst_26 : f32 to vector<384x1xf32>
    %59 = arith.addf %58, %57 : vector<384x1xf32>
    %60 = math.log %59 : vector<384x1xf32>
    %cst_27 = arith.constant 1.000000e+00 : f32
    %61 = vector.broadcast %cst_27 : f32 to vector<384x1xf32>
    %62 = arith.subf %61, %57 : vector<384x1xf32>
    %63 = math.log %62 : vector<384x1xf32>
    %64 = arith.subf %60, %63 : vector<384x1xf32>
    %cst_28 = arith.constant 5.000000e-01 : f32
    %65 = vector.broadcast %cst_28 : f32 to vector<384x1xf32>
    %66 = arith.mulf %65, %64 : vector<384x1xf32>
    %67 = arith.mulf %51, %66 : vector<384x1xf32>
    %cst_29 = arith.constant -1.500000e+01 : f32
    %cst_30 = arith.constant 1.500000e+01 : f32
    %68 = vector.broadcast %cst_29 : f32 to vector<384x1xf32>
    %69 = arith.maximumf %68, %67 : vector<384x1xf32>
    %70 = vector.broadcast %cst_30 : f32 to vector<384x1xf32>
    %71 = arith.minimumf %70, %69 : vector<384x1xf32>
    %72 = math.tanh %71 : vector<384x1xf32>
    %73 = vector.broadcast %1 : f32 to vector<384x1xf32>
    %74 = arith.mulf %72, %73 : vector<384x1xf32>
    %cst_31 = arith.constant 0.000000e+00 : f32
    %75 = vector.broadcast %cst_31 : f32 to vector<384x1xf32>
    %76 = arith.cmpf oeq, %49, %75 : vector<384x1xf32>
    %cst_32 = arith.constant 1.000000e+00 : f32
    %77 = vector.broadcast %cst_32 : f32 to vector<384x1xf32>
    %78 = arith.select %76, %77, %49 : vector<384x1xi1>, vector<384x1xf32>
    %79 = vector.broadcast %0 : f32 to vector<384x1xf32>
    %80 = arith.mulf %78, %79 : vector<384x1xf32>
    %81 = tpu.reciprocal %80 : vector<384x1xf32> -> vector<384x1xf32>
    %82 = arith.mulf %72, %81 : vector<384x1xf32>
    %cst_33 = arith.constant 9.99999974E-6 : f32
    %83 = vector.broadcast %cst_33 : f32 to vector<384x1xf32>
    %84 = arith.maximumf %74, %83 : vector<384x1xf32>
    %cst_34 = arith.constant 9.990000e-01 : f32
    %85 = arith.mulf %cst_34, %1 : f32
    %86 = vector.broadcast %85 : f32 to vector<384x1xf32>
    %87 = arith.cmpf ogt, %84, %86 : vector<384x1xf32>
    %88 = tpu.reciprocal %84 : vector<384x1xf32> -> vector<384x1xf32>
    %89 = vector.broadcast %85 : f32 to vector<384x1xf32>
    %90 = arith.mulf %89, %88 : vector<384x1xf32>
    %cst_35 = arith.constant 1.000000e+00 : f32
    %91 = vector.broadcast %cst_35 : f32 to vector<384x1xf32>
    %92 = arith.select %87, %90, %91 : vector<384x1xi1>, vector<384x1xf32>
    %93 = vector.broadcast %85 : f32 to vector<384x1xf32>
    %94 = arith.select %87, %93, %84 : vector<384x1xi1>, vector<384x1xf32>
    %95 = vector.broadcast %0 : f32 to vector<384x1xf32>
    %96 = arith.mulf %95, %94 : vector<384x1xf32>
    %cst_36 = arith.constant -0.999989986 : f32
    %cst_37 = arith.constant 0.999989986 : f32
    %97 = vector.broadcast %cst_36 : f32 to vector<384x1xf32>
    %98 = arith.maximumf %97, %96 : vector<384x1xf32>
    %99 = vector.broadcast %cst_37 : f32 to vector<384x1xf32>
    %100 = arith.minimumf %99, %98 : vector<384x1xf32>
    %cst_38 = arith.constant 1.000000e+00 : f32
    %101 = vector.broadcast %cst_38 : f32 to vector<384x1xf32>
    %102 = arith.addf %101, %100 : vector<384x1xf32>
    %103 = math.log %102 : vector<384x1xf32>
    %cst_39 = arith.constant 1.000000e+00 : f32
    %104 = vector.broadcast %cst_39 : f32 to vector<384x1xf32>
    %105 = arith.subf %104, %100 : vector<384x1xf32>
    %106 = math.log %105 : vector<384x1xf32>
    %107 = arith.subf %103, %106 : vector<384x1xf32>
    %cst_40 = arith.constant 5.000000e-01 : f32
    %108 = vector.broadcast %cst_40 : f32 to vector<384x1xf32>
    %109 = arith.mulf %108, %107 : vector<384x1xf32>
    %110 = vector.broadcast %0 : f32 to vector<384x1xf32>
    %111 = arith.mulf %94, %110 : vector<384x1xf32>
    %112 = tpu.reciprocal %111 : vector<384x1xf32> -> vector<384x1xf32>
    %113 = arith.mulf %109, %112 : vector<384x1xf32>
    %cst_41 = arith.constant 0.000000e+00 : f32
    %114 = vector.broadcast %cst_41 : f32 to vector<384x1xf32>
    %115 = arith.cmpf oeq, %49, %114 : vector<384x1xf32>
    %116 = arith.mulf %82, %92 : vector<384x1xf32>
    %117 = arith.mulf %116, %113 : vector<384x1xf32>
    %cst_42 = arith.constant 0.000000e+00 : f32
    %118 = vector.broadcast %cst_42 : f32 to vector<384x1xf32>
    %119 = arith.select %115, %118, %117 : vector<384x1xi1>, vector<384x1xf32>
    %120 = vector.broadcast %119 : vector<384x1xf32> to vector<384x128xf32>
    %121 = arith.mulf %120, %28 : vector<384x128xf32>
    %c0_43 = arith.constant 0 : index
    %c0_44 = arith.constant 0 : index
    %122 = vector.load %arg4[%c0_43, %c0_44] : memref<384x384xf32, #tpu.memory_space<vmem>>, vector<384x128xf32>
    tpu.vector_store %arg4[%c0_43, %c0_44], %121 {strides = array<i32>} : memref<384x384xf32, #tpu.memory_space<vmem>>, vector<384x128xf32>,
    %123 = vector.broadcast %119 : vector<384x1xf32> to vector<384x128xf32>
    %124 = arith.mulf %123, %36 : vector<384x128xf32>
    %c0_45 = arith.constant 0 : index
    %c128 = arith.constant 128 : index
    %125 = vector.load %arg4[%c0_45, %c128] : memref<384x384xf32, #tpu.memory_space<vmem>>, vector<384x128xf32>
    tpu.vector_store %arg4[%c0_45, %c128], %124 {strides = array<i32>} : memref<384x384xf32, #tpu.memory_space<vmem>>, vector<384x128xf32>,
    %126 = vector.broadcast %119 : vector<384x1xf32> to vector<384x128xf32>
    %127 = arith.mulf %126, %44 : vector<384x128xf32>
    %c0_46 = arith.constant 0 : index
    %c256 = arith.constant 256 : index
    %128 = vector.load %arg4[%c0_46, %c256] : memref<384x384xf32, #tpu.memory_space<vmem>>, vector<384x128xf32>
    tpu.vector_store %arg4[%c0_46, %c256], %127 {strides = array<i32>} : memref<384x384xf32, #tpu.memory_space<vmem>>, vector<384x128xf32>,
    return
  }
  func.func @transform_0(%arg0: i32, %arg1: i32) -> (i32, i32) {
    %c1_i32 = arith.constant 1 : i32
    %0 = arith.muli %arg0, %c1_i32 : i32
    %1 = arith.addi %0, %arg1 : i32
    %c0_i32 = arith.constant 0 : i32
    %c0_i32_0 = arith.constant 0 : i32
    return %1, %c0_i32 : i32, i32
  }
  func.func @transform_1(%arg0: i32, %arg1: i32) -> (i32, i32, i32, i32) {
    %c0_i32 = arith.constant 0 : i32
    %c0_i32_0 = arith.constant 0 : i32
    %c0_i32_1 = arith.constant 0 : i32
    %c0_i32_2 = arith.constant 0 : i32
    return %arg0, %c0_i32, %c0_i32_0, %c0_i32_1 : i32, i32, i32, i32
  }
  func.func @transform_2(%arg0: i32, %arg1: i32) -> (i32, i32) {
    %c1_i32 = arith.constant 1 : i32
    %0 = arith.muli %arg0, %c1_i32 : i32
    %1 = arith.addi %0, %arg1 : i32
    %c0_i32 = arith.constant 0 : i32
    %c0_i32_0 = arith.constant 0 : i32
    return %1, %c0_i32 : i32, i32
  }
}

</mosaic_0001>

<bundles_post_ra>
// kernel: tpu_custom_call.1
= control target key start
LH: loop header
LB: loop body
LE: loop exit
PB: predicated region body
PF: predicated region fallthrough
CT: control target
= control target key end

     0   :  { %7 = vsyncpa [#allocation3], 0  ;;  %s13418_s0 = inlined_call_operand.hbm [shape: f32[1152,384], index: 0, kind: input, shape index: {}]   ;;  %s13419_s1 = inlined_call_operand.hbm [shape: f32[3,3,128,128], index: 1, kind: input, shape index: {}]   ;;  %s13420_s2 = inlined_call_operand.hbm [shape: f32[1152,384], index: 2, kind: output, shape index: {}]  }
   0x1   :  { %9 = vsyncpa [#allocation3 + $0x1], 0 }
   0x2   :  { %10 = vsyncpa [#allocation6], 0 }
   0x3   :  { %12 = vsyncpa [#allocation6 + $0x1], 0 }
   0x4   :  { %13 = vsyncpa [#allocation4], 0 }
   0x5   :  { %15 = vsyncpa [#allocation4 + $0x1], 0  ;;  %s8185_s9 = smov 0   ;;  %s8187_s10 = smov 0  }
   0x6   :  { %s8189_s11 = smov 0   ;;  %s8191_s12 = smov 0  }
   0x7   :  { %s8193_s13 = smov 0   ;;  %s8195_s14 = smov 0  }
   0x8 LB: > { %s5775_s15 = sadd.s32 4294967295, %s8159_s14   ;;  %s5776_s16 = sadd.s32 4294967294, %s8159_s14   ;;  %s8159_s14 = sphi %s8195_s14, %s21_s14   ;;  %s8155_s13 = sphi %s8193_s13, %s14482_s13   ;;  %s8151_s12 = sphi %s8191_s12, %s14481_s12   ;;  %s8147_s11 = sphi %s8189_s11, %s14480_s11   ;;  %s8143_s10 = sphi %s8187_s10, %s14479_s10   ;;  %s8139_s9 = sphi %s8185_s9, %s14478_s9  }
   0x9   : > { %s33_s17 = sadd.s32 1, %s8155_s13  ;;  %s42_s18 = sadd.s32 1, %s8147_s11 }
   0xa   : > { %p35_p0 = scmp.ge.s32.totalorder %s33_s17, 3  ;;  %p49_p1 = scmp.ne.s32.totalorder %s8147_s11, %s8143_s10 }
   0xb   : > { %p50_p2 = scmp.eq.s32.totalorder %s8159_s14, 0  ;;  %p55_p3 = scmp.ne.s32.totalorder %s8143_s10, %s8139_s9 }
   0xc   : > { %s14484_s17 = smov (%p35_p0, %s33_s17), 0  ;;  %p56_p5 = scmp.eq.s32.totalorder %s5775_s15, 0 }
   0xd   : > { %p8226_p4 = por %p50_p2, %p49_p1  ;;  %s39_s20 = ssub.s32 %s8155_s13, %s14484_s17 }
   0xe   : > { %p107_p6 = scmp.eq.s32.totalorder %s5775_s15, 2  ;;  %p40_p7 = scmp.eq.s32.totalorder %s39_s20, 0 }
   0xf   : > { %p8232_p8 = por %p56_p5, %p55_p3  ;;  %p113_p10 = scmp.eq.s32.totalorder %s5776_s16, 2 }
  0x10   : > { %p8236_p9 = por %p107_p6, %p49_p1  ;;  %p6569_p12 = scmp.lt.s32.totalorder %s8159_s14, 3 }
  0x11   : > { %s8241_s23 = scalar_select %p40_p7, %s8147_s11, %s42_s18  }
  0x12   : > { %p8243_p11 = por %p113_p10, %p55_p3  ;;  %s8249_s25 = sand.u32 1, %s8147_s11  }
  0x13   : > { %s6545_s26 = smul.u32 1152, %s8249_s25  ;;  %p8254_p13 = pnand %p6569_p12, %p8226_p4 }
  0x14   : > { %s6570_s28 = smul.u32 18432, %s8155_s13  ;;  %s134_s6 = scalar_lea.sflag [#allocation3], %s8249_s25 }
  0x15   : > { %s137_s29 = scalar_lea.vmem [#allocation2], %s6545_s26  ;;  %p8021_p0 = pneg %p8254_p13 }
  0x16   : > { %s146_s30 = sshll.u32 %s137_s29, 4  ;;  %s145_s5 = scalar_lea.hbm %s13418_s0, %s6570_s28  ;;  %s147_s30 = int_to_ptr.vmem [resolvable:$true] %s146_s30 }
  0x17   : > { %s8032_s7 = scalar_lea.vmem %s147_s30, 18432  ;;  %s8161_s8 = smov [#allocation2]  }
  0x18   : > { %p8033_p1 = scmp.ne.s32.totalorder %s147_s30, %s8032_s7  ;;  %s8037_s15 = sshll.u32 %s8161_s8, 4  ;;  %s8038_s15 = int_to_ptr.vmem [resolvable:$false] %s8037_s15 }
  0x19   : > { %s8039_s16 = scalar_lea.vmem %s8038_s15, 36864  ;;  %p8040_p4 = scmp.lt.s32.totalorder %s147_s30, %s8038_s15 }
  0x1a   : > { %p8035_p2 = pnand %p8033_p1, %p8021_p0  ;;  %p8041_p5 = scmp.lt.s32.totalorder %s8039_s16, %s8032_s7 }
  0x1c   : > { %p8036_p3 = pneg %p8035_p2  ;;  %p8042_p6 = por %p8041_p5, %p8040_p4 }
  0x1e   : > { %p8043_p7 = pnand %p8042_p6, %p8036_p3 }
  0x20   : > { %8046 = shalt.err (!%p8043_p7)
}
  0x21   : > { %s8162_s18 = smov 384   ;;  %s8163_s19 = smov 24  }
  0x22   : > { %6561 = dma.hbm_to_vmem [thread:$0]  (!%p8254_p13), %s145_s5, 18432, %s147_s30, %s134_s6, %s8162_s18, %s8162_s18, %s8163_s19  }
  0x23   : > { %p5781_p10 = scmp.ge.s32.totalorder %s8159_s14, 1  ;;  %p175_p12 = scmp.lt.s32.totalorder %s8159_s14, 4 }
  0x24   : > { %s6547_s20 = smul.u32 384, %s8249_s25  ;;  %s157_s15 = scalar_lea.sflag [#allocation6], %s8249_s25 }
  0x25   : > { %p8273_p1 = pnand %p5781_p10, %p175_p12  ;;  %s6548_s28 = smul.u32 6144, %s8155_s13 }
  0x26   : > { %s160_s7 = scalar_lea.vmem [#allocation5], %s6547_s20  ;;  %s8164_s30 = smov [#allocation5]  }
  0x27   : > { %s166_s4 = scalar_lea.hbm %s13419_s1, %s6548_s28  ;;  %s167_s8 = sshll.u32 %s160_s7, 4  ;;  %s168_s8 = int_to_ptr.vmem [resolvable:$true] %s167_s8 }
  0x28   : > { %s8060_s16 = scalar_lea.vmem %s168_s8, 6144  ;;  %s8065_s5 = sshll.u32 %s8164_s30, 4  ;;  %s8066_s5 = int_to_ptr.vmem [resolvable:$false] %s8065_s5 }
  0x29   : > { %p8061_p2 = scmp.ne.s32.totalorder %s168_s8, %s8060_s16  ;;  %s8067_s6 = scalar_lea.vmem %s8066_s5, 12288 }
  0x2a   : > { %p8068_p5 = scmp.lt.s32.totalorder %s168_s8, %s8066_s5  ;;  %p8069_p6 = scmp.lt.s32.totalorder %s8067_s6, %s8060_s16 }
  0x2b   : > { %p8063_p3 = pnand %p8061_p2, %p8021_p0 }
  0x2c   : > { %p8070_p7 = por %p8069_p6, %p8068_p5 }
  0x2d   : > { %p8064_p4 = pneg %p8063_p3 }
  0x2f   : > { %p8071_p10 = pnand %p8070_p7, %p8064_p4 }
  0x31   : > { %8074 = shalt.err (!%p8071_p10)
}
  0x32   : > { %s8165_s18 = smov 128   ;;  %s8166_s19 = smov 8  }
  0x33   : > { %6564 = dma.hbm_to_vmem [thread:$0]  (!%p8254_p13), %s166_s4, 6144, %s168_s8, %s157_s15, %s8165_s18, %s8165_s18, %s8166_s19  }
  0x34   : > { %179 = sbr.rel (%p8273_p1) target bundleno = 1313 (0x521), region = 28 }
  0x39   : > { %s8290_s25 = sand.u32 1, %s8143_s10  }
  0x3a   : > { %s6549_s20 = smul.u32 1152, %s8290_s25  ;;  %s182_s28 = scalar_lea.sflag [#allocation3], %s8290_s25 }
  0x3c   : > { %s8296_s29 = scalar_lea.vmem [#allocation2], %s6549_s20 }
  0x3d   : > { %8126 = dma.done.wait (%p8232_p8), %s182_s28, 18432  }
  0x3e   : > { %8128 = vsyncadd (%p8232_p8), %s182_s28, 4294948864  ;;  %s6550_s27 = smul.u32 384, %s8290_s25  ;;  %s191_s26 = scalar_lea.sflag [#allocation6], %s8290_s25 }
  0x40   : > { %s8304_s3 = scalar_lea.vmem [#allocation5], %s6550_s27 }
  0x41   : > { %8130 = dma.done.wait (%p8232_p8), %s191_s26, 6144  }
  0x42   : > { %8132 = vsyncadd (%p8232_p8), %s191_s26, 4294961152  ;;  %v296_v0 = vld [vmem:[%s8296_s29 + $0x240] sm:$0xff]  ;;  %v297_v1 = vld [vmem:[%s8296_s29 + $0x248] sm:$0xff]  ;;  %s11359_s21 = scalar_lea.vmem [#allocation7], %s6549_s20  ;;  %s6571_s4 = smul.u32 18432, %s8151_s12 }
  0x43   : > { %v298_v2 = vld [vmem:[%s8296_s29 + $0x250] sm:$0xff]  ;;  %v440_v3 = vmul.f32 %v296_v0, %v296_v0  ;;  %v441_v4 = vmul.f32 %v297_v1, %v297_v1  ;;  %v224_v6 = vld [vmem:[%s8296_s29] sm:$0xff]  ;;  %v225_v7 = vld [vmem:[%s8296_s29 + $0x8] sm:$0xff]  ;;  %s5669_s7 = sshll.u32 %s11359_s21, 4  ;;  %s5654_s12 = scalar_lea.sflag [#allocation4], %s8290_s25  ;;  %s13365_s7 = int_to_ptr.vmem [resolvable:$true] %s5669_s7 }
  0x44   : > { %v442_v5 = vmul.f32 %v298_v2, %v298_v2  ;;  %v226_v8 = vld [vmem:[%s8296_s29 + $0x10] sm:$0xff]  ;;  %v368_v9 = vmul.f32 %v224_v6, %v224_v6  ;;  %v369_v10 = vmul.f32 %v225_v7, %v225_v7  ;;  %v299_v12 = vld [vmem:[%s8296_s29 + $0x258] sm:$0xff]  ;;  %v300_v13 = vld [vmem:[%s8296_s29 + $0x260] sm:$0xff]  ;;  %s13363_s16 = scalar_lea.hbm %s13420_s2, %s6571_s4  ;;  %s8075_s30 = scalar_lea.vmem %s13365_s7, 18432 }
  0x45   : > { %v370_v11 = vmul.f32 %v226_v8, %v226_v8  ;;  %v301_v14 = vld [vmem:[%s8296_s29 + $0x268] sm:$0xff]  ;;  %v608_v15 = vadd.f32 %v441_v4, %v440_v3  ;;  %v443_v16 = vmul.f32 %v299_v12, %v299_v12  ;;  %v444_v17 = vmul.f32 %v300_v13, %v300_v13  ;;  %v227_v19 = vld [vmem:[%s8296_s29 + $0x18] sm:$0xff]  ;;  %v228_v20 = vld [vmem:[%s8296_s29 + $0x20] sm:$0xff]  ;;  %p8076_p8 = scmp.ne.s32.totalorder %s13365_s7, %s8075_s30  ;;  %s8167_s5 = smov [#allocation7]  }
  0x46   : > { %v445_v18 = vmul.f32 %v301_v14, %v301_v14  ;;  %v229_v21 = vld [vmem:[%s8296_s29 + $0x28] sm:$0xff]  ;;  %v512_v22 = vadd.f32 %v369_v10, %v368_v9  ;;  %v371_v23 = vmul.f32 %v227_v19, %v227_v19  ;;  %v372_v24 = vmul.f32 %v228_v20, %v228_v20  ;;  %v302_v26 = vld [vmem:[%s8296_s29 + $0x270] sm:$0xff]  ;;  %v303_v27 = vld [vmem:[%s8296_s29 + $0x278] sm:$0xff]  ;;  %s8079_s6 = sshll.u32 %s8167_s5, 4  ;;  %s8080_s6 = int_to_ptr.vmem [resolvable:$false] %s8079_s6 }
  0x47   : > { %v373_v25 = vmul.f32 %v229_v21, %v229_v21  ;;  %v304_v28 = vld [vmem:[%s8296_s29 + $0x280] sm:$0xff]  ;;  %v609_v29 = vadd.f32 %v608_v15, %v442_v5  ;;  %v612_v30 = vadd.f32 %v444_v17, %v443_v16  ;;  %v446_v31 = vmul.f32 %v302_v26, %v302_v26  ;;  %v305_v33 = vld [vmem:[%s8296_s29 + $0x288] sm:$0xff]  ;;  %v306_v34 = vld [vmem:[%s8296_s29 + $0x290] sm:$0xff]  ;;  %p8077_p13 = pnand %p8076_p8, %p8236_p9  ;;  %s8081_s18 = scalar_lea.vmem %s8080_s6, 36864 }
  0x48   : > { %v447_v32 = vmul.f32 %v303_v27, %v303_v27  ;;  %v307_v35 = vld [vmem:[%s8296_s29 + $0x298] sm:$0xff]  ;;  %v513_v36 = vadd.f32 %v512_v22, %v370_v11  ;;  %v516_v37 = vadd.f32 %v372_v24, %v371_v23  ;;  %v449_v38 = vmul.f32 %v305_v33, %v305_v33  ;;  %v230_v39 = vld [vmem:[%s8296_s29 + $0x30] sm:$0xff]  ;;  %v232_v45 = vld [vmem:[%s8296_s29 + $0x40] sm:$0xff]  ;;  %p8082_p12 = scmp.lt.s32.totalorder %s13365_s7, %s8080_s6  ;;  %p8083_p1 = scmp.lt.s32.totalorder %s8081_s18, %s8075_s30 }
  0x49   : > { %v231_v40 = vld [vmem:[%s8296_s29 + $0x38] sm:$0xff]  ;;  %610 = vadd.xlane.f32.xlu0 %v609_v29  ;;  %v613_v41 = vadd.f32 %v612_v30, %v445_v18  ;;  %v448_v42 = vmul.f32 %v304_v28, %v304_v28  ;;  %v450_v44 = vmul.f32 %v306_v34, %v306_v34  ;;  %v233_v46 = vld [vmem:[%s8296_s29 + $0x48] sm:$0xff]  ;;  %v234_v47 = vld [vmem:[%s8296_s29 + $0x50] sm:$0xff]  ;;  %v451_v49 = vmul.f32 %v307_v35, %v307_v35  ;;  %p8078_p0 = pneg %p8077_p13 }
  0x4a   : > { %v616_v43 = vadd.f32 %v447_v32, %v446_v31  ;;  %514 = vadd.xlane.f32.xlu1 %v513_v36  ;;  %v517_v48 = vadd.f32 %v516_v37, %v373_v25  ;;  %v374_v50 = vmul.f32 %v230_v39, %v230_v39  ;;  %v375_v51 = vmul.f32 %v231_v40, %v231_v40  ;;  %v235_v52 = vld [vmem:[%s8296_s29 + $0x58] sm:$0xff]  ;;  %v308_v53 = vld [vmem:[%s8296_s29 + $0x2a0] sm:$0xff]  ;;  %v309_v54 = vld [vmem:[%s8296_s29 + $0x2a8] sm:$0xff]  ;;  %p8084_p2 = por %p8083_p1, %p8082_p12 }
  0x4b   : > { %v620_v55 = vadd.f32 %v450_v44, %v449_v38  ;;  %v377_v56 = vmul.f32 %v233_v46, %v233_v46  ;;  %v378_v57 = vmul.f32 %v234_v47, %v234_v47  ;;  %v311_v58 = vld [vmem:[%s8296_s29 + $0x2b8] sm:$0xff]  ;;  %v312_v59 = vld [vmem:[%s8296_s29 + $0x2c0] sm:$0xff]  ;;  %v376_v60 = vmul.f32 %v232_v45, %v232_v45  ;;  %v310_v0 = vld [vmem:[%s8296_s29 + $0x2b0] sm:$0xff] }
  0x4c   : > { %v520_v61 = vadd.f32 %v375_v51, %v374_v50  ;;  %v617_v62 = vadd.f32 %v616_v43, %v448_v42  ;;  %v379_v63 = vmul.f32 %v235_v52, %v235_v52  ;;  %v452_v1 = vmul.f32 %v308_v53, %v308_v53  ;;  %v313_v5 = vld [vmem:[%s8296_s29 + $0x2c8] sm:$0xff]  ;;  %v236_v8 = vld [vmem:[%s8296_s29 + $0x60] sm:$0xff]  ;;  %v239_v10 = vld [vmem:[%s8296_s29 + $0x78] sm:$0xff]  ;;  %p8085_p3 = pnand %p8084_p2, %p8078_p0 }
  0x4d   : > { %614 = vadd.xlane.f32.xlu0 %v613_v41  ;;  %v453_v2 = vmul.f32 %v309_v54, %v309_v54  ;;  %v621_v3 = vadd.f32 %v620_v55, %v451_v49  ;;  %v524_v4 = vadd.f32 %v378_v57, %v377_v56  ;;  %v455_v6 = vmul.f32 %v311_v58, %v311_v58  ;;  %v237_v9 = vld [vmem:[%s8296_s29 + $0x68] sm:$0xff]  ;;  %v240_v11 = vld [vmem:[%s8296_s29 + $0x80] sm:$0xff]  ;;  %v314_v18 = vld [vmem:[%s8296_s29 + $0x2d0] sm:$0xff] }
  0x4e   : > { %518 = vadd.xlane.f32.xlu1 %v517_v48  ;;  %v456_v7 = vmul.f32 %v312_v59, %v312_v59  ;;  %v521_v12 = vadd.f32 %v520_v61, %v376_v60  ;;  %v454_v13 = vmul.f32 %v310_v0, %v310_v0  ;;  %v457_v15 = vmul.f32 %v313_v5, %v313_v5  ;;  %v315_v19 = vld [vmem:[%s8296_s29 + $0x2d8] sm:$0xff]  ;;  %v238_v22 = vld [vmem:[%s8296_s29 + $0x70] sm:$0xff]  ;;  %v241_v23 = vld [vmem:[%s8296_s29 + $0x88] sm:$0xff] }
  0x4f   : > { %v624_v14 = vadd.f32 %v453_v2, %v452_v1  ;;  %v380_v16 = vmul.f32 %v236_v8, %v236_v8  ;;  %v381_v17 = vmul.f32 %v237_v9, %v237_v9  ;;  %v525_v20 = vadd.f32 %v524_v4, %v379_v63  ;;  %v317_v26 = vld [vmem:[%s8296_s29 + $0x2e8] sm:$0xff]  ;;  %v318_v27 = vld [vmem:[%s8296_s29 + $0x2f0] sm:$0xff]  ;;  %v316_v34 = vld [vmem:[%s8296_s29 + $0x2e0] sm:$0xff] }
  0x50   : > { %v628_v21 = vadd.f32 %v456_v7, %v455_v6  ;;  %v383_v24 = vmul.f32 %v239_v10, %v239_v10  ;;  %v384_v25 = vmul.f32 %v240_v11, %v240_v11  ;;  %v458_v28 = vmul.f32 %v314_v18, %v314_v18  ;;  %v319_v37 = vld [vmem:[%s8296_s29 + $0x2f8] sm:$0xff]  ;;  %v242_v40 = vld [vmem:[%s8296_s29 + $0x90] sm:$0xff]  ;;  %v245_v42 = vld [vmem:[%s8296_s29 + $0xa8] sm:$0xff] }
  0x51   : > { %618 = vadd.xlane.f32.xlu0 %v617_v62  ;;  %v459_v29 = vmul.f32 %v315_v19, %v315_v19  ;;  %v625_v30 = vadd.f32 %v624_v14, %v454_v13  ;;  %v382_v31 = vmul.f32 %v238_v22, %v238_v22  ;;  %v528_v32 = vadd.f32 %v381_v17, %v380_v16  ;;  %v243_v41 = vld [vmem:[%s8296_s29 + $0x98] sm:$0xff]  ;;  %v246_v43 = vld [vmem:[%s8296_s29 + $0xb0] sm:$0xff]  ;;  %v244_v48 = vld [vmem:[%s8296_s29 + $0xa0] sm:$0xff] }
  0x52   : > { %622 = vadd.xlane.f32.xlu1 %v621_v3  ;;  %v385_v33 = vmul.f32 %v241_v23, %v241_v23  ;;  %v629_v35 = vadd.f32 %v628_v21, %v457_v15  ;;  %v532_v36 = vadd.f32 %v384_v25, %v383_v24  ;;  %v461_v38 = vmul.f32 %v317_v26, %v317_v26  ;;  %v247_v53 = vld [vmem:[%s8296_s29 + $0xb8] sm:$0xff]  ;;  %v320_v56 = vld [vmem:[%s8296_s29 + $0x300] sm:$0xff]  ;;  %v321_v57 = vld [vmem:[%s8296_s29 + $0x308] sm:$0xff] }
  0x53   : > { %v462_v39 = vmul.f32 %v318_v27, %v318_v27  ;;  %v460_v44 = vmul.f32 %v316_v34, %v316_v34  ;;  %v632_v45 = vadd.f32 %v459_v29, %v458_v28  ;;  %v529_v46 = vadd.f32 %v528_v32, %v382_v31  ;;  %v323_v58 = vld [vmem:[%s8296_s29 + $0x318] sm:$0xff]  ;;  %v324_v59 = vld [vmem:[%s8296_s29 + $0x320] sm:$0xff]  ;;  %v249_v3 = vld [vmem:[%s8296_s29 + $0xc8] sm:$0xff] }
  0x54   : > { %v463_v47 = vmul.f32 %v319_v37, %v319_v37  ;;  %v386_v49 = vmul.f32 %v242_v40, %v242_v40  ;;  %v387_v50 = vmul.f32 %v243_v41, %v243_v41  ;;  %v533_v51 = vadd.f32 %v532_v36, %v385_v33  ;;  %v248_v2 = vld [vmem:[%s8296_s29 + $0xc0] sm:$0xff]  ;;  %v322_v6 = vld [vmem:[%s8296_s29 + $0x310] sm:$0xff]  ;;  %v325_v7 = vld [vmem:[%s8296_s29 + $0x328] sm:$0xff] }
  0x55   : > { %522 = vadd.xlane.f32.xlu0 %v521_v12  ;;  %v636_v52 = vadd.f32 %v462_v39, %v461_v38  ;;  %v389_v54 = vmul.f32 %v245_v42, %v245_v42  ;;  %v390_v55 = vmul.f32 %v246_v43, %v246_v43  ;;  %v633_v60 = vadd.f32 %v632_v45, %v460_v44  ;;  %v251_v10 = vld [vmem:[%s8296_s29 + $0xd8] sm:$0xff]  ;;  %v252_v11 = vld [vmem:[%s8296_s29 + $0xe0] sm:$0xff]  ;;  %v250_v18 = vld [vmem:[%s8296_s29 + $0xd0] sm:$0xff] }
  0x56   : > { %526 = vadd.xlane.f32.xlu1 %v525_v20  ;;  %v388_v61 = vmul.f32 %v244_v48, %v244_v48  ;;  %v536_v62 = vadd.f32 %v387_v50, %v386_v49  ;;  %v391_v63 = vmul.f32 %v247_v53, %v247_v53  ;;  %v464_v0 = vmul.f32 %v320_v56, %v320_v56  ;;  %v253_v21 = vld [vmem:[%s8296_s29 + $0xe8] sm:$0xff]  ;;  %v326_v24 = vld [vmem:[%s8296_s29 + $0x330] sm:$0xff]  ;;  %v327_v25 = vld [vmem:[%s8296_s29 + $0x338] sm:$0xff] }
  0x57   : > { %v465_v1 = vmul.f32 %v321_v57, %v321_v57  ;;  %v637_v4 = vadd.f32 %v636_v52, %v463_v47  ;;  %v540_v5 = vadd.f32 %v390_v55, %v389_v54  ;;  %v467_v8 = vmul.f32 %v323_v58, %v323_v58  ;;  %v329_v26 = vld [vmem:[%s8296_s29 + $0x348] sm:$0xff]  ;;  %v330_v27 = vld [vmem:[%s8296_s29 + $0x350] sm:$0xff]  ;;  %v328_v32 = vld [vmem:[%s8296_s29 + $0x340] sm:$0xff] }
  0x58   : > { %v468_v9 = vmul.f32 %v324_v59, %v324_v59  ;;  %v392_v12 = vmul.f32 %v248_v2, %v248_v2  ;;  %v393_v13 = vmul.f32 %v249_v3, %v249_v3  ;;  %v537_v14 = vadd.f32 %v536_v62, %v388_v61  ;;  %v331_v37 = vld [vmem:[%s8296_s29 + $0x358] sm:$0xff]  ;;  %v254_v40 = vld [vmem:[%s8296_s29 + $0xf0] sm:$0xff]  ;;  %v257_v42 = vld [vmem:[%s8296_s29 + $0x108] sm:$0xff] }
  0x59   : > { %626 = vadd.xlane.f32.xlu0 %v625_v30  ;;  %v466_v15 = vmul.f32 %v322_v6, %v322_v6  ;;  %v640_v16 = vadd.f32 %v465_v1, %v464_v0  ;;  %v469_v17 = vmul.f32 %v325_v7, %v325_v7  ;;  %v541_v19 = vadd.f32 %v540_v5, %v391_v63  ;;  %v255_v41 = vld [vmem:[%s8296_s29 + $0xf8] sm:$0xff]  ;;  %v258_v43 = vld [vmem:[%s8296_s29 + $0x110] sm:$0xff]  ;;  %v332_v50 = vld [vmem:[%s8296_s29 + $0x360] sm:$0xff] }
  0x5a   : > { %630 = vadd.xlane.f32.xlu1 %v629_v35  ;;  %v644_v20 = vadd.f32 %v468_v9, %v467_v8  ;;  %v395_v22 = vmul.f32 %v251_v10, %v251_v10  ;;  %v396_v23 = vmul.f32 %v252_v11, %v252_v11  ;;  %v394_v28 = vmul.f32 %v250_v18, %v250_v18  ;;  %v256_v54 = vld [vmem:[%s8296_s29 + $0x100] sm:$0xff]  ;;  %v259_v55 = vld [vmem:[%s8296_s29 + $0x118] sm:$0xff]  ;;  %v334_v2 = vld [vmem:[%s8296_s29 + $0x370] sm:$0xff] }
  0x5b   : > { %v544_v29 = vadd.f32 %v393_v13, %v392_v12  ;;  %v641_v30 = vadd.f32 %v640_v16, %v466_v15  ;;  %v397_v31 = vmul.f32 %v253_v21, %v253_v21  ;;  %v470_v33 = vmul.f32 %v326_v24, %v326_v24  ;;  %v335_v58 = vld [vmem:[%s8296_s29 + $0x378] sm:$0xff]  ;;  %v336_v59 = vld [vmem:[%s8296_s29 + $0x380] sm:$0xff]  ;;  %v337_v5 = vld [vmem:[%s8296_s29 + $0x388] sm:$0xff] }
  0x5c   : > { %v471_v34 = vmul.f32 %v327_v25, %v327_v25  ;;  %v645_v35 = vadd.f32 %v644_v20, %v469_v17  ;;  %v548_v36 = vadd.f32 %v396_v23, %v395_v22  ;;  %v473_v38 = vmul.f32 %v329_v26, %v329_v26  ;;  %v260_v8 = vld [vmem:[%s8296_s29 + $0x120] sm:$0xff]  ;;  %v261_v9 = vld [vmem:[%s8296_s29 + $0x128] sm:$0xff]  ;;  %v263_v10 = vld [vmem:[%s8296_s29 + $0x138] sm:$0xff] }
  0x5d   : > { %530 = vadd.xlane.f32.xlu0 %v529_v46  ;;  %v474_v39 = vmul.f32 %v330_v27, %v330_v27  ;;  %v545_v44 = vadd.f32 %v544_v29, %v394_v28  ;;  %v472_v45 = vmul.f32 %v328_v32, %v328_v32  ;;  %v475_v47 = vmul.f32 %v331_v37, %v331_v37  ;;  %v264_v11 = vld [vmem:[%s8296_s29 + $0x140] sm:$0xff]  ;;  %v262_v16 = vld [vmem:[%s8296_s29 + $0x130] sm:$0xff]  ;;  %v339_v25 = vld [vmem:[%s8296_s29 + $0x398] sm:$0xff] }
  0x5e   : > { %534 = vadd.xlane.f32.xlu1 %v533_v51  ;;  %v648_v46 = vadd.f32 %v471_v34, %v470_v33  ;;  %v398_v48 = vmul.f32 %v254_v40, %v254_v40  ;;  %v399_v49 = vmul.f32 %v255_v41, %v255_v41  ;;  %v333_v51 = vld [vmem:[%s8296_s29 + $0x368] sm:$0xff]  ;;  %v549_v52 = vadd.f32 %v548_v36, %v397_v31  ;;  %v338_v24 = vld [vmem:[%s8296_s29 + $0x390] sm:$0xff]  ;;  %v1535_v26 = vld [vmem:[%s8304_s3 + $0x78] sm:$0xff] }
  0x5f   : > { %v652_v53 = vadd.f32 %v474_v39, %v473_v38  ;;  %v401_v56 = vmul.f32 %v257_v42, %v257_v42  ;;  %v402_v57 = vmul.f32 %v258_v43, %v258_v43  ;;  %v477_v61 = vmul.f32 %v333_v51, %v333_v51  ;;  %v341_v27 = vld [vmem:[%s8296_s29 + $0x3a8] sm:$0xff]  ;;  %v342_v28 = vld [vmem:[%s8296_s29 + $0x3b0] sm:$0xff]  ;;  %6201 = vmatprep.subr.mxu0 %v1535_v26  ;;  %v340_v33 = vld [vmem:[%s8296_s29 + $0x3a0] sm:$0xff] }
  0x60   : > { %v649_v62 = vadd.f32 %v648_v46, %v472_v45  ;;  %v400_v63 = vmul.f32 %v256_v54, %v256_v54  ;;  %v552_v0 = vadd.f32 %v399_v49, %v398_v48  ;;  %v403_v1 = vmul.f32 %v259_v55, %v259_v55  ;;  %6513 = vmatprep.subr.mxu1 %v1535_v26  ;;  %v266_v36 = vld [vmem:[%s8296_s29 + $0x150] sm:$0xff]  ;;  %v267_v37 = vld [vmem:[%s8296_s29 + $0x158] sm:$0xff]  ;;  %v269_v42 = vld [vmem:[%s8296_s29 + $0x168] sm:$0xff] }
  0x61   : > { %634 = vadd.xlane.f32.xlu0 %v633_v60  ;;  %v476_v60 = vmul.f32 %v332_v50, %v332_v50  ;;  %v653_v3 = vadd.f32 %v652_v53, %v475_v47  ;;  %v479_v6 = vmul.f32 %v335_v58, %v335_v58  ;;  %v480_v7 = vmul.f32 %v336_v59, %v336_v59  ;;  %v270_v43 = vld [vmem:[%s8296_s29 + $0x170] sm:$0xff]  ;;  %v268_v51 = vld [vmem:[%s8296_s29 + $0x160] sm:$0xff]  ;;  %v345_v55 = vld [vmem:[%s8296_s29 + $0x3c8] sm:$0xff] }
  0x62   : > { %638 = vadd.xlane.f32.xlu1 %v637_v4  ;;  %v556_v4 = vadd.f32 %v402_v57, %v401_v56  ;;  %v478_v12 = vmul.f32 %v334_v2, %v334_v2  ;;  %v481_v15 = vmul.f32 %v337_v5, %v337_v5  ;;  %v404_v17 = vmul.f32 %v260_v8, %v260_v8  ;;  %v1534_v48 = vld [vmem:[%s8304_s3 + $0x70] sm:$0xff]  ;;  %v344_v54 = vld [vmem:[%s8296_s29 + $0x3c0] sm:$0xff]  ;;  %v271_v59 = vld [vmem:[%s8296_s29 + $0x178] sm:$0xff] }
  0x63   : > { %v656_v13 = vadd.f32 %v477_v61, %v476_v60  ;;  %v405_v18 = vmul.f32 %v261_v9, %v261_v9  ;;  %v660_v21 = vadd.f32 %v480_v7, %v479_v6  ;;  %v407_v22 = vmul.f32 %v263_v10, %v263_v10  ;;  %6202 = vmatpush3.msra.mxu0 %v1535_v26  ;;  %v347_v60 = vld [vmem:[%s8296_s29 + $0x3d8] sm:$0xff]  ;;  %v348_v61 = vld [vmem:[%s8296_s29 + $0x3e0] sm:$0xff]  ;;  %v349_v7 = vld [vmem:[%s8296_s29 + $0x3e8] sm:$0xff] }
  0x64   : > { %v557_v20 = vadd.f32 %v556_v4, %v403_v1  ;;  %v408_v23 = vmul.f32 %v264_v11, %v264_v11  ;;  %v482_v34 = vmul.f32 %v338_v24, %v338_v24  ;;  %v485_v40 = vmul.f32 %v341_v27, %v341_v27  ;;  %6529 = vmatpush3.msra.mxu1 %v1535_v26  ;;  %v272_v11 = vld [vmem:[%s8296_s29 + $0x180] sm:$0xff]  ;;  %v350_v24 = vld [vmem:[%s8296_s29 + $0x3f0] sm:$0xff]  ;;  %v1531_v26 = vld [vmem:[%s8304_s3 + $0x58] sm:$0xff] }
  0x65   : > { %538 = vadd.xlane.f32.xlu0 %v537_v14  ;;  %v553_v14 = vadd.f32 %v552_v0, %v400_v63  ;;  %v657_v29 = vadd.f32 %v656_v13, %v478_v12  ;;  %v560_v31 = vadd.f32 %v405_v18, %v404_v17  ;;  %v661_v38 = vadd.f32 %v660_v21, %v481_v15  ;;  %v346_v0 = vld [vmem:[%s8296_s29 + $0x3d0] sm:$0xff]  ;;  %v273_v12 = vld [vmem:[%s8296_s29 + $0x188] sm:$0xff]  ;;  %v276_v15 = vld [vmem:[%s8296_s29 + $0x1a0] sm:$0xff] }
  0x66   : > { %542 = vadd.xlane.f32.xlu1 %v541_v19  ;;  %v265_v19 = vld [vmem:[%s8296_s29 + $0x148] sm:$0xff]  ;;  %v564_v39 = vadd.f32 %v408_v23, %v407_v22  ;;  %v486_v41 = vmul.f32 %v342_v28, %v342_v28  ;;  %v484_v45 = vmul.f32 %v340_v33, %v340_v33  ;;  %v410_v46 = vmul.f32 %v266_v36, %v266_v36 }
  0x67   : > { %v409_v32 = vmul.f32 %v265_v19, %v265_v19  ;;  %v411_v47 = vmul.f32 %v267_v37, %v267_v37  ;;  %v414_v53 = vmul.f32 %v270_v43, %v270_v43  ;;  %6203 = vmatprep.subr.mxu0 %v1534_v48  ;;  %v488_v1 = vmul.f32 %v344_v54, %v344_v54  ;;  %v277_v33 = vld [vmem:[%s8296_s29 + $0x1a8] sm:$0xff]  ;;  %v279_v43 = vld [vmem:[%s8296_s29 + $0x1b8] sm:$0xff] }
  0x68   : > { %v668_v58 = vadd.f32 %v486_v41, %v485_v40  ;;  %v489_v2 = vmul.f32 %v345_v55, %v345_v55  ;;  %6514 = vmatprep.subr.mxu1 %v1534_v48  ;;  %v415_v5 = vmul.f32 %v271_v59, %v271_v59  ;;  %v491_v9 = vmul.f32 %v347_v60, %v347_v60  ;;  %v283_v59 = vld [vmem:[%s8296_s29 + $0x1d8] sm:$0xff]  ;;  %v1528_v60 = vld [vmem:[%s8304_s3 + $0x40] sm:$0xff] }
  0x69   : > { %642 = vadd.xlane.f32.xlu0 %v641_v30  ;;  %v406_v30 = vmul.f32 %v262_v16, %v262_v16  ;;  %v565_v56 = vadd.f32 %v564_v39, %v409_v32  ;;  %v568_v63 = vadd.f32 %v411_v47, %v410_v46  ;;  %v492_v10 = vmul.f32 %v348_v61, %v348_v61  ;;  %v1532_v16 = vld [vmem:[%s8304_s3 + $0x60] sm:$0xff]  ;;  %v355_v47 = vld [vmem:[%s8296_s29 + $0x418] sm:$0xff] }
  0x6a   : > { %646 = vadd.xlane.f32.xlu1 %v645_v35  ;;  %v483_v35 = vmul.f32 %v339_v25, %v339_v25  ;;  %6204 = vmatpush3.msra.mxu0 %v1534_v48  ;;  %v490_v13 = vmul.f32 %v346_v0, %v346_v0  ;;  %v672_v18 = vadd.f32 %v489_v2, %v488_v1  ;;  %v351_v25 = vld [vmem:[%s8296_s29 + $0x3f8] sm:$0xff]  ;;  %v356_v0 = vld [vmem:[%s8296_s29 + $0x420] sm:$0xff]  ;;  %v357_v1 = vld [vmem:[%s8296_s29 + $0x428] sm:$0xff] }
  0x6b   : > { %v561_v49 = vadd.f32 %v560_v31, %v406_v30  ;;  %6530 = vmatpush3.msra.mxu1 %v1534_v48  ;;  %v493_v19 = vmul.f32 %v349_v7, %v349_v7  ;;  %v416_v22 = vmul.f32 %v272_v11, %v272_v11  ;;  %v417_v23 = vmul.f32 %v273_v12, %v273_v12  ;;  %v353_v30 = vld [vmem:[%s8296_s29 + $0x408] sm:$0xff]  ;;  %v354_v31 = vld [vmem:[%s8296_s29 + $0x410] sm:$0xff] }
  0x6c   : > { %v664_v50 = vadd.f32 %v483_v35, %v482_v34  ;;  %v676_v27 = vadd.f32 %v492_v10, %v491_v9  ;;  %v673_v34 = vadd.f32 %v672_v18, %v490_v13  ;;  %v352_v35 = vld [vmem:[%s8296_s29 + $0x400] sm:$0xff]  ;;  %v494_v36 = vmul.f32 %v350_v24, %v350_v24  ;;  %v1527_v9 = vld [vmem:[%s8304_s3 + $0x38] sm:$0xff]  ;;  %v286_v24 = vld [vmem:[%s8296_s29 + $0x1f0] sm:$0xff] }
  0x6d   : > { %546 = vadd.xlane.f32.xlu0 %v545_v44  ;;  %v343_v44 = vld [vmem:[%s8296_s29 + $0x3b8] sm:$0xff]  ;;  %v495_v37 = vmul.f32 %v351_v25, %v351_v25  ;;  %v576_v39 = vadd.f32 %v417_v23, %v416_v22  ;;  %v497_v40 = vmul.f32 %v353_v30, %v353_v30  ;;  %v498_v41 = vmul.f32 %v354_v31, %v354_v31  ;;  %v284_v13 = vld [vmem:[%s8296_s29 + $0x1e0] sm:$0xff]  ;;  %v1526_v22 = vld [vmem:[%s8304_s3 + $0x30] sm:$0xff] }
  0x6e   : > { %550 = vadd.xlane.f32.xlu1 %v549_v52  ;;  %v413_v52 = vmul.f32 %v269_v42, %v269_v42  ;;  %v487_v57 = vmul.f32 %v343_v44, %v343_v44  ;;  %v665_v4 = vadd.f32 %v664_v50, %v484_v45  ;;  %v278_v42 = vld [vmem:[%s8296_s29 + $0x1b0] sm:$0xff]  ;;  %v677_v44 = vadd.f32 %v676_v27, %v493_v19  ;;  %v287_v18 = vld [vmem:[%s8296_s29 + $0x1f8] sm:$0xff]  ;;  %v288_v19 = vld [vmem:[%s8296_s29 + $0x200] sm:$0xff] }
  0x6f   : > { %v421_v45 = vmul.f32 %v277_v33, %v277_v33  ;;  %v496_v48 = vmul.f32 %v352_v35, %v352_v35  ;;  %v282_v50 = vld [vmem:[%s8296_s29 + $0x1d0] sm:$0xff]  ;;  %v422_v54 = vmul.f32 %v278_v42, %v278_v42  ;;  %v423_v55 = vmul.f32 %v279_v43, %v279_v43  ;;  %v363_v31 = vld [vmem:[%s8296_s29 + $0x458] sm:$0xff] }
  0x70   : > { %v572_v6 = vadd.f32 %v414_v53, %v413_v52  ;;  %v669_v8 = vadd.f32 %v668_v58, %v487_v57  ;;  %v680_v52 = vadd.f32 %v495_v37, %v494_v36  ;;  %v280_v53 = vld [vmem:[%s8296_s29 + $0x1c0] sm:$0xff]  ;;  %v499_v57 = vmul.f32 %v355_v47, %v355_v47  ;;  %v362_v30 = vld [vmem:[%s8296_s29 + $0x450] sm:$0xff]  ;;  %v289_v36 = vld [vmem:[%s8296_s29 + $0x208] sm:$0xff] }
  0x71   : > { %650 = vadd.xlane.f32.xlu0 %v649_v62  ;;  %v412_v62 = vmul.f32 %v268_v51, %v268_v51  ;;  %v1529_v51 = vld [vmem:[%s8304_s3 + $0x48] sm:$0xff]  ;;  %v684_v58 = vadd.f32 %v498_v41, %v497_v40  ;;  %v424_v2 = vmul.f32 %v280_v53, %v280_v53  ;;  %v427_v7 = vmul.f32 %v283_v59, %v283_v59  ;;  %v364_v41 = vld [vmem:[%s8296_s29 + $0x460] sm:$0xff]  ;;  %v291_v53 = vld [vmem:[%s8296_s29 + $0x218] sm:$0xff] }
  0x72   : > { %654 = vadd.xlane.f32.xlu1 %v653_v3  ;;  %v1533_v3 = vld [vmem:[%s8304_s3 + $0x68] sm:$0xff]  ;;  %v573_v21 = vadd.f32 %v572_v6, %v415_v5  ;;  %v681_v5 = vadd.f32 %v680_v52, %v496_v48  ;;  %v584_v6 = vadd.f32 %v423_v55, %v422_v54  ;;  %v500_v11 = vmul.f32 %v356_v0, %v356_v0  ;;  %v367_v48 = vld [vmem:[%s8296_s29 + $0x478] sm:$0xff]  ;;  %v290_v52 = vld [vmem:[%s8296_s29 + $0x210] sm:$0xff] }
  0x73   : > { %6205 = vmatprep.subr.mxu0 %v1533_v3  ;;  %v569_v17 = vadd.f32 %v568_v63, %v412_v62  ;;  %6515 = vmatprep.subr.mxu1 %v1533_v3  ;;  %v426_v63 = vmul.f32 %v282_v50, %v282_v50  ;;  %v685_v10 = vadd.f32 %v684_v58, %v499_v57  ;;  %v293_v55 = vld [vmem:[%s8296_s29 + $0x228] sm:$0xff]  ;;  %v1523_v57 = vld [vmem:[%s8304_s3 + $0x18] sm:$0xff]  ;;  %v1522_v0 = vld [vmem:[%s8304_s3 + $0x10] sm:$0xff] }
  0x74   : > { %6206 = vmatpush3.msra.mxu0 %v1533_v3  ;;  %6531 = vmatpush3.msra.mxu1 %v1533_v3  ;;  %v359_v3 = vld [vmem:[%s8296_s29 + $0x438] sm:$0xff]  ;;  %v501_v12 = vmul.f32 %v357_v1, %v357_v1  ;;  %v585_v23 = vadd.f32 %v584_v6, %v424_v2  ;;  %v428_v25 = vmul.f32 %v284_v13, %v284_v13  ;;  %v292_v2 = vld [vmem:[%s8296_s29 + $0x220] sm:$0xff]  ;;  %v1521_v6 = vld [vmem:[%s8304_s3 + $0x8] sm:$0xff] }
  0x75   : > { %554 = vadd.xlane.f32.xlu0 %v553_v14  ;;  %v275_v14 = vld [vmem:[%s8296_s29 + $0x198] sm:$0xff]  ;;  %6207 = vmatprep.subr.mxu0 %v1532_v16  ;;  %v430_v37 = vmul.f32 %v286_v24, %v286_v24  ;;  %v506_v42 = vmul.f32 %v362_v30, %v362_v30  ;;  %v507_v43 = vmul.f32 %v363_v31, %v363_v31 }
  0x76   : > { %558 = vadd.xlane.f32.xlu1 %v557_v20  ;;  %v274_v20 = vld [vmem:[%s8296_s29 + $0x190] sm:$0xff]  ;;  %v419_v28 = vmul.f32 %v275_v14, %v275_v14  ;;  %6516 = vmatprep.subr.mxu1 %v1532_v16  ;;  %v285_v14 = vld [vmem:[%s8296_s29 + $0x1e8] sm:$0xff]  ;;  %v688_v27 = vadd.f32 %v501_v12, %v500_v11  ;;  %v508_v54 = vmul.f32 %v364_v41, %v364_v41 }
  0x77   : > { %v418_v32 = vmul.f32 %v274_v20, %v274_v20  ;;  %6208 = vmatpush3.msra.mxu0 %v1532_v16  ;;  %6532 = vmatpush3.msra.mxu1 %v1532_v16  ;;  %v503_v16 = vmul.f32 %v359_v3, %v359_v3  ;;  %v696_v59 = vadd.f32 %v507_v43, %v506_v42 }
  0x78   : > { %6209 = vmatprep.subr.mxu0 %v1531_v26  ;;  %6517 = vmatprep.subr.mxu1 %v1531_v26  ;;  %v437_v3 = vmul.f32 %v293_v55, %v293_v55 }
  0x79   : > { %658 = vadd.xlane.f32.xlu0 %v657_v29  ;;  %v420_v29 = vmul.f32 %v276_v15, %v276_v15  ;;  %6210 = vmatpush3.msra.mxu0 %v1531_v26 }
  0x7a   : > { %662 = vadd.xlane.f32.xlu1 %v661_v38  ;;  %v1530_v38 = vld [vmem:[%s8304_s3 + $0x50] sm:$0xff]  ;;  %6533 = vmatpush3.msra.mxu1 %v1531_v26  ;;  %v429_v26 = vmul.f32 %v285_v14, %v285_v14 }
  0x7b   : > { %v580_v46 = vadd.f32 %v420_v29, %v419_v28  ;;  %6211 = vmatprep.subr.mxu0 %v1530_v38  ;;  %6518 = vmatprep.subr.mxu1 %v1530_v38  ;;  %v431_v28 = vmul.f32 %v287_v18, %v287_v18  ;;  %v432_v29 = vmul.f32 %v288_v19, %v288_v19 }
  0x7c   : > { %6212 = vmatpush3.msra.mxu0 %v1530_v38  ;;  %6534 = vmatpush3.msra.mxu1 %v1530_v38  ;;  %v365_v38 = vld [vmem:[%s8296_s29 + $0x468] sm:$0xff]  ;;  %v592_v40 = vadd.f32 %v429_v26, %v428_v25 }
  0x7d   : > { %562 = vadd.xlane.f32.xlu0 %v561_v49  ;;  %v281_v49 = vld [vmem:[%s8296_s29 + $0x1c8] sm:$0xff]  ;;  %v581_v61 = vadd.f32 %v580_v46, %v421_v45  ;;  %6213 = vmatprep.subr.mxu0 %v1529_v51  ;;  %v433_v46 = vmul.f32 %v289_v36, %v289_v36  ;;  %v596_v47 = vadd.f32 %v432_v29, %v431_v28 }
  0x7e   : > { %566 = vadd.xlane.f32.xlu1 %v565_v56  ;;  %v577_v56 = vadd.f32 %v576_v39, %v418_v32  ;;  %v425_v62 = vmul.f32 %v281_v49, %v281_v49  ;;  %6519 = vmatprep.subr.mxu1 %v1529_v51  ;;  %v1525_v32 = vld [vmem:[%s8304_s3 + $0x28] sm:$0xff]  ;;  %v366_v39 = vld [vmem:[%s8296_s29 + $0x470] sm:$0xff]  ;;  %v509_v50 = vmul.f32 %v365_v38, %v365_v38 }
  0x7f   : > { %6214 = vmatpush3.msra.mxu0 %v1529_v51  ;;  %6535 = vmatpush3.msra.mxu1 %v1529_v51  ;;  %v510_v51 = vmul.f32 %v366_v39, %v366_v39  ;;  %v593_v58 = vadd.f32 %v592_v40, %v430_v37 }
  0x80   : > { %6215 = vmatprep.subr.mxu0 %v1528_v60  ;;  %6520 = vmatprep.subr.mxu1 %v1528_v60  ;;  %v588_v15 = vadd.f32 %v426_v63, %v425_v62  ;;  %v434_v62 = vmul.f32 %v290_v52, %v290_v52  ;;  %v435_v63 = vmul.f32 %v291_v53, %v291_v53 }
  0x81   : > { %666 = vadd.xlane.f32.xlu0 %v665_v4  ;;  %v360_v4 = vld [vmem:[%s8296_s29 + $0x440] sm:$0xff]  ;;  %6216 = vmatpush3.msra.mxu0 %v1528_v60  ;;  %v700_v1 = vadd.f32 %v510_v51, %v509_v50 }
  0x82   : > { %670 = vadd.xlane.f32.xlu1 %v669_v8  ;;  %v358_v8 = vld [vmem:[%s8296_s29 + $0x430] sm:$0xff]  ;;  %6536 = vmatpush3.msra.mxu1 %v1528_v60  ;;  %v589_v33 = vadd.f32 %v588_v15, %v427_v7  ;;  %v511_v60 = vmul.f32 %v367_v48, %v367_v48  ;;  %v697_v7 = vadd.f32 %v696_v59, %v508_v54  ;;  %v1520_v15 = vld [vmem:[%s8304_s3] sm:$0xff] }
  0x83   : > { %v502_v20 = vmul.f32 %v358_v8, %v358_v8  ;;  %6217 = vmatprep.subr.mxu0 %v1527_v9  ;;  %6521 = vmatprep.subr.mxu1 %v1527_v9  ;;  %v436_v8 = vmul.f32 %v292_v2, %v292_v2 }
  0x84   : > { %6218 = vmatpush3.msra.mxu0 %v1527_v9  ;;  %6537 = vmatpush3.msra.mxu1 %v1527_v9  ;;  %v600_v9 = vadd.f32 %v435_v63, %v434_v62 }
  0x85   : > { %570 = vadd.xlane.f32.xlu0 %v569_v17  ;;  %v504_v17 = vmul.f32 %v360_v4, %v360_v4  ;;  %6219 = vmatprep.subr.mxu0 %v1526_v22  ;;  %v689_v45 = vadd.f32 %v688_v27, %v502_v20 }
  0x86   : > { %574 = vadd.xlane.f32.xlu1 %v573_v21  ;;  %v361_v21 = vld [vmem:[%s8296_s29 + $0x448] sm:$0xff]  ;;  %6522 = vmatprep.subr.mxu1 %v1526_v22  ;;  %v601_v13 = vadd.f32 %v600_v9, %v436_v8 }
  0x87   : > { %v692_v35 = vadd.f32 %v504_v17, %v503_v16  ;;  %6220 = vmatpush3.msra.mxu0 %v1526_v22  ;;  %6538 = vmatpush3.msra.mxu1 %v1526_v22 }
  0x88   : > { %6221 = vmatprep.subr.mxu0 %v1525_v32  ;;  %6523 = vmatprep.subr.mxu1 %v1525_v32 }
  0x89   : > { %674 = vadd.xlane.f32.xlu0 %v673_v34  ;;  %v505_v34 = vmul.f32 %v361_v21, %v361_v21  ;;  %6222 = vmatpush3.msra.mxu0 %v1525_v32 }
  0x8a   : > { %678 = vadd.xlane.f32.xlu1 %v677_v44  ;;  %v1524_v44 = vld [vmem:[%s8304_s3 + $0x20] sm:$0xff]  ;;  %6539 = vmatpush3.msra.mxu1 %v1525_v32 }
  0x8b   : > { %v693_v49 = vadd.f32 %v692_v35, %v505_v34  ;;  %6223 = vmatprep.subr.mxu0 %v1524_v44  ;;  %6524 = vmatprep.subr.mxu1 %v1524_v44 }
  0x8c   : > { %6224 = vmatpush3.msra.mxu0 %v1524_v44  ;;  %6540 = vmatpush3.msra.mxu1 %v1524_v44 }
  0x8d   : > { %578 = vadd.xlane.f32.xlu0 %v577_v56  ;;  %v294_v56 = vld [vmem:[%s8296_s29 + $0x230] sm:$0xff]  ;;  %6225 = vmatprep.subr.mxu0 %v1523_v57 }
  0x8e   : > { %582 = vadd.xlane.f32.xlu1 %v581_v61  ;;  %v597_v61 = vadd.f32 %v596_v47, %v433_v46  ;;  %v438_v4 = vmul.f32 %v294_v56, %v294_v56  ;;  %6525 = vmatprep.subr.mxu1 %v1523_v57 }
  0x8f   : > { %6226 = vmatpush3.msra.mxu0 %v1523_v57  ;;  %6541 = vmatpush3.msra.mxu1 %v1523_v57 }
  0x90   : > { %6227 = vmatprep.subr.mxu0 %v1522_v0  ;;  %6526 = vmatprep.subr.mxu1 %v1522_v0  ;;  %v604_v12 = vadd.f32 %v438_v4, %v437_v3 }
  0x91   : > { %682 = vadd.xlane.f32.xlu0 %v681_v5  ;;  %v295_v5 = vld [vmem:[%s8296_s29 + $0x238] sm:$0xff]  ;;  %6228 = vmatpush3.msra.mxu0 %v1522_v0 }
  0x92   : > { %686 = vadd.xlane.f32.xlu1 %v685_v10  ;;  %v701_v10 = vadd.f32 %v700_v1, %v511_v60  ;;  %v439_v11 = vmul.f32 %v295_v5, %v295_v5  ;;  %6542 = vmatpush3.msra.mxu1 %v1522_v0 }
  0x93   : > { %6229 = vmatprep.subr.mxu0 %v1521_v6  ;;  %6527 = vmatprep.subr.mxu1 %v1521_v6 }
  0x94   : > { %6230 = vmatpush3.msra.mxu0 %v1521_v6  ;;  %6543 = vmatpush3.msra.mxu1 %v1521_v6  ;;  %v605_v14 = vadd.f32 %v604_v12, %v439_v11 }
  0x95   : > { %586 = vadd.xlane.f32.xlu0 %v585_v23  ;;  %6231 = vmatprep.subr.mxu0 %v1520_v15 }
  0x96   : > { %590 = vadd.xlane.f32.xlu1 %v589_v33  ;;  %6528 = vmatprep.subr.mxu1 %v1520_v15 }
  0x97   : > { %6232 = vmatpush3.msra.mxu0 %v1520_v15  ;;  %6544 = vmatpush3.msra.mxu1 %v1520_v15 }
  0x99   : > { %690 = vadd.xlane.f32.xlu0 %v689_v45 }
  0x9a   : > { %694 = vadd.xlane.f32.xlu1 %v693_v49 }
  0x9d   : > { %594 = vadd.xlane.f32.xlu0 %v593_v58 }
  0x9e   : > { %598 = vadd.xlane.f32.xlu1 %v597_v61 }
  0xa1   : > { %698 = vadd.xlane.f32.xlu0 %v697_v7 }
  0xa2   : > { %702 = vadd.xlane.f32.xlu1 %v701_v10 }
  0xa5   : > { %602 = vadd.xlane.f32.xlu0 %v601_v13 }
  0xa6   : > { %606 = vadd.xlane.f32.xlu1 %v605_v14 }
  0xd2   : > { %v8470_v16 = vpop.xlane.xlu0 %610 }
  0xd3   : > { %v8472_v17 = vpop.xlane.xlu1 %514 }
  0xd6   : > { %v615_v18 = vpop.xlane.xlu0 %614 }
  0xd7   : > { %6627 = vrsqrt.f32 %v615_v18  ;;  %v519_v19 = vpop.xlane.xlu1 %518  ;;  %vm881_vm0 = vcmp.eq.f32.partialorder %v615_v18, inf  ;;  %v884_v36 = vand.u32 2147483648, %v615_v18  ;;  %vm883_vm2 = vcmp.eq.f32.partialorder %v615_v18, 0.0 }
  0xd8   : > { %6629 = vrsqrt.f32 %v519_v19  ;;  %vm713_vm1 = vcmp.eq.f32.partialorder %v519_v19, inf  ;;  %v716_v39 = vand.u32 2147483648, %v519_v19  ;;  %vm715_vm3 = vcmp.eq.f32.partialorder %v519_v19, 0.0 }
  0xda   : > { %v619_v20 = vpop.xlane.xlu0 %618 }
  0xdb   : > { %6631 = vrsqrt.f32 %v619_v20  ;;  %v623_v21 = vpop.xlane.xlu1 %622  ;;  %vm888_vm4 = vcmp.eq.f32.partialorder %v619_v20, inf  ;;  %v891_v46 = vand.u32 2147483648, %v619_v20  ;;  %vm890_vm6 = vcmp.eq.f32.partialorder %v619_v20, 0.0 }
  0xdc   : > { %6633 = vrsqrt.f32 %v623_v21  ;;  %vm895_vm5 = vcmp.eq.f32.partialorder %v623_v21, inf  ;;  %v898_v50 = vand.u32 2147483648, %v623_v21  ;;  %vm897_vm7 = vcmp.eq.f32.partialorder %v623_v21, 0.0 }
  0xde   : > { %v8474_v22 = vpop.xlane.xlu0 %522 }
  0xdf   : > { %6635 = vrsqrt.f32 %v8474_v22  ;;  %v8477_v23 = vpop.xlane.xlu1 %526  ;;  %vm720_vm8 = vcmp.eq.f32.partialorder %v8474_v22, inf  ;;  %vm722_vm10 = vcmp.eq.f32.partialorder %v8474_v22, 0.0  ;;  %v723_v57 = vand.u32 2147483648, %v8474_v22 }
  0xe0   : > { %6637 = vrsqrt.f32 %v8477_v23  ;;  %vm727_vm9 = vcmp.eq.f32.partialorder %v8477_v23, inf  ;;  %vm729_vm11 = vcmp.eq.f32.partialorder %v8477_v23, 0.0  ;;  %v730_v61 = vand.u32 2147483648, %v8477_v23 }
  0xe2   : > { %v8480_v24 = vpop.xlane.xlu0 %626 }
  0xe3   : > { %6639 = vrsqrt.f32 %v8480_v24  ;;  %v8483_v25 = vpop.xlane.xlu1 %630  ;;  %vm902_vm12 = vcmp.eq.f32.partialorder %v8480_v24, inf  ;;  %v905_v4 = vand.u32 2147483648, %v8480_v24  ;;  %vm904_vm14 = vcmp.eq.f32.partialorder %v8480_v24, 0.0 }
  0xe4   : > { %v6628_v26 = vpop.eup %6627  ;;  %6641 = vrsqrt.f32 %v8483_v25  ;;  %vm909_vm13 = vcmp.eq.f32.partialorder %v8483_v25, inf  ;;  %v912_v15 = vand.u32 2147483648, %v8483_v25  ;;  %vm911_vm15 = vcmp.eq.f32.partialorder %v8483_v25, 0.0 }
  0xe5   : > { %v6630_v27 = vpop.eup %6629  ;;  %v880_v28 = vmul.f32 %v6628_v26, %v615_v18 }
  0xe6   : > { %v712_v29 = vmul.f32 %v6630_v27, %v519_v19  ;;  %v8486_v31 = vpop.xlane.xlu0 %530 }
  0xe7   : > { %v882_v33 = vsel %vm881_vm0, %v615_v18, %v880_v28  ;;  %v8488_v35 = vpop.xlane.xlu1 %534  ;;  %6643 = vrsqrt.f32 %v8486_v31  ;;  %vm734_vm0 = vcmp.eq.f32.partialorder %v8486_v31, inf }
  0xe8   : > { %v6632_v30 = vpop.eup %6631  ;;  %v714_v37 = vsel %vm713_vm1, %v519_v19, %v712_v29  ;;  %v885_v41 = vsel %vm883_vm2, %v884_v36, %v882_v33  ;;  %6645 = vrsqrt.f32 %v8488_v35  ;;  %vm741_vm1 = vcmp.eq.f32.partialorder %v8488_v35, inf }
  0xe9   : > { %v6634_v32 = vpop.eup %6633  ;;  %v887_v34 = vmul.f32 %v6632_v30, %v619_v20  ;;  %v717_v43 = vsel %vm715_vm3, %v716_v39, %v714_v37  ;;  %6647 = vrsqrt.f32 %v8470_v16  ;;  %v1065_v49 = vmax.f32 %v885_v41, 1e-05 }
  0xea   : > { %v894_v38 = vmul.f32 %v6634_v32, %v623_v21  ;;  %6649 = vrsqrt.f32 %v8472_v17  ;;  %v1041_v52 = vmax.f32 %v717_v43, 1e-05  ;;  %v8509_v5 = vpop.xlane.xlu0 %634  ;;  %vm736_vm2 = vcmp.eq.f32.partialorder %v8486_v31, 0.0 }
  0xeb   : > { %v889_v44 = vsel %vm888_vm4, %v619_v20, %v887_v34  ;;  %v5807_v59 = vclamps-f32 %v1065_v49, 15.0  ;;  %6651 = vrcp.f32 %v1065_v49  ;;  %v8512_v9 = vpop.xlane.xlu1 %638  ;;  %v737_v34 = vand.u32 2147483648, %v8486_v31 }
  0xec   : > { %v6636_v40 = vpop.eup %6635  ;;  %v896_v47 = vsel %vm895_vm5, %v623_v21, %v894_v38  ;;  %v892_v53 = vsel %vm890_vm6, %v891_v46, %v889_v44  ;;  %v5783_v63 = vclamps-f32 %v1041_v52, 15.0  ;;  %6653 = vrcp.f32 %v1041_v52 }
  0xed   : > { %v6638_v42 = vpop.eup %6637  ;;  %v719_v45 = vmul.f32 %v6636_v40, %v8474_v22  ;;  %v899_v55 = vsel %vm897_vm7, %v898_v50, %v896_v47  ;;  %v1066_v60 = vmax.f32 %v892_v53, 1e-05  ;;  %6655 = vtanh.f32 %v5807_v59 }
  0xee   : > { %v726_v48 = vmul.f32 %v6638_v42, %v8477_v23  ;;  %v1067_v0 = vmax.f32 %v899_v55, 1e-05  ;;  %6657 = vtanh.f32 %v5783_v63  ;;  %v8520_v28 = vpop.xlane.xlu0 %538  ;;  %v744_v38 = vand.u32 2147483648, %v8488_v35 }
  0xef   : > { %v721_v56 = vsel %vm720_vm8, %v8474_v22, %v719_v45  ;;  %v5808_v6 = vclamps-f32 %v1066_v60, 15.0  ;;  %6659 = vrcp.f32 %v1066_v60  ;;  %v8522_v29 = vpop.xlane.xlu1 %542  ;;  %vm743_vm3 = vcmp.eq.f32.partialorder %v8488_v35, 0.0 }
  0xf0   : > { %v6640_v51 = vpop.eup %6639  ;;  %v728_v58 = vsel %vm727_vm9, %v8477_v23, %v726_v48  ;;  %v724_v1 = vsel %vm722_vm10, %v723_v57, %v721_v56  ;;  %v5809_v11 = vclamps-f32 %v1067_v0, 15.0  ;;  %6661 = vrcp.f32 %v1067_v0 }
  0xf1   : > { %v6642_v54 = vpop.eup %6641  ;;  %v901_v62 = vmul.f32 %v6640_v51, %v8480_v24  ;;  %v731_v3 = vsel %vm729_vm11, %v730_v61, %v728_v58  ;;  %v1042_v7 = vmax.f32 %v724_v1, 1e-05  ;;  %6663 = vtanh.f32 %v5808_v6 }
  0xf2   : > { %v908_v2 = vmul.f32 %v6642_v54, %v8483_v25  ;;  %v1043_v12 = vmax.f32 %v731_v3, 1e-05  ;;  %6665 = vtanh.f32 %v5809_v11  ;;  %v8536_v42 = vpop.xlane.xlu0 %642  ;;  %vm706_vm4 = vcmp.eq.f32.partialorder %v8472_v17, inf  ;;  %v8605_v11 = vld [vmem:[%s8304_s3 + $0xf8] sm:$0xff] }
  0xf3   : > { %v903_v8 = vsel %vm902_vm12, %v8480_v24, %v901_v62  ;;  %v5784_v20 = vclamps-f32 %v1042_v7, 15.0  ;;  %6667 = vrcp.f32 %v1042_v7  ;;  %v8541_v45 = vpop.xlane.xlu1 %646  ;;  %vm874_vm5 = vcmp.eq.f32.partialorder %v8470_v16, inf  ;;  %6305 = vmatprep.subr.mxu1 %v8605_v11 }
  0xf4   : > { %v6644_v10 = vpop.eup %6643  ;;  %v910_v13 = vsel %vm909_vm13, %v8483_v25, %v908_v2  ;;  %v906_v18 = vsel %vm904_vm14, %v905_v4, %v903_v8  ;;  %v5785_v26 = vclamps-f32 %v1043_v12, 15.0  ;;  %6669 = vrcp.f32 %v1043_v12 }
  0xf5   : > { %v6646_v14 = vpop.eup %6645  ;;  %v913_v21 = vsel %vm911_vm15, %v912_v15, %v910_v13  ;;  %v733_v22 = vmul.f32 %v6644_v10, %v8486_v31  ;;  %v1068_v24 = vmax.f32 %v906_v18, 1e-05  ;;  %6671 = vtanh.f32 %v5784_v20 }
  0xf6   : > { %v6648_v19 = vpop.eup %6647  ;;  %v740_v27 = vmul.f32 %v6646_v14, %v8488_v35  ;;  %v1069_v30 = vmax.f32 %v913_v21, 1e-05  ;;  %6673 = vtanh.f32 %v5785_v26  ;;  %v709_v50 = vand.u32 2147483648, %v8472_v17  ;;  %v8566_v56 = vpop.xlane.xlu0 %546 }
  0xf7   : > { %v6650_v23 = vpop.eup %6649  ;;  %v873_v25 = vmul.f32 %v6648_v19, %v8470_v16  ;;  %v735_v32 = vsel %vm734_vm0, %v8486_v31, %v733_v22  ;;  %v5810_v37 = vclamps-f32 %v1068_v24, 15.0  ;;  %6675 = vrcp.f32 %v1068_v24  ;;  %v8572_v59 = vpop.xlane.xlu1 %550  ;;  %v8631_v24 = vld [vmem:[%s8304_s3 + $0x178] sm:$0xff] }
  0xf8   : > { %v705_v33 = vmul.f32 %v6650_v23, %v8472_v17  ;;  %v742_v36 = vsel %vm741_vm1, %v8488_v35, %v740_v27  ;;  %v8533_v39 = vpop.eup %6651  ;;  %v5811_v40 = vclamps-f32 %v1069_v30, 15.0  ;;  %6677 = vrcp.f32 %v1069_v30  ;;  %6409 = vmatprep.subr.mxu0 %v8631_v24 }
  0xf9   : > { %v738_v41 = vsel %vm736_vm2, %v737_v34, %v735_v32  ;;  %v8538_v43 = vpop.eup %6653  ;;  %v745_v44 = vsel %vm743_vm3, %v744_v38, %v742_v36  ;;  %6679 = vrsqrt.f32 %v8509_v5  ;;  %v875_v49 = vsel %vm874_vm5, %v8470_v16, %v873_v25 }
  0xfa   : > { %v8543_v46 = vpop.eup %6655  ;;  %6681 = vrsqrt.f32 %v8512_v9  ;;  %v707_v35 = vsel %vm706_vm4, %v8472_v17, %v705_v33  ;;  %v1044_v47 = vmax.f32 %v738_v41, 1e-05  ;;  %v1045_v51 = vmax.f32 %v745_v44, 1e-05  ;;  %v8596_v6 = vpop.xlane.xlu0 %650 }
  0xfb   : > { %13679 = vst [vmem:[#allocation11_spill] sm:$0xff] %v8543_v46  ;;  %v8547_v31 = vpop.eup %6657  ;;  %6683 = vtanh.f32 %v5810_v37  ;;  %v877_v53 = vand.u32 2147483648, %v8470_v16  ;;  %vm708_vm6 = vcmp.eq.f32.partialorder %v8472_v17, 0.0  ;;  %vm876_vm7 = vcmp.eq.f32.partialorder %v8470_v16, 0.0  ;;  %v8602_v8 = vpop.xlane.xlu1 %654 }
  0xfc   : > { %13680 = vst [vmem:[#allocation12_spill] sm:$0xff] %v8547_v31  ;;  %v8551_v48 = vpop.eup %6659  ;;  %6685 = vtanh.f32 %v5811_v40  ;;  %v8563_v55 = vsel %vm708_vm6, %v709_v50, %v707_v35  ;;  %v5786_v61 = vclamps-f32 %v1044_v47, 15.0  ;;  %v5787_v0 = vclamps-f32 %v1045_v51, 15.0 }
  0xfd   : > { %v8555_v52 = vpop.eup %6661  ;;  %6687 = vrsqrt.f32 %v8520_v28  ;;  %v8570_v58 = vsel %vm876_vm7, %v877_v53, %v875_v49  ;;  %v1040_v16 = vmax.f32 %v8563_v55, 1e-05  ;;  %vm916_vm8 = vcmp.eq.f32.partialorder %v8509_v5, inf }
  0xfe   : > { %v8560_v54 = vpop.eup %6663  ;;  %6689 = vrsqrt.f32 %v8522_v29  ;;  %v1064_v63 = vmax.f32 %v8570_v58, 1e-05  ;;  %vm918_vm9 = vcmp.eq.f32.partialorder %v8509_v5, 0.0  ;;  %v919_v2 = vand.u32 2147483648, %v8509_v5 }
  0xff   : > { %13681 = vst [vmem:[#allocation13_spill] sm:$0xff] %v8560_v54  ;;  %v8568_v57 = vpop.eup %6665  ;;  %6691 = vrcp.f32 %v1044_v47  ;;  %vm923_vm10 = vcmp.eq.f32.partialorder %v8512_v9, inf  ;;  %vm925_vm11 = vcmp.eq.f32.partialorder %v8512_v9, 0.0  ;;  %v926_v4 = vand.u32 2147483648, %v8512_v9 }
 0x100   : > { %13682 = vst [vmem:[#allocation14_spill] sm:$0xff] %v8568_v57  ;;  %v8574_v17 = vpop.eup %6667  ;;  %6693 = vrcp.f32 %v1045_v51  ;;  %vm748_vm12 = vcmp.eq.f32.partialorder %v8520_v28, inf  ;;  %vm750_vm13 = vcmp.eq.f32.partialorder %v8520_v28, 0.0  ;;  %v5782_v10 = vclamps-f32 %v1040_v16, 15.0 }
 0x101   : > { %v8576_v60 = vpop.eup %6669  ;;  %6695 = vrsqrt.f32 %v8536_v42  ;;  %v751_v13 = vand.u32 2147483648, %v8520_v28  ;;  %vm755_vm14 = vcmp.eq.f32.partialorder %v8522_v29, inf  ;;  %vm757_vm15 = vcmp.eq.f32.partialorder %v8522_v29, 0.0 }
 0x102   : > { %v8580_v62 = vpop.eup %6671  ;;  %6697 = vrsqrt.f32 %v8541_v45  ;;  %v758_v18 = vand.u32 2147483648, %v8522_v29  ;;  %v5806_v19 = vclamps-f32 %v1064_v63, 15.0  ;;  %vm930_vm0 = vcmp.eq.f32.partialorder %v8536_v42, inf }
 0x103   : > { %13683 = vst [vmem:[#allocation15_spill] sm:$0xff] %v8580_v62  ;;  %v8584_v1 = vpop.eup %6673  ;;  %6699 = vrsqrt.f32 %v8566_v56  ;;  %v933_v22 = vand.u32 2147483648, %v8536_v42  ;;  %vm932_vm1 = vcmp.eq.f32.partialorder %v8536_v42, 0.0  ;;  %vm937_vm2 = vcmp.eq.f32.partialorder %v8541_v45, inf }
 0x104   : > { %13684 = vst [vmem:[#allocation16_spill] sm:$0xff] %v8584_v1  ;;  %v8590_v3 = vpop.eup %6675  ;;  %6701 = vrsqrt.f32 %v8572_v59  ;;  %v940_v27 = vand.u32 2147483648, %v8541_v45  ;;  %vm939_vm3 = vcmp.eq.f32.partialorder %v8541_v45, 0.0  ;;  %vm762_vm4 = vcmp.eq.f32.partialorder %v8566_v56, inf }
 0x105   : > { %v8598_v7 = vpop.eup %6677  ;;  %6703 = vtanh.f32 %v5786_v61  ;;  %vm764_vm5 = vcmp.eq.f32.partialorder %v8566_v56, 0.0  ;;  %v765_v44 = vand.u32 2147483648, %v8566_v56  ;;  %v772_v35 = vand.u32 2147483648, %v8572_v59 }
 0x106   : > { %v6680_v12 = vpop.eup %6679  ;;  %6705 = vtanh.f32 %v5787_v0  ;;  %vm769_vm6 = vcmp.eq.f32.partialorder %v8572_v59, inf  ;;  %v947_v49 = vand.u32 2147483648, %v8596_v6  ;;  %v8663_v50 = vmul.f32 %v8547_v31, %v8538_v43 }
 0x107   : > { %v6682_v14 = vpop.eup %6681  ;;  %v915_v15 = vmul.f32 %v6680_v12, %v8509_v5  ;;  %6707 = vrsqrt.f32 %v8596_v6  ;;  %vm771_vm7 = vcmp.eq.f32.partialorder %v8572_v59, 0.0  ;;  %v954_v58 = vand.u32 2147483648, %v8602_v8 }
 0x108   : > { %v8616_v20 = vpop.eup %6683  ;;  %v922_v21 = vmul.f32 %v6682_v14, %v8512_v9  ;;  %6709 = vrsqrt.f32 %v8602_v8 }
 0x109   : > { %13685 = vst [vmem:[#allocation17_spill] sm:$0xff] %v8616_v20  ;;  %v8622_v23 = vpop.eup %6685  ;;  %v917_v26 = vsel %vm916_vm8, %v8509_v5, %v915_v15  ;;  %6711 = vtanh.f32 %v5782_v10  ;;  %v8645_v5 = vpop.xlane.xlu0 %554  ;;  %vm944_vm8 = vcmp.eq.f32.partialorder %v8596_v6, inf }
 0x10a   : > { %13686 = vst [vmem:[#allocation18_spill] sm:$0xff] %v8622_v23  ;;  %v6688_v30 = vpop.eup %6687  ;;  %v920_v25 = vsel %vm918_vm9, %v919_v2, %v917_v26  ;;  %v924_v32 = vsel %vm923_vm10, %v8512_v9, %v922_v21  ;;  %6713 = vrcp.f32 %v1040_v16  ;;  %vm946_vm9 = vcmp.eq.f32.partialorder %v8596_v6, 0.0 }
 0x10b   : > { %v6690_v33 = vpop.eup %6689  ;;  %v1070_v34 = vmax.f32 %v920_v25, 1e-05  ;;  %v927_v36 = vsel %vm925_vm11, %v926_v4, %v924_v32  ;;  %v747_v37 = vmul.f32 %v6688_v30, %v8520_v28  ;;  %6715 = vtanh.f32 %v5806_v19 }
 0x10c   : > { %v8647_v38 = vpop.eup %6691  ;;  %v1071_v40 = vmax.f32 %v927_v36, 1e-05  ;;  %v754_v41 = vmul.f32 %v6690_v33, %v8522_v29  ;;  %6717 = vrcp.f32 %v1064_v63  ;;  %vm951_vm10 = vcmp.eq.f32.partialorder %v8602_v8, inf }
 0x10d   : > { %v8652_v47 = vpop.eup %6693  ;;  %v749_v9 = vsel %vm748_vm12, %v8520_v28, %v747_v37  ;;  %v5812_v53 = vclamps-f32 %v1070_v34, 15.0  ;;  %v8680_v28 = vmul.f32 %v8543_v46, %v8533_v39  ;;  %6719 = vrcp.f32 %v1070_v34  ;;  %v7875_v39 = vld [vmem:[%s8296_s29 + $0x18] sm:$0xff]  ;;  %v8694_v19 = vpop.xlane.xlu0 %658 }
 0x10e   : > { %v6696_v51 = vpop.eup %6695  ;;  %v752_v55 = vsel %vm750_vm13, %v751_v13, %v749_v9  ;;  %v756_v16 = vsel %vm755_vm14, %v8522_v29, %v754_v41  ;;  %v5813_v4 = vclamps-f32 %v1071_v40, 15.0  ;;  %vm953_vm11 = vcmp.eq.f32.partialorder %v8602_v8, 0.0  ;;  %v8684_v29 = vpop.xlane.xlu1 %558 }
 0x10f   : > { %v6698_v61 = vpop.eup %6697  ;;  %v1046_v63 = vmax.f32 %v752_v55, 1e-05  ;;  %v759_v43 = vsel %vm757_vm15, %v758_v18, %v756_v16  ;;  %v929_v0 = vmul.f32 %v6696_v51, %v8536_v42  ;;  %6721 = vrcp.f32 %v1071_v40 }
 0x110   : > { %v6700_v2 = vpop.eup %6699  ;;  %v1047_v10 = vmax.f32 %v759_v43, 1e-05  ;;  %v936_v12 = vmul.f32 %v6698_v61, %v8541_v45  ;;  %v8692_v18 = vmul.f32 %v7875_v39, %v8663_v50  ;;  %6723 = vtanh.f32 %v5812_v53  ;;  %v7876_v39 = vld [vmem:[%s8296_s29 + $0x30] sm:$0xff] }
 0x111   : > { %v6702_v13 = vpop.eup %6701  ;;  %v931_v14 = vsel %vm930_vm0, %v8536_v42, %v929_v0  ;;  %v761_v15 = vmul.f32 %v6700_v2, %v8566_v56  ;;  %v5788_v26 = vclamps-f32 %v1046_v63, 15.0  ;;  %6725 = vtanh.f32 %v5813_v4  ;;  %v8741_v43 = vpop.xlane.xlu0 %562 }
 0x112   : > { %v8696_v21 = vpop.eup %6703  ;;  %v934_v30 = vsel %vm932_vm1, %v933_v22, %v931_v14  ;;  %v938_v25 = vsel %vm937_vm2, %v8541_v45, %v936_v12  ;;  %v5789_v33 = vclamps-f32 %v1047_v10, 15.0  ;;  %v768_v41 = vmul.f32 %v6702_v13, %v8572_v59  ;;  %v8732_v16 = vpop.xlane.xlu1 %662 }
 0x113   : > { %13687 = vst [vmem:[#allocation19_spill] sm:$0xff] %v8696_v21  ;;  %v8705_v32 = vpop.eup %6705  ;;  %v1072_v34 = vmax.f32 %v934_v30, 1e-05  ;;  %v941_v36 = vsel %vm939_vm3, %v940_v27, %v938_v25  ;;  %v763_v37 = vsel %vm762_vm4, %v8566_v56, %v761_v15  ;;  %6727 = vrcp.f32 %v1046_v63  ;;  %v7878_v25 = vld [vmem:[%s8296_s29 + $0x258] sm:$0xff] }
 0x114   : > { %13688 = vst [vmem:[#allocation20_spill] sm:$0xff] %v8705_v32  ;;  %v6708_v40 = vpop.eup %6707  ;;  %v1073_v42 = vmax.f32 %v941_v36, 1e-05  ;;  %v766_v22 = vsel %vm764_vm5, %v765_v44, %v763_v37  ;;  %v8720_v45 = vmul.f32 %v8560_v54, %v8551_v48  ;;  %v8724_v27 = vmul.f32 %v8580_v62, %v8574_v17 }
 0x115   : > { %v6710_v9 = vpop.eup %6709  ;;  %v943_v51 = vmul.f32 %v6708_v40, %v8596_v6  ;;  %6729 = vtanh.f32 %v5788_v26  ;;  %v1048_v55 = vmax.f32 %v766_v22, 1e-05  ;;  %v770_v56 = vsel %vm769_vm6, %v8572_v59, %v768_v41  ;;  %v7879_v40 = vld [vmem:[%s8296_s29 + $0x240] sm:$0xff]  ;;  %v7880_v41 = vld [vmem:[%s8296_s29 + $0x270] sm:$0xff] }
 0x116   : > { %v8726_v53 = vpop.eup %6711  ;;  %v950_v44 = vmul.f32 %v6710_v9, %v8602_v8  ;;  %6731 = vtanh.f32 %v5789_v33  ;;  %v5814_v48 = vclamps-f32 %v1072_v34, 15.0  ;;  %v773_v17 = vsel %vm771_vm7, %v772_v35, %v770_v56  ;;  %v8780_v36 = vpop.xlane.xlu1 %566 }
 0x117   : > { %13689 = vst [vmem:[#allocation21_spill] sm:$0xff] %v8726_v53  ;;  %v6714_v61 = vpop.eup %6713  ;;  %v945_v63 = vsel %vm944_vm8, %v8596_v6, %v943_v51  ;;  %v5815_v2 = vclamps-f32 %v1073_v42, 15.0  ;;  %v1049_v4 = vmax.f32 %v773_v17, 1e-05  ;;  %6733 = vrcp.f32 %v1047_v10  ;;  %v8786_v51 = vpop.xlane.xlu0 %666 }
 0x118   : > { %v8743_v0 = vpop.eup %6715  ;;  %v8749_v12 = vsel %vm946_vm9, %v947_v49, %v945_v63  ;;  %v952_v59 = vsel %vm951_vm10, %v8602_v8, %v950_v44  ;;  %v8759_v13 = vmul.f32 %v6714_v61, %v8726_v53  ;;  %v8763_v14 = vmul.f32 %v8584_v1, %v8576_v60  ;;  %v7881_v44 = vld [vmem:[%s8296_s29 + $0x48] sm:$0xff]  ;;  %v5844_v63 = vld [vmem:[%s8304_s3 + $0xf0] sm:$0xff] }
 0x119   : > { %13690 = vst [vmem:[#allocation22_spill] sm:$0xff] %v8743_v0  ;;  %v8756_v35 = vsel %vm953_vm11, %v954_v58, %v952_v59  ;;  %v6718_v6 = vpop.eup %6717  ;;  %6735 = vrcp.f32 %v1072_v34  ;;  %v5790_v49 = vclamps-f32 %v1048_v55, 15.0  ;;  %v1074_v15 = vmax.f32 %v8749_v12, 1e-05  ;;  %v7877_v58 = vld [vmem:[%s8296_s29] sm:$0xff]  ;;  %v5859_v12 = vld [vmem:[%s8304_s3 + $0x168] sm:$0xff] }
 0x11a   : > { %v1334_v10 = vmul.f32 %v7876_v39, %v8724_v27  ;;  %6737 = vtanh.f32 %v5814_v48  ;;  %v1075_v8 = vmax.f32 %v8756_v35, 1e-05  ;;  %v1328_v26 = vmul.f32 %v7877_v58, %v8759_v13  ;;  %v6720_v37 = vpop.eup %6719  ;;  %v7884_v39 = vld [vmem:[%s8296_s29 + $0x60] sm:$0xff] }
 0x11b   : > { %v8772_v30 = vmul.f32 %v6718_v6, %v8743_v0  ;;  %6739 = vtanh.f32 %v5815_v2  ;;  %v5791_v60 = vclamps-f32 %v1049_v4, 15.0  ;;  %v1403_v33 = vmul.f32 %v7878_v25, %v8680_v28  ;;  %v7883_v6 = vld [vmem:[%s8296_s29 + $0x2a0] sm:$0xff]  ;;  %v5860_v25 = vld [vmem:[%s8304_s3 + $0x170] sm:$0xff]  ;;  %v5853_v0 = vld [vmem:[%s8304_s3 + $0x138] sm:$0xff] }
 0x11c   : > { %v8778_v34 = vmul.f32 %v8568_v57, %v8555_v52  ;;  %6741 = vrcp.f32 %v1073_v42  ;;  %6233 = vmatprep.mubr.f32.mxu0 %v1328_v26  ;;  %v1406_v9 = vmul.f32 %v7880_v41, %v8720_v45  ;;  %v8790_v56 = vmul.f32 %v8616_v20, %v8590_v3  ;;  %v6722_v52 = vpop.eup %6721 }
 0x11d   : > { %v1400_v22 = vmul.f32 %v7879_v40, %v8772_v30  ;;  %6743 = vtanh.f32 %v5790_v49  ;;  %v5816_v42 = vclamps-f32 %v1074_v15, 15.0  ;;  %6234 = vmatmul.mubr.f32.vlgmr.msra.gmra.mxu0 %v8692_v18  ;;  %v1337_v61 = vmul.f32 %v7881_v44, %v8763_v14  ;;  %v8797_v48 = vpop.eup %6723  ;;  %v7882_v18 = vld [vmem:[%s8296_s29 + $0x288] sm:$0xff]  ;;  %v7886_v40 = vld [vmem:[%s8296_s29 + $0x2b8] sm:$0xff] }
 0x11e   : > { %13691 = vst [vmem:[#allocation23_spill] sm:$0xff] %v8797_v48  ;;  %6745 = vrcp.f32 %v1048_v55  ;;  %v5817_v17 = vclamps-f32 %v1075_v8, 15.0  ;;  %6236 = vmatprep.mubr.f32.mxu0 %v1334_v10  ;;  %v8803_v3 = vmul.f32 %v8696_v21, %v8647_v38  ;;  %v1409_v2 = vmul.f32 %v7882_v18, %v8778_v34  ;;  %6410 = vmatpush3.msra.mxu0 %v8631_v24  ;;  %v8817_v38 = vpop.eup %6725  ;;  %v7885_v24 = vld [vmem:[%s8296_s29 + $0x78] sm:$0xff] }
 0x11f   : > { %6269 = vmatprep.mubr.f32.mxu1 %v1400_v22  ;;  %6747 = vtanh.f32 %v5791_v60  ;;  %v8810_v55 = vmul.f32 %v8622_v23, %v8598_v7  ;;  %v8814_v59 = vmul.f32 %v8705_v32, %v8652_v47  ;;  %13692 = vst [vmem:[#allocation24_spill] sm:$0xff] %v8817_v38  ;;  %v1412_v49 = vmul.f32 %v7883_v6, %v8790_v56  ;;  %v5843_v7 = vld [vmem:[%s8304_s3 + $0xe8] sm:$0xff]  ;;  %v8825_v47 = vpop.xlane.xlu1 %670  ;;  %v8831_v60 = vpop.xlane.xlu0 %570 }
 0x120   : > { %6270 = vmatmul.mubr.f32.vlgmr.msra.gmra.mxu1 %v1403_v33  ;;  %6749 = vrcp.f32 %v1049_v4  ;;  %v1340_v10 = vmul.f32 %v7884_v39, %v8803_v3  ;;  %v6728_v58 = vpop.eup %6727  ;;  %v8844_v41 = vmul.f32 %v8817_v38, %v6722_v52  ;;  %6411 = vmatprep.subr.mxu0 %v5860_v25  ;;  %v5841_v52 = vld [vmem:[%s8304_s3 + $0xd8] sm:$0xff]  ;;  %vm776_vm12 = vcmp.eq.f32.partialorder %v8645_v5, inf }
 0x121   : > { %6272 = vmatprep.mubr.f32.mxu1 %v1406_v9  ;;  %6306 = vmatpush3.msra.mxu1 %v8605_v11  ;;  %6751 = vtanh.f32 %v5816_v42  ;;  %v1343_v4 = vmul.f32 %v7885_v24, %v8814_v59  ;;  %v8834_v11 = vmul.f32 %v8797_v48, %v6720_v37  ;;  %v1415_v22 = vmul.f32 %v7886_v40, %v8810_v55  ;;  %v5842_v9 = vld [vmem:[%s8304_s3 + $0xe0] sm:$0xff]  ;;  %v7887_v37 = vld [vmem:[%s8296_s29 + $0x2d0] sm:$0xff] }
 0x122   : > { %6237 = vmatmul.mubr.f32.gmra.mxu0 %v1337_v61  ;;  %6307 = vmatprep.subr.mxu1 %v5844_v63  ;;  %v8829_v26 = vpop.eup %6729  ;;  %6753 = vtanh.f32 %v5817_v17  ;;  %vm778_vm13 = vcmp.eq.f32.partialorder %v8645_v5, 0.0  ;;  %vm783_vm14 = vcmp.eq.f32.partialorder %v8684_v29, inf  ;;  %vm785_vm15 = vcmp.eq.f32.partialorder %v8684_v29, 0.0 }
 0x123   : > { %13693 = vst [vmem:[#allocation25_spill] sm:$0xff] %v8829_v26  ;;  %6239 = vmatprep.mubr.f32.mxu0 %v1340_v10  ;;  %6308 = vmatpush3.msra.mxu1 %v5844_v63  ;;  %v8837_v33 = vpop.eup %6731  ;;  %6755 = vrcp.f32 %v1074_v15  ;;  %v1418_v42 = vmul.f32 %v7887_v37, %v8834_v11  ;;  %v8855_v35 = vpop.xlane.xlu1 %574  ;;  %v8860_v63 = vmul.f32 %v8829_v26, %v6728_v58  ;;  %v7889_v10 = vld [vmem:[%s8296_s29 + $0x90] sm:$0xff]  ;;  %v7890_v58 = vld [vmem:[%s8296_s29 + $0xa8] sm:$0xff]  ;;  %v5857_v37 = vld [vmem:[%s8304_s3 + $0x158] sm:$0xff]  ;;  %vm958_vm0 = vcmp.eq.f32.partialorder %v8694_v19, inf }
 0x124   : > { %13694 = vst [vmem:[#allocation26_spill] sm:$0xff] %v8837_v33  ;;  %6273 = vmatmul.mubr.f32.gmra.mxu1 %v1409_v2  ;;  %6309 = vmatprep.subr.mxu1 %v5843_v7  ;;  %6757 = vrcp.f32 %v1075_v8  ;;  %v6734_v15 = vpop.eup %6733  ;;  %v7888_v8 = vld [vmem:[%s8296_s29 + $0x2e8] sm:$0xff]  ;;  %v5858_v2 = vld [vmem:[%s8304_s3 + $0x160] sm:$0xff]  ;;  %vm960_vm1 = vcmp.eq.f32.partialorder %v8694_v19, 0.0  ;;  %vm965_vm2 = vcmp.eq.f32.partialorder %v8732_v16, inf  ;;  %vm967_vm3 = vcmp.eq.f32.partialorder %v8732_v16, 0.0 }
 0x125   : > { %6275 = vmatprep.mubr.f32.mxu1 %v1412_v49  ;;  %6310 = vmatpush3.msra.mxu1 %v5843_v7  ;;  %v1421_v17 = vmul.f32 %v7888_v8, %v8844_v41  ;;  %v8863_v18 = vmul.f32 %v6734_v15, %v8837_v33  ;;  %v8868_v49 = vpop.xlane.xlu0 %674  ;;  %6759 = vrsqrt.f32 %v8645_v5  ;;  %v1346_v7 = vmul.f32 %v7889_v10, %v8860_v63  ;;  %v7891_v8 = vld [vmem:[%s8296_s29 + $0x300] sm:$0xff] }
 0x126   : > { %6240 = vmatmul.mubr.f32.gmra.mxu0 %v1343_v4  ;;  %v6736_v44 = vpop.eup %6735  ;;  %6311 = vmatprep.subr.mxu1 %v5842_v9  ;;  %v5840_v4 = vld [vmem:[%s8304_s3 + $0xd0] sm:$0xff]  ;;  %6761 = vrsqrt.f32 %v8684_v29  ;;  %vm790_vm4 = vcmp.eq.f32.partialorder %v8741_v43, inf  ;;  %vm792_vm5 = vcmp.eq.f32.partialorder %v8741_v43, 0.0  ;;  %vm797_vm6 = vcmp.eq.f32.partialorder %v8780_v36, inf  ;;  %v5834_v26 = vld [vmem:[%s8304_s3 + $0xa0] sm:$0xff] }
 0x127   : > { %6412 = vmatpush3.msra.mxu0 %v5860_v25  ;;  %v8853_v61 = vpop.eup %6737  ;;  %6312 = vmatpush3.msra.mxu1 %v5842_v9  ;;  %v1349_v24 = vmul.f32 %v7890_v58, %v8863_v18  ;;  %6763 = vrsqrt.f32 %v8694_v19  ;;  %vm799_vm7 = vcmp.eq.f32.partialorder %v8780_v36, 0.0  ;;  %vm972_vm8 = vcmp.eq.f32.partialorder %v8786_v51, inf }
 0x128   : > { %13695 = vst [vmem:[#allocation27_spill] sm:$0xff] %v8853_v61  ;;  %6276 = vmatmul.mubr.f32.gmra.mxu1 %v1415_v22  ;;  %6413 = vmatprep.subr.mxu0 %v5859_v12  ;;  %v8866_v6 = vpop.eup %6739  ;;  %v8880_v22 = vmul.f32 %v8853_v61, %v6736_v44  ;;  %v7892_v44 = vld [vmem:[%s8296_s29 + $0x318] sm:$0xff]  ;;  %6765 = vrsqrt.f32 %v8732_v16  ;;  %vm974_vm9 = vcmp.eq.f32.partialorder %v8786_v51, 0.0  ;;  %vm979_vm10 = vcmp.eq.f32.partialorder %v8825_v47, inf }
 0x129   : > { %13696 = vst [vmem:[#allocation28_spill] sm:$0xff] %v8866_v6  ;;  %6278 = vmatprep.mubr.f32.mxu1 %v1418_v42  ;;  %v6742_v39 = vpop.eup %6741  ;;  %6414 = vmatpush3.msra.mxu0 %v5859_v12  ;;  %v5839_v42 = vld [vmem:[%s8304_s3 + $0xc8] sm:$0xff]  ;;  %v8900_v58 = vpop.xlane.xlu0 %578  ;;  %6767 = vrsqrt.f32 %v8741_v43  ;;  %v7894_v61 = vld [vmem:[%s8296_s29 + $0xd8] sm:$0xff]  ;;  %vm981_vm11 = vcmp.eq.f32.partialorder %v8825_v47, 0.0 }
 0x12a   : > { %6313 = vmatprep.subr.mxu1 %v5841_v52  ;;  %v8876_v25 = vpop.eup %6743  ;;  %6415 = vmatprep.subr.mxu0 %v5858_v2  ;;  %v8883_v9 = vmul.f32 %v6742_v39, %v8866_v6  ;;  %v5856_v39 = vld [vmem:[%s8304_s3 + $0x150] sm:$0xff]  ;;  %v7893_v6 = vld [vmem:[%s8296_s29 + $0xc0] sm:$0xff]  ;;  %6769 = vrsqrt.f32 %v8780_v36 }
 0x12b   : > { %13697 = vst [vmem:[#allocation29_spill] sm:$0xff] %v8876_v25  ;;  %6314 = vmatpush3.msra.mxu1 %v5841_v52  ;;  %v6746_v40 = vpop.eup %6745  ;;  %6242 = vmatprep.mubr.f32.mxu0 %v1346_v7  ;;  %v8890_v52 = vpop.xlane.xlu1 %678  ;;  %6771 = vrsqrt.f32 %v8786_v51 }
 0x12c   : > { %6279 = vmatmul.mubr.f32.gmra.mxu1 %v1421_v17  ;;  %v8887_v12 = vpop.eup %6747  ;;  %6243 = vmatmul.mubr.f32.gmra.mxu0 %v1349_v24  ;;  %v1424_v17 = vmul.f32 %v7891_v8, %v8880_v22  ;;  %v1427_v10 = vmul.f32 %v7892_v44, %v8883_v9  ;;  %v8903_v24 = vmul.f32 %v6746_v40, %v8876_v25  ;;  %6773 = vrsqrt.f32 %v8825_v47 }
 0x12d   : > { %13698 = vst [vmem:[#allocation30_spill] sm:$0xff] %v8887_v12  ;;  %6315 = vmatprep.subr.mxu1 %v5840_v4  ;;  %v6750_v15 = vpop.eup %6749  ;;  %6416 = vmatpush3.msra.mxu0 %v5858_v2  ;;  %6775 = vrsqrt.f32 %v8831_v60 }
 0x12e   : > { %6316 = vmatpush3.msra.mxu1 %v5840_v4  ;;  %v8897_v7 = vpop.eup %6751  ;;  %6417 = vmatprep.subr.mxu0 %v5857_v37  ;;  %v8909_v2 = vmul.f32 %v6750_v15, %v8887_v12  ;;  %v5838_v4 = vld [vmem:[%s8304_s3 + $0xc0] sm:$0xff]  ;;  %v1352_v40 = vmul.f32 %v7893_v6, %v8903_v24  ;;  %v5855_v15 = vld [vmem:[%s8304_s3 + $0x148] sm:$0xff]  ;;  %6777 = vrsqrt.f32 %v8855_v35 }
 0x12f   : > { %13699 = vst [vmem:[#allocation31_spill] sm:$0xff] %v8897_v7  ;;  %6317 = vmatprep.subr.mxu1 %v5839_v42  ;;  %v8905_v8 = vpop.eup %6753  ;;  %6281 = vmatprep.mubr.f32.mxu1 %v1424_v17  ;;  %6779 = vrsqrt.f32 %v8868_v49 }
 0x130   : > { %13700 = vst [vmem:[#allocation32_spill] sm:$0xff] %v8905_v8  ;;  %6418 = vmatpush3.msra.mxu0 %v5857_v37  ;;  %v6756_v44 = vpop.eup %6755  ;;  %6282 = vmatmul.mubr.f32.gmra.mxu1 %v1427_v10  ;;  %v1355_v17 = vmul.f32 %v7894_v61, %v8909_v2  ;;  %v5837_v37 = vld [vmem:[%s8304_s3 + $0xb8] sm:$0xff]  ;;  %v779_v61 = vand.u32 2147483648, %v8645_v5  ;;  %6781 = vrsqrt.f32 %v8890_v52 }
 0x131   : > { %6419 = vmatprep.subr.mxu0 %v5856_v39  ;;  %v6758_v25 = vpop.eup %6757  ;;  %6318 = vmatpush3.msra.mxu1 %v5839_v42  ;;  %v8923_v6 = vmul.f32 %v6756_v44, %v8897_v7  ;;  %v8932_v42 = vpop.xlane.xlu1 %582  ;;  %v786_v44 = vand.u32 2147483648, %v8684_v29  ;;  %v7896_v7 = vld [vmem:[%s8296_s29 + $0x348] sm:$0xff]  ;;  %6783 = vrsqrt.f32 %v8900_v58 }
 0x132   : > { %6420 = vmatpush3.msra.mxu0 %v5856_v39  ;;  %6245 = vmatprep.mubr.f32.mxu0 %v1352_v40  ;;  %v8926_v10 = vmul.f32 %v6758_v25, %v8905_v8  ;;  %v5854_v39 = vld [vmem:[%s8304_s3 + $0x140] sm:$0xff]  ;;  %v8937_v25 = vpop.xlane.xlu0 %682  ;;  %v7895_v40 = vld [vmem:[%s8296_s29 + $0x330] sm:$0xff]  ;;  %6785 = vrsqrt.f32 %v8932_v42 }
 0x133   : > { %6319 = vmatprep.subr.mxu1 %v5838_v4  ;;  %6246 = vmatmul.mubr.f32.gmra.mxu0 %v1355_v17  ;;  %v1430_v8 = vmul.f32 %v7895_v40, %v8923_v6  ;;  %v5836_v17 = vld [vmem:[%s8304_s3 + $0xb0] sm:$0xff]  ;;  %v6760_v40 = vpop.eup %6759  ;;  %6787 = vrsqrt.f32 %v8937_v25 }
 0x134   : > { %6320 = vmatpush3.msra.mxu1 %v5838_v4  ;;  %v1433_v12 = vmul.f32 %v7896_v7, %v8926_v10  ;;  %6421 = vmatprep.subr.mxu0 %v5855_v15  ;;  %v6762_v4 = vpop.eup %6761  ;;  %v775_v53 = vmul.f32 %v6760_v40, %v8645_v5  ;;  %v5852_v7 = vld [vmem:[%s8304_s3 + $0x130] sm:$0xff] }
 0x135   : > { %6321 = vmatprep.subr.mxu1 %v5837_v37  ;;  %6422 = vmatpush3.msra.mxu0 %v5855_v15  ;;  %v782_v33 = vmul.f32 %v6762_v4, %v8684_v29  ;;  %v8970_v4 = vpop.xlane.xlu1 %686  ;;  %v6764_v15 = vpop.eup %6763 }
 0x136   : > { %6322 = vmatpush3.msra.mxu1 %v5837_v37  ;;  %6284 = vmatprep.mubr.f32.mxu1 %v1430_v8  ;;  %v5835_v37 = vld [vmem:[%s8304_s3 + $0xa8] sm:$0xff]  ;;  %v777_v40 = vsel %vm776_vm12, %v8645_v5, %v775_v53  ;;  %v6766_v5 = vpop.eup %6765  ;;  %6789 = vrsqrt.f32 %v8970_v4  ;;  %vm804_vm12 = vcmp.eq.f32.partialorder %v8831_v60, inf }
 0x137   : > { %6423 = vmatprep.subr.mxu0 %v5854_v39  ;;  %6285 = vmatmul.mubr.f32.gmra.mxu1 %v1433_v12  ;;  %v5851_v8 = vld [vmem:[%s8304_s3 + $0x128] sm:$0xff]  ;;  %v780_v38 = vsel %vm778_vm13, %v779_v61, %v777_v40  ;;  %v784_v53 = vsel %vm783_vm14, %v8684_v29, %v782_v33  ;;  %v957_v33 = vmul.f32 %v6764_v15, %v8694_v19  ;;  %v5833_v40 = vld [vmem:[%s8304_s3 + $0x98] sm:$0xff]  ;;  %v6768_v12 = vpop.eup %6767  ;;  %v13701_v29 = vand.u32 2147483648, %v8694_v19 }
 0x138   : > { %6424 = vmatpush3.msra.mxu0 %v5854_v39  ;;  %6323 = vmatprep.subr.mxu1 %v5836_v17  ;;  %v1050_v61 = vmax.f32 %v780_v38, 1e-05  ;;  %v5850_v39 = vld [vmem:[%s8304_s3 + $0x120] sm:$0xff]  ;;  %v964_v38 = vmul.f32 %v6766_v5, %v8732_v16  ;;  %v789_v15 = vmul.f32 %v6768_v12, %v8741_v43  ;;  %v6770_v5 = vpop.eup %6769  ;;  %vm806_vm13 = vcmp.eq.f32.partialorder %v8831_v60, 0.0 }
 0x139   : > { %6425 = vmatprep.subr.mxu0 %v5853_v0  ;;  %6324 = vmatpush3.msra.mxu1 %v5836_v17  ;;  %v787_v17 = vsel %vm785_vm15, %v786_v44, %v784_v53  ;;  %v5849_v53 = vld [vmem:[%s8304_s3 + $0x118] sm:$0xff]  ;;  %vm811_vm14 = vcmp.eq.f32.partialorder %v8855_v35, inf  ;;  %vm813_vm15 = vcmp.eq.f32.partialorder %v8855_v35, 0.0 }
 0x13a   : > { %6426 = vmatpush3.msra.mxu0 %v5853_v0  ;;  %v8983_v0 = vpop.xlane.xlu0 %586  ;;  %6325 = vmatprep.subr.mxu1 %v5835_v37  ;;  %v1051_v48 = vmax.f32 %v787_v17, 1e-05  ;;  %v5792_v44 = vclamps-f32 %v1050_v61, 15.0  ;;  %v966_v12 = vsel %vm965_vm2, %v8732_v16, %v964_v38  ;;  %v5831_v38 = vld [vmem:[%s8304_s3 + $0x88] sm:$0xff]  ;;  %vm993_vm2 = vcmp.eq.f32.partialorder %v8890_v52, inf }
 0x13b   : > { %6427 = vmatprep.subr.mxu0 %v5852_v7  ;;  %6326 = vmatpush3.msra.mxu1 %v5835_v37  ;;  %6791 = vrsqrt.f32 %v8983_v0  ;;  %v5832_v37 = vld [vmem:[%s8304_s3 + $0x90] sm:$0xff] }
 0x13c   : > { %6428 = vmatpush3.msra.mxu0 %v5852_v7  ;;  %6327 = vmatprep.subr.mxu1 %v5834_v26  ;;  %v959_v7 = vsel %vm958_vm0, %v8694_v19, %v957_v33  ;;  %6793 = vrcp.f32 %v1050_v61  ;;  %v5793_v17 = vclamps-f32 %v1051_v48, 15.0  ;;  %v13702_v61 = vand.u32 2147483648, %v8732_v16 }
 0x13d   : > { %6429 = vmatprep.subr.mxu0 %v5851_v8  ;;  %6328 = vmatpush3.msra.mxu1 %v5834_v26  ;;  %v962_v32 = vsel %vm960_vm1, %v13701_v29, %v959_v7  ;;  %v6772_v26 = vpop.eup %6771  ;;  %6795 = vrcp.f32 %v1051_v48  ;;  %v791_v19 = vsel %vm790_vm4, %v8741_v43, %v789_v15  ;;  %v5848_v29 = vld [vmem:[%s8304_s3 + $0x110] sm:$0xff]  ;;  %v13703_v16 = vand.u32 2147483648, %v8741_v43 }
 0x13e   : > { %6430 = vmatpush3.msra.mxu0 %v5851_v8  ;;  %6329 = vmatprep.subr.mxu1 %v5833_v40  ;;  %v1076_v8 = vmax.f32 %v962_v32, 1e-05  ;;  %v969_v33 = vsel %vm967_vm3, %v13702_v61, %v966_v12  ;;  %v6774_v48 = vpop.eup %6773  ;;  %6797 = vtanh.f32 %v5792_v44  ;;  %v796_v15 = vmul.f32 %v6770_v5, %v8780_v36  ;;  %v5830_v44 = vld [vmem:[%s8304_s3 + $0x80] sm:$0xff]  ;;  %v5847_v61 = vld [vmem:[%s8304_s3 + $0x108] sm:$0xff] }
 0x13f   : > { %6431 = vmatprep.subr.mxu0 %v5850_v39  ;;  %6330 = vmatpush3.msra.mxu1 %v5833_v40  ;;  %v1077_v32 = vmax.f32 %v969_v33, 1e-05  ;;  %v794_v7 = vsel %vm792_vm5, %v13703_v16, %v791_v19  ;;  %vm986_vm0 = vcmp.eq.f32.partialorder %v8868_v49, inf  ;;  %6799 = vtanh.f32 %v5793_v17  ;;  %v6776_v43 = vpop.eup %6775  ;;  %v5846_v16 = vld [vmem:[%s8304_s3 + $0x100] sm:$0xff] }
 0x140   : > { %6432 = vmatpush3.msra.mxu0 %v5850_v39  ;;  %6331 = vmatprep.subr.mxu1 %v5832_v37  ;;  %v5818_v39 = vclamps-f32 %v1076_v8, 15.0  ;;  %v1052_v40 = vmax.f32 %v794_v7, 1e-05  ;;  %v971_v12 = vmul.f32 %v6772_v26, %v8786_v51  ;;  %6801 = vrcp.f32 %v1076_v8  ;;  %v6778_v17 = vpop.eup %6777 }
 0x141   : > { %6433 = vmatprep.subr.mxu0 %v5849_v53  ;;  %6332 = vmatpush3.msra.mxu1 %v5832_v37  ;;  %v5819_v33 = vclamps-f32 %v1077_v32, 15.0  ;;  %v798_v5 = vsel %vm797_vm6, %v8780_v36, %v796_v15  ;;  %v978_v19 = vmul.f32 %v6774_v48, %v8825_v47  ;;  %vm988_vm1 = vcmp.eq.f32.partialorder %v8868_v49, 0.0  ;;  %v6780_v48 = vpop.eup %6779 }
 0x142   : > { %6434 = vmatpush3.msra.mxu0 %v5849_v53  ;;  %6333 = vmatprep.subr.mxu1 %v5831_v38  ;;  %6803 = vrcp.f32 %v1077_v32  ;;  %v5794_v37 = vclamps-f32 %v1052_v40, 15.0  ;;  %v13704_v53 = vand.u32 2147483648, %v8780_v36  ;;  %v973_v8 = vsel %vm972_vm8, %v8786_v51, %v971_v12 }
 0x143   : > { %6435 = vmatprep.subr.mxu0 %v5848_v29  ;;  %6334 = vmatpush3.msra.mxu1 %v5831_v38  ;;  %6805 = vtanh.f32 %v5818_v39  ;;  %v13705_v15 = vand.u32 2147483648, %v8786_v51  ;;  %v980_v36 = vsel %vm979_vm10, %v8825_v47, %v978_v19  ;;  %v13706_v38 = vand.u32 2147483648, %v8825_v47 }
 0x144   : > { %v801_v26 = vsel %vm799_vm7, %v13704_v53, %v798_v5  ;;  %6436 = vmatpush3.msra.mxu0 %v5848_v29  ;;  %6335 = vmatprep.subr.mxu1 %v5830_v44  ;;  %v6782_v5 = vpop.eup %6781  ;;  %6807 = vtanh.f32 %v5819_v33  ;;  %v803_v39 = vmul.f32 %v6776_v43, %v8831_v60  ;;  %v810_v19 = vmul.f32 %v6778_v17, %v8855_v35 }
 0x145   : > { %v1053_v7 = vmax.f32 %v801_v26, 1e-05  ;;  %v976_v32 = vsel %vm974_vm9, %v13705_v15, %v973_v8  ;;  %6437 = vmatprep.subr.mxu0 %v5847_v61  ;;  %v983_v29 = vsel %vm981_vm11, %v13706_v38, %v980_v36  ;;  %6336 = vmatpush3.msra.mxu1 %v5830_v44  ;;  %v6784_v51 = vpop.eup %6783  ;;  %6809 = vtanh.f32 %v5794_v37 }
 0x146   : > { %v1078_v12 = vmax.f32 %v976_v32, 1e-05  ;;  %6438 = vmatpush3.msra.mxu0 %v5847_v61  ;;  %v1079_v26 = vmax.f32 %v983_v29, 1e-05  ;;  %v6786_v8 = vpop.eup %6785  ;;  %6811 = vrcp.f32 %v1052_v40  ;;  %v805_v15 = vsel %vm804_vm12, %v8831_v60, %v803_v39 }
 0x147   : > { %v5795_v53 = vclamps-f32 %v1053_v7, 15.0  ;;  %6439 = vmatprep.subr.mxu0 %v5846_v16  ;;  %v985_v47 = vmul.f32 %v6780_v48, %v8868_v49  ;;  %v6788_v43 = vpop.eup %6787  ;;  %6813 = vrcp.f32 %v1053_v7  ;;  %v13707_v61 = vand.u32 2147483648, %v8831_v60 }
 0x148   : > { %v5820_v33 = vclamps-f32 %v1078_v12, 15.0  ;;  %6440 = vmatpush3.msra.mxu0 %v5846_v16  ;;  %v5821_v44 = vclamps-f32 %v1079_v26, 15.0  ;;  %v812_v40 = vsel %vm811_vm14, %v8855_v35, %v810_v19  ;;  %v6790_v17 = vpop.eup %6789  ;;  %v13708_v36 = vand.u32 2147483648, %v8855_v35 }
 0x149   : > { %v808_v37 = vsel %vm806_vm13, %v13707_v61, %v805_v15  ;;  %6815 = vtanh.f32 %v5795_v53  ;;  %v987_v48 = vsel %vm986_vm0, %v8868_v49, %v985_v47  ;;  %v6792_v7 = vpop.eup %6791  ;;  %v992_v38 = vmul.f32 %v6782_v5, %v8890_v52 }
 0x14a   : > { %v1054_v32 = vmax.f32 %v808_v37, 1e-05  ;;  %v815_v16 = vsel %vm813_vm15, %v13708_v36, %v812_v40  ;;  %6817 = vtanh.f32 %v5820_v33  ;;  %v6794_v29 = vpop.eup %6793  ;;  %v13709_v53 = vand.u32 2147483648, %v8868_v49 }
 0x14b   : > { %v1055_v60 = vmax.f32 %v815_v16, 1e-05  ;;  %6819 = vrcp.f32 %v1078_v12  ;;  %v817_v19 = vmul.f32 %v6784_v51, %v8900_v58  ;;  %v6796_v15 = vpop.eup %6795  ;;  %v994_v47 = vsel %vm993_vm2, %v8890_v52, %v992_v38 }
 0x14c   : > { %v5796_v39 = vclamps-f32 %v1054_v32, 15.0  ;;  %v990_v35 = vsel %vm988_vm1, %v13709_v53, %v987_v48  ;;  %6821 = vtanh.f32 %v5821_v44  ;;  %v824_v33 = vmul.f32 %v6786_v8, %v8932_v42  ;;  %v9086_v61 = vpop.eup %6797 }
 0x14d   : > { %13710 = vst [vmem:[#allocation33_spill] sm:$0xff] %v9086_v61  ;;  %v5797_v5 = vclamps-f32 %v1055_v60, 15.0  ;;  %v996_v12 = vand.u32 2147483648, %v8890_v52  ;;  %v9089_v37 = vpop.eup %6799  ;;  %v1080_v40 = vmax.f32 %v990_v35, 1e-05  ;;  %vm995_vm3 = vcmp.eq.f32.partialorder %v8890_v52, 0.0 }
 0x14e   : > { %6823 = vtanh.f32 %v5796_v39  ;;  %13711 = vst [vmem:[#allocation34_spill] sm:$0xff] %v9089_v37  ;;  %vm818_vm4 = vcmp.eq.f32.partialorder %v8900_v58, inf  ;;  %v6802_v49 = vpop.eup %6801  ;;  %vm825_vm5 = vcmp.eq.f32.partialorder %v8932_v42, inf  ;;  %vm820_vm6 = vcmp.eq.f32.partialorder %v8900_v58, 0.0 }
 0x14f   : > { %6825 = vrcp.f32 %v1079_v26  ;;  %v9093_v51 = vsel %vm995_vm3, %v996_v12, %v994_v47  ;;  %v819_v8 = vsel %vm818_vm4, %v8900_v58, %v817_v19  ;;  %v6804_v44 = vpop.eup %6803  ;;  %v821_v36 = vand.u32 2147483648, %v8900_v58 }
 0x150   : > { %6827 = vrcp.f32 %v1054_v32  ;;  %v826_v26 = vsel %vm825_vm5, %v8932_v42, %v824_v33  ;;  %v9100_v16 = vpop.eup %6805  ;;  %vm827_vm7 = vcmp.eq.f32.partialorder %v8932_v42, 0.0  ;;  %v828_v52 = vand.u32 2147483648, %v8932_v42 }
 0x151   : > { %13712 = vst [vmem:[#allocation35_spill] sm:$0xff] %v9100_v16  ;;  %6829 = vtanh.f32 %v5797_v5  ;;  %v999_v32 = vmul.f32 %v6788_v43, %v8937_v25  ;;  %v9105_v48 = vpop.eup %6807  ;;  %v5822_v38 = vclamps-f32 %v1080_v40, 15.0  ;;  %v1081_v39 = vmax.f32 %v9093_v51, 1e-05 }
 0x152   : > { %13713 = vst [vmem:[#allocation36_spill] sm:$0xff] %v9105_v48  ;;  %6831 = vrcp.f32 %v1055_v60  ;;  %v9108_v53 = vsel %vm820_vm6, %v821_v36, %v819_v8  ;;  %v9110_v58 = vpop.eup %6809  ;;  %v9112_v35 = vsel %vm827_vm7, %v828_v52, %v826_v26  ;;  %vm1000_vm8 = vcmp.eq.f32.partialorder %v8937_v25, inf }
 0x153   : > { %13714 = vst [vmem:[#allocation37_spill] sm:$0xff] %v9110_v58  ;;  %vm1002_vm9 = vcmp.eq.f32.partialorder %v8937_v25, 0.0  ;;  %v1003_v42 = vand.u32 2147483648, %v8937_v25  ;;  %v6812_v19 = vpop.eup %6811  ;;  %v1006_v43 = vmul.f32 %v6790_v17, %v8970_v4  ;;  %vm1007_vm10 = vcmp.eq.f32.partialorder %v8970_v4, inf }
 0x154   : > { %v831_v60 = vmul.f32 %v6792_v7, %v8983_v0  ;;  %v9121_v47 = vmul.f32 %v9086_v61, %v6794_v29  ;;  %v6814_v33 = vpop.eup %6813  ;;  %v1056_v5 = vmax.f32 %v9108_v53, 1e-05  ;;  %v1001_v12 = vsel %vm1000_vm8, %v8937_v25, %v999_v32  ;;  %v7899_v61 = vld [vmem:[%s8296_s29 + $0x360] sm:$0xff] }
 0x155   : > { %v9126_v51 = vmul.f32 %v9089_v37, %v6796_v15  ;;  %v9129_v8 = vmul.f32 %v9100_v16, %v6802_v49  ;;  %6833 = vtanh.f32 %v5822_v38  ;;  %v5823_v36 = vclamps-f32 %v1081_v39, 15.0  ;;  %v7897_v38 = vld [vmem:[%s8296_s29 + $0xf0] sm:$0xff]  ;;  %v7898_v16 = vld [vmem:[%s8296_s29 + $0x108] sm:$0xff] }
 0x156   : > { %v9131_v17 = vpop.eup %6815  ;;  %vm1009_vm11 = vcmp.eq.f32.partialorder %v8970_v4, 0.0  ;;  %6835 = vrcp.f32 %v1080_v40  ;;  %v1008_v15 = vsel %vm1007_vm10, %v8970_v4, %v1006_v43  ;;  %v1010_v26 = vand.u32 2147483648, %v8970_v4 }
 0x157   : > { %13715 = vst [vmem:[#allocation38_spill] sm:$0xff] %v9131_v17  ;;  %v9135_v29 = vpop.eup %6817  ;;  %vm832_vm12 = vcmp.eq.f32.partialorder %v8983_v0, inf  ;;  %v9142_v52 = vsel %vm1002_vm9, %v1003_v42, %v1001_v12  ;;  %vm834_vm13 = vcmp.eq.f32.partialorder %v8983_v0, 0.0  ;;  %v1358_v53 = vmul.f32 %v7897_v38, %v9121_v47 }
 0x158   : > { %13716 = vst [vmem:[#allocation39_spill] sm:$0xff] %v9135_v29  ;;  %v6820_v49 = vpop.eup %6819  ;;  %v833_v32 = vsel %vm832_vm12, %v8983_v0, %v831_v60  ;;  %v5798_v40 = vclamps-f32 %v1056_v5, 15.0  ;;  %v835_v43 = vand.u32 2147483648, %v8983_v0  ;;  %v1361_v37 = vmul.f32 %v7898_v16, %v9126_v51 }
 0x159   : > { %v9148_v7 = vpop.eup %6821  ;;  %v1436_v25 = vmul.f32 %v7899_v61, %v9129_v8  ;;  %6837 = vtanh.f32 %v5823_v36  ;;  %v13719_v60 = vmax.f32 %v9112_v35, 1e-05  ;;  %v1011_v38 = vsel %vm1009_vm11, %v1010_v26, %v1008_v15  ;;  %6248 = vmatprep.mubr.f32.mxu0 %v1358_v53  ;;  %v7900_v26 = vld [vmem:[%s8296_s29 + $0x378] sm:$0xff] }
 0x15a   : > { %13717 = vst [vmem:[#allocation40_spill] sm:$0xff] %v9148_v7  ;;  %v9162_v21 = vmul.f32 %v9105_v48, %v6804_v44  ;;  %v1082_v16 = vmax.f32 %v9142_v52, 1e-05  ;;  %v836_v61 = vsel %vm834_vm13, %v835_v43, %v833_v32  ;;  %6249 = vmatmul.mubr.f32.gmra.mxu0 %v1361_v37  ;;  %v9168_v36 = vmul.f32 %v6812_v19, %v9110_v58  ;;  %v9173_v44 = vpop.xlane.xlu1 %590  ;;  %v7901_v32 = vld [vmem:[%s8296_s29 + $0x120] sm:$0xff]  ;;  %v7902_v53 = vld [vmem:[%s8296_s29 + $0x138] sm:$0xff] }
 0x15b   : > { %v9155_v42 = vpop.eup %6823  ;;  %v5799_v12 = vclamps-f32 %v13719_v60, 15.0  ;;  %6287 = vmatprep.mubr.f32.mxu1 %v1436_v25  ;;  %v9171_v4 = vmul.f32 %v9131_v17, %v6814_v33  ;;  %6839 = vrcp.f32 %v1081_v39  ;;  %v9178_v0 = vmul.f32 %v6820_v49, %v9135_v29  ;;  %v7903_v49 = vld [vmem:[%s8296_s29 + $0x390] sm:$0xff] }
 0x15c   : > { %13718 = vst [vmem:[#allocation41_spill] sm:$0xff] %v9155_v42  ;;  %v6826_v23 = vpop.eup %6825  ;;  %v1439_v52 = vmul.f32 %v7900_v26, %v9162_v21  ;;  %v1083_v19 = vmax.f32 %v1011_v38, 1e-05  ;;  %v1364_v33 = vmul.f32 %v7901_v32, %v9168_v36  ;;  %6841 = vtanh.f32 %v5798_v40 }
 0x15d   : > { %v6828_v15 = vpop.eup %6827  ;;  %v9181_v37 = vmul.f32 %v6826_v23, %v9148_v7  ;;  %v1367_v39 = vmul.f32 %v7902_v53, %v9171_v4  ;;  %v1442_v60 = vmul.f32 %v7903_v49, %v9178_v0  ;;  %v7904_v23 = vld [vmem:[%s8296_s29 + $0x3a8] sm:$0xff]  ;;  %6843 = vrcp.f32 %v1056_v5  ;;  %v7905_v7 = vld [vmem:[%s8296_s29 + $0x150] sm:$0xff]  ;;  %v9201_v49 = vpop.xlane.xlu0 %690 }
 0x15e   : > { %v9188_v43 = vmul.f32 %v6828_v15, %v9155_v42  ;;  %v9190_v25 = vpop.eup %6829  ;;  %6288 = vmatmul.mubr.f32.gmra.mxu1 %v1439_v52  ;;  %v5824_v32 = vclamps-f32 %v1082_v16, 15.0  ;;  %6251 = vmatprep.mubr.f32.mxu0 %v1364_v33  ;;  %6845 = vtanh.f32 %v5799_v12  ;;  %v1058_v15 = vmax.f32 %v836_v61, 1e-05  ;;  %v9205_v5 = vpop.xlane.xlu1 %694  ;;  %v7906_v33 = vld [vmem:[%s8296_s29 + $0x168] sm:$0xff] }
 0x15f   : > { %13720 = vst [vmem:[#allocation42_spill] sm:$0xff] %v9190_v25  ;;  %v1445_v38 = vmul.f32 %v7904_v23, %v9181_v37  ;;  %v6832_v26 = vpop.eup %6831  ;;  %6252 = vmatmul.mubr.f32.gmra.mxu0 %v1367_v39  ;;  %6290 = vmatprep.mubr.f32.mxu1 %v1442_v60  ;;  %v5825_v52 = vclamps-f32 %v1083_v19, 15.0  ;;  %v13721_v23 = vmax.f32 %v9112_v35, 1e-05  ;;  %vm839_vm14 = vcmp.eq.f32.partialorder %v9173_v44, inf }
 0x160   : > { %v1370_v53 = vmul.f32 %v7905_v7, %v9188_v43  ;;  %v9199_v40 = vmul.f32 %v6832_v26, %v9190_v25  ;;  %v5800_v39 = vclamps-f32 %v1058_v15, 15.0  ;;  %vm841_vm15 = vcmp.eq.f32.partialorder %v9173_v44, 0.0 }
 0x161   : > { %6847 = vrcp.f32 %v13721_v23  ;;  %v9216_v26 = vpop.xlane.xlu0 %594  ;;  %vm1014_vm0 = vcmp.eq.f32.partialorder %v9201_v49, inf  ;;  %vm1016_vm1 = vcmp.eq.f32.partialorder %v9201_v49, 0.0  ;;  %vm1021_vm2 = vcmp.eq.f32.partialorder %v9205_v5, inf }
 0x162   : > { %6254 = vmatprep.mubr.f32.mxu0 %v1370_v53  ;;  %6291 = vmatmul.mubr.f32.gmra.mxu1 %v1445_v38  ;;  %v1373_v7 = vmul.f32 %v7906_v33, %v9199_v40  ;;  %v9209_v12 = vpop.eup %6833  ;;  %6849 = vtanh.f32 %v5824_v32  ;;  %v7907_v38 = vld [vmem:[%s8296_s29 + $0x3c0] sm:$0xff]  ;;  %v9220_v23 = vpop.xlane.xlu1 %598  ;;  %v7908_v33 = vld [vmem:[%s8296_s29 + $0x3d8] sm:$0xff]  ;;  %vm1023_vm3 = vcmp.eq.f32.partialorder %v9205_v5, 0.0  ;;  %v1024_v48 = vand.u32 2147483648, %v9205_v5 }
 0x163   : > { %13722 = vst [vmem:[#allocation43_spill] sm:$0xff] %v9209_v12  ;;  %v6836_v61 = vpop.eup %6835  ;;  %6851 = vrcp.f32 %v1082_v16  ;;  %vm846_vm4 = vcmp.eq.f32.partialorder %v9216_v26, inf  ;;  %vm848_vm5 = vcmp.eq.f32.partialorder %v9216_v26, 0.0  ;;  %v849_v1 = vand.u32 2147483648, %v9216_v26 }
 0x164   : > { %6255 = vmatmul.mubr.f32.gmra.mxu0 %v1373_v7  ;;  %6853 = vtanh.f32 %v5825_v52  ;;  %v9212_v60 = vmul.f32 %v6836_v61, %v9209_v12  ;;  %vm853_vm6 = vcmp.eq.f32.partialorder %v9220_v23, inf  ;;  %vm855_vm7 = vcmp.eq.f32.partialorder %v9220_v23, 0.0 }
 0x165   : > { %6855 = vrcp.f32 %v1083_v19  ;;  %v856_v57 = vand.u32 2147483648, %v9220_v23 }
 0x166   : > { %v9214_v35 = vpop.eup %6837  ;;  %v1448_v53 = vmul.f32 %v7907_v38, %v9212_v60  ;;  %6857 = vtanh.f32 %v5800_v39  ;;  %v9239_v38 = vpop.xlane.xlu1 %702 }
 0x167   : > { %13723 = vst [vmem:[#allocation44_spill] sm:$0xff] %v9214_v35  ;;  %6859 = vrcp.f32 %v1058_v15  ;;  %v9234_v15 = vpop.xlane.xlu0 %698  ;;  %vm1035_vm10 = vcmp.eq.f32.partialorder %v9239_v38, inf  ;;  %vm1037_vm11 = vcmp.eq.f32.partialorder %v9239_v38, 0.0 }
 0x168   : > { %v6840_v32 = vpop.eup %6839  ;;  %6293 = vmatprep.mubr.f32.mxu1 %v1448_v53  ;;  %6861 = vrsqrt.f32 %v9173_v44  ;;  %vm1028_vm8 = vcmp.eq.f32.partialorder %v9234_v15, inf  ;;  %vm1030_vm9 = vcmp.eq.f32.partialorder %v9234_v15, 0.0 }
 0x169   : > { %v9223_v16 = vmul.f32 %v6840_v32, %v9214_v35  ;;  %v9225_v52 = vpop.eup %6841  ;;  %6863 = vrsqrt.f32 %v9201_v49  ;;  %v7909_v32 = vld [vmem:[%s8296_s29 + $0x180] sm:$0xff] }
 0x16a   : > { %13724 = vst [vmem:[#allocation45_spill] sm:$0xff] %v9225_v52  ;;  %v6844_v19 = vpop.eup %6843  ;;  %6865 = vrsqrt.f32 %v9205_v5 }
 0x16b   : > { %v1451_v7 = vmul.f32 %v7908_v33, %v9223_v16  ;;  %v9231_v61 = vpop.eup %6845  ;;  %v9237_v39 = vmul.f32 %v6844_v19, %v9225_v52  ;;  %6867 = vrsqrt.f32 %v9216_v26 }
 0x16c   : > { %13725 = vst [vmem:[#allocation46_spill] sm:$0xff] %v9231_v61  ;;  %6869 = vrsqrt.f32 %v9220_v23 }
 0x16d   : > { %6294 = vmatmul.mubr.f32.gmra.mxu1 %v1451_v7  ;;  %v1376_v35 = vmul.f32 %v7909_v32, %v9237_v39  ;;  %6871 = vrsqrt.f32 %v9234_v15  ;;  %v7910_v7 = vld [vmem:[%s8296_s29 + $0x198] sm:$0xff]  ;;  %v9258_v32 = vpop.xlane.xlu0 %602 }
 0x16e   : > { %v6848_v53 = vpop.eup %6847  ;;  %6873 = vrsqrt.f32 %v9239_v38  ;;  %vm860_vm12 = vcmp.eq.f32.partialorder %v9258_v32, inf  ;;  %vm862_vm13 = vcmp.eq.f32.partialorder %v9258_v32, 0.0 }
 0x16f   : > { %v9244_v33 = vpop.eup %6849  ;;  %v9247_v12 = vmul.f32 %v6848_v53, %v9231_v61  ;;  %6257 = vmatprep.mubr.f32.mxu0 %v1376_v35  ;;  %v9261_v53 = vpop.xlane.xlu1 %606  ;;  %v7911_v35 = vld [vmem:[%s8296_s29 + $0x3f0] sm:$0xff]  ;;  %6875 = vrsqrt.f32 %v9258_v32 }
 0x170   : > { %13726 = vst [vmem:[#allocation47_spill] sm:$0xff] %v9244_v33  ;;  %v6852_v25 = vpop.eup %6851  ;;  %6877 = vrsqrt.f32 %v9261_v53 }
 0x171   : > { %v9250_v19 = vpop.eup %6853  ;;  %v1379_v52 = vmul.f32 %v7910_v7, %v9247_v12  ;;  %v9256_v42 = vmul.f32 %v6852_v25, %v9244_v33  ;;  %v842_v25 = vand.u32 2147483648, %v9173_v44 }
 0x172   : > { %13727 = vst [vmem:[#allocation48_spill] sm:$0xff] %v9250_v19  ;;  %v6856_v29 = vpop.eup %6855 }
 0x173   : > { %13728 = vst [vmem:[#allocation49_spill] sm:$0xff] %v9256_v42  ;;  %6258 = vmatmul.mubr.f32.gmra.mxu0 %v1379_v52  ;;  %v1454_v61 = vmul.f32 %v7911_v35, %v9256_v42  ;;  %v9265_v17 = vpop.eup %6857  ;;  %v9271_v7 = vmul.f32 %v6856_v29, %v9250_v19  ;;  %v1017_v52 = vand.u32 2147483648, %v9201_v49  ;;  %v7912_v35 = vld [vmem:[%s8296_s29 + $0x408] sm:$0xff] }
 0x174   : > { %13729 = vst [vmem:[#allocation50_spill] sm:$0xff] %v9265_v17  ;;  %v6860_v33 = vpop.eup %6859 }
 0x175   : > { %13730 = vst [vmem:[#allocation51_spill] sm:$0xff] %v9271_v7  ;;  %6296 = vmatprep.mubr.f32.mxu1 %v1454_v61  ;;  %v1457_v58 = vmul.f32 %v7912_v35, %v9271_v7  ;;  %v9282_v29 = vmul.f32 %v6860_v33, %v9265_v17  ;;  %v6862_v19 = vpop.eup %6861  ;;  %v7913_v35 = vld [vmem:[%s8296_s29 + $0x1b0] sm:$0xff] }
 0x176   : > { %v6864_v61 = vpop.eup %6863  ;;  %v838_v20 = vmul.f32 %v6862_v19, %v9173_v44 }
 0x177   : > { %6297 = vmatmul.mubr.f32.gmra.mxu1 %v1457_v58  ;;  %v1382_v33 = vmul.f32 %v7913_v35, %v9282_v29  ;;  %v6866_v17 = vpop.eup %6865  ;;  %v1013_v62 = vmul.f32 %v6864_v61, %v9201_v49  ;;  %v1031_v58 = vand.u32 2147483648, %v9234_v15 }
 0x178   : > { %v840_v19 = vsel %vm839_vm14, %v9173_v44, %v838_v20  ;;  %v1020_v54 = vmul.f32 %v6866_v17, %v9205_v5  ;;  %v6868_v61 = vpop.eup %6867  ;;  %v1038_v20 = vand.u32 2147483648, %v9239_v38  ;;  %vm867_vm14 = vcmp.eq.f32.partialorder %v9261_v53, inf }
 0x179   : > { %6260 = vmatprep.mubr.f32.mxu0 %v1382_v33  ;;  %v843_v35 = vsel %vm841_vm15, %v842_v25, %v840_v19  ;;  %v1015_v31 = vsel %vm1014_vm0, %v9201_v49, %v1013_v62  ;;  %v845_v7 = vmul.f32 %v6868_v61, %v9216_v26  ;;  %v6870_v44 = vpop.eup %6869  ;;  %v863_v62 = vand.u32 2147483648, %v9258_v32 }
 0x17a   : > { %v1059_v17 = vmax.f32 %v843_v35, 1e-05  ;;  %v1018_v46 = vsel %vm1016_vm1, %v1017_v52, %v1015_v31  ;;  %v1022_v33 = vsel %vm1021_vm2, %v9205_v5, %v1020_v54  ;;  %v6872_v42 = vpop.eup %6871  ;;  %vm869_vm15 = vcmp.eq.f32.partialorder %v9261_v53, 0.0 }
 0x17b   : > { %v1084_v25 = vmax.f32 %v1018_v46, 1e-05  ;;  %v1025_v19 = vsel %vm1023_vm3, %v1024_v48, %v1022_v33  ;;  %v847_v31 = vsel %vm846_vm4, %v9216_v26, %v845_v7  ;;  %v852_v48 = vmul.f32 %v6870_v44, %v9220_v23  ;;  %v6874_v5 = vpop.eup %6873 }
 0x17c   : > { %v5801_v35 = vclamps-f32 %v1059_v17, 15.0  ;;  %6879 = vrcp.f32 %v1059_v17  ;;  %v1085_v49 = vmax.f32 %v1025_v19, 1e-05  ;;  %v850_v54 = vsel %vm848_vm5, %v849_v1, %v847_v31 }
 0x17d   : > { %v5826_v46 = vclamps-f32 %v1084_v25, 15.0  ;;  %6881 = vrcp.f32 %v1084_v25  ;;  %v1060_v61 = vmax.f32 %v850_v54, 1e-05  ;;  %v1027_v17 = vmul.f32 %v6872_v42, %v9234_v15  ;;  %v6876_v25 = vpop.eup %6875 }
 0x17e   : > { %6883 = vtanh.f32 %v5801_v35  ;;  %v5827_v52 = vclamps-f32 %v1085_v49, 15.0  ;;  %v854_v7 = vsel %vm853_vm6, %v9220_v23, %v852_v48  ;;  %v1034_v33 = vmul.f32 %v6874_v5, %v9239_v38  ;;  %v6878_v42 = vpop.eup %6877 }
 0x17f   : > { %6885 = vtanh.f32 %v5826_v46  ;;  %v5802_v1 = vclamps-f32 %v1060_v61, 15.0  ;;  %v857_v26 = vsel %vm855_vm7, %v856_v57, %v854_v7  ;;  %v1029_v44 = vsel %vm1028_vm8, %v9234_v15, %v1027_v17 }
 0x180   : > { %6887 = vtanh.f32 %v5827_v52  ;;  %v1061_v19 = vmax.f32 %v857_v26, 1e-05  ;;  %v1032_v35 = vsel %vm1030_vm9, %v1031_v58, %v1029_v44  ;;  %v1036_v31 = vsel %vm1035_vm10, %v9239_v38, %v1034_v33 }
 0x181   : > { %6889 = vrcp.f32 %v1085_v49  ;;  %v1086_v46 = vmax.f32 %v1032_v35, 1e-05  ;;  %v1039_v23 = vsel %vm1037_vm11, %v1038_v20, %v1036_v31  ;;  %v859_v57 = vmul.f32 %v6876_v25, %v9258_v32  ;;  %v7914_v35 = vld [vmem:[%s8296_s29 + $0x1c8] sm:$0xff] }
 0x182   : > { %6891 = vtanh.f32 %v5802_v1  ;;  %v5803_v54 = vclamps-f32 %v1061_v19, 15.0  ;;  %v1087_v48 = vmax.f32 %v1039_v23, 1e-05  ;;  %v866_v49 = vmul.f32 %v6878_v42, %v9261_v53  ;;  %v7915_v23 = vld [vmem:[%s8296_s29 + $0x420] sm:$0xff] }
 0x183   : > { %6893 = vrcp.f32 %v1060_v61  ;;  %v5828_v5 = vclamps-f32 %v1086_v46, 15.0  ;;  %v861_v15 = vsel %vm860_vm12, %v9258_v32, %v859_v57  ;;  %v870_v58 = vand.u32 2147483648, %v9261_v53 }
 0x184   : > { %6895 = vrcp.f32 %v1061_v19  ;;  %v5829_v52 = vclamps-f32 %v1087_v48, 15.0  ;;  %v864_v38 = vsel %vm862_vm13, %v863_v62, %v861_v15  ;;  %v868_v20 = vsel %vm867_vm14, %v9261_v53, %v866_v49 }
 0x185   : > { %6897 = vtanh.f32 %v5803_v54  ;;  %v1062_v61 = vmax.f32 %v864_v38, 1e-05  ;;  %v871_v17 = vsel %vm869_vm15, %v870_v58, %v868_v20  ;;  %v7917_v20 = vld [vmem:[%s8296_s29 + $0x1e0] sm:$0xff] }
 0x186   : > { %6899 = vtanh.f32 %v5828_v5  ;;  %v1063_v7 = vmax.f32 %v871_v17, 1e-05  ;;  %v7916_v5 = vld [vmem:[%s8296_s29 + $0x438] sm:$0xff] }
 0x187   : > { %6901 = vrcp.f32 %v1086_v46  ;;  %v5804_v33 = vclamps-f32 %v1062_v61, 15.0 }
 0x188   : > { %6903 = vtanh.f32 %v5829_v52  ;;  %v5805_v1 = vclamps-f32 %v1063_v7, 15.0 }
 0x189   : > { %v6880_v25 = vpop.eup %6879  ;;  %6905 = vrcp.f32 %v1087_v48 }
 0x18a   : > { %v6882_v32 = vpop.eup %6881  ;;  %6907 = vtanh.f32 %v5804_v33 }
 0x18b   : > { %v9360_v62 = vpop.eup %6883  ;;  %6909 = vrcp.f32 %v1062_v61 }
 0x18c   : > { %v9362_v26 = vpop.eup %6885  ;;  %6911 = vtanh.f32 %v5805_v1  ;;  %v9365_v53 = vmul.f32 %v9360_v62, %v6880_v25  ;;  %v7918_v25 = vld [vmem:[%s8296_s29 + $0x1f8] sm:$0xff] }
 0x18d   : > { %13731 = vst [vmem:[#allocation52_spill] sm:$0xff] %v9362_v26  ;;  %v9367_v44 = vpop.eup %6887  ;;  %6913 = vrcp.f32 %v1063_v7  ;;  %v9370_v42 = vmul.f32 %v9362_v26, %v6882_v32 }
 0x18e   : > { %13732 = vst [vmem:[#allocation53_spill] sm:$0xff] %v9367_v44  ;;  %v6890_v19 = vpop.eup %6889  ;;  %v1385_v31 = vmul.f32 %v7914_v35, %v9365_v53 }
 0x18f   : > { %v9374_v46 = vpop.eup %6891  ;;  %v1460_v57 = vmul.f32 %v7915_v23, %v9370_v42  ;;  %v9379_v54 = vmul.f32 %v6890_v19, %v9367_v44 }
 0x190   : > { %v6894_v48 = vpop.eup %6893  ;;  %6261 = vmatmul.mubr.f32.gmra.mxu0 %v1385_v31  ;;  %v7919_v31 = vld [vmem:[%s8296_s29 + $0x450] sm:$0xff] }
 0x191   : > { %v6896_v49 = vpop.eup %6895  ;;  %6299 = vmatprep.mubr.f32.mxu1 %v1460_v57  ;;  %v1463_v15 = vmul.f32 %v7916_v5, %v9379_v54  ;;  %v9384_v58 = vmul.f32 %v6894_v48, %v9374_v46  ;;  %v7920_v5 = vld [vmem:[%s8296_s29 + $0x468] sm:$0xff] }
 0x192   : > { %v9386_v52 = vpop.eup %6897 }
 0x193   : > { %v9388_v38 = vpop.eup %6899  ;;  %6300 = vmatmul.mubr.f32.gmra.mxu1 %v1463_v15  ;;  %v1388_v61 = vmul.f32 %v7917_v20, %v9384_v58  ;;  %v9393_v17 = vmul.f32 %v9386_v52, %v6896_v49 }
 0x194   : > { %13733 = vst [vmem:[#allocation54_spill] sm:$0xff] %v9388_v38  ;;  %v6902_v7 = vpop.eup %6901 }
 0x195   : > { %v9395_v33 = vpop.eup %6903  ;;  %6263 = vmatprep.mubr.f32.mxu0 %v1388_v61  ;;  %v1391_v1 = vmul.f32 %v7918_v25, %v9393_v17  ;;  %v9400_v32 = vmul.f32 %v6902_v7, %v9388_v38  ;;  %v7921_v7 = vld [vmem:[%s8296_s29 + $0x8] sm:$0xff] }
 0x196   : > { %13734 = vst [vmem:[#allocation55_spill] sm:$0xff] %v9395_v33  ;;  %v6906_v19 = vpop.eup %6905  ;;  %v1329_v25 = vmul.f32 %v7921_v7, %v8759_v13  ;;  %v7925_v7 = vld [vmem:[%s8296_s29 + $0x38] sm:$0xff] }
 0x197   : > { %v9402_v35 = vpop.eup %6907  ;;  %6264 = vmatmul.mubr.f32.gmra.mxu0 %v1391_v1  ;;  %v1466_v23 = vmul.f32 %v7919_v31, %v9400_v32  ;;  %v9407_v57 = vmul.f32 %v6906_v19, %v9395_v33  ;;  %v7922_v1 = vld [vmem:[%s8296_s29 + $0x210] sm:$0xff] }
 0x198   : > { %13735 = vst [vmem:[#allocation56_spill] sm:$0xff] %v9402_v35  ;;  %v6910_v48 = vpop.eup %6909  ;;  %v7926_v33 = vld [vmem:[%s8296_s29 + $0x10] sm:$0xff] }
 0x199   : > { %v9409_v49 = vpop.eup %6911  ;;  %6302 = vmatprep.mubr.f32.mxu1 %v1466_v23  ;;  %v1469_v15 = vmul.f32 %v7920_v5, %v9407_v57  ;;  %v9414_v20 = vmul.f32 %v6910_v48, %v9402_v35  ;;  %v7923_v23 = vld [vmem:[%s8296_s29 + $0x228] sm:$0xff]  ;;  %v7924_v5 = vld [vmem:[%s8296_s29 + $0x20] sm:$0xff] }
 0x19a   : > { %13736 = vst [vmem:[#allocation57_spill] sm:$0xff] %v9409_v49  ;;  %v6914_v61 = vpop.eup %6913  ;;  %v1332_v35 = vmul.f32 %v7924_v5, %v8663_v50  ;;  %v7929_v5 = vld [vmem:[%s8296_s29 + $0x68] sm:$0xff] }
 0x19b   : > { %6303 = vmatmul.mubr.f32.gmra.mxu1 %v1469_v15  ;;  %v1394_v19 = vmul.f32 %v7922_v1, %v9414_v20  ;;  %v9421_v31 = vmul.f32 %v6914_v61, %v9409_v49  ;;  %v1335_v15 = vmul.f32 %v7925_v7, %v8724_v27  ;;  %v1330_v1 = vmul.f32 %v7926_v33, %v8759_v13  ;;  %v7927_v61 = vld [vmem:[%s8296_s29 + $0x50] sm:$0xff]  ;;  %v7930_v49 = vld [vmem:[%s8296_s29 + $0x40] sm:$0xff] }
 0x19c   : > { %6337 = vmatprep.mubr.f32.mxu1 %v1329_v25  ;;  %v1338_v25 = vmul.f32 %v7927_v61, %v8763_v14  ;;  %v1341_v7 = vmul.f32 %v7929_v5, %v8803_v3  ;;  %v1336_v13 = vmul.f32 %v7930_v49, %v8724_v27  ;;  %v7931_v33 = vld [vmem:[%s8296_s29 + $0x80] sm:$0xff]  ;;  %v7934_v61 = vld [vmem:[%s8296_s29 + $0x70] sm:$0xff] }
 0x19d   : > { %6266 = vmatprep.mubr.f32.mxu0 %v1394_v19  ;;  %v1397_v48 = vmul.f32 %v7923_v23, %v9421_v31  ;;  %v7928_v19 = vld [vmem:[%s8296_s29 + $0x28] sm:$0xff]  ;;  %v1342_v27 = vmul.f32 %v7934_v61, %v8803_v3  ;;  %v7935_v49 = vld [vmem:[%s8296_s29 + $0xb0] sm:$0xff] }
 0x19e   : > { %v1333_v23 = vmul.f32 %v7928_v19, %v8663_v50  ;;  %v7936_v19 = vld [vmem:[%s8296_s29 + $0x88] sm:$0xff] }
 0x19f   : > { %6267 = vmatmul.mubr.f32.gmra.mxu0 %v1397_v48  ;;  %6338 = vmatmul.mubr.f32.vlgmr.msra.gmra.mxu1 %v1332_v35  ;;  %v1344_v35 = vmul.f32 %v7931_v33, %v8814_v59  ;;  %v7932_v48 = vld [vmem:[%s8296_s29 + $0x58] sm:$0xff] }
 0x1a0   : > { %6340 = vmatprep.mubr.f32.mxu1 %v1335_v15  ;;  %6441 = vmatprep.mubr.f32.mxu0 %v1330_v1  ;;  %v1339_v50 = vmul.f32 %v7932_v48, %v8763_v14  ;;  %v7933_v15 = vld [vmem:[%s8296_s29 + $0x98] sm:$0xff]  ;;  %v1345_v14 = vmul.f32 %v7936_v19, %v8814_v59  ;;  %v7946_v19 = vld [vmem:[%s8296_s29 + $0x100] sm:$0xff] }
 0x1a1   : > { %v1347_v1 = vmul.f32 %v7933_v15, %v8860_v63  ;;  %v7941_v48 = vld [vmem:[%s8296_s29 + $0xf8] sm:$0xff]  ;;  %v7942_v15 = vld [vmem:[%s8296_s29 + $0xd0] sm:$0xff] }
 0x1a3   : > { %6341 = vmatmul.mubr.f32.gmra.mxu1 %v1338_v25  ;;  %6442 = vmatmul.mubr.f32.vlgmr.msra.gmra.mxu0 %v1333_v23  ;;  %v1350_v25 = vmul.f32 %v7935_v49, %v8863_v18  ;;  %v7937_v23 = vld [vmem:[%s8296_s29 + $0xc8] sm:$0xff] }
 0x1a4   : > { %6343 = vmatprep.mubr.f32.mxu1 %v1341_v7  ;;  %6444 = vmatprep.mubr.f32.mxu0 %v1336_v13  ;;  %v1353_v5 = vmul.f32 %v7937_v23, %v8903_v24  ;;  %v7938_v7 = vld [vmem:[%s8296_s29 + $0xa0] sm:$0xff]  ;;  %v7945_v49 = vld [vmem:[%s8296_s29 + $0x128] sm:$0xff] }
 0x1a5   : > { %v1348_v3 = vmul.f32 %v7938_v7, %v8860_v63  ;;  %v7939_v13 = vld [vmem:[%s8296_s29 + $0xe0] sm:$0xff]  ;;  %v1354_v63 = vmul.f32 %v7942_v15, %v8903_v24  ;;  %v1360_v24 = vmul.f32 %v7946_v19, %v9121_v47  ;;  %v7949_v7 = vld [vmem:[%s8296_s29 + $0x158] sm:$0xff] }
 0x1a6   : > { %v1356_v33 = vmul.f32 %v7939_v13, %v8909_v2  ;;  %v7950_v13 = vld [vmem:[%s8296_s29 + $0x130] sm:$0xff]  ;;  %v7954_v15 = vld [vmem:[%s8296_s29 + $0x160] sm:$0xff] }
 0x1a7   : > { %6344 = vmatmul.mubr.f32.gmra.mxu1 %v1344_v35  ;;  %6445 = vmatmul.mubr.f32.gmra.mxu0 %v1339_v50  ;;  %v7940_v35 = vld [vmem:[%s8296_s29 + $0xb8] sm:$0xff]  ;;  %v1359_v50 = vmul.f32 %v7941_v48, %v9121_v47  ;;  %v1366_v47 = vmul.f32 %v7950_v13, %v9168_v36  ;;  %v7953_v48 = vld [vmem:[%s8296_s29 + $0x188] sm:$0xff] }
 0x1a8   : > { %6346 = vmatprep.mubr.f32.mxu1 %v1347_v1  ;;  %6447 = vmatprep.mubr.f32.mxu0 %v1342_v27  ;;  %v1351_v59 = vmul.f32 %v7940_v35, %v8863_v18  ;;  %v7943_v1 = vld [vmem:[%s8296_s29 + $0x110] sm:$0xff]  ;;  %v7944_v27 = vld [vmem:[%s8296_s29 + $0xe8] sm:$0xff]  ;;  %v7965_v13 = vld [vmem:[%s8296_s29 + $0x218] sm:$0xff] }
 0x1a9   : > { %v1362_v61 = vmul.f32 %v7943_v1, %v9126_v51  ;;  %v1357_v18 = vmul.f32 %v7944_v27, %v8909_v2  ;;  %v7957_v27 = vld [vmem:[%s8296_s29 + $0x1b8] sm:$0xff] }
 0x1ab   : > { %6347 = vmatmul.mubr.f32.gmra.mxu1 %v1350_v25  ;;  %6448 = vmatmul.mubr.f32.gmra.mxu0 %v1345_v14  ;;  %v1365_v25 = vmul.f32 %v7945_v49, %v9168_v36  ;;  %v7947_v14 = vld [vmem:[%s8296_s29 + $0x140] sm:$0xff]  ;;  %v1372_v36 = vmul.f32 %v7954_v15, %v9188_v43  ;;  %v7958_v49 = vld [vmem:[%s8296_s29 + $0x190] sm:$0xff] }
 0x1ac   : > { %6349 = vmatprep.mubr.f32.mxu1 %v1353_v5  ;;  %6450 = vmatprep.mubr.f32.mxu0 %v1348_v3  ;;  %v1368_v23 = vmul.f32 %v7947_v14, %v9171_v4  ;;  %v7948_v5 = vld [vmem:[%s8296_s29 + $0x118] sm:$0xff]  ;;  %v1371_v3 = vmul.f32 %v7949_v7, %v9188_v43  ;;  %v1378_v43 = vmul.f32 %v7958_v49, %v9237_v39  ;;  %v7961_v14 = vld [vmem:[%s8296_s29 + $0x1e8] sm:$0xff]  ;;  %v7970_v15 = vld [vmem:[%s8296_s29 + $0x220] sm:$0xff] }
 0x1ad   : > { %v1363_v2 = vmul.f32 %v7948_v5, %v9126_v51  ;;  %v7962_v5 = vld [vmem:[%s8296_s29 + $0x1c0] sm:$0xff] }
 0x1af   : > { %6350 = vmatmul.mubr.f32.gmra.mxu1 %v1356_v33  ;;  %6451 = vmatmul.mubr.f32.gmra.mxu0 %v1351_v59  ;;  %v7951_v33 = vld [vmem:[%s8296_s29 + $0x170] sm:$0xff]  ;;  %v7952_v59 = vld [vmem:[%s8296_s29 + $0x148] sm:$0xff] }
 0x1b0   : > { %6352 = vmatprep.mubr.f32.mxu1 %v1359_v50  ;;  %6453 = vmatprep.mubr.f32.mxu0 %v1354_v63  ;;  %v1374_v35 = vmul.f32 %v7951_v33, %v9199_v40  ;;  %v1369_v51 = vmul.f32 %v7952_v59, %v9171_v4  ;;  %v1377_v50 = vmul.f32 %v7953_v48, %v9237_v39  ;;  %v7955_v63 = vld [vmem:[%s8296_s29 + $0x1a0] sm:$0xff]  ;;  %v7966_v33 = vld [vmem:[%s8296_s29 + $0x1f0] sm:$0xff]  ;;  %v7969_v48 = vld [vmem:[%s8296_s29 + $0x248] sm:$0xff] }
 0x1b1   : > { %v1380_v1 = vmul.f32 %v7955_v63, %v9247_v12  ;;  %v1384_v39 = vmul.f32 %v7962_v5, %v9282_v29  ;;  %v7981_v5 = vld [vmem:[%s8296_s29 + $0x2d8] sm:$0xff] }
 0x1b3   : > { %6353 = vmatmul.mubr.f32.gmra.mxu1 %v1362_v61  ;;  %6454 = vmatmul.mubr.f32.gmra.mxu0 %v1357_v18  ;;  %v7956_v61 = vld [vmem:[%s8296_s29 + $0x178] sm:$0xff]  ;;  %v1383_v18 = vmul.f32 %v7957_v27, %v9282_v29  ;;  %v1390_v29 = vmul.f32 %v7966_v33, %v9384_v58  ;;  %v7974_v27 = vld [vmem:[%s8296_s29 + $0x250] sm:$0xff]  ;;  %v7986_v33 = vld [vmem:[%s8296_s29 + $0x2e0] sm:$0xff] }
 0x1b4   : > { %6355 = vmatprep.mubr.f32.mxu1 %v1365_v25  ;;  %6456 = vmatprep.mubr.f32.mxu0 %v1360_v24  ;;  %v1375_v4 = vmul.f32 %v7956_v61, %v9199_v40  ;;  %v7959_v25 = vld [vmem:[%s8296_s29 + $0x1d0] sm:$0xff]  ;;  %v7960_v24 = vld [vmem:[%s8296_s29 + $0x1a8] sm:$0xff]  ;;  %v7973_v61 = vld [vmem:[%s8296_s29 + $0x278] sm:$0xff] }
 0x1b5   : > { %v1386_v19 = vmul.f32 %v7959_v25, %v9365_v53  ;;  %v1381_v40 = vmul.f32 %v7960_v24, %v9247_v12  ;;  %v7977_v25 = vld [vmem:[%s8296_s29 + $0x2a8] sm:$0xff]  ;;  %v7978_v24 = vld [vmem:[%s8296_s29 + $0x280] sm:$0xff] }
 0x1b7   : > { %6356 = vmatmul.mubr.f32.gmra.mxu1 %v1368_v23  ;;  %6457 = vmatmul.mubr.f32.gmra.mxu0 %v1363_v2  ;;  %v1389_v23 = vmul.f32 %v7961_v14, %v9384_v58  ;;  %v7963_v2 = vld [vmem:[%s8296_s29 + $0x200] sm:$0xff]  ;;  %v1396_v58 = vmul.f32 %v7970_v15, %v9414_v20  ;;  %v7989_v15 = vld [vmem:[%s8296_s29 + $0x338] sm:$0xff] }
 0x1b8   : > { %6358 = vmatprep.mubr.f32.mxu1 %v1371_v3  ;;  %6459 = vmatprep.mubr.f32.mxu0 %v1366_v47  ;;  %v1392_v7 = vmul.f32 %v7963_v2, %v9393_v17  ;;  %v7964_v3 = vld [vmem:[%s8296_s29 + $0x1d8] sm:$0xff]  ;;  %v1395_v47 = vmul.f32 %v7965_v13, %v9414_v20  ;;  %v1402_v20 = vmul.f32 %v7974_v27, %v8772_v30  ;;  %v7982_v2 = vld [vmem:[%s8296_s29 + $0x2b0] sm:$0xff]  ;;  %v7992_v27 = vld [vmem:[%s8296_s29 + $0x328] sm:$0xff] }
 0x1b9   : > { %v1387_v12 = vmul.f32 %v7964_v3, %v9365_v53 }
 0x1bb   : > { %6359 = vmatmul.mubr.f32.gmra.mxu1 %v1374_v35  ;;  %6460 = vmatmul.mubr.f32.gmra.mxu0 %v1369_v51  ;;  %v7967_v35 = vld [vmem:[%s8296_s29 + $0x230] sm:$0xff]  ;;  %v7968_v51 = vld [vmem:[%s8296_s29 + $0x208] sm:$0xff] }
 0x1bc   : > { %6361 = vmatprep.mubr.f32.mxu1 %v1377_v50  ;;  %6462 = vmatprep.mubr.f32.mxu0 %v1372_v36  ;;  %v1398_v59 = vmul.f32 %v7967_v35, %v9421_v31  ;;  %v1393_v53 = vmul.f32 %v7968_v51, %v9393_v17  ;;  %v1401_v50 = vmul.f32 %v7969_v48, %v8772_v30  ;;  %v7971_v36 = vld [vmem:[%s8296_s29 + $0x260] sm:$0xff]  ;;  %v7988_v48 = vld [vmem:[%s8296_s29 + $0x2f8] sm:$0xff] }
 0x1bd   : > { %v1404_v63 = vmul.f32 %v7971_v36, %v8680_v28  ;;  %v1408_v30 = vmul.f32 %v7978_v24, %v8720_v45  ;;  %v7987_v51 = vld [vmem:[%s8296_s29 + $0x320] sm:$0xff]  ;;  %v7990_v36 = vld [vmem:[%s8296_s29 + $0x310] sm:$0xff] }
 0x1be   : > { %v7995_v24 = vld [vmem:[%s8296_s29 + $0x380] sm:$0xff] }
 0x1bf   : > { %6362 = vmatmul.mubr.f32.gmra.mxu1 %v1380_v1  ;;  %6463 = vmatmul.mubr.f32.gmra.mxu0 %v1375_v4  ;;  %v7972_v1 = vld [vmem:[%s8296_s29 + $0x238] sm:$0xff]  ;;  %v1407_v4 = vmul.f32 %v7973_v61, %v8720_v45  ;;  %v1414_v45 = vmul.f32 %v7982_v2, %v8790_v56  ;;  %v7991_v61 = vld [vmem:[%s8296_s29 + $0x350] sm:$0xff] }
 0x1c0   : > { %6364 = vmatprep.mubr.f32.mxu1 %v1383_v18  ;;  %6465 = vmatprep.mubr.f32.mxu0 %v1378_v43  ;;  %v1399_v17 = vmul.f32 %v7972_v1, %v9421_v31  ;;  %v7975_v18 = vld [vmem:[%s8296_s29 + $0x290] sm:$0xff]  ;;  %v7976_v43 = vld [vmem:[%s8296_s29 + $0x268] sm:$0xff] }
 0x1c1   : > { %v1410_v49 = vmul.f32 %v7975_v18, %v8778_v34  ;;  %v1405_v31 = vmul.f32 %v7976_v43, %v8680_v28  ;;  %v7993_v18 = vld [vmem:[%s8296_s29 + $0x368] sm:$0xff]  ;;  %v7994_v43 = vld [vmem:[%s8296_s29 + $0x340] sm:$0xff] }
 0x1c3   : > { %6365 = vmatmul.mubr.f32.gmra.mxu1 %v1386_v19  ;;  %6466 = vmatmul.mubr.f32.gmra.mxu0 %v1381_v40  ;;  %v1413_v19 = vmul.f32 %v7977_v25, %v8790_v56  ;;  %v7979_v40 = vld [vmem:[%s8296_s29 + $0x2c0] sm:$0xff] }
 0x1c4   : > { %6367 = vmatprep.mubr.f32.mxu1 %v1389_v23  ;;  %6468 = vmatprep.mubr.f32.mxu0 %v1384_v39  ;;  %v1416_v14 = vmul.f32 %v7979_v40, %v8810_v55  ;;  %v7980_v23 = vld [vmem:[%s8296_s29 + $0x298] sm:$0xff]  ;;  %v1419_v39 = vmul.f32 %v7981_v5, %v8834_v11  ;;  %v7998_v5 = vld [vmem:[%s8296_s29 + $0x370] sm:$0xff] }
 0x1c5   : > { %v1411_v28 = vmul.f32 %v7980_v23, %v8778_v34  ;;  %v7996_v40 = vld [vmem:[%s8296_s29 + $0x358] sm:$0xff] }
 0x1c6   : > { %v7997_v23 = vld [vmem:[%s8296_s29 + $0x398] sm:$0xff] }
 0x1c7   : > { %6368 = vmatmul.mubr.f32.gmra.mxu1 %v1392_v7  ;;  %6469 = vmatmul.mubr.f32.gmra.mxu0 %v1387_v12  ;;  %v7983_v7 = vld [vmem:[%s8296_s29 + $0x2f0] sm:$0xff]  ;;  %v7984_v12 = vld [vmem:[%s8296_s29 + $0x2c8] sm:$0xff] }
 0x1c8   : > { %6370 = vmatprep.mubr.f32.mxu1 %v1395_v47  ;;  %6471 = vmatprep.mubr.f32.mxu0 %v1390_v29  ;;  %v1422_v3 = vmul.f32 %v7983_v7, %v8844_v41  ;;  %v1417_v13 = vmul.f32 %v7984_v12, %v8810_v55  ;;  %v7985_v47 = vld [vmem:[%s8296_s29 + $0x308] sm:$0xff]  ;;  %v1420_v29 = vmul.f32 %v7986_v33, %v8834_v11  ;;  %v7999_v7 = vld [vmem:[%s8296_s29 + $0x3b0] sm:$0xff]  ;;  %v8002_v33 = vld [vmem:[%s8296_s29 + $0x3a0] sm:$0xff] }
 0x1c9   : > { %v1425_v34 = vmul.f32 %v7985_v47, %v8880_v22  ;;  %v1423_v11 = vmul.f32 %v7988_v48, %v8844_v41  ;;  %v8000_v12 = vld [vmem:[%s8296_s29 + $0x388] sm:$0xff] }
 0x1ca   : > { %v8001_v47 = vld [vmem:[%s8296_s29 + $0x3c8] sm:$0xff] }
 0x1cb   : > { %6371 = vmatmul.mubr.f32.gmra.mxu1 %v1398_v59  ;;  %6472 = vmatmul.mubr.f32.gmra.mxu0 %v1393_v53  ;;  %v1428_v53 = vmul.f32 %v7987_v51, %v8883_v9 }
 0x1cc   : > { %6373 = vmatprep.mubr.f32.mxu1 %v1401_v50  ;;  %6474 = vmatprep.mubr.f32.mxu0 %v1396_v58  ;;  %v1431_v58 = vmul.f32 %v7989_v15, %v8923_v6  ;;  %v8005_v15 = vld [vmem:[%s8296_s29 + $0x3f8] sm:$0xff] }
 0x1cf   : > { %6374 = vmatmul.mubr.f32.gmra.mxu1 %v1404_v63  ;;  %6475 = vmatmul.mubr.f32.gmra.mxu0 %v1399_v17  ;;  %v1426_v63 = vmul.f32 %v7990_v36, %v8880_v22 }
 0x1d0   : > { %6376 = vmatprep.mubr.f32.mxu1 %v1407_v4  ;;  %6477 = vmatprep.mubr.f32.mxu0 %v1402_v20  ;;  %v1434_v4 = vmul.f32 %v7991_v61, %v8926_v10  ;;  %v1429_v20 = vmul.f32 %v7992_v27, %v8883_v9  ;;  %v8007_v27 = vld [vmem:[%s8296_s29 + $0x410] sm:$0xff] }
 0x1d3   : > { %6377 = vmatmul.mubr.f32.gmra.mxu1 %v1410_v49  ;;  %6478 = vmatmul.mubr.f32.gmra.mxu0 %v1405_v31  ;;  %v1437_v49 = vmul.f32 %v7993_v18, %v9129_v8  ;;  %v1432_v31 = vmul.f32 %v7994_v43, %v8923_v6  ;;  %v8008_v18 = vld [vmem:[%s8296_s29 + $0x3e8] sm:$0xff] }
 0x1d4   : > { %6379 = vmatprep.mubr.f32.mxu1 %v1413_v19  ;;  %6480 = vmatprep.mubr.f32.mxu0 %v1408_v30  ;;  %v1440_v30 = vmul.f32 %v7995_v24, %v9162_v21  ;;  %v8009_v43 = vld [vmem:[%s8296_s29 + $0x428] sm:$0xff] }
 0x1d7   : > { %6380 = vmatmul.mubr.f32.gmra.mxu1 %v1416_v14  ;;  %6481 = vmatmul.mubr.f32.gmra.mxu0 %v1411_v28  ;;  %v1435_v14 = vmul.f32 %v7996_v40, %v8926_v10  ;;  %v1443_v28 = vmul.f32 %v7997_v23, %v9178_v0  ;;  %v8012_v23 = vld [vmem:[%s8296_s29 + $0x418] sm:$0xff] }
 0x1d8   : > { %6382 = vmatprep.mubr.f32.mxu1 %v1419_v39  ;;  %6483 = vmatprep.mubr.f32.mxu0 %v1414_v45  ;;  %v1438_v39 = vmul.f32 %v7998_v5, %v9129_v8 }
 0x1db   : > { %6383 = vmatmul.mubr.f32.gmra.mxu1 %v1422_v3  ;;  %6484 = vmatmul.mubr.f32.gmra.mxu0 %v1417_v13  ;;  %v1446_v3 = vmul.f32 %v7999_v7, %v9181_v37  ;;  %v1441_v13 = vmul.f32 %v8000_v12, %v9162_v21  ;;  %v8014_v7 = vld [vmem:[%s8296_s29 + $0x430] sm:$0xff] }
 0x1dc   : > { %6385 = vmatprep.mubr.f32.mxu1 %v1425_v34  ;;  %6486 = vmatprep.mubr.f32.mxu0 %v1420_v29  ;;  %v1449_v34 = vmul.f32 %v8001_v47, %v9212_v60  ;;  %v1444_v29 = vmul.f32 %v8002_v33, %v9178_v0  ;;  %v8015_v47 = vld [vmem:[%s8296_s29 + $0x470] sm:$0xff]  ;;  %v8016_v33 = vld [vmem:[%s8296_s29 + $0x448] sm:$0xff] }
 0x1dd   : > { %v9551_v56 = vpop.f32.mrf.mxu0 }
 0x1de   : > { %13737 = vst [vmem:[#allocation58_spill] sm:$0xff] %v9551_v56  ;;  %v1842_v35 = vmul.f32 %v9551_v56, %v9551_v56 }
 0x1df   : > { %v9557_v55 = vpop.f32.mrf.mxu0  ;;  %6386 = vmatmul.mubr.f32.gmra.mxu1 %v1428_v53  ;;  %6487 = vmatmul.mubr.f32.gmra.mxu0 %v1423_v11  ;;  %v8003_v53 = vld [vmem:[%s8296_s29 + $0x3e0] sm:$0xff]  ;;  %v8004_v11 = vld [vmem:[%s8296_s29 + $0x3b8] sm:$0xff] }
 0x1e0   : > { %v9555_v59 = vpop.f32.mrf.mxu1  ;;  %13739 = vst [vmem:[#allocation60_spill] sm:$0xff] %v9557_v55  ;;  %1891 = vadd.xlane.f32.xlu1 %v1842_v35  ;;  %v1841_v50 = vmul.f32 %v9557_v55, %v9557_v55  ;;  %6388 = vmatprep.mubr.f32.mxu1 %v1431_v58  ;;  %v1452_v48 = vmul.f32 %v8003_v53, %v9223_v16  ;;  %v13748_v58 = vld [vmem:[#allocation49_spill] sm:$0xff]  ;;  %v13883_v55 = vld [vmem:[#allocation40_spill] sm:$0xff] }
 0x1e1   : > { %13738 = vst [vmem:[#allocation59_spill] sm:$0xff] %v9555_v59  ;;  %v1866_v41 = vmul.f32 %v9555_v59, %v9555_v59  ;;  %6489 = vmatprep.mubr.f32.mxu0 %v1426_v63  ;;  %v1455_v36 = vmul.f32 %v8005_v15, %v13748_v58  ;;  %v8006_v63 = vld [vmem:[%s8296_s29 + $0x3d0] sm:$0xff] }
 0x1e2   : > { %v9569_v1 = vpop.f32.mrf.mxu0  ;;  %v9573_v17 = vpop.f32.mrf.mxu1  ;;  %1889 = vadd.xlane.f32.xlu0 %v1841_v50  ;;  %v1447_v50 = vmul.f32 %v8004_v11, %v9181_v37  ;;  %v13821_v59 = vld [vmem:[#allocation25_spill] sm:$0xff] }
 0x1e3   : > { %13740 = vst [vmem:[#allocation61_spill] sm:$0xff] %v9569_v1  ;;  %13741 = vst [vmem:[#allocation62_spill] sm:$0xff] %v9573_v17  ;;  %v1844_v22 = vmul.f32 %v9569_v1, %v9569_v1  ;;  %6389 = vmatmul.mubr.f32.gmra.mxu1 %v1434_v4  ;;  %6490 = vmatmul.mubr.f32.gmra.mxu0 %v1429_v20  ;;  %v1865_v9 = vmul.f32 %v9573_v17, %v9573_v17  ;;  %v13751_v20 = vld [vmem:[#allocation51_spill] sm:$0xff]  ;;  %v13819_v17 = vld [vmem:[#allocation24_spill] sm:$0xff] }
 0x1e4   : > { %1939 = vadd.xlane.f32.xlu1 %v1866_v41  ;;  %v9585_v25 = vpop.f32.mrf.mxu0  ;;  %6391 = vmatprep.mubr.f32.mxu1 %v1437_v49  ;;  %v9589_v19 = vpop.f32.mrf.mxu1  ;;  %v1450_v41 = vmul.f32 %v8006_v63, %v9212_v60  ;;  %v1453_v49 = vmul.f32 %v8008_v18, %v9223_v16 }
 0x1e5   : > { %13742 = vst [vmem:[#allocation63_spill] sm:$0xff] %v9585_v25  ;;  %6492 = vmatprep.mubr.f32.mxu0 %v1432_v31  ;;  %13743 = vst [vmem:[#allocation64_spill] sm:$0xff] %v9589_v19  ;;  %v1843_v6 = vmul.f32 %v9585_v25, %v9585_v25  ;;  %v1868_v10 = vmul.f32 %v9589_v19, %v9589_v19  ;;  %v1461_v31 = vmul.f32 %v8009_v43, %v9370_v42 }
 0x1e6   : > { %1937 = vadd.xlane.f32.xlu0 %v1865_v9  ;;  %v9601_v2 = vpop.f32.mrf.mxu0  ;;  %v9605_v45 = vpop.f32.mrf.mxu1  ;;  %v8010_v9 = vld [vmem:[%s8296_s29 + $0x400] sm:$0xff] }
 0x1e7   : > { %13744 = vst [vmem:[#allocation65_spill] sm:$0xff] %v9601_v2  ;;  %6392 = vmatmul.mubr.f32.gmra.mxu1 %v1440_v30  ;;  %6493 = vmatmul.mubr.f32.gmra.mxu0 %v1435_v14  ;;  %13745 = vst [vmem:[#allocation66_spill] sm:$0xff] %v9605_v45  ;;  %v1846_v8 = vmul.f32 %v9601_v2, %v9601_v2  ;;  %v1867_v21 = vmul.f32 %v9605_v45, %v9605_v45  ;;  %v8011_v14 = vld [vmem:[%s8296_s29 + $0x440] sm:$0xff] }
 0x1e8   : > { %1895 = vadd.xlane.f32.xlu1 %v1844_v22  ;;  %6394 = vmatprep.mubr.f32.mxu1 %v1443_v28  ;;  %v9617_v35 = vpop.f32.mrf.mxu0  ;;  %v9621_v51 = vpop.f32.mrf.mxu1  ;;  %v1458_v22 = vmul.f32 %v8007_v27, %v13751_v20  ;;  %v1456_v24 = vmul.f32 %v8010_v9, %v13748_v58  ;;  %v1459_v28 = vmul.f32 %v8012_v23, %v13751_v20 }
 0x1e9   : > { %6495 = vmatprep.mubr.f32.mxu0 %v1438_v39  ;;  %13746 = vst [vmem:[#allocation67_spill] sm:$0xff] %v9617_v35  ;;  %13747 = vst [vmem:[#allocation68_spill] sm:$0xff] %v9621_v51  ;;  %v1845_v0 = vmul.f32 %v9617_v35, %v9617_v35  ;;  %v1870_v37 = vmul.f32 %v9621_v51, %v9621_v51  ;;  %v8013_v39 = vld [vmem:[%s8296_s29 + $0x458] sm:$0xff]  ;;  %v13815_v51 = vld [vmem:[#allocation23_spill] sm:$0xff] }
 0x1ea   : > { %1893 = vadd.xlane.f32.xlu0 %v1843_v6  ;;  %v9637_v4 = vpop.f32.mrf.mxu1  ;;  %v1464_v6 = vmul.f32 %v8011_v14, %v9379_v54  ;;  %v13860_v35 = vld [vmem:[#allocation34_spill] sm:$0xff] }
 0x1eb   : > { %6395 = vmatmul.mubr.f32.gmra.mxu1 %v1446_v3  ;;  %6496 = vmatmul.mubr.f32.gmra.mxu0 %v1441_v13  ;;  %13750 = vst [vmem:[#allocation69_spill] sm:$0xff] %v9637_v4  ;;  %v1869_v16 = vmul.f32 %v9637_v4, %v9637_v4  ;;  %v1462_v3 = vmul.f32 %v8014_v7, %v9370_v42  ;;  %v13813_v4 = vld [vmem:[#allocation20_spill] sm:$0xff] }
 0x1ec   : > { %1943 = vadd.xlane.f32.xlu1 %v1868_v10  ;;  %6397 = vmatprep.mubr.f32.mxu1 %v1449_v34  ;;  %v9633_v61 = vpop.f32.mrf.mxu0  ;;  %v9653_v40 = vpop.f32.mrf.mxu1  ;;  %v1467_v10 = vmul.f32 %v8013_v39, %v9400_v32  ;;  %v1470_v34 = vmul.f32 %v8015_v47, %v9407_v57 }
 0x1ed   : > { %6498 = vmatprep.mubr.f32.mxu0 %v1444_v29  ;;  %13749 = vst [vmem:[#allocation49_spill] sm:$0xff] %v9633_v61  ;;  %v1848_v60 = vmul.f32 %v9633_v61, %v9633_v61  ;;  %13753 = vst [vmem:[#allocation70_spill] sm:$0xff] %v9653_v40  ;;  %v1872_v13 = vmul.f32 %v9653_v40, %v9653_v40  ;;  %v1465_v29 = vmul.f32 %v8016_v33, %v9379_v54  ;;  %v13864_v61 = vld [vmem:[#allocation35_spill] sm:$0xff] }
 0x1ee   : > { %1941 = vadd.xlane.f32.xlu0 %v1867_v21  ;;  %v9649_v30 = vpop.f32.mrf.mxu0  ;;  %v8017_v21 = vld [vmem:[%s8296_s29 + $0x460] sm:$0xff] }
 0x1ef   : > { %6398 = vmatmul.mubr.f32.gmra.mxu1 %v1452_v48  ;;  %6499 = vmatmul.mubr.f32.gmra.mxu0 %v1447_v50  ;;  %13752 = vst [vmem:[#allocation51_spill] sm:$0xff] %v9649_v30  ;;  %v1847_v5 = vmul.f32 %v9649_v30, %v9649_v30  ;;  %v1468_v53 = vmul.f32 %v8017_v21, %v9400_v32  ;;  %v13849_v30 = vld [vmem:[#allocation31_spill] sm:$0xff] }
 0x1f0   : > { %1899 = vadd.xlane.f32.xlu1 %v1846_v8  ;;  %6400 = vmatprep.mubr.f32.mxu1 %v1455_v36  ;;  %v9669_v8 = vpop.f32.mrf.mxu1 }
 0x1f1   : > { %6501 = vmatprep.mubr.f32.mxu0 %v1450_v41  ;;  %13755 = vst [vmem:[#allocation72_spill] sm:$0xff] %v9669_v8  ;;  %v1871_v11 = vmul.f32 %v9669_v8, %v9669_v8 }
 0x1f2   : > { %1897 = vadd.xlane.f32.xlu0 %v1845_v0  ;;  %v9683_v50 = vpop.f32.mrf.mxu1  ;;  %v8018_v0 = vld [vmem:[%s8296_s29 + $0x478] sm:$0xff] }
 0x1f3   : > { %6401 = vmatmul.mubr.f32.gmra.mxu1 %v1458_v22  ;;  %6502 = vmatmul.mubr.f32.gmra.mxu0 %v1453_v49  ;;  %v9665_v12 = vpop.f32.mrf.mxu0  ;;  %13757 = vst [vmem:[#allocation74_spill] sm:$0xff] %v9683_v50  ;;  %v1471_v54 = vmul.f32 %v8018_v0, %v9407_v57  ;;  %v1874_v32 = vmul.f32 %v9683_v50, %v9683_v50  ;;  %v13809_v50 = vld [vmem:[#allocation19_spill] sm:$0xff] }
 0x1f4   : > { %1947 = vadd.xlane.f32.xlu1 %v1870_v37  ;;  %6403 = vmatprep.mubr.f32.mxu1 %v1461_v31  ;;  %13754 = vst [vmem:[#allocation71_spill] sm:$0xff] %v9665_v12  ;;  %v1850_v42 = vmul.f32 %v9665_v12, %v9665_v12  ;;  %v9691_v58 = vpop.f32.mrf.mxu1 }
 0x1f5   : > { %6504 = vmatprep.mubr.f32.mxu0 %v1456_v24  ;;  %v9679_v48 = vpop.f32.mrf.mxu0  ;;  %13758 = vst [vmem:[#allocation75_spill] sm:$0xff] %v9691_v58  ;;  %v1873_v36 = vmul.f32 %v9691_v58, %v9691_v58  ;;  %v13807_v58 = vld [vmem:[#allocation18_spill] sm:$0xff] }
 0x1f6   : > { %1945 = vadd.xlane.f32.xlu0 %v1869_v16  ;;  %13756 = vst [vmem:[#allocation73_spill] sm:$0xff] %v9679_v48  ;;  %v1849_v15 = vmul.f32 %v9679_v48, %v9679_v48  ;;  %v13818_v19 = vmax.f32 %v13807_v58, 1e-05 }
 0x1f7   : > { %6404 = vmatmul.mubr.f32.gmra.mxu1 %v1464_v6  ;;  %6505 = vmatmul.mubr.f32.gmra.mxu0 %v1459_v28  ;;  %v9695_v63 = vpop.f32.mrf.mxu1 }
 0x1f8   : > { %1903 = vadd.xlane.f32.xlu1 %v1848_v60  ;;  %6406 = vmatprep.mubr.f32.mxu1 %v1467_v10  ;;  %13759 = vst [vmem:[#allocation76_spill] sm:$0xff] %v9695_v63  ;;  %v1876_v22 = vmul.f32 %v9695_v63, %v9695_v63 }
 0x1f9   : > { %6507 = vmatprep.mubr.f32.mxu0 %v1462_v3  ;;  %v9705_v20 = vpop.f32.mrf.mxu1 }
 0x1fa   : > { %1901 = vadd.xlane.f32.xlu0 %v1847_v5  ;;  %13762 = vst [vmem:[#allocation79_spill] sm:$0xff] %v9705_v20  ;;  %v1875_v49 = vmul.f32 %v9705_v20, %v9705_v20  ;;  %v13803_v20 = vld [vmem:[#allocation17_spill] sm:$0xff] }
 0x1fb   : > { %6407 = vmatmul.mubr.f32.gmra.mxu1 %v1470_v34  ;;  %6508 = vmatmul.mubr.f32.gmra.mxu0 %v1465_v29 }
 0x1fc   : > { %1951 = vadd.xlane.f32.xlu1 %v1872_v13  ;;  %6510 = vmatprep.mubr.f32.mxu0 %v1468_v53 }
 0x1fe   : > { %1949 = vadd.xlane.f32.xlu0 %v1871_v11 }
 0x1ff   : > { %6511 = vmatmul.mubr.f32.gmra.mxu0 %v1471_v54 }
 0x200   : > { %1907 = vadd.xlane.f32.xlu1 %v1850_v42 }
 0x202   : > { %1905 = vadd.xlane.f32.xlu0 %v1849_v15 }
 0x204   : > { %1955 = vadd.xlane.f32.xlu1 %v1874_v32 }
 0x206   : > { %1953 = vadd.xlane.f32.xlu0 %v1873_v36 }
 0x21a   : > { %v9697_v57 = vpop.f32.mrf.mxu0 }
 0x21b   : > { %13760 = vst [vmem:[#allocation77_spill] sm:$0xff] %v9697_v57  ;;  %v1852_v41 = vmul.f32 %v9697_v57, %v9697_v57 }
 0x21c   : > { %v9701_v37 = vpop.f32.mrf.mxu0 }
 0x21d   : > { %13761 = vst [vmem:[#allocation78_spill] sm:$0xff] %v9701_v37  ;;  %1911 = vadd.xlane.f32.xlu1 %v1852_v41  ;;  %v1851_v27 = vmul.f32 %v9701_v37, %v9701_v37 }
 0x21e   : > { %v9717_v31 = vpop.f32.mrf.mxu1 }
 0x21f   : > { %1909 = vadd.xlane.f32.xlu0 %v1851_v27  ;;  %v9709_v18 = vpop.f32.mrf.mxu0  ;;  %13765 = vst [vmem:[#allocation82_spill] sm:$0xff] %v9717_v31  ;;  %v1878_v14 = vmul.f32 %v9717_v31, %v9717_v31  ;;  %v13801_v31 = vld [vmem:[#allocation16_spill] sm:$0xff] }
 0x220   : > { %13763 = vst [vmem:[#allocation80_spill] sm:$0xff] %v9709_v18  ;;  %v1854_v43 = vmul.f32 %v9709_v18, %v9709_v18  ;;  %v9723_v16 = vpop.f32.mrf.mxu1  ;;  %v13812_v40 = vmax.f32 %v13801_v31, 1e-05  ;;  %v13839_v18 = vld [vmem:[#allocation29_spill] sm:$0xff] }
 0x221   : > { %1959 = vadd.xlane.f32.xlu1 %v1876_v22  ;;  %v9713_v60 = vpop.f32.mrf.mxu0  ;;  %13767 = vst [vmem:[#allocation84_spill] sm:$0xff] %v9723_v16  ;;  %v1877_v23 = vmul.f32 %v9723_v16, %v9723_v16 }
 0x222   : > { %13764 = vst [vmem:[#allocation81_spill] sm:$0xff] %v9713_v60  ;;  %v1853_v9 = vmul.f32 %v9713_v60, %v9713_v60  ;;  %v9733_v5 = vpop.f32.mrf.mxu1 }
 0x223   : > { %1957 = vadd.xlane.f32.xlu0 %v1875_v49  ;;  %13769 = vst [vmem:[#allocation86_spill] sm:$0xff] %v9733_v5  ;;  %v1880_v7 = vmul.f32 %v9733_v5, %v9733_v5 }
 0x224   : > { %v9721_v24 = vpop.f32.mrf.mxu0  ;;  %v9737_v10 = vpop.f32.mrf.mxu1 }
 0x225   : > { %13766 = vst [vmem:[#allocation83_spill] sm:$0xff] %v9721_v24  ;;  %1915 = vadd.xlane.f32.xlu1 %v1854_v43  ;;  %v1856_v28 = vmul.f32 %v9721_v24, %v9721_v24  ;;  %13770 = vst [vmem:[#allocation87_spill] sm:$0xff] %v9737_v10  ;;  %v1879_v3 = vmul.f32 %v9737_v10, %v9737_v10 }
 0x226   : > { %v9727_v6 = vpop.f32.mrf.mxu0 }
 0x227   : > { %1913 = vadd.xlane.f32.xlu0 %v1853_v9  ;;  %13768 = vst [vmem:[#allocation85_spill] sm:$0xff] %v9727_v6  ;;  %v1855_v39 = vmul.f32 %v9727_v6, %v9727_v6 }
 0x229   : > { %1963 = vadd.xlane.f32.xlu1 %v1878_v14 }
 0x22b   : > { %1961 = vadd.xlane.f32.xlu0 %v1877_v23 }
 0x22d   : > { %1919 = vadd.xlane.f32.xlu1 %v1856_v28  ;;  %v9743_v13 = vpop.f32.mrf.mxu1 }
 0x22e   : > { %13771 = vst [vmem:[#allocation88_spill] sm:$0xff] %v9743_v13  ;;  %v1882_v21 = vmul.f32 %v9743_v13, %v9743_v13  ;;  %v13796_v13 = vld [vmem:[#allocation14_spill] sm:$0xff] }
 0x22f   : > { %1917 = vadd.xlane.f32.xlu0 %v1855_v39  ;;  %v9753_v42 = vpop.f32.mrf.mxu1 }
 0x230   : > { %13774 = vst [vmem:[#allocation91_spill] sm:$0xff] %v9753_v42  ;;  %v1881_v53 = vmul.f32 %v9753_v42, %v9753_v42 }
 0x231   : > { %1967 = vadd.xlane.f32.xlu1 %v1880_v7 }
 0x233   : > { %v9745_v47 = vpop.f32.mrf.mxu0  ;;  %1965 = vadd.xlane.f32.xlu0 %v1879_v3 }
 0x234   : > { %13772 = vst [vmem:[#allocation89_spill] sm:$0xff] %v9745_v47  ;;  %v1858_v34 = vmul.f32 %v9745_v47, %v9745_v47  ;;  %v13833_v47 = vmax.f32 %v13821_v59, 1e-05 }
 0x235   : > { %v9749_v33 = vpop.f32.mrf.mxu0 }
 0x236   : > { %13773 = vst [vmem:[#allocation90_spill] sm:$0xff] %v9749_v33  ;;  %1923 = vadd.xlane.f32.xlu1 %v1858_v34  ;;  %v1857_v29 = vmul.f32 %v9749_v33, %v9749_v33 }
 0x237   : > { %v9759_v11 = vpop.f32.mrf.mxu1 }
 0x238   : > { %1921 = vadd.xlane.f32.xlu0 %v1857_v29  ;;  %13775 = vst [vmem:[#allocation92_spill] sm:$0xff] %v9759_v11  ;;  %v1884_v27 = vmul.f32 %v9759_v11, %v9759_v11 }
 0x239   : > { %v9767_v32 = vpop.f32.mrf.mxu1 }
 0x23a   : > { %1971 = vadd.xlane.f32.xlu1 %v1882_v21  ;;  %13778 = vst [vmem:[#allocation95_spill] sm:$0xff] %v9767_v32  ;;  %v1883_v49 = vmul.f32 %v9767_v32, %v9767_v32 }
 0x23c   : > { %1969 = vadd.xlane.f32.xlu0 %v1881_v53 }
 0x250   : > { %v9761_v0 = vpop.f32.mrf.mxu0 }
 0x251   : > { %13776 = vst [vmem:[#allocation93_spill] sm:$0xff] %v9761_v0  ;;  %v1860_v54 = vmul.f32 %v9761_v0, %v9761_v0  ;;  %v13830_v0 = vld [vmem:[#allocation22_spill] sm:$0xff] }
 0x252   : > { %v9765_v15 = vpop.f32.mrf.mxu0 }
 0x253   : > { %13777 = vst [vmem:[#allocation94_spill] sm:$0xff] %v9765_v15  ;;  %1927 = vadd.xlane.f32.xlu1 %v1860_v54  ;;  %v1859_v36 = vmul.f32 %v9765_v15, %v9765_v15  ;;  %v9771_v41 = vpop.f32.mrf.mxu1 }
 0x254   : > { %13779 = vst [vmem:[#allocation96_spill] sm:$0xff] %v9771_v41  ;;  %v1886_v7 = vmul.f32 %v9771_v41, %v9771_v41  ;;  %v13793_v41 = vld [vmem:[#allocation13_spill] sm:$0xff] }
 0x255   : > { %1925 = vadd.xlane.f32.xlu0 %v1859_v36  ;;  %v9781_v9 = vpop.f32.mrf.mxu1  ;;  %v13802_v10 = vmax.f32 %v13793_v41, 1e-05 }
 0x256   : > { %13781 = vst [vmem:[#allocation98_spill] sm:$0xff] %v9781_v9  ;;  %v1885_v29 = vmul.f32 %v9781_v9, %v9781_v9 }
 0x257   : > { %1975 = vadd.xlane.f32.xlu1 %v1884_v27  ;;  %v9775_v22 = vpop.f32.mrf.mxu0  ;;  %v13789_v27 = vld [vmem:[#allocation11_spill] sm:$0xff] }
 0x258   : > { %13780 = vst [vmem:[#allocation97_spill] sm:$0xff] %v9775_v22  ;;  %v1862_v43 = vmul.f32 %v9775_v22, %v9775_v22 }
 0x259   : > { %1973 = vadd.xlane.f32.xlu0 %v1883_v49  ;;  %v9783_v14 = vpop.f32.mrf.mxu0  ;;  %v13521_v49 = vmax.f32 %v13789_v27, 1e-05 }
 0x25a   : > { %13782 = vst [vmem:[#allocation99_spill] sm:$0xff] %v9783_v14  ;;  %v1861_v23 = vmul.f32 %v9783_v14, %v9783_v14 }
 0x25b   : > { %1931 = vadd.xlane.f32.xlu1 %v1862_v43  ;;  %v9787_v28 = vpop.f32.mrf.mxu1  ;;  %6915 = vrcp.f32 %v13521_v49 }
 0x25c   : > { %13783 = vst [vmem:[#allocation100_spill] sm:$0xff] %v9787_v28  ;;  %v1888_v42 = vmul.f32 %v9787_v28, %v9787_v28 }
 0x25d   : > { %1929 = vadd.xlane.f32.xlu0 %v1861_v23  ;;  %v9789_v39 = vpop.f32.mrf.mxu1 }
 0x25e   : > { %13784 = vst [vmem:[#allocation101_spill] sm:$0xff] %v9789_v39 }
 0x25f   : > { %1979 = vadd.xlane.f32.xlu1 %v1886_v7  ;;  %v9793_v3 = vpop.f32.mrf.mxu0  ;;  %v9795_v34 = vpop.f32.mrf.mxu1  ;;  %v13792_v7 = vld [vmem:[#allocation12_spill] sm:$0xff] }
 0x260   : > { %13785 = vst [vmem:[#allocation102_spill] sm:$0xff] %v9793_v3  ;;  %13786 = vst [vmem:[#allocation103_spill] sm:$0xff] %v9795_v34  ;;  %v1864_v21 = vmul.f32 %v9793_v3, %v9793_v3  ;;  %v13800_v32 = vmax.f32 %v13792_v7, 1e-05  ;;  %v2356_v63 = vmul.f32 %v9795_v34, %v9795_v34  ;;  %v13824_v3 = vld [vmem:[#allocation26_spill] sm:$0xff] }
 0x261   : > { %1977 = vadd.xlane.f32.xlu0 %v1885_v29  ;;  %v9801_v53 = vpop.f32.mrf.mxu0  ;;  %v9803_v54 = vpop.f32.mrf.mxu1 }
 0x262   : > { %13787 = vst [vmem:[#allocation104_spill] sm:$0xff] %v9801_v53  ;;  %13788 = vst [vmem:[#allocation105_spill] sm:$0xff] %v9803_v54  ;;  %v1863_v36 = vmul.f32 %v9801_v53, %v9801_v53  ;;  %6917 = vrcp.f32 %v13800_v32  ;;  %v2355_v8 = vmul.f32 %v9803_v54, %v9803_v54  ;;  %v13814_v32 = vmax.f32 %v13803_v20, 1e-05 }
 0x263   : > { %1935 = vadd.xlane.f32.xlu1 %v1864_v21  ;;  %v9808_v43 = vpop.f32.mrf.mxu1  ;;  %v9810_v23 = vpop.f32.mrf.mxu0  ;;  %v13797_v21 = vld [vmem:[#allocation15_spill] sm:$0xff]  ;;  %6919 = vrcp.f32 %v13802_v10 }
 0x264   : > { %13790 = vst [vmem:[#allocation11_spill] sm:$0xff] %v9808_v43  ;;  %13791 = vst [vmem:[#allocation106_spill] sm:$0xff] %v9810_v23  ;;  %v13808_v28 = vmax.f32 %v13797_v21, 1e-05 }
 0x265   : > { %1933 = vadd.xlane.f32.xlu0 %v1863_v36  ;;  %v9814_v29 = vpop.f32.mrf.mxu1  ;;  %v9816_v11 = vpop.f32.mrf.mxu0  ;;  %v1887_v36 = vmul.f32 %v9789_v39, %v9789_v39  ;;  %v13806_v39 = vmax.f32 %v13796_v13, 1e-05 }
 0x266   : > { %13794 = vst [vmem:[#allocation12_spill] sm:$0xff] %v9814_v29  ;;  %13795 = vst [vmem:[#allocation13_spill] sm:$0xff] %v9816_v11  ;;  %v2357_v6 = vmul.f32 %v9814_v29, %v9814_v29 }
 0x267   : > { %1983 = vadd.xlane.f32.xlu1 %v1888_v42  ;;  %v9824_v16 = vpop.f32.mrf.mxu1  ;;  %v9826_v9 = vpop.f32.mrf.mxu0  ;;  %6921 = vrcp.f32 %v13806_v39  ;;  %v13820_v39 = vmax.f32 %v13809_v50, 1e-05 }
 0x268   : > { %13798 = vst [vmem:[#allocation14_spill] sm:$0xff] %v9824_v16  ;;  %13799 = vst [vmem:[#allocation15_spill] sm:$0xff] %v9826_v9  ;;  %6923 = vrcp.f32 %v13808_v28  ;;  %v2869_v28 = vmul.f32 %v9816_v11, %v9816_v11  ;;  %v9900_v24 = vpop.eup %6915 }
 0x269   : > { %1981 = vadd.xlane.f32.xlu0 %v1887_v36  ;;  %v9836_v5 = vpop.f32.mrf.mxu1  ;;  %v9838_v42 = vpop.f32.mrf.mxu0  ;;  %6925 = vrcp.f32 %v13812_v40  ;;  %v13827_v40 = vld [vmem:[#allocation21_spill] sm:$0xff]  ;;  %13835 = vst [vmem:[#allocation107_spill] sm:$0xff] %v9900_v24  ;;  %v13843_v24 = vld [vmem:[#allocation30_spill] sm:$0xff] }
 0x26a   : > { %13804 = vst [vmem:[#allocation16_spill] sm:$0xff] %v9836_v5  ;;  %13805 = vst [vmem:[#allocation17_spill] sm:$0xff] %v9838_v42  ;;  %6927 = vrcp.f32 %v13814_v32  ;;  %v9879_v22 = vpop.xlane.xlu1 %1891  ;;  %v2358_v32 = vmul.f32 %v9808_v43, %v9808_v43  ;;  %v13840_v57 = vmax.f32 %v13827_v40, 1e-05  ;;  %v13879_v43 = vmax.f32 %v13864_v61, 1e-05 }
 0x26b   : > { %2405 = vadd.xlane.f32.xlu1 %v2356_v63  ;;  %v9848_v49 = vpop.f32.mrf.mxu1  ;;  %v9850_v36 = vpop.f32.mrf.mxu0  ;;  %v2870_v63 = vmul.f32 %v9810_v23, %v9810_v23  ;;  %6929 = vrcp.f32 %v13818_v19  ;;  %13825 = vst [vmem:[#allocation25_spill] sm:$0xff] %v9879_v22  ;;  %v13826_v19 = vmax.f32 %v13815_v51, 1e-05 }
 0x26c   : > { %13810 = vst [vmem:[#allocation18_spill] sm:$0xff] %v9848_v49  ;;  %13811 = vst [vmem:[#allocation19_spill] sm:$0xff] %v9850_v36  ;;  %6931 = vrcp.f32 %v13820_v39  ;;  %v9893_v14 = vpop.xlane.xlu0 %1889  ;;  %v2362_v56 = vmul.f32 %v9848_v49, %v9848_v49  ;;  %v13895_v49 = vld [vmem:[#allocation43_spill] sm:$0xff] }
 0x26d   : > { %2403 = vadd.xlane.f32.xlu0 %v2355_v8  ;;  %v9862_v10 = vpop.f32.mrf.mxu1  ;;  %v9864_v45 = vpop.f32.mrf.mxu0  ;;  %v13823_v8 = vmax.f32 %v13813_v4, 1e-05  ;;  %13832 = vst [vmem:[#allocation22_spill] sm:$0xff] %v9893_v14 }
 0x26e   : > { %13816 = vst [vmem:[#allocation20_spill] sm:$0xff] %v9862_v10  ;;  %13817 = vst [vmem:[#allocation23_spill] sm:$0xff] %v9864_v45  ;;  %v9921_v12 = vpop.xlane.xlu1 %1939 }
 0x26f   : > { %2919 = vadd.xlane.f32.xlu1 %v2870_v63  ;;  %v9874_v53 = vpop.f32.mrf.mxu0  ;;  %6933 = vrcp.f32 %v13823_v8  ;;  %v9886_v15 = vpop.f32.mrf.mxu1  ;;  %v13829_v63 = vmax.f32 %v13819_v17, 1e-05  ;;  %13846 = vst [vmem:[#allocation110_spill] sm:$0xff] %v9921_v12 }
 0x270   : > { %13822 = vst [vmem:[#allocation24_spill] sm:$0xff] %v9874_v53  ;;  %6935 = vrcp.f32 %v13826_v19  ;;  %13828 = vst [vmem:[#allocation26_spill] sm:$0xff] %v9886_v15  ;;  %v13834_v19 = vld [vmem:[#allocation27_spill] sm:$0xff]  ;;  %v9905_v60 = vpop.eup %6917  ;;  %v9935_v2 = vpop.xlane.xlu0 %1937 }
 0x271   : > { %2917 = vadd.xlane.f32.xlu0 %v2869_v28  ;;  %6937 = vrcp.f32 %v13829_v63  ;;  %v9891_v33 = vpop.f32.mrf.mxu0  ;;  %v13836_v28 = vmax.f32 %v13824_v3, 1e-05  ;;  %v13837_v63 = vld [vmem:[#allocation28_spill] sm:$0xff]  ;;  %13838 = vst [vmem:[#allocation108_spill] sm:$0xff] %v9905_v60  ;;  %v9912_v39 = vpop.f32.mrf.mxu1  ;;  %13853 = vst [vmem:[#allocation113_spill] sm:$0xff] %v9935_v2  ;;  %v13875_v2 = vld [vmem:[#allocation38_spill] sm:$0xff] }
 0x272   : > { %13831 = vst [vmem:[#allocation21_spill] sm:$0xff] %v9891_v33  ;;  %6939 = vrcp.f32 %v13833_v47  ;;  %v2872_v47 = vmul.f32 %v9826_v9, %v9826_v9  ;;  %13841 = vst [vmem:[#allocation29_spill] sm:$0xff] %v9912_v39  ;;  %v13851_v48 = vmax.f32 %v13837_v63, 1e-05  ;;  %v9965_v1 = vpop.xlane.xlu1 %1895  ;;  %v13910_v60 = vld [vmem:[#allocation47_spill] sm:$0xff] }
 0x273   : > { %2409 = vadd.xlane.f32.xlu1 %v2358_v32  ;;  %6941 = vrcp.f32 %v13836_v28  ;;  %v9914_v32 = vpop.eup %6919  ;;  %v13844_v28 = vmax.f32 %v13830_v0, 1e-05  ;;  %v9919_v8 = vpop.f32.mrf.mxu0  ;;  %13868 = vst [vmem:[#allocation118_spill] sm:$0xff] %v9965_v1 }
 0x274   : > { %6943 = vrcp.f32 %v13840_v57  ;;  %13842 = vst [vmem:[#allocation109_spill] sm:$0xff] %v9914_v32  ;;  %13845 = vst [vmem:[#allocation30_spill] sm:$0xff] %v9919_v8  ;;  %v9923_v37 = vpop.eup %6921  ;;  %v13848_v57 = vmax.f32 %v13834_v19, 1e-05  ;;  %v9983_v34 = vpop.xlane.xlu0 %1893 }
 0x275   : > { %2407 = vadd.xlane.f32.xlu0 %v2357_v6  ;;  %6945 = vrcp.f32 %v13844_v28  ;;  %13847 = vst [vmem:[#allocation111_spill] sm:$0xff] %v9923_v37  ;;  %v2871_v6 = vmul.f32 %v9838_v42, %v9838_v42  ;;  %v9930_v32 = vpop.eup %6923  ;;  %v13852_v28 = vld [vmem:[#allocation32_spill] sm:$0xff]  ;;  %v13855_v37 = vmax.f32 %v13839_v18, 1e-05  ;;  %v2360_v42 = vmul.f32 %v9824_v16, %v9824_v16  ;;  %v9951_v25 = vpop.f32.mrf.mxu0  ;;  %13877 = vst [vmem:[#allocation121_spill] sm:$0xff] %v9983_v34  ;;  %v13906_v34 = vld [vmem:[#allocation46_spill] sm:$0xff] }
 0x276   : > { %6947 = vrcp.f32 %v13848_v57  ;;  %13850 = vst [vmem:[#allocation112_spill] sm:$0xff] %v9930_v32  ;;  %v9937_v12 = vpop.eup %6925  ;;  %v13856_v57 = vld [vmem:[#allocation33_spill] sm:$0xff]  ;;  %13861 = vst [vmem:[#allocation34_spill] sm:$0xff] %v9951_v25  ;;  %v2359_v16 = vmul.f32 %v9836_v5, %v9836_v5  ;;  %v2874_v5 = vmul.f32 %v9850_v36, %v9850_v36  ;;  %v13880_v36 = vld [vmem:[#allocation39_spill] sm:$0xff] }
 0x277   : > { %2923 = vadd.xlane.f32.xlu1 %v2872_v47  ;;  %6949 = vrcp.f32 %v13851_v48  ;;  %13854 = vst [vmem:[#allocation114_spill] sm:$0xff] %v9937_v12  ;;  %v9944_v47 = vpop.f32.mrf.mxu1  ;;  %v9946_v29 = vpop.eup %6927  ;;  %v13859_v48 = vmax.f32 %v13843_v24, 1e-05  ;;  %v13886_v32 = vld [vmem:[#allocation41_spill] sm:$0xff] }
 0x278   : > { %6951 = vrcp.f32 %v13855_v37  ;;  %13857 = vst [vmem:[#allocation33_spill] sm:$0xff] %v9944_v47  ;;  %13858 = vst [vmem:[#allocation115_spill] sm:$0xff] %v9946_v29  ;;  %v9953_v9 = vpop.eup %6929  ;;  %v13863_v37 = vmax.f32 %v13849_v30, 1e-05  ;;  %v13866_v29 = vmax.f32 %v13852_v28, 1e-05  ;;  %v9981_v23 = vpop.f32.mrf.mxu0 }
 0x279   : > { %2921 = vadd.xlane.f32.xlu0 %v2871_v6  ;;  %6953 = vrcp.f32 %v13859_v48  ;;  %13862 = vst [vmem:[#allocation116_spill] sm:$0xff] %v9953_v9  ;;  %v9960_v6 = vpop.eup %6931  ;;  %v13867_v48 = vld [vmem:[#allocation36_spill] sm:$0xff]  ;;  %v13870_v9 = vmax.f32 %v13856_v57, 1e-05  ;;  %13876 = vst [vmem:[#allocation38_spill] sm:$0xff] %v9981_v23  ;;  %v10027_v1 = vpop.xlane.xlu0 %1941 }
 0x27a   : > { %6955 = vrcp.f32 %v13863_v37  ;;  %13865 = vst [vmem:[#allocation117_spill] sm:$0xff] %v9960_v6  ;;  %v13871_v37 = vld [vmem:[#allocation37_spill] sm:$0xff]  ;;  %v13898_v6 = vld [vmem:[#allocation44_spill] sm:$0xff]  ;;  %13899 = vst [vmem:[#allocation129_spill] sm:$0xff] %v10027_v1 }
 0x27b   : > { %2413 = vadd.xlane.f32.xlu1 %v2360_v42  ;;  %6957 = vrcp.f32 %v13866_v29  ;;  %v9974_v42 = vpop.f32.mrf.mxu1  ;;  %v13874_v29 = vmax.f32 %v13860_v35, 1e-05  ;;  %v13913_v1 = vmax.f32 %v13898_v6, 1e-05  ;;  %v14005_v6 = vmax.f32 %v9360_v62, 1e-05 }
 0x27c   : > { %v9967_v11 = vpop.eup %6933  ;;  %6959 = vrcp.f32 %v13870_v9  ;;  %13872 = vst [vmem:[#allocation37_spill] sm:$0xff] %v9974_v42 }
 0x27d   : > { %13869 = vst [vmem:[#allocation119_spill] sm:$0xff] %v9967_v11  ;;  %2411 = vadd.xlane.f32.xlu0 %v2359_v16  ;;  %v9976_v54 = vpop.eup %6935  ;;  %6961 = vrcp.f32 %v13874_v29  ;;  %v2873_v16 = vmul.f32 %v9864_v45, %v9864_v45  ;;  %v13882_v29 = vmax.f32 %v13867_v48, 1e-05  ;;  %v10004_v12 = vpop.f32.mrf.mxu1  ;;  %v13889_v45 = vmax.f32 %v13875_v2, 1e-05 }
 0x27e   : > { %13873 = vst [vmem:[#allocation120_spill] sm:$0xff] %v9976_v54  ;;  %v9985_v9 = vpop.eup %6937  ;;  %6963 = vrcp.f32 %v13879_v43  ;;  %13887 = vst [vmem:[#allocation41_spill] sm:$0xff] %v10004_v12  ;;  %v13894_v43 = vmax.f32 %v13880_v36, 1e-05  ;;  %v13914_v36 = vld [vmem:[#allocation48_spill] sm:$0xff] }
 0x27f   : > { %13878 = vst [vmem:[#allocation122_spill] sm:$0xff] %v9985_v9  ;;  %2927 = vadd.xlane.f32.xlu1 %v2874_v5  ;;  %v9992_v54 = vpop.eup %6939  ;;  %6965 = vrcp.f32 %v13882_v29  ;;  %v13885_v9 = vmax.f32 %v13871_v37, 1e-05  ;;  %v13890_v29 = vld [vmem:[#allocation42_spill] sm:$0xff] }
 0x280   : > { %13881 = vst [vmem:[#allocation123_spill] sm:$0xff] %v9992_v54  ;;  %v9997_v11 = vpop.eup %6941  ;;  %v10011_v54 = vpop.f32.mrf.mxu0 }
 0x281   : > { %13884 = vst [vmem:[#allocation124_spill] sm:$0xff] %v9997_v11  ;;  %6967 = vrcp.f32 %v13885_v9  ;;  %2925 = vadd.xlane.f32.xlu0 %v2873_v16  ;;  %v10006_v5 = vpop.eup %6943  ;;  %13891 = vst [vmem:[#allocation42_spill] sm:$0xff] %v10011_v54  ;;  %v10013_v11 = vpop.xlane.xlu1 %1943  ;;  %v2361_v16 = vmul.f32 %v9862_v10, %v9862_v10  ;;  %v2876_v10 = vmul.f32 %v9874_v53, %v9874_v53 }
 0x282   : > { %13888 = vst [vmem:[#allocation125_spill] sm:$0xff] %v10006_v5  ;;  %6969 = vrcp.f32 %v13889_v45  ;;  %13892 = vst [vmem:[#allocation126_spill] sm:$0xff] %v10013_v11  ;;  %v10015_v9 = vpop.eup %6945  ;;  %v13897_v45 = vmax.f32 %v13883_v55, 1e-05  ;;  %v10043_v14 = vpop.f32.mrf.mxu0  ;;  %v2875_v53 = vmul.f32 %v9891_v33, %v9891_v33  ;;  %v13918_v33 = vld [vmem:[#allocation50_spill] sm:$0xff] }
 0x283   : > { %13893 = vst [vmem:[#allocation127_spill] sm:$0xff] %v10015_v9  ;;  %6971 = vrcp.f32 %v13894_v43  ;;  %2417 = vadd.xlane.f32.xlu1 %v2362_v56  ;;  %v10022_v5 = vpop.eup %6947  ;;  %v13901_v9 = vmax.f32 %v13886_v32, 1e-05  ;;  %v13902_v43 = vld [vmem:[#allocation45_spill] sm:$0xff]  ;;  %v10036_v56 = vpop.f32.mrf.mxu1  ;;  %13907 = vst [vmem:[#allocation46_spill] sm:$0xff] %v10043_v14 }
 0x284   : > { %13896 = vst [vmem:[#allocation128_spill] sm:$0xff] %v10022_v5  ;;  %6973 = vrcp.f32 %v13897_v45  ;;  %v10029_v11 = vpop.eup %6949  ;;  %13903 = vst [vmem:[#allocation45_spill] sm:$0xff] %v10036_v56  ;;  %v13905_v45 = vmax.f32 %v13890_v29, 1e-05  ;;  %v13917_v22 = vmax.f32 %v13902_v43, 1e-05 }
 0x285   : > { %13900 = vst [vmem:[#allocation130_spill] sm:$0xff] %v10029_v11  ;;  %6975 = vrcp.f32 %v13901_v9  ;;  %2415 = vadd.xlane.f32.xlu0 %v2361_v16  ;;  %v10038_v5 = vpop.eup %6951  ;;  %v13909_v9 = vmax.f32 %v13895_v49, 1e-05  ;;  %v13911_v16 = vmax.f32 %v13792_v7, 1e-05  ;;  %v10061_v55 = vpop.xlane.xlu1 %1899  ;;  %v2364_v7 = vmul.f32 %v9886_v15, %v9886_v15 }
 0x286   : > { %13904 = vst [vmem:[#allocation131_spill] sm:$0xff] %v10038_v5  ;;  %6977 = vrcp.f32 %v13905_v45  ;;  %v10045_v11 = vpop.eup %6953  ;;  %13915 = vst [vmem:[#allocation134_spill] sm:$0xff] %v10061_v55  ;;  %v10077_v55 = vpop.f32.mrf.mxu0  ;;  %v2363_v15 = vmul.f32 %v9912_v39, %v9912_v39  ;;  %v2878_v39 = vmul.f32 %v9919_v8, %v9919_v8  ;;  %v2877_v8 = vmul.f32 %v9951_v25, %v9951_v25  ;;  %v13942_v25 = vld [vmem:[#allocation55_spill] sm:$0xff] }
 0x287   : > { %13908 = vst [vmem:[#allocation132_spill] sm:$0xff] %v10045_v11  ;;  %6979 = vrcp.f32 %v13909_v9  ;;  %2931 = vadd.xlane.f32.xlu1 %v2876_v10  ;;  %v10054_v5 = vclamps-f32 %v13911_v16, 0.99999  ;;  %v10056_v45 = vpop.eup %6955  ;;  %v10070_v16 = vpop.f32.mrf.mxu1  ;;  %13922 = vst [vmem:[#allocation137_spill] sm:$0xff] %v10077_v55  ;;  %v13925_v10 = vmax.f32 %v13910_v60, 1e-05 }
 0x288   : > { %13912 = vst [vmem:[#allocation133_spill] sm:$0xff] %v10056_v45  ;;  %6981 = vrcp.f32 %v13913_v1  ;;  %v10063_v9 = vpop.eup %6957  ;;  %13919 = vst [vmem:[#allocation50_spill] sm:$0xff] %v10070_v16  ;;  %v13921_v1 = vmax.f32 %v13906_v34, 1e-05  ;;  %v10107_v11 = vpop.f32.mrf.mxu0 }
 0x289   : > { %13916 = vst [vmem:[#allocation135_spill] sm:$0xff] %v10063_v9  ;;  %6983 = vrcp.f32 %v13917_v22  ;;  %2929 = vadd.xlane.f32.xlu0 %v2875_v53  ;;  %v10072_v45 = vpop.eup %6959  ;;  %v10079_v9 = vpop.xlane.xlu0 %1897  ;;  %v3590_v53 = vadd.f32 1.0, %v10054_v5  ;;  %13933 = vst [vmem:[#allocation144_spill] sm:$0xff] %v10107_v11 }
 0x28a   : > { %13920 = vst [vmem:[#allocation136_spill] sm:$0xff] %v10072_v45  ;;  %6985 = vrcp.f32 %v13921_v1  ;;  %13923 = vst [vmem:[#allocation138_spill] sm:$0xff] %v10079_v9  ;;  %v10081_v22 = vpop.eup %6961  ;;  %v13927_v1 = vmax.f32 %v13914_v36, 1e-05 }
 0x28b   : > { %13924 = vst [vmem:[#allocation139_spill] sm:$0xff] %v10081_v22  ;;  %6987 = vrcp.f32 %v13925_v10  ;;  %2421 = vadd.xlane.f32.xlu1 %v2364_v7  ;;  %v10088_v45 = vpop.eup %6963  ;;  %v13929_v22 = vmax.f32 %v13918_v33, 1e-05  ;;  %v10100_v7 = vpop.f32.mrf.mxu1  ;;  %v13941_v10 = vmax.f32 %v9367_v44, 1e-05 }
 0x28c   : > { %13926 = vst [vmem:[#allocation140_spill] sm:$0xff] %v10088_v45  ;;  %6989 = vrcp.f32 %v13927_v1  ;;  %v10093_v49 = vpop.eup %6965  ;;  %13930 = vst [vmem:[#allocation142_spill] sm:$0xff] %v10100_v7  ;;  %v13932_v45 = vmax.f32 %v9360_v62, 1e-05 }
 0x28d   : > { %13928 = vst [vmem:[#allocation141_spill] sm:$0xff] %v10093_v49  ;;  %6991 = vrcp.f32 %v13929_v22  ;;  %2419 = vadd.xlane.f32.xlu0 %v2363_v15  ;;  %v10109_v49 = vpop.xlane.xlu1 %1947  ;;  %v10121_v1 = vpop.xlane.xlu0 %1945 }
 0x28e   : > { %v10102_v9 = vpop.eup %6967  ;;  %6993 = vrcp.f32 %v13932_v45  ;;  %13934 = vst [vmem:[#allocation145_spill] sm:$0xff] %v10109_v49  ;;  %13938 = vst [vmem:[#allocation148_spill] sm:$0xff] %v10121_v1  ;;  %v13940_v49 = vmax.f32 %v13827_v40, 1e-05  ;;  %v13945_v45 = vmax.f32 %v9374_v46, 1e-05  ;;  %v10139_v40 = vpop.f32.mrf.mxu0 }
 0x28f   : > { %13931 = vst [vmem:[#allocation143_spill] sm:$0xff] %v10102_v9  ;;  %v10111_v22 = vpop.eup %6969  ;;  %2935 = vadd.xlane.f32.xlu1 %v2878_v39  ;;  %6995 = vlog2.f32 %v3590_v53  ;;  %v13937_v9 = vmax.f32 %v9362_v26, 1e-05  ;;  %v2366_v53 = vmul.f32 %v9944_v47, %v9944_v47  ;;  %v13950_v39 = vld [vmem:[#allocation57_spill] sm:$0xff]  ;;  %v2365_v47 = vmul.f32 %v9974_v42, %v9974_v42 }
 0x290   : > { %13935 = vst [vmem:[#allocation146_spill] sm:$0xff] %v10111_v22  ;;  %v10116_v15 = vpop.eup %6971  ;;  %v5862_v22 = vclamps-f32 %v13940_v49, 0.99999  ;;  %v13957_v42 = vmax.f32 %v13942_v25, 1e-05 }
 0x291   : > { %13936 = vst [vmem:[#allocation147_spill] sm:$0xff] %v10116_v15  ;;  %6997 = vrcp.f32 %v13937_v9  ;;  %v10123_v60 = vpop.eup %6973  ;;  %v10132_v15 = vpop.f32.mrf.mxu1  ;;  %2933 = vadd.xlane.f32.xlu0 %v2877_v8  ;;  %v13951_v8 = vmax.f32 %v13801_v31, 1e-05  ;;  %v2880_v31 = vmul.f32 %v9981_v23, %v9981_v23 }
 0x292   : > { %13939 = vst [vmem:[#allocation149_spill] sm:$0xff] %v10123_v60  ;;  %6999 = vrcp.f32 %v13941_v10  ;;  %13943 = vst [vmem:[#allocation150_spill] sm:$0xff] %v10132_v15  ;;  %v10134_v9 = vpop.eup %6975  ;;  %v13946_v60 = vld [vmem:[#allocation56_spill] sm:$0xff]  ;;  %v13949_v10 = vmax.f32 %v9386_v52, 1e-05  ;;  %v10154_v1 = vpop.xlane.xlu1 %1903  ;;  %v2372_v62 = vmul.f32 %v10132_v15, %v10132_v15 }
 0x293   : > { %13944 = vst [vmem:[#allocation151_spill] sm:$0xff] %v10134_v9  ;;  %7001 = vrcp.f32 %v13945_v45  ;;  %13947 = vst [vmem:[#allocation56_spill] sm:$0xff] %v10139_v40  ;;  %v10141_v49 = vpop.eup %6977  ;;  %2425 = vadd.xlane.f32.xlu1 %v2366_v53  ;;  %v5865_v9 = vclamps-f32 %v13951_v8, 0.99999  ;;  %v13953_v45 = vmax.f32 %v9388_v38, 1e-05  ;;  %v10165_v53 = vpop.f32.mrf.mxu1 }
 0x294   : > { %13948 = vst [vmem:[#allocation152_spill] sm:$0xff] %v10141_v49  ;;  %7003 = vrcp.f32 %v13949_v10  ;;  %v10150_v44 = vpop.eup %6979  ;;  %13954 = vst [vmem:[#allocation153_spill] sm:$0xff] %v10154_v1  ;;  %v3734_v49 = vsub.f32 1.0, %v10054_v5  ;;  %v13955_v10 = vmax.f32 %v13797_v21, 1e-05  ;;  %v3589_v8 = vadd.f32 1.0, %v5862_v22  ;;  %v10181_v23 = vpop.xlane.xlu0 %1901 }
 0x295   : > { %13952 = vst [vmem:[#allocation57_spill] sm:$0xff] %v10150_v44  ;;  %7005 = vrcp.f32 %v13953_v45  ;;  %v10159_v26 = vpop.eup %6981  ;;  %13958 = vst [vmem:[#allocation155_spill] sm:$0xff] %v10165_v53  ;;  %2423 = vadd.xlane.f32.xlu0 %v2365_v47  ;;  %v13959_v45 = vmax.f32 %v13813_v4, 1e-05  ;;  %v13961_v21 = vmax.f32 %v13830_v0, 1e-05  ;;  %v2879_v0 = vmul.f32 %v10011_v54, %v10011_v54 }
 0x296   : > { %v5864_v36 = vclamps-f32 %v13955_v10, 0.99999  ;;  %13956 = vst [vmem:[#allocation154_spill] sm:$0xff] %v10159_v26  ;;  %7007 = vrcp.f32 %v13957_v42  ;;  %v10171_v5 = vpop.eup %6983  ;;  %v13962_v26 = vmax.f32 %v13946_v60, 1e-05  ;;  %v10179_v42 = vpop.f32.mrf.mxu0  ;;  %13964 = vst [vmem:[#allocation158_spill] sm:$0xff] %v10181_v23 }
 0x297   : > { %v10169_v44 = vclamps-f32 %v13959_v45, 0.99999  ;;  %13960 = vst [vmem:[#allocation156_spill] sm:$0xff] %v10171_v5  ;;  %v10175_v10 = vclamps-f32 %v13961_v21, 0.99999  ;;  %13963 = vst [vmem:[#allocation157_spill] sm:$0xff] %v10179_v42  ;;  %v10187_v4 = vpop.eup %6985  ;;  %2939 = vadd.xlane.f32.xlu1 %v2880_v31 }
 0x298   : > { %7009 = vrcp.f32 %v13962_v26  ;;  %v3733_v1 = vsub.f32 1.0, %v5862_v22  ;;  %v13965_v47 = vmax.f32 %v13809_v50, 1e-05  ;;  %13966 = vst [vmem:[#allocation159_spill] sm:$0xff] %v10187_v4  ;;  %v13967_v45 = vmax.f32 %v13950_v39, 1e-05  ;;  %v10193_v5 = vpop.eup %6987  ;;  %v10203_v4 = vpop.f32.mrf.mxu1 }
 0x299   : > { %v3592_v21 = vadd.f32 1.0, %v5865_v9  ;;  %v3736_v26 = vsub.f32 1.0, %v5865_v9  ;;  %13968 = vst [vmem:[#allocation160_spill] sm:$0xff] %v10193_v5  ;;  %v3591_v23 = vadd.f32 1.0, %v5864_v36  ;;  %v3735_v22 = vsub.f32 1.0, %v5864_v36  ;;  %v10199_v25 = vpop.eup %6989  ;;  %13971 = vst [vmem:[#allocation162_spill] sm:$0xff] %v10203_v4  ;;  %2937 = vadd.xlane.f32.xlu0 %v2879_v0 }
 0x29a   : > { %v10185_v38 = vclamps-f32 %v13965_v47, 0.99999  ;;  %7011 = vrcp.f32 %v13967_v45  ;;  %v13969_v50 = vmax.f32 %v13824_v3, 1e-05  ;;  %13970 = vst [vmem:[#allocation161_spill] sm:$0xff] %v10199_v25  ;;  %v2368_v45 = vmul.f32 %v10004_v12, %v10004_v12  ;;  %v10210_v36 = vpop.eup %6991  ;;  %v10212_v3 = vpop.f32.mrf.mxu0 }
 0x29b   : > { %7013 = vlog2.f32 %v3734_v49  ;;  %v3594_v9 = vadd.f32 1.0, %v10169_v44  ;;  %v13972_v31 = vmax.f32 %v13821_v59, 1e-05  ;;  %13973 = vst [vmem:[#allocation163_spill] sm:$0xff] %v10210_v36  ;;  %13974 = vst [vmem:[#allocation164_spill] sm:$0xff] %v10212_v3  ;;  %v3738_v5 = vsub.f32 1.0, %v10169_v44  ;;  %v10222_v12 = vpop.eup %6993  ;;  %v10231_v36 = vpop.xlane.xlu0 %1949 }
 0x29c   : > { %v10197_v47 = vclamps-f32 %v13969_v50, 0.99999  ;;  %7015 = vlog2.f32 %v3589_v8  ;;  %v10214_v50 = vpop.xlane.xlu1 %1951  ;;  %v3593_v25 = vadd.f32 1.0, %v10185_v38  ;;  %v13976_v0 = vmax.f32 %v13843_v24, 1e-05  ;;  %13977 = vst [vmem:[#allocation166_spill] sm:$0xff] %v10222_v12  ;;  %2429 = vadd.xlane.f32.xlu1 %v2368_v45  ;;  %v6996_v44 = vpop.eup %6995 }
 0x29d   : > { %v10208_v49 = vclamps-f32 %v13972_v31, 0.99999  ;;  %13975 = vst [vmem:[#allocation165_spill] sm:$0xff] %v10214_v50  ;;  %7017 = vlog2.f32 %v3733_v1  ;;  %v2367_v59 = vmul.f32 %v10036_v56, %v10036_v56  ;;  %v3737_v31 = vsub.f32 1.0, %v10185_v38  ;;  %13979 = vst [vmem:[#allocation167_spill] sm:$0xff] %v10231_v36 }
 0x29e   : > { %v10220_v8 = vclamps-f32 %v13976_v0, 0.99999  ;;  %7019 = vlog2.f32 %v3592_v21  ;;  %v13978_v50 = vmax.f32 %v13839_v18, 1e-05  ;;  %v3596_v24 = vadd.f32 1.0, %v10197_v47  ;;  %v10239_v45 = vpop.eup %6997  ;;  %v10243_v18 = vpop.f32.mrf.mxu1 }
 0x29f   : > { %7021 = vlog2.f32 %v3736_v26  ;;  %v3740_v0 = vsub.f32 1.0, %v10197_v47  ;;  %v13980_v12 = vmax.f32 %v13860_v35, 1e-05  ;;  %13981 = vst [vmem:[#allocation168_spill] sm:$0xff] %v10239_v45  ;;  %v2882_v38 = vmul.f32 %v10043_v14, %v10043_v14  ;;  %13982 = vst [vmem:[#allocation169_spill] sm:$0xff] %v10243_v18  ;;  %2427 = vadd.xlane.f32.xlu0 %v2367_v59  ;;  %v10249_v47 = vpop.f32.mrf.mxu0 }
 0x2a0   : > { %v10229_v1 = vclamps-f32 %v13978_v50, 0.99999  ;;  %7023 = vlog2.f32 %v3591_v23  ;;  %v3595_v21 = vadd.f32 1.0, %v10208_v49  ;;  %v10247_v50 = vpop.eup %6999  ;;  %13984 = vst [vmem:[#allocation171_spill] sm:$0xff] %v10249_v47  ;;  %v10252_v35 = vadd.f32 1.0, %v10220_v8  ;;  %v10270_v56 = vpop.xlane.xlu1 %1907 }
 0x2a1   : > { %v10237_v54 = vclamps-f32 %v13980_v12, 0.99999  ;;  %13983 = vst [vmem:[#allocation170_spill] sm:$0xff] %v10247_v50  ;;  %7025 = vlog2.f32 %v3735_v22  ;;  %v13985_v45 = vmax.f32 %v13856_v57, 1e-05  ;;  %v10259_v59 = vpop.eup %7001  ;;  %v2881_v23 = vmul.f32 %v10077_v55, %v10077_v55  ;;  %2943 = vadd.xlane.f32.xlu1 %v2882_v38  ;;  %13988 = vst [vmem:[#allocation174_spill] sm:$0xff] %v10270_v56  ;;  %v10285_v55 = vpop.f32.mrf.mxu1 }
 0x2a2   : > { %13986 = vst [vmem:[#allocation172_spill] sm:$0xff] %v10259_v59  ;;  %v10263_v26 = vmul.f32 0.6931472, %v6996_v44  ;;  %7027 = vlog2.f32 %v3594_v9  ;;  %v10266_v22 = vadd.f32 1.0, %v10229_v1  ;;  %v10268_v50 = vpop.eup %7003  ;;  %v13990_v59 = vmax.f32 %v13871_v37, 1e-05 }
 0x2a3   : > { %v10257_v36 = vclamps-f32 %v13985_v45, 0.99999  ;;  %13987 = vst [vmem:[#allocation173_spill] sm:$0xff] %v10268_v50  ;;  %7029 = vlog2.f32 %v3738_v5  ;;  %v13989_v45 = vmax.f32 %v13875_v2, 1e-05  ;;  %v10281_v44 = vpop.eup %7005  ;;  %v2370_v9 = vmul.f32 %v10070_v16, %v10070_v16  ;;  %13992 = vst [vmem:[#allocation176_spill] sm:$0xff] %v10285_v55  ;;  %2941 = vadd.xlane.f32.xlu0 %v2881_v23 }
 0x2a4   : > { %v10279_v38 = vclamps-f32 %v13990_v59, 0.99999  ;;  %13991 = vst [vmem:[#allocation175_spill] sm:$0xff] %v10281_v44  ;;  %v10288_v5 = vadd.f32 1.0, %v10237_v54  ;;  %v13993_v2 = vmax.f32 %v13890_v29, 1e-05  ;;  %v10295_v37 = vpop.eup %7007  ;;  %v10297_v59 = vpop.f32.mrf.mxu0  ;;  %7031 = vlog2.f32 %v3593_v25 }
 0x2a5   : > { %v10275_v12 = vclamps-f32 %v13989_v45, 0.99999  ;;  %13994 = vst [vmem:[#allocation177_spill] sm:$0xff] %v10295_v37  ;;  %13995 = vst [vmem:[#allocation178_spill] sm:$0xff] %v10297_v59  ;;  %v10299_v44 = vpop.xlane.xlu0 %1905  ;;  %v10302_v50 = vadd.f32 1.0, %v10257_v36  ;;  %v10312_v29 = vpop.eup %7009  ;;  %2433 = vadd.xlane.f32.xlu1 %v2370_v9  ;;  %7033 = vlog2.f32 %v3737_v31  ;;  %v2884_v31 = vmul.f32 %v10107_v11, %v10107_v11 }
 0x2a6   : > { %v10293_v45 = vclamps-f32 %v13993_v2, 0.99999  ;;  %13996 = vst [vmem:[#allocation179_spill] sm:$0xff] %v10299_v44  ;;  %v13997_v23 = vmax.f32 %v13886_v32, 1e-05  ;;  %13999 = vst [vmem:[#allocation180_spill] sm:$0xff] %v10312_v29  ;;  %v2369_v2 = vmul.f32 %v10100_v7, %v10100_v7  ;;  %v10333_v25 = vpop.f32.mrf.mxu1  ;;  %7035 = vlog2.f32 %v3596_v24  ;;  %v10341_v7 = vpop.xlane.xlu1 %1955 }
 0x2a7   : > { %v13998_v57 = vmax.f32 %v13906_v34, 1e-05  ;;  %v14000_v37 = vmax.f32 %v13902_v43, 1e-05  ;;  %v10321_v32 = vpop.eup %7011  ;;  %14002 = vst [vmem:[#allocation182_spill] sm:$0xff] %v10333_v25  ;;  %v10339_v34 = vpop.f32.mrf.mxu0  ;;  %14004 = vst [vmem:[#allocation184_spill] sm:$0xff] %v10341_v7  ;;  %7037 = vlog2.f32 %v3740_v0 }
 0x2a8   : > { %v10306_v16 = vclamps-f32 %v13997_v23, 0.99999  ;;  %14001 = vst [vmem:[#allocation181_spill] sm:$0xff] %v10321_v32  ;;  %v10324_v23 = vadd.f32 1.0, %v10275_v12  ;;  %v7014_v9 = vpop.eup %7013  ;;  %2431 = vadd.xlane.f32.xlu0 %v2369_v2  ;;  %v10336_v43 = vadd.f32 1.0, %v10293_v45  ;;  %14003 = vst [vmem:[#allocation183_spill] sm:$0xff] %v10339_v34  ;;  %v2883_v2 = vmul.f32 %v10139_v40, %v10139_v40 }
 0x2a9   : > { %v10310_v14 = vclamps-f32 %v13998_v57, 0.99999  ;;  %v10319_v44 = vclamps-f32 %v14000_v37, 0.99999  ;;  %v10328_v57 = vadd.f32 1.0, %v10279_v38  ;;  %v7016_v32 = vpop.eup %7015  ;;  %2947 = vadd.xlane.f32.xlu1 %v2884_v31  ;;  %7039 = vlog2.f32 %v3595_v21  ;;  %v10357_v61 = vpop.xlane.xlu0 %1953 }
 0x2aa   : > { %v10344_v29 = vadd.f32 1.0, %v10306_v16  ;;  %v7018_v24 = vpop.eup %7017  ;;  %v10355_v7 = vclamps-f32 %v14005_v6, 0.99999  ;;  %14006 = vst [vmem:[#allocation185_spill] sm:$0xff] %v10357_v61  ;;  %v3784_v48 = vmul.f32 0.6931472, %v7014_v9  ;;  %v10370_v6 = vpop.f32.mrf.mxu1 }
 0x2ab   : > { %v10348_v56 = vadd.f32 1.0, %v10310_v14  ;;  %v7020_v0 = vpop.eup %7019  ;;  %v14007_v11 = vsub.f32 1.0, %v10208_v49  ;;  %v10362_v30 = vadd.f32 1.0, %v10319_v44  ;;  %v14008_v40 = vmax.f32 %v13918_v33, 1e-05  ;;  %14009 = vst [vmem:[#allocation186_spill] sm:$0xff] %v10370_v6  ;;  %v10378_v61 = vpop.f32.mrf.mxu0 }
 0x2ac   : > { %v7022_v21 = vpop.eup %7021  ;;  %2945 = vadd.xlane.f32.xlu0 %v2883_v2  ;;  %14011 = vst [vmem:[#allocation187_spill] sm:$0xff] %v10378_v61  ;;  %v3638_v33 = vmul.f32 0.6931472, %v7016_v32  ;;  %v14013_v15 = vmax.f32 %v9374_v46, 1e-05  ;;  %v10394_v32 = vadd.f32 1.0, %v10355_v7  ;;  %v3878_v46 = vsub.f32 %v10263_v26, %v3784_v48 }
 0x2ad   : > { %7041 = vlog2.f32 %v14007_v11  ;;  %v10366_v31 = vclamps-f32 %v14008_v40, 0.99999  ;;  %v14010_v11 = vmax.f32 %v9386_v52, 1e-05  ;;  %v7024_v37 = vpop.eup %7023  ;;  %v14012_v40 = vsub.f32 1.0, %v10220_v8  ;;  %2437 = vadd.xlane.f32.xlu1 %v2372_v62  ;;  %v10410_v48 = vpop.f32.mrf.mxu0 }
 0x2ae   : > { %7043 = vlog2.f32 %v10252_v35  ;;  %v10384_v28 = vclamps-f32 %v14013_v15, 0.99999  ;;  %v14014_v2 = vmax.f32 %v13950_v39, 1e-05  ;;  %v7026_v9 = vpop.eup %7025  ;;  %v2371_v52 = vmul.f32 %v10165_v53, %v10165_v53  ;;  %14018 = vst [vmem:[#allocation190_spill] sm:$0xff] %v10410_v48 }
 0x2af   : > { %v10376_v49 = vclamps-f32 %v14010_v11, 0.99999  ;;  %7045 = vlog2.f32 %v14012_v40  ;;  %v3782_v11 = vmul.f32 0.6931472, %v7018_v24  ;;  %v7028_v8 = vpop.eup %7027  ;;  %v10396_v40 = vpop.xlane.xlu1 %1911  ;;  %v14016_v15 = vsub.f32 1.0, %v10229_v1 }
 0x2b0   : > { %v10388_v35 = vclamps-f32 %v14014_v2, 0.99999  ;;  %7047 = vlog2.f32 %v10266_v22  ;;  %14015 = vst [vmem:[#allocation188_spill] sm:$0xff] %v10396_v40  ;;  %v10403_v2 = vadd.f32 1.0, %v10366_v31  ;;  %v7030_v62 = vpop.eup %7029  ;;  %v2886_v22 = vmul.f32 %v10179_v42, %v10179_v42  ;;  %v10407_v24 = vpop.f32.mrf.mxu1  ;;  %2435 = vadd.xlane.f32.xlu0 %v2371_v52 }
 0x2b1   : > { %7049 = vlog2.f32 %v14016_v15  ;;  %14017 = vst [vmem:[#allocation189_spill] sm:$0xff] %v10407_v24  ;;  %v3644_v53 = vmul.f32 0.6931472, %v7020_v0  ;;  %v3788_v19 = vmul.f32 0.6931472, %v7022_v21  ;;  %v10412_v1 = vpop.xlane.xlu0 %1909  ;;  %v14020_v39 = vsub.f32 1.0, %v10237_v54  ;;  %v7032_v63 = vpop.eup %7031 }
 0x2b2   : > { %7051 = vlog2.f32 %v10288_v5  ;;  %14019 = vst [vmem:[#allocation191_spill] sm:$0xff] %v10412_v1  ;;  %v3642_v26 = vmul.f32 0.6931472, %v7024_v37  ;;  %v3786_v15 = vmul.f32 0.6931472, %v7026_v9  ;;  %v2885_v42 = vmul.f32 %v10212_v3, %v10212_v3  ;;  %2951 = vadd.xlane.f32.xlu1 %v2886_v22  ;;  %v7034_v21 = vpop.eup %7033  ;;  %v10429_v40 = vpop.f32.mrf.mxu1 }
 0x2b3   : > { %7053 = vlog2.f32 %v14020_v39  ;;  %v3877_v0 = vsub.f32 %v3638_v33, %v3782_v11  ;;  %v10421_v5 = vadd.f32 1.0, %v10376_v49  ;;  %v10423_v52 = vmul.f32 0.5, %v3878_v46  ;;  %14022 = vst [vmem:[#allocation192_spill] sm:$0xff] %v10429_v40  ;;  %v7036_v11 = vpop.eup %7035  ;;  %v10433_v22 = vpop.f32.mrf.mxu0 }
 0x2b4   : > { %7055 = vlog2.f32 %v10302_v50  ;;  %v3648_v37 = vmul.f32 0.6931472, %v7028_v8  ;;  %v3792_v9 = vmul.f32 0.6931472, %v7030_v62  ;;  %v14021_v54 = vsub.f32 1.0, %v10257_v36  ;;  %2949 = vadd.xlane.f32.xlu0 %v2885_v42  ;;  %14023 = vst [vmem:[#allocation193_spill] sm:$0xff] %v10433_v22  ;;  %v10435_v46 = vpop.xlane.xlu1 %1959 }
 0x2b5   : > { %v2374_v39 = vmul.f32 %v10203_v4, %v10203_v4  ;;  %v3880_v33 = vsub.f32 %v3644_v53, %v3788_v19  ;;  %14024 = vst [vmem:[#allocation194_spill] sm:$0xff] %v10435_v46  ;;  %v3879_v8 = vsub.f32 %v3642_v26, %v3786_v15  ;;  %v14025_v36 = vsub.f32 1.0, %v10275_v12  ;;  %v7038_v19 = vpop.eup %7037  ;;  %v10450_v15 = vpop.xlane.xlu0 %1957 }
 0x2b6   : > { %7057 = vlog2.f32 %v14021_v54  ;;  %v10440_v62 = vadd.f32 1.0, %v10384_v28  ;;  %v14026_v54 = vmax.f32 %v13946_v60, 1e-05  ;;  %v2373_v53 = vmul.f32 %v10243_v18, %v10243_v18  ;;  %v7040_v26 = vpop.eup %7039  ;;  %14027 = vst [vmem:[#allocation195_spill] sm:$0xff] %v10450_v15 }
 0x2b7   : > { %7059 = vlog2.f32 %v10324_v23  ;;  %2441 = vadd.xlane.f32.xlu1 %v2374_v39  ;;  %v10448_v23 = vmul.f32 0.5, %v3877_v0  ;;  %v3646_v50 = vmul.f32 0.6931472, %v7032_v63  ;;  %v3790_v46 = vmul.f32 0.6931472, %v7034_v21  ;;  %v10459_v39 = vpop.f32.mrf.mxu1 }
 0x2b8   : > { %7061 = vlog2.f32 %v14025_v36  ;;  %v10444_v42 = vclamps-f32 %v14026_v54, 0.99999  ;;  %v3882_v12 = vsub.f32 %v3648_v37, %v3792_v9  ;;  %v10455_v60 = vadd.f32 1.0, %v10388_v35  ;;  %14028 = vst [vmem:[#allocation196_spill] sm:$0xff] %v10459_v39  ;;  %2439 = vadd.xlane.f32.xlu0 %v2373_v53  ;;  %v10466_v37 = vpop.f32.mrf.mxu0 }
 0x2b9   : > { %7063 = vlog2.f32 %v10328_v57  ;;  %v2888_v18 = vmul.f32 %v10249_v47, %v10249_v47  ;;  %v10461_v63 = vmul.f32 0.5, %v3880_v33  ;;  %v14029_v0 = vsub.f32 1.0, %v10279_v38  ;;  %14030 = vst [vmem:[#allocation197_spill] sm:$0xff] %v10466_v37 }
 0x2ba   : > { %v7042_v54 = vpop.eup %7041  ;;  %v10468_v9 = vmul.f32 0.5, %v3879_v8  ;;  %v3652_v36 = vmul.f32 0.6931472, %v7036_v11  ;;  %v3796_v15 = vmul.f32 0.6931472, %v7038_v19  ;;  %v10471_v4 = vadd.f32 1.0, %v10444_v42  ;;  %v10480_v8 = vpop.xlane.xlu1 %1915 }
 0x2bb   : > { %7065 = vlog2.f32 %v14029_v0  ;;  %v7044_v57 = vpop.eup %7043  ;;  %v2887_v33 = vmul.f32 %v10297_v59, %v10297_v59  ;;  %2955 = vadd.xlane.f32.xlu1 %v2888_v18  ;;  %v3881_v53 = vsub.f32 %v3646_v50, %v3790_v46  ;;  %v14031_v38 = vmax.f32 %v13789_v27, 1e-05  ;;  %14032 = vst [vmem:[#allocation198_spill] sm:$0xff] %v10480_v8 }
 0x2bc   : > { %v7046_v47 = vpop.eup %7045  ;;  %7067 = vlog2.f32 %v10336_v43  ;;  %v10482_v11 = vmul.f32 0.5, %v3882_v12  ;;  %v3650_v19 = vmul.f32 0.6931472, %v7040_v26  ;;  %v14033_v3 = vsub.f32 1.0, %v10293_v45  ;;  %v10489_v43 = vpop.f32.mrf.mxu1 }
 0x2bd   : > { %v10478_v0 = vclamps-f32 %v14031_v38, 0.99999  ;;  %v7048_v21 = vpop.eup %7047  ;;  %v2376_v18 = vmul.f32 %v10285_v55, %v10285_v55  ;;  %14034 = vst [vmem:[#allocation199_spill] sm:$0xff] %v10489_v43  ;;  %2953 = vadd.xlane.f32.xlu0 %v2887_v33  ;;  %v3794_v27 = vmul.f32 0.6931472, %v7042_v54  ;;  %v10493_v50 = vadd.f32 1.0, %v10175_v10  ;;  %v10495_v26 = vpop.f32.mrf.mxu0 }
 0x2be   : > { %7069 = vlog2.f32 %v14033_v3  ;;  %v7050_v59 = vpop.eup %7049  ;;  %14035 = vst [vmem:[#allocation200_spill] sm:$0xff] %v10495_v26  ;;  %v10497_v45 = vpop.xlane.xlu0 %1913  ;;  %v3884_v3 = vsub.f32 %v3652_v36, %v3796_v15  ;;  %v3656_v12 = vmul.f32 0.6931472, %v7044_v57  ;;  %v3800_v38 = vmul.f32 0.6931472, %v7046_v47 }
 0x2bf   : > { %7071 = vlog2.f32 %v10344_v29  ;;  %v7052_v46 = vpop.eup %7051  ;;  %14036 = vst [vmem:[#allocation201_spill] sm:$0xff] %v10497_v45  ;;  %v14037_v1 = vsub.f32 1.0, %v10306_v16  ;;  %v2375_v54 = vmul.f32 %v10333_v25, %v10333_v25  ;;  %2445 = vadd.xlane.f32.xlu1 %v2376_v18  ;;  %v10503_v29 = vmul.f32 0.5, %v3881_v53  ;;  %v10514_v57 = vpop.f32.mrf.mxu1 }
 0x2c0   : > { %v7054_v55 = vpop.eup %7053  ;;  %v10507_v33 = vadd.f32 1.0, %v10478_v0  ;;  %v3654_v45 = vmul.f32 0.6931472, %v7048_v21  ;;  %v3798_v15 = vmul.f32 0.6931472, %v7050_v59  ;;  %v14038_v47 = vsub.f32 1.0, %v10310_v14  ;;  %v10521_v21 = vpop.f32.mrf.mxu0 }
 0x2c1   : > { %7073 = vlog2.f32 %v14037_v1  ;;  %v7056_v8 = vpop.eup %7055  ;;  %v2890_v36 = vmul.f32 %v10339_v34, %v10339_v34  ;;  %14039 = vst [vmem:[#allocation202_spill] sm:$0xff] %v10514_v57  ;;  %2443 = vadd.xlane.f32.xlu0 %v2375_v54  ;;  %v3883_v53 = vsub.f32 %v3650_v19, %v3794_v27  ;;  %14041 = vst [vmem:[#allocation203_spill] sm:$0xff] %v10521_v21  ;;  %v10523_v14 = vpop.xlane.xlu1 %1963  ;;  %v14043_v25 = vsub.f32 1.0, %v10319_v44 }
 0x2c2   : > { %7075 = vlog2.f32 %v10348_v56  ;;  %v14040_v56 = vmax.f32 %v13796_v13, 1e-05  ;;  %14042 = vst [vmem:[#allocation204_spill] sm:$0xff] %v10523_v14  ;;  %v3886_v16 = vsub.f32 %v3656_v12, %v3800_v38  ;;  %v3660_v13 = vmul.f32 0.6931472, %v7052_v46  ;;  %v10539_v38 = vpop.f32.mrf.mxu1 }
 0x2c3   : > { %7077 = vlog2.f32 %v14038_v47  ;;  %v7058_v1 = vpop.eup %7057  ;;  %v10525_v47 = vmul.f32 0.5, %v3884_v3  ;;  %2959 = vadd.xlane.f32.xlu1 %v2890_v36  ;;  %v3804_v27 = vmul.f32 0.6931472, %v7054_v55  ;;  %v3885_v14 = vsub.f32 %v3654_v45, %v3798_v15  ;;  %14046 = vst [vmem:[#allocation206_spill] sm:$0xff] %v10539_v38 }
 0x2c4   : > { %7079 = vlog2.f32 %v10362_v30  ;;  %v10519_v18 = vclamps-f32 %v14040_v56, 0.99999  ;;  %v7060_v59 = vpop.eup %7059  ;;  %v2889_v30 = vmul.f32 %v10378_v61, %v10378_v61  ;;  %v10533_v56 = vpop.xlane.xlu0 %1961  ;;  %v3658_v3 = vmul.f32 0.6931472, %v7056_v8 }
 0x2c5   : > { %7081 = vlog2.f32 %v14043_v25  ;;  %v7062_v19 = vpop.eup %7061  ;;  %14044 = vst [vmem:[#allocation205_spill] sm:$0xff] %v10533_v56  ;;  %v3802_v34 = vmul.f32 0.6931472, %v7058_v1  ;;  %v14045_v12 = vsub.f32 1.0, %v10355_v7  ;;  %v2378_v25 = vmul.f32 %v10370_v6, %v10370_v6  ;;  %v10547_v8 = vpop.f32.mrf.mxu0  ;;  %v14071_v6 = vld [vmem:[#allocation28_spill] sm:$0xff] }
 0x2c6   : > { %7083 = vlog2.f32 %v10394_v32  ;;  %v7064_v44 = vpop.eup %7063  ;;  %2957 = vadd.xlane.f32.xlu0 %v2889_v30  ;;  %v10541_v36 = vmul.f32 0.5, %v3883_v53  ;;  %v10545_v55 = vadd.f32 1.0, %v10519_v18  ;;  %14047 = vst [vmem:[#allocation207_spill] sm:$0xff] %v10547_v8  ;;  %v3664_v46 = vmul.f32 0.6931472, %v7060_v59 }
 0x2c7   : > { %7085 = vlog2.f32 %v14045_v12  ;;  %v3808_v7 = vmul.f32 0.6931472, %v7062_v19  ;;  %v14048_v45 = vsub.f32 1.0, %v10366_v31  ;;  %v14049_v15 = vmax.f32 %v13793_v41, 1e-05  ;;  %2449 = vadd.xlane.f32.xlu1 %v2378_v25  ;;  %v10562_v19 = vpop.xlane.xlu1 %1919 }
 0x2c8   : > { %7087 = vlog2.f32 %v10403_v2  ;;  %v7066_v32 = vpop.eup %7065  ;;  %v2377_v53 = vmul.f32 %v10407_v24, %v10407_v24  ;;  %v3888_v2 = vsub.f32 %v3660_v13, %v3804_v27  ;;  %v14050_v12 = vmax.f32 %v13807_v58, 1e-05  ;;  %v10571_v27 = vpop.f32.mrf.mxu1 }
 0x2c9   : > { %7089 = vlog2.f32 %v14048_v45  ;;  %v10553_v1 = vclamps-f32 %v14049_v15, 0.99999  ;;  %v7068_v59 = vpop.eup %7067  ;;  %v10564_v31 = vmul.f32 0.5, %v3886_v16  ;;  %v10566_v45 = vmul.f32 0.5, %v3885_v14  ;;  %14051 = vst [vmem:[#allocation208_spill] sm:$0xff] %v10571_v27  ;;  %v10575_v16 = vpop.f32.mrf.mxu0 }
 0x2ca   : > { %v10560_v54 = vclamps-f32 %v14050_v12, 0.99999  ;;  %v3887_v41 = vsub.f32 %v3658_v3, %v3802_v34  ;;  %7091 = vlog2.f32 %v10421_v5  ;;  %v2892_v13 = vmul.f32 %v10410_v48, %v10410_v48  ;;  %2447 = vadd.xlane.f32.xlu0 %v2377_v53  ;;  %14053 = vst [vmem:[#allocation209_spill] sm:$0xff] %v10575_v16  ;;  %v10577_v14 = vpop.xlane.xlu0 %1917 }
 0x2cb   : > { %v7070_v15 = vpop.eup %7069  ;;  %v3662_v58 = vmul.f32 0.6931472, %v7064_v44  ;;  %v3806_v25 = vmul.f32 0.6931472, %v7066_v32  ;;  %v14052_v12 = vsub.f32 1.0, %v10376_v49  ;;  %v3890_v34 = vsub.f32 %v3664_v46, %v3808_v7  ;;  %v10609_v7 = vpop.xlane.xlu1 %1967 }
 0x2cc   : > { %v7072_v30 = vpop.eup %7071  ;;  %v10581_v5 = vadd.f32 1.0, %v10553_v1  ;;  %v2891_v44 = vmul.f32 %v10433_v22, %v10433_v22  ;;  %2963 = vadd.xlane.f32.xlu1 %v2892_v13  ;;  %v10586_v49 = vmul.f32 0.5, %v3888_v2  ;;  %v14054_v32 = vsub.f32 1.0, %v10384_v28  ;;  %v10603_v28 = vpop.f32.mrf.mxu1  ;;  %14059 = vst [vmem:[#allocation212_spill] sm:$0xff] %v10609_v7 }
 0x2cd   : > { %7093 = vlog2.f32 %v14052_v12  ;;  %v10591_v53 = vadd.f32 1.0, %v10560_v54  ;;  %v14055_v12 = vmax.f32 %v13803_v20, 1e-05  ;;  %v2380_v2 = vmul.f32 %v10429_v40, %v10429_v40  ;;  %14056 = vst [vmem:[#allocation210_spill] sm:$0xff] %v10603_v28 }
 0x2ce   : > { %7095 = vlog2.f32 %v10440_v62  ;;  %v7074_v56 = vpop.eup %7073  ;;  %v10593_v62 = vmul.f32 0.5, %v3887_v41  ;;  %2961 = vadd.xlane.f32.xlu0 %v2891_v44  ;;  %v3668_v22 = vmul.f32 0.6931472, %v7068_v59  ;;  %v14057_v41 = vsub.f32 1.0, %v10388_v35 }
 0x2cf   : > { %7097 = vlog2.f32 %v14054_v32  ;;  %v7076_v46 = vpop.eup %7075  ;;  %v10599_v3 = vclamps-f32 %v14055_v12, 0.99999  ;;  %v3889_v32 = vsub.f32 %v3662_v58, %v3806_v25  ;;  %v10611_v20 = vmul.f32 0.5, %v3890_v34  ;;  %v10622_v34 = vpop.xlane.xlu0 %1965 }
 0x2d0   : > { %7099 = vlog2.f32 %v10455_v60  ;;  %v7078_v13 = vpop.eup %7077  ;;  %v10607_v60 = vpop.f32.mrf.mxu0  ;;  %v3812_v12 = vmul.f32 0.6931472, %v7070_v15  ;;  %v14061_v40 = vmax.f32 %v13819_v17, 1e-05  ;;  %v2379_v59 = vmul.f32 %v10459_v39, %v10459_v39  ;;  %2453 = vadd.xlane.f32.xlu1 %v2380_v2  ;;  %14063 = vst [vmem:[#allocation214_spill] sm:$0xff] %v10622_v34 }
 0x2d1   : > { %7101 = vlog2.f32 %v14057_v41  ;;  %v7080_v24 = vpop.eup %7079  ;;  %14058 = vst [vmem:[#allocation211_spill] sm:$0xff] %v10607_v60  ;;  %14060 = vst [vmem:[#allocation213_spill] sm:$0xff] %v10611_v20  ;;  %v3666_v35 = vmul.f32 0.6931472, %v7072_v30  ;;  %v3810_v58 = vmul.f32 0.6931472, %v7074_v56  ;;  %v10630_v2 = vpop.f32.mrf.mxu1 }
 0x2d2   : > { %7103 = vlog2.f32 %v10471_v4  ;;  %v10616_v48 = vclamps-f32 %v14061_v40, 0.99999  ;;  %v7082_v44 = vpop.eup %7081  ;;  %v14062_v25 = vsub.f32 1.0, %v10444_v42  ;;  %v3672_v15 = vmul.f32 0.6931472, %v7076_v46  ;;  %14064 = vst [vmem:[#allocation215_spill] sm:$0xff] %v10630_v2  ;;  %2451 = vadd.xlane.f32.xlu0 %v2379_v59 }
 0x2d3   : > { %v7084_v41 = vpop.eup %7083  ;;  %v3816_v7 = vmul.f32 0.6931472, %v7078_v13  ;;  %v10626_v17 = vadd.f32 1.0, %v10599_v3  ;;  %v2894_v40 = vmul.f32 %v10466_v37, %v10466_v37  ;;  %v10632_v56 = vmul.f32 0.5, %v3889_v32  ;;  %v10637_v13 = vpop.f32.mrf.mxu0 }
 0x2d4   : > { %7105 = vlog2.f32 %v14062_v25  ;;  %v7086_v4 = vpop.eup %7085  ;;  %v14066_v42 = vsub.f32 1.0, %v10478_v0  ;;  %14067 = vst [vmem:[#allocation217_spill] sm:$0xff] %v10637_v13  ;;  %v10641_v25 = vadd.f32 1.0, %v10616_v48  ;;  %v2893_v32 = vmul.f32 %v10495_v26, %v10495_v26 }
 0x2d5   : > { %7107 = vlog2.f32 %v10507_v33  ;;  %14065 = vst [vmem:[#allocation216_spill] sm:$0xff] %v10632_v56  ;;  %v7088_v46 = vpop.eup %7087  ;;  %v3892_v33 = vsub.f32 %v3668_v22, %v3812_v12  ;;  %2967 = vadd.xlane.f32.xlu1 %v2894_v40  ;;  %v3891_v0 = vsub.f32 %v3666_v35, %v3810_v58  ;;  %v14068_v59 = vsub.f32 1.0, %v10175_v10  ;;  %v10652_v22 = vpop.xlane.xlu1 %1923 }
 0x2d6   : > { %7109 = vlog2.f32 %v14066_v42  ;;  %v7090_v39 = vpop.eup %7089  ;;  %v14069_v42 = vmax.f32 %v13815_v51, 1e-05  ;;  %14070 = vst [vmem:[#allocation218_spill] sm:$0xff] %v10652_v22  ;;  %v3670_v12 = vmul.f32 0.6931472, %v7080_v24  ;;  %v2382_v35 = vmul.f32 %v10489_v43, %v10489_v43  ;;  %v10660_v58 = vpop.f32.mrf.mxu1  ;;  %2965 = vadd.xlane.f32.xlu0 %v2893_v32 }
 0x2d7   : > { %7111 = vlog2.f32 %v10493_v50  ;;  %v3894_v50 = vsub.f32 %v3672_v15, %v3816_v7  ;;  %v3814_v37 = vmul.f32 0.6931472, %v7082_v44  ;;  %v14072_v34 = vmax.f32 %v14071_v6, 1e-05  ;;  %v7092_v56 = vpop.eup %7091  ;;  %14073 = vst [vmem:[#allocation28_spill] sm:$0xff] %v10660_v58  ;;  %v10665_v24 = vpop.xlane.xlu0 %1921 }
 0x2d8   : > { %7113 = vlog2.f32 %v14068_v59  ;;  %v10650_v30 = vclamps-f32 %v14069_v42, 0.99999  ;;  %v3676_v10 = vmul.f32 0.6931472, %v7084_v41  ;;  %v3820_v51 = vmul.f32 0.6931472, %v7086_v4  ;;  %v10663_v59 = vpop.f32.mrf.mxu0 }
 0x2d9   : > { %v10656_v61 = vclamps-f32 %v14072_v34, 0.99999  ;;  %7115 = vlog2.f32 %v10545_v55  ;;  %14074 = vst [vmem:[#allocation219_spill] sm:$0xff] %v10663_v59  ;;  %14075 = vst [vmem:[#allocation220_spill] sm:$0xff] %v10665_v24  ;;  %v10667_v7 = vmul.f32 0.5, %v3892_v33  ;;  %v14077_v34 = vsub.f32 1.0, %v10519_v18  ;;  %2457 = vadd.xlane.f32.xlu1 %v2382_v35  ;;  %v10684_v35 = vpop.f32.mrf.mxu1 }
 0x2da   : > { %v7094_v40 = vpop.eup %7093  ;;  %v3674_v6 = vmul.f32 0.6931472, %v7088_v46  ;;  %v3818_v44 = vmul.f32 0.6931472, %v7090_v39  ;;  %v2381_v32 = vmul.f32 %v10514_v57, %v10514_v57  ;;  %v10673_v41 = vmul.f32 0.5, %v3891_v0  ;;  %14081 = vst [vmem:[#allocation224_spill] sm:$0xff] %v10684_v35  ;;  %v10688_v57 = vpop.f32.mrf.mxu0 }
 0x2db   : > { %14076 = vst [vmem:[#allocation221_spill] sm:$0xff] %v10667_v7  ;;  %7117 = vlog2.f32 %v14077_v34  ;;  %v7096_v15 = vpop.eup %7095  ;;  %v3619_v55 = vadd.f32 1.0, %v10650_v30  ;;  %v10677_v42 = vmul.f32 0.5, %v3894_v50  ;;  %v3893_v33 = vsub.f32 %v3670_v12, %v3814_v37  ;;  %14082 = vst [vmem:[#allocation225_spill] sm:$0xff] %v10688_v57  ;;  %v10690_v37 = vpop.xlane.xlu1 %1971 }
 0x2dc   : > { %14078 = vst [vmem:[#allocation222_spill] sm:$0xff] %v10673_v41  ;;  %7119 = vlog2.f32 %v10581_v5  ;;  %v7098_v4 = vpop.eup %7097  ;;  %v14080_v39 = vsub.f32 1.0, %v10553_v1  ;;  %v3763_v18 = vsub.f32 1.0, %v10650_v30  ;;  %v2896_v34 = vmul.f32 %v10521_v21, %v10521_v21  ;;  %2455 = vadd.xlane.f32.xlu0 %v2381_v32  ;;  %14083 = vst [vmem:[#allocation226_spill] sm:$0xff] %v10690_v37 }
 0x2dd   : > { %14079 = vst [vmem:[#allocation223_spill] sm:$0xff] %v10677_v42  ;;  %v7100_v46 = vpop.eup %7099  ;;  %v3896_v0 = vsub.f32 %v3676_v10, %v3820_v51  ;;  %v3622_v5 = vadd.f32 1.0, %v10656_v61  ;;  %v3895_v1 = vsub.f32 %v3674_v6, %v3818_v44  ;;  %v14084_v30 = vsub.f32 1.0, %v10560_v54  ;;  %v10702_v6 = vpop.xlane.xlu0 %1969 }
 0x2de   : > { %7121 = vlog2.f32 %v14080_v39  ;;  %v7102_v50 = vpop.eup %7101  ;;  %v3766_v12 = vsub.f32 1.0, %v10656_v61  ;;  %v14085_v39 = vld [vmem:[#allocation27_spill] sm:$0xff]  ;;  %2971 = vadd.xlane.f32.xlu1 %v2896_v34  ;;  %v10699_v10 = vmul.f32 0.6931472, %v7092_v56  ;;  %v3824_v51 = vmul.f32 0.6931472, %v7094_v40  ;;  %v10712_v34 = vpop.f32.mrf.mxu1 }
 0x2df   : > { %7123 = vlog2.f32 %v10591_v53  ;;  %v14086_v21 = vmax.f32 %v14085_v39, 1e-05  ;;  %v7104_v32 = vpop.eup %7103  ;;  %v2895_v53 = vmul.f32 %v10547_v8, %v10547_v8  ;;  %14087 = vst [vmem:[#allocation27_spill] sm:$0xff] %v10702_v6  ;;  %v3678_v54 = vmul.f32 0.6931472, %v7096_v15 }
 0x2e0   : > { %7125 = vlog2.f32 %v14084_v30  ;;  %v3822_v44 = vmul.f32 0.6931472, %v7098_v4  ;;  %v14088_v61 = vsub.f32 1.0, %v10599_v3  ;;  %v14089_v30 = vld [vmem:[#allocation32_spill] sm:$0xff]  ;;  %v2384_v56 = vmul.f32 %v10539_v38, %v10539_v38  ;;  %v10719_v3 = vpop.f32.mrf.mxu0  ;;  %v10728_v38 = vpop.xlane.xlu1 %1927 }
 0x2e1   : > { %v5894_v43 = vclamps-f32 %v14086_v21, 0.99999  ;;  %7127 = vlog2.f32 %v10626_v17  ;;  %v7106_v37 = vpop.eup %7105  ;;  %v14090_v21 = vmax.f32 %v14089_v30, 1e-05  ;;  %14091 = vst [vmem:[#allocation32_spill] sm:$0xff] %v10712_v34  ;;  %2969 = vadd.xlane.f32.xlu0 %v2895_v53  ;;  %v10714_v17 = vmul.f32 0.5, %v3893_v33 }
 0x2e2   : > { %7129 = vlog2.f32 %v14088_v61  ;;  %v7108_v26 = vpop.eup %7107  ;;  %v10716_v40 = vmul.f32 0.5, %v3896_v0  ;;  %14094 = vst [vmem:[#allocation229_spill] sm:$0xff] %v10719_v3  ;;  %v10721_v4 = vmul.f32 0.5, %v3895_v1  ;;  %v14096_v61 = vsub.f32 1.0, %v10616_v48  ;;  %2461 = vadd.xlane.f32.xlu1 %v2384_v56  ;;  %14097 = vst [vmem:[#allocation231_spill] sm:$0xff] %v10728_v38 }
 0x2e3   : > { %v10708_v39 = vclamps-f32 %v14090_v21, 0.99999  ;;  %14092 = vst [vmem:[#allocation227_spill] sm:$0xff] %v10714_v17  ;;  %7131 = vlog2.f32 %v10641_v25  ;;  %v7110_v15 = vpop.eup %7109  ;;  %v3621_v30 = vadd.f32 1.0, %v5894_v43  ;;  %v3765_v21 = vsub.f32 1.0, %v5894_v43 }
 0x2e4   : > { %14093 = vst [vmem:[#allocation228_spill] sm:$0xff] %v10716_v40  ;;  %14095 = vst [vmem:[#allocation230_spill] sm:$0xff] %v10721_v4  ;;  %7133 = vlog2.f32 %v14096_v61  ;;  %v7112_v6 = vpop.eup %7111  ;;  %v2383_v53 = vmul.f32 %v10571_v27, %v10571_v27  ;;  %v3898_v33 = vsub.f32 %v10699_v10, %v3824_v51  ;;  %v3684_v0 = vmul.f32 0.6931472, %v7100_v46  ;;  %v10733_v61 = vpop.f32.mrf.mxu1 }
 0x2e5   : > { %7135 = vlog2.f32 %v3619_v55  ;;  %v7114_v25 = vpop.eup %7113  ;;  %v3897_v8 = vsub.f32 %v3678_v54, %v3822_v44  ;;  %v3828_v1 = vmul.f32 0.6931472, %v7102_v50  ;;  %v3624_v48 = vadd.f32 1.0, %v10708_v39  ;;  %14098 = vst [vmem:[#allocation232_spill] sm:$0xff] %v10733_v61  ;;  %v10735_v46 = vpop.f32.mrf.mxu0 }
 0x2e6   : > { %7137 = vlog2.f32 %v3763_v18  ;;  %v2898_v43 = vmul.f32 %v10575_v16, %v10575_v16  ;;  %2459 = vadd.xlane.f32.xlu0 %v2383_v53  ;;  %v3682_v27 = vmul.f32 0.6931472, %v7104_v32  ;;  %v3826_v56 = vmul.f32 0.6931472, %v7106_v37  ;;  %v7116_v10 = vpop.eup %7115  ;;  %14099 = vst [vmem:[#allocation233_spill] sm:$0xff] %v10735_v46  ;;  %v10737_v55 = vpop.xlane.xlu0 %1925  ;;  %v14101_v18 = vld [vmem:[#allocation31_spill] sm:$0xff] }
 0x2e7   : > { %7139 = vlog2.f32 %v3622_v5  ;;  %14100 = vst [vmem:[#allocation234_spill] sm:$0xff] %v10737_v55  ;;  %v3688_v51 = vmul.f32 0.6931472, %v7108_v26  ;;  %v3832_v54 = vmul.f32 0.6931472, %v7110_v15  ;;  %v2897_v16 = vmul.f32 %v10607_v60, %v10607_v60  ;;  %v10745_v53 = vpop.xlane.xlu1 %1975  ;;  %v10754_v60 = vpop.f32.mrf.mxu1 }
 0x2e8   : > { %7141 = vlog2.f32 %v3766_v12  ;;  %v14102_v50 = vmax.f32 %v14101_v18, 1e-05  ;;  %v7118_v4 = vpop.eup %7117  ;;  %2975 = vadd.xlane.f32.xlu1 %v2898_v43  ;;  %v3686_v32 = vmul.f32 0.6931472, %v7112_v6  ;;  %v3830_v37 = vmul.f32 0.6931472, %v7114_v25 }
 0x2e9   : > { %7143 = vlog2.f32 %v3621_v30  ;;  %v7120_v5 = vpop.eup %7119  ;;  %14103 = vst [vmem:[#allocation31_spill] sm:$0xff] %v10745_v53  ;;  %v3900_v40 = vsub.f32 %v3684_v0, %v3828_v1  ;;  %v3768_v26 = vsub.f32 1.0, %v10708_v39  ;;  %v14104_v12 = vld [vmem:[#allocation36_spill] sm:$0xff]  ;;  %v2386_v17 = vmul.f32 %v10603_v28, %v10603_v28 }
 0x2ea   : > { %v10741_v44 = vclamps-f32 %v14102_v50, 0.99999  ;;  %7145 = vlog2.f32 %v3765_v21  ;;  %v14105_v15 = vmax.f32 %v14104_v12, 1e-05  ;;  %14106 = vst [vmem:[#allocation36_spill] sm:$0xff] %v10754_v60  ;;  %2973 = vadd.xlane.f32.xlu0 %v2897_v16  ;;  %v10756_v6 = vmul.f32 0.5, %v3898_v33  ;;  %v10760_v21 = vpop.f32.mrf.mxu0  ;;  %v10762_v39 = vpop.xlane.xlu0 %1973 }
 0x2eb   : > { %v7122_v50 = vpop.eup %7121  ;;  %v10758_v30 = vmul.f32 0.5, %v3897_v8  ;;  %v3899_v25 = vsub.f32 %v3682_v27, %v3826_v56  ;;  %14109 = vst [vmem:[#allocation237_spill] sm:$0xff] %v10760_v21  ;;  %14110 = vst [vmem:[#allocation238_spill] sm:$0xff] %v10762_v39  ;;  %v3902_v1 = vsub.f32 %v3688_v51, %v3832_v54  ;;  %v10764_v43 = vmul.f32 0.6931472, %v7116_v10  ;;  %v10775_v39 = vpop.xlane.xlu1 %1931 }
 0x2ec   : > { %v10750_v18 = vclamps-f32 %v14105_v15, 0.99999  ;;  %14107 = vst [vmem:[#allocation235_spill] sm:$0xff] %v10756_v6  ;;  %v7124_v0 = vpop.eup %7123  ;;  %v10766_v12 = vmul.f32 0.6931472, %v7118_v4  ;;  %v14111_v15 = vld [vmem:[#allocation35_spill] sm:$0xff]  ;;  %v2385_v8 = vmul.f32 %v10630_v2, %v10630_v2  ;;  %2465 = vadd.xlane.f32.xlu1 %v2386_v17  ;;  %v3901_v27 = vsub.f32 %v3686_v32, %v3830_v37 }
 0x2ed   : > { %14108 = vst [vmem:[#allocation236_spill] sm:$0xff] %v10758_v30  ;;  %v14112_v53 = vmax.f32 %v14111_v15, 1e-05  ;;  %v7126_v16 = vpop.eup %7125  ;;  %7147 = vlog2.f32 %v3624_v48  ;;  %v3623_v33 = vadd.f32 1.0, %v10741_v44  ;;  %14113 = vst [vmem:[#allocation35_spill] sm:$0xff] %v10775_v39  ;;  %v10777_v10 = vmul.f32 0.5, %v3900_v40  ;;  %v10783_v15 = vpop.f32.mrf.mxu1 }
 0x2ee   : > { %v7128_v56 = vpop.eup %7127  ;;  %7149 = vlog2.f32 %v3768_v26  ;;  %v3767_v4 = vsub.f32 1.0, %v10741_v44  ;;  %v3626_v51 = vadd.f32 1.0, %v10750_v18  ;;  %14115 = vst [vmem:[#allocation240_spill] sm:$0xff] %v10783_v15  ;;  %2463 = vadd.xlane.f32.xlu0 %v2385_v8  ;;  %v10785_v17 = vmul.f32 0.5, %v3899_v25  ;;  %v14117_v32 = vld [vmem:[#allocation40_spill] sm:$0xff]  ;;  %v10790_v26 = vpop.f32.mrf.mxu0 }
 0x2ef   : > { %v10770_v28 = vclamps-f32 %v14112_v53, 0.99999  ;;  %14114 = vst [vmem:[#allocation239_spill] sm:$0xff] %v10777_v10  ;;  %v7130_v54 = vpop.eup %7129  ;;  %v2900_v53 = vmul.f32 %v10637_v13, %v10637_v13  ;;  %v3770_v48 = vsub.f32 1.0, %v10750_v18  ;;  %v14118_v37 = vmax.f32 %v14117_v32, 1e-05  ;;  %v10792_v44 = vpop.xlane.xlu0 %1929 }
 0x2f0   : > { %14116 = vst [vmem:[#allocation241_spill] sm:$0xff] %v10785_v17  ;;  %v7132_v2 = vpop.eup %7131  ;;  %14119 = vst [vmem:[#allocation40_spill] sm:$0xff] %v10790_v26  ;;  %v10794_v10 = vmul.f32 0.5, %v3902_v1  ;;  %v3904_v13 = vsub.f32 %v10764_v43, %v10766_v12  ;;  %v10798_v30 = vmul.f32 0.6931472, %v7120_v5  ;;  %v2899_v18 = vmul.f32 %v10663_v59, %v10663_v59  ;;  %v10807_v1 = vpop.xlane.xlu1 %1979 }
 0x2f1   : > { %v5901_v40 = vclamps-f32 %v14118_v37, 0.99999  ;;  %14120 = vst [vmem:[#allocation242_spill] sm:$0xff] %v10792_v44  ;;  %v3625_v25 = vadd.f32 1.0, %v10770_v28  ;;  %v7134_v8 = vpop.eup %7133  ;;  %2979 = vadd.xlane.f32.xlu1 %v2900_v53  ;;  %v10803_v32 = vmul.f32 0.5, %v3901_v27  ;;  %7151 = vlog2.f32 %v3623_v33  ;;  %14123 = vst [vmem:[#allocation245_spill] sm:$0xff] %v10807_v1  ;;  %v10816_v53 = vpop.f32.mrf.mxu1 }
 0x2f2   : > { %14121 = vst [vmem:[#allocation243_spill] sm:$0xff] %v10794_v10  ;;  %v10805_v37 = vmul.f32 0.6931472, %v7122_v50  ;;  %v7136_v17 = vpop.eup %7135  ;;  %v10809_v10 = vmul.f32 0.6931472, %v7124_v0  ;;  %7153 = vlog2.f32 %v3767_v4  ;;  %v3769_v5 = vsub.f32 1.0, %v10770_v28  ;;  %2977 = vadd.xlane.f32.xlu0 %v2899_v18  ;;  %v10820_v0 = vpop.f32.mrf.mxu0 }
 0x2f3   : > { %14122 = vst [vmem:[#allocation244_spill] sm:$0xff] %v10803_v32  ;;  %v10811_v43 = vmul.f32 0.6931472, %v7126_v16  ;;  %v7138_v12 = vpop.eup %7137  ;;  %v2388_v59 = vmul.f32 %v10660_v58, %v10660_v58  ;;  %14124 = vst [vmem:[#allocation246_spill] sm:$0xff] %v10816_v53  ;;  %7155 = vlog2.f32 %v3626_v51  ;;  %v3628_v50 = vadd.f32 1.0, %v5901_v40  ;;  %v14125_v27 = vld [vmem:[#allocation39_spill] sm:$0xff]  ;;  %v10822_v16 = vpop.xlane.xlu0 %1977 }
 0x2f4   : > { %v14126_v33 = vmax.f32 %v14125_v27, 1e-05  ;;  %v7140_v1 = vpop.eup %7139  ;;  %14127 = vst [vmem:[#allocation39_spill] sm:$0xff] %v10820_v0  ;;  %14128 = vst [vmem:[#allocation247_spill] sm:$0xff] %v10822_v16  ;;  %v10824_v4 = vmul.f32 0.6931472, %v7128_v56  ;;  %7157 = vlog2.f32 %v3770_v48  ;;  %v2387_v18 = vmul.f32 %v10684_v35, %v10684_v35  ;;  %v10834_v39 = vpop.xlane.xlu1 %1935 }
 0x2f5   : > { %v10826_v28 = vmul.f32 0.6931472, %v7130_v54  ;;  %v3772_v6 = vsub.f32 1.0, %v5901_v40  ;;  %v7142_v58 = vpop.eup %7141  ;;  %2469 = vadd.xlane.f32.xlu1 %v2388_v59  ;;  %v10830_v51 = vmul.f32 0.6931472, %v7132_v2  ;;  %7159 = vlog2.f32 %v3625_v25  ;;  %v14129_v27 = vld [vmem:[#allocation44_spill] sm:$0xff]  ;;  %v10838_v55 = vpop.f32.mrf.mxu1 }
 0x2f6   : > { %v5900_v32 = vclamps-f32 %v14126_v33, 0.99999  ;;  %v14130_v33 = vmax.f32 %v14129_v27, 1e-05  ;;  %v7144_v42 = vpop.eup %7143  ;;  %14131 = vst [vmem:[#allocation44_spill] sm:$0xff] %v10834_v39  ;;  %7161 = vlog2.f32 %v3769_v5  ;;  %v2902_v40 = vmul.f32 %v10688_v57, %v10688_v57  ;;  %14132 = vst [vmem:[#allocation248_spill] sm:$0xff] %v10838_v55  ;;  %2467 = vadd.xlane.f32.xlu0 %v2387_v18  ;;  %v10840_v25 = vpop.f32.mrf.mxu0 }
 0x2f7   : > { %v3844_v56 = vmul.f32 0.6931472, %v7134_v8  ;;  %v3698_v16 = vmul.f32 0.6931472, %v7136_v17  ;;  %v3842_v54 = vmul.f32 0.6931472, %v7138_v12  ;;  %v7146_v48 = vpop.eup %7145  ;;  %7163 = vlog2.f32 %v3628_v50  ;;  %v10842_v27 = vpop.xlane.xlu0 %1933 }
 0x2f8   : > { %v5903_v44 = vclamps-f32 %v14130_v33, 0.99999  ;;  %v3704_v2 = vmul.f32 0.6931472, %v7140_v1  ;;  %v3627_v59 = vadd.f32 1.0, %v5900_v32  ;;  %14133 = vst [vmem:[#allocation249_spill] sm:$0xff] %v10840_v25  ;;  %7165 = vlog2.f32 %v3772_v6  ;;  %v10852_v39 = vpop.xlane.xlu1 %1983 }
 0x2f9   : > { %14134 = vst [vmem:[#allocation250_spill] sm:$0xff] %v10842_v27  ;;  %v3848_v33 = vmul.f32 0.6931472, %v7142_v58  ;;  %v3771_v8 = vsub.f32 1.0, %v5900_v32  ;;  %v14135_v17 = vld [vmem:[#allocation43_spill] sm:$0xff]  ;;  %v2901_v35 = vmul.f32 %v10719_v3, %v10719_v3  ;;  %2983 = vadd.xlane.f32.xlu1 %v2902_v40  ;;  %v10848_v57 = vmul.f32 0.5, %v3904_v13  ;;  %v10860_v40 = vpop.f32.mrf.mxu1 }
 0x2fa   : > { %v14136_v12 = vmax.f32 %v14135_v17, 1e-05  ;;  %v3903_v1 = vsub.f32 %v10798_v30, %v10805_v37  ;;  %v3630_v50 = vadd.f32 1.0, %v5903_v44  ;;  %v7148_v18 = vpop.eup %7147  ;;  %14138 = vst [vmem:[#allocation251_spill] sm:$0xff] %v10852_v39  ;;  %v3906_v58 = vsub.f32 %v10809_v10, %v10811_v43  ;;  %14139 = vst [vmem:[#allocation252_spill] sm:$0xff] %v10860_v40  ;;  %v10863_v39 = vpop.f32.mrf.mxu0  ;;  %v14166_v27 = vld [vmem:[#allocation55_spill] sm:$0xff] }
 0x2fb   : > { %14137 = vst [vmem:[#allocation43_spill] sm:$0xff] %v10848_v57  ;;  %v3905_v6 = vsub.f32 %v10824_v4, %v10826_v28  ;;  %v3702_v32 = vmul.f32 0.6931472, %v7144_v42  ;;  %v3846_v17 = vmul.f32 0.6931472, %v7146_v48  ;;  %v2390_v13 = vmul.f32 %v10712_v34, %v10712_v34  ;;  %2981 = vadd.xlane.f32.xlu0 %v2901_v35  ;;  %14140 = vst [vmem:[#allocation253_spill] sm:$0xff] %v10863_v39  ;;  %v10865_v3 = vpop.xlane.xlu0 %1981 }
 0x2fc   : > { %v5902_v5 = vclamps-f32 %v14136_v12, 0.99999  ;;  %v7150_v12 = vpop.eup %7149  ;;  %v3908_v30 = vsub.f32 %v10830_v51, %v3844_v56  ;;  %7167 = vlog2.f32 %v3627_v59  ;;  %v3774_v37 = vsub.f32 1.0, %v5903_v44  ;;  %14141 = vst [vmem:[#allocation254_spill] sm:$0xff] %v10865_v3  ;;  %v2406_v51 = vpop.xlane.xlu1 %2405  ;;  %v14143_v3 = vld [vmem:[#allocation48_spill] sm:$0xff] }
 0x2fd   : > { %v3907_v10 = vsub.f32 %v3698_v16, %v3842_v54  ;;  %v3910_v43 = vsub.f32 %v3704_v2, %v3848_v33  ;;  %7169 = vlog2.f32 %v3771_v8  ;;  %v2389_v4 = vmul.f32 %v10733_v61, %v10733_v61  ;;  %2473 = vadd.xlane.f32.xlu1 %v2390_v13  ;;  %v10879_v8 = vpop.f32.mrf.mxu1 }
 0x2fe   : > { %v3629_v42 = vadd.f32 1.0, %v5902_v5  ;;  %v10869_v28 = vmul.f32 0.5, %v3903_v1  ;;  %7171 = vlog2.f32 %v3630_v50  ;;  %v3773_v35 = vsub.f32 1.0, %v5902_v5  ;;  %v7152_v48 = vpop.eup %7151  ;;  %14145 = vst [vmem:[#allocation48_spill] sm:$0xff] %v10879_v8 }
 0x2ff   : > { %v3909_v56 = vsub.f32 %v3702_v32, %v3846_v17  ;;  %v10871_v44 = vmul.f32 0.6931472, %v7148_v18  ;;  %v10873_v59 = vmul.f32 0.6931472, %v7150_v12  ;;  %v14144_v16 = vmax.f32 %v14143_v3, 1e-05  ;;  %v7154_v2 = vpop.eup %7153  ;;  %2471 = vadd.xlane.f32.xlu0 %v2389_v4  ;;  %v10885_v18 = vpop.f32.mrf.mxu0 }
 0x300   : > { %14142 = vst [vmem:[#allocation255_spill] sm:$0xff] %v10869_v28  ;;  %v2904_v33 = vmul.f32 %v10735_v46, %v10735_v46  ;;  %v10881_v1 = vmul.f32 0.5, %v3906_v58  ;;  %v10883_v5 = vmul.f32 0.5, %v3905_v6  ;;  %7173 = vlog2.f32 %v3774_v37  ;;  %v7156_v50 = vpop.eup %7155  ;;  %14148 = vst [vmem:[#allocation258_spill] sm:$0xff] %v10885_v18  ;;  %v2404_v32 = vpop.xlane.xlu0 %2403  ;;  %v14152_v58 = vld [vmem:[#allocation25_spill] sm:$0xff]  ;;  %v14153_v6 = vld [vmem:[#allocation47_spill] sm:$0xff] }
 0x301   : > { %v5905_v54 = vclamps-f32 %v14144_v16, 0.99999  ;;  %v10887_v17 = vmul.f32 0.5, %v3908_v30  ;;  %v10889_v3 = vmul.f32 0.5, %v3907_v10  ;;  %v10891_v12 = vmul.f32 0.5, %v3910_v43  ;;  %v7158_v13 = vpop.eup %7157  ;;  %v2920_v34 = vpop.xlane.xlu1 %2919  ;;  %v14165_v28 = vld [vmem:[#allocation118_spill] sm:$0xff] }
 0x302   : > { %14146 = vst [vmem:[#allocation256_spill] sm:$0xff] %v10881_v1  ;;  %14147 = vst [vmem:[#allocation257_spill] sm:$0xff] %v10883_v5  ;;  %7175 = vlog2.f32 %v3629_v42  ;;  %v2903_v4 = vmul.f32 %v10760_v21, %v10760_v21  ;;  %v2500_v16 = vadd.f32 %v2406_v51, %v14152_v58  ;;  %2987 = vadd.xlane.f32.xlu1 %v2904_v33  ;;  %v14154_v37 = vmax.f32 %v14153_v6, 1e-05  ;;  %v7160_v46 = vpop.eup %7159  ;;  %v10906_v51 = vpop.f32.mrf.mxu1 }
 0x303   : > { %14149 = vst [vmem:[#allocation259_spill] sm:$0xff] %v10887_v17  ;;  %14150 = vst [vmem:[#allocation260_spill] sm:$0xff] %v10889_v3  ;;  %7177 = vlog2.f32 %v3773_v35  ;;  %v10898_v30 = vmul.f32 0.5, %v3909_v56  ;;  %v10902_v43 = vmul.f32 0.6931472, %v7152_v48  ;;  %v3632_v42 = vadd.f32 1.0, %v5905_v54  ;;  %v10912_v6 = vpop.f32.mrf.mxu0 }
 0x304   : > { %14151 = vst [vmem:[#allocation261_spill] sm:$0xff] %v10891_v12  ;;  %v5904_v61 = vclamps-f32 %v14154_v37, 0.99999  ;;  %v7162_v12 = vpop.eup %7161  ;;  %v2392_v21 = vmul.f32 %v10754_v60, %v10754_v60  ;;  %14156 = vst [vmem:[#allocation47_spill] sm:$0xff] %v10906_v51  ;;  %v10908_v35 = vadd.f32 %v2920_v34, %v2500_v16  ;;  %2985 = vadd.xlane.f32.xlu0 %v2903_v4  ;;  %v10910_v33 = vmul.f32 0.6931472, %v7154_v2  ;;  %v2918_v48 = vpop.xlane.xlu0 %2917 }
 0x305   : > { %14155 = vst [vmem:[#allocation25_spill] sm:$0xff] %v10898_v30  ;;  %v3776_v58 = vsub.f32 1.0, %v5905_v54  ;;  %v7164_v56 = vpop.eup %7163  ;;  %14157 = vst [vmem:[#allocation262_spill] sm:$0xff] %v10912_v6  ;;  %v14158_v37 = vld [vmem:[#allocation22_spill] sm:$0xff]  ;;  %v10915_v30 = vmul.f32 0.6931472, %v7156_v50  ;;  %v2391_v34 = vmul.f32 %v10783_v15, %v10783_v15  ;;  %v2394_v41 = vmul.f32 %v10816_v53, %v10816_v53 }
 0x306   : > { %v2499_v10 = vadd.f32 %v2404_v32, %v14158_v37  ;;  %v10917_v3 = vmul.f32 0.6931472, %v7158_v13  ;;  %v14159_v17 = vld [vmem:[#allocation53_spill] sm:$0xff]  ;;  %v7166_v1 = vpop.eup %7165  ;;  %7179 = vrsqrt.f32 %v10908_v35  ;;  %2477 = vadd.xlane.f32.xlu1 %v2392_v21  ;;  %v3710_v54 = vmul.f32 0.6931472, %v7160_v46  ;;  %v2410_v32 = vpop.xlane.xlu1 %2409  ;;  %v14162_v37 = vld [vmem:[#allocation52_spill] sm:$0xff] }
 0x307   : > { %v14160_v60 = vmax.f32 %v14159_v17, 1e-05  ;;  %v3631_v2 = vadd.f32 1.0, %v5904_v61  ;;  %v3854_v16 = vmul.f32 0.6931472, %v7162_v12  ;;  %7181 = vlog2.f32 %v3632_v42  ;;  %v10928_v17 = vpop.f32.mrf.mxu1 }
 0x308   : > { %v10924_v4 = vadd.f32 %v2918_v48, %v2499_v10  ;;  %v3775_v50 = vsub.f32 1.0, %v5904_v61  ;;  %v2906_v13 = vmul.f32 %v10790_v26, %v10790_v26  ;;  %14161 = vst [vmem:[#allocation22_spill] sm:$0xff] %v10928_v17  ;;  %2475 = vadd.xlane.f32.xlu0 %v2391_v34  ;;  %7183 = vlog2.f32 %v3776_v58  ;;  %v10934_v10 = vpop.f32.mrf.mxu0  ;;  %v2408_v12 = vpop.xlane.xlu0 %2407 }
 0x309   : > { %v5907_v5 = vclamps-f32 %v14160_v60, 0.99999  ;;  %v3911_v60 = vsub.f32 %v10902_v43, %v10910_v33  ;;  %v14163_v21 = vmax.f32 %v14162_v37, 1e-05  ;;  %v7168_v15 = vpop.eup %7167  ;;  %14164 = vst [vmem:[#allocation53_spill] sm:$0xff] %v10934_v10  ;;  %v2905_v34 = vmul.f32 %v10820_v0, %v10820_v0  ;;  %v10948_v0 = vpop.f32.mrf.mxu1 }
 0x30a   : > { %7185 = vrsqrt.f32 %v10924_v4  ;;  %v3716_v61 = vmul.f32 0.6931472, %v7164_v56  ;;  %v3860_v42 = vmul.f32 0.6931472, %v7166_v1  ;;  %v7170_v26 = vpop.eup %7169  ;;  %v2502_v57 = vadd.f32 %v2410_v32, %v14165_v28  ;;  %2991 = vadd.xlane.f32.xlu1 %v2906_v13  ;;  %v2924_v58 = vpop.xlane.xlu1 %2923  ;;  %14168 = vst [vmem:[#allocation52_spill] sm:$0xff] %v10948_v0 }
 0x30b   : > { %v5906_v46 = vclamps-f32 %v14163_v21, 0.99999  ;;  %v3634_v48 = vadd.f32 1.0, %v5907_v5  ;;  %v3914_v43 = vsub.f32 %v10915_v30, %v10917_v3  ;;  %7187 = vlog2.f32 %v3631_v2  ;;  %v7172_v33 = vpop.eup %7171 }
 0x30c   : > { %v3913_v37 = vsub.f32 %v3710_v54, %v3854_v16  ;;  %7189 = vlog2.f32 %v3775_v50  ;;  %v3778_v21 = vsub.f32 1.0, %v5907_v5  ;;  %v14167_v56 = vmax.f32 %v14166_v27, 1e-05  ;;  %2989 = vadd.xlane.f32.xlu0 %v2905_v34  ;;  %v10956_v54 = vpop.f32.mrf.mxu0  ;;  %v14172_v5 = vld [vmem:[#allocation121_spill] sm:$0xff]  ;;  %v2922_v27 = vpop.xlane.xlu0 %2921 }
 0x30d   : > { %v10950_v28 = vadd.f32 %v2924_v58, %v2502_v57  ;;  %v10952_v32 = vmul.f32 0.6931472, %v7168_v15  ;;  %v3633_v3 = vadd.f32 1.0, %v5906_v46  ;;  %v10954_v30 = vpop.eup %7173  ;;  %14171 = vst [vmem:[#allocation263_spill] sm:$0xff] %v10956_v54  ;;  %v2501_v2 = vadd.f32 %v2408_v12, %v14172_v5 }
 0x30e   : > { %v10944_v1 = vclamps-f32 %v14167_v56, 0.99999  ;;  %14170 = vst [vmem:[#allocation55_spill] sm:$0xff] %v10954_v30  ;;  %v3916_v16 = vsub.f32 %v3716_v61, %v3860_v42  ;;  %v10959_v50 = vmul.f32 0.6931472, %v7170_v26  ;;  %7191 = vlog2.f32 %v3634_v48  ;;  %2481 = vadd.xlane.f32.xlu1 %v2394_v41  ;;  %v2414_v26 = vpop.xlane.xlu1 %2413  ;;  %v10980_v41 = vpop.f32.mrf.mxu1 }
 0x30f   : > { %14169 = vst [vmem:[#allocation118_spill] sm:$0xff] %v10952_v32  ;;  %v10961_v13 = vpop.eup %7175  ;;  %v2393_v57 = vmul.f32 %v10838_v55, %v10838_v55  ;;  %7193 = vrsqrt.f32 %v10950_v28  ;;  %v14175_v15 = vsub.f32 %v10871_v44, %v10873_v59  ;;  %v3777_v58 = vsub.f32 1.0, %v5906_v46  ;;  %14179 = vst [vmem:[#allocation268_spill] sm:$0xff] %v10980_v41  ;;  %v10986_v46 = vpop.f32.mrf.mxu0 }
 0x310   : > { %14173 = vst [vmem:[#allocation121_spill] sm:$0xff] %v10959_v50  ;;  %14174 = vst [vmem:[#allocation264_spill] sm:$0xff] %v10961_v13  ;;  %v10971_v12 = vpop.eup %7177  ;;  %v10973_v61 = vadd.f32 %v2922_v27, %v2501_v2  ;;  %v10975_v42 = vmul.f32 0.5, %v3911_v60  ;;  %7195 = vlog2.f32 %v3778_v21  ;;  %v3636_v48 = vadd.f32 1.0, %v10944_v1  ;;  %v2412_v60 = vpop.xlane.xlu0 %2411 }
 0x311   : > { %v10969_v34 = vmul.f32 0.5, %v14175_v15  ;;  %14177 = vst [vmem:[#allocation266_spill] sm:$0xff] %v10971_v12  ;;  %v2908_v56 = vmul.f32 %v10840_v25, %v10840_v25  ;;  %2479 = vadd.xlane.f32.xlu0 %v2393_v57  ;;  %v10982_v44 = vmul.f32 0.5, %v3914_v43  ;;  %v10984_v59 = vmul.f32 0.5, %v3913_v37  ;;  %14182 = vst [vmem:[#allocation271_spill] sm:$0xff] %v10986_v46  ;;  %v14185_v43 = vld [vmem:[#allocation134_spill] sm:$0xff] }
 0x312   : > { %14178 = vst [vmem:[#allocation267_spill] sm:$0xff] %v10975_v42  ;;  %7197 = vlog2.f32 %v3633_v3  ;;  %v10989_v5 = vmul.f32 0.5, %v3916_v16  ;;  %v10993_v2 = vmul.f32 0.6931472, %v7172_v33  ;;  %v2907_v27 = vmul.f32 %v10863_v39, %v10863_v39  ;;  %v14186_v37 = vld [vmem:[#allocation54_spill] sm:$0xff]  ;;  %v2928_v39 = vpop.xlane.xlu1 %2927 }
 0x313   : > { %14176 = vst [vmem:[#allocation265_spill] sm:$0xff] %v10969_v34  ;;  %14180 = vst [vmem:[#allocation269_spill] sm:$0xff] %v10982_v44  ;;  %7199 = vrsqrt.f32 %v10973_v61  ;;  %v2504_v57 = vadd.f32 %v2414_v26, %v14185_v43  ;;  %2995 = vadd.xlane.f32.xlu1 %v2908_v56  ;;  %v14187_v3 = vmax.f32 %v14186_v37, 1e-05  ;;  %v7180_v55 = vpop.eup %7179  ;;  %v2396_v16 = vmul.f32 %v10860_v40, %v10860_v40  ;;  %v11018_v43 = vpop.f32.mrf.mxu1 }
 0x314   : > { %14181 = vst [vmem:[#allocation270_spill] sm:$0xff] %v10984_v59  ;;  %14183 = vst [vmem:[#allocation272_spill] sm:$0xff] %v10989_v5  ;;  %7201 = vlog2.f32 %v3777_v58  ;;  %v2395_v21 = vmul.f32 %v10879_v8, %v10879_v8  ;;  %v11008_v33 = vmul.f32 %v10906_v51, %v10906_v51  ;;  %v11010_v26 = vpop.eup %7181  ;;  %v2910_v58 = vmul.f32 %v10885_v18, %v10885_v18  ;;  %v11027_v8 = vpop.f32.mrf.mxu0 }
 0x315   : > { %14184 = vst [vmem:[#allocation273_spill] sm:$0xff] %v10993_v2  ;;  %v11000_v15 = vclamps-f32 %v14187_v3, 0.99999  ;;  %7203 = vlog2.f32 %v3636_v48  ;;  %14188 = vst [vmem:[#allocation134_spill] sm:$0xff] %v11010_v26  ;;  %v11016_v56 = vmul.f32 %v10928_v17, %v10928_v17  ;;  %v3069_v37 = vmul.f32 %v7180_v55, %v10908_v35  ;;  %2993 = vadd.xlane.f32.xlu0 %v2907_v27  ;;  %v11023_v51 = vpop.eup %7183  ;;  %v14192_v17 = vld [vmem:[#allocation138_spill] sm:$0xff]  ;;  %v2926_v25 = vpop.xlane.xlu0 %2925 }
 0x316   : > { %14189 = vst [vmem:[#allocation54_spill] sm:$0xff] %v11018_v43  ;;  %v11021_v3 = vadd.f32 %v2928_v39, %v2504_v57  ;;  %14190 = vst [vmem:[#allocation274_spill] sm:$0xff] %v11023_v51  ;;  %v2909_v48 = vmul.f32 %v10912_v6, %v10912_v6  ;;  %vm3070_vm0 = vcmp.eq.f32.partialorder %v10908_v35, inf  ;;  %v3073_v18 = vand.u32 2147483648, %v10908_v35 }
 0x317   : > { %14191 = vst [vmem:[#allocation275_spill] sm:$0xff] %v11027_v8  ;;  %v2503_v40 = vadd.f32 %v2412_v60, %v14192_v17  ;;  %v7186_v53 = vpop.eup %7185  ;;  %v11034_v55 = vmul.f32 %v10948_v0, %v10948_v0  ;;  %v3071_v39 = vsel %vm3070_vm0, %v10908_v35, %v3069_v37  ;;  %vm3072_vm1 = vcmp.eq.f32.partialorder %v10908_v35, 0.0  ;;  %2485 = vadd.xlane.f32.xlu1 %v2396_v16  ;;  %v2418_v0 = vpop.xlane.xlu1 %2417  ;;  %v14196_v37 = vld [vmem:[#allocation108_spill] sm:$0xff] }
 0x318   : > { %7205 = vrsqrt.f32 %v11021_v3  ;;  %v11039_v27 = vpop.eup %7187  ;;  %v11043_v57 = vmul.f32 %v10934_v10, %v10934_v10  ;;  %v11045_v17 = vsel %vm3072_vm1, %v3073_v18, %v3071_v39  ;;  %v3062_v60 = vmul.f32 %v7186_v53, %v10924_v4  ;;  %v11056_v16 = vpop.f32.mrf.mxu1 }
 0x319   : > { %14193 = vst [vmem:[#allocation138_spill] sm:$0xff] %v11039_v27  ;;  %v11048_v6 = vadd.f32 %v2926_v25, %v2503_v40  ;;  %v11050_v5 = vpop.eup %7189  ;;  %v11054_v35 = vmul.f32 %v10980_v41, %v10980_v41  ;;  %14195 = vst [vmem:[#allocation277_spill] sm:$0xff] %v11056_v16  ;;  %v3446_v59 = vmul.f32 %v14196_v37, %v11045_v17  ;;  %vm3063_vm2 = vcmp.eq.f32.partialorder %v10924_v4, inf  ;;  %v11066_v25 = vpop.f32.mrf.mxu0 }
 0x31a   : > { %14194 = vst [vmem:[#allocation276_spill] sm:$0xff] %v11050_v5  ;;  %v3066_v18 = vand.u32 2147483648, %v10924_v4  ;;  %2483 = vadd.xlane.f32.xlu0 %v2395_v21  ;;  %v11064_v53 = vmul.f32 %v10956_v54, %v10956_v54  ;;  %14197 = vst [vmem:[#allocation108_spill] sm:$0xff] %v11066_v25  ;;  %v3064_v40 = vsel %vm3063_vm2, %v10924_v4, %v3062_v60  ;;  %vm3065_vm3 = vcmp.eq.f32.partialorder %v10924_v4, 0.0  ;;  %v2416_v39 = vpop.xlane.xlu0 %2415  ;;  %v14199_v54 = vld [vmem:[#allocation153_spill] sm:$0xff] }
 0x31b   : > { %7207 = vrsqrt.f32 %v11048_v6  ;;  %v11071_v41 = vpop.eup %7191  ;;  %v11075_v37 = vmul.f32 %v11018_v43, %v11018_v43  ;;  %v3974_v21 = vmul.f32 %v10423_v52, %v3446_v59  ;;  %v2506_v44 = vadd.f32 %v2418_v0, %v14199_v54  ;;  %2999 = vadd.xlane.f32.xlu1 %v2910_v58  ;;  %v14200_v52 = vld [vmem:[#allocation125_spill] sm:$0xff] }
 0x31c   : > { %14198 = vst [vmem:[#allocation278_spill] sm:$0xff] %v11071_v41  ;;  %v11078_v10 = vsel %vm3065_vm3, %v3066_v18, %v3064_v40  ;;  %v7194_v42 = vpop.eup %7193  ;;  %v11083_v4 = vmul.f32 %v10986_v46, %v10986_v46  ;;  %v11087_v60 = vmul.f32 %v11056_v16, %v11056_v16  ;;  %v11091_v43 = vmul.f32 %v11027_v8, %v11027_v8  ;;  %v2932_v18 = vpop.xlane.xlu1 %2931 }
 0x31d   : > { %v3445_v59 = vmul.f32 %v14200_v52, %v11078_v10  ;;  %v11095_v40 = vpop.eup %7195  ;;  %v11099_v0 = vmul.f32 %v11066_v25, %v11066_v25  ;;  %v5911_v54 = vclamps-f32 %v3974_v21, 15.0  ;;  %v3083_v58 = vmul.f32 %v7194_v42, %v10950_v28 }
 0x31e   : > { %14201 = vst [vmem:[#allocation153_spill] sm:$0xff] %v11095_v40  ;;  %v11102_v46 = vadd.f32 %v2932_v18, %v2506_v44  ;;  %2997 = vadd.xlane.f32.xlu0 %v2909_v48  ;;  %vm3084_vm4 = vcmp.eq.f32.partialorder %v10950_v28, inf  ;;  %vm3086_vm5 = vcmp.eq.f32.partialorder %v10950_v28, 0.0  ;;  %v3087_v52 = vand.u32 2147483648, %v10950_v28  ;;  %v2930_v40 = vpop.xlane.xlu0 %2929  ;;  %v14203_v44 = vld [vmem:[#allocation158_spill] sm:$0xff] }
 0x31f   : > { %v11104_v16 = vpop.eup %7197  ;;  %v3973_v8 = vmul.f32 %v10448_v23, %v3445_v59  ;;  %7209 = vtanh.f32 %v5911_v54  ;;  %vm4166_vm6 = vcmp.eq.f32.partialorder %v11045_v17, 0.0  ;;  %v3085_v42 = vsel %vm3084_vm4, %v10950_v28, %v3083_v58  ;;  %2489 = vadd.xlane.f32.xlu1 %v11008_v33  ;;  %v14206_v54 = vld [vmem:[#allocation114_spill] sm:$0xff] }
 0x320   : > { %14202 = vst [vmem:[#allocation125_spill] sm:$0xff] %v11104_v16  ;;  %v7200_v34 = vpop.eup %7199  ;;  %v2505_v21 = vadd.f32 %v2416_v39, %v14203_v44  ;;  %v11116_v59 = vsel %vm3086_vm5, %v3087_v52, %v3085_v42  ;;  %7211 = vrsqrt.f32 %v11102_v46  ;;  %v2422_v25 = vpop.xlane.xlu1 %2421  ;;  %vm3077_vm7 = vcmp.eq.f32.partialorder %v10973_v61, inf  ;;  %v14208_v42 = vld [vmem:[#allocation174_spill] sm:$0xff] }
 0x321   : > { %v11114_v48 = vpop.eup %7201  ;;  %v5910_v23 = vclamps-f32 %v3973_v8, 15.0  ;;  %v3076_v18 = vmul.f32 %v7200_v34, %v10973_v61  ;;  %v3448_v41 = vmul.f32 %v14206_v54, %v11116_v59  ;;  %v3080_v28 = vand.u32 2147483648, %v10973_v61 }
 0x322   : > { %14204 = vst [vmem:[#allocation158_spill] sm:$0xff] %v11114_v48  ;;  %v11120_v16 = vpop.eup %7203  ;;  %v11126_v33 = vadd.f32 %v2930_v40, %v2505_v21  ;;  %2487 = vadd.xlane.f32.xlu0 %v11016_v56  ;;  %vm3079_vm8 = vcmp.eq.f32.partialorder %v10973_v61, 0.0  ;;  %vm3098_vm9 = vcmp.eq.f32.partialorder %v11021_v3, inf  ;;  %v4214_v34 = vsel %vm4166_vm6, 1.0, %v11045_v17  ;;  %v14207_v40 = vld [vmem:[#allocation112_spill] sm:$0xff] }
 0x323   : > { %14205 = vst [vmem:[#allocation279_spill] sm:$0xff] %v11120_v16  ;;  %7213 = vtanh.f32 %v5910_v23  ;;  %v3078_v8 = vsel %vm3077_vm7, %v10973_v61, %v3076_v18  ;;  %v3976_v39 = vmul.f32 %v10461_v63, %v3448_v41  ;;  %vm3100_vm10 = vcmp.eq.f32.partialorder %v11021_v3, 0.0  ;;  %3003 = vadd.xlane.f32.xlu1 %v11043_v57  ;;  %v14214_v16 = vld [vmem:[#allocation188_spill] sm:$0xff] }
 0x324   : > { %v11136_v58 = vsel %vm3079_vm8, %v3080_v28, %v3078_v8  ;;  %v3101_v61 = vand.u32 2147483648, %v11021_v3  ;;  %vm3091_vm11 = vcmp.eq.f32.partialorder %v11048_v6, inf  ;;  %v2508_v44 = vadd.f32 %v2422_v25, %v14208_v42  ;;  %v2936_v21 = vpop.xlane.xlu1 %2935 }
 0x325   : > { %v7206_v56 = vpop.eup %7205  ;;  %v3447_v52 = vmul.f32 %v14207_v40, %v11136_v58  ;;  %vm4165_vm12 = vcmp.eq.f32.partialorder %v11078_v10, 0.0  ;;  %v5913_v63 = vclamps-f32 %v3976_v39, 15.0  ;;  %7215 = vrsqrt.f32 %v11126_v33 }
 0x326   : > { %v3097_v41 = vmul.f32 %v7206_v56, %v11021_v3  ;;  %3001 = vadd.xlane.f32.xlu0 %v11064_v53  ;;  %7217 = vrcp.f32 %v4214_v34  ;;  %vm4168_vm13 = vcmp.eq.f32.partialorder %v11116_v59, 0.0  ;;  %v11151_v23 = vadd.f32 %v2936_v21, %v2508_v44  ;;  %v11167_v34 = vpop.f32.mrf.mxu0  ;;  %v14210_v56 = vld [vmem:[#allocation119_spill] sm:$0xff]  ;;  %v14211_v21 = vld [vmem:[#allocation117_spill] sm:$0xff] }
 0x327   : > { %v3975_v57 = vmul.f32 %v10468_v9, %v3447_v52  ;;  %7219 = vtanh.f32 %v5913_v63  ;;  %vm4167_vm14 = vcmp.eq.f32.partialorder %v11136_v58, 0.0  ;;  %v3094_v54 = vand.u32 2147483648, %v11048_v6  ;;  %2493 = vadd.xlane.f32.xlu1 %v11034_v55  ;;  %14209 = vst [vmem:[#allocation114_spill] sm:$0xff] %v11167_v34 }
 0x328   : > { %v7208_v18 = vpop.eup %7207  ;;  %v3099_v25 = vsel %vm3098_vm9, %v11021_v3, %v3097_v41  ;;  %v4213_v53 = vsel %vm4165_vm12, 1.0, %v11078_v10  ;;  %v4216_v39 = vsel %vm4168_vm13, 1.0, %v11116_v59  ;;  %7221 = vrsqrt.f32 %v11151_v23 }
 0x329   : > { %v5912_v28 = vclamps-f32 %v3975_v57, 15.0  ;;  %v11164_v9 = vsel %vm3100_vm10, %v3101_v61, %v3099_v25  ;;  %v3090_v8 = vmul.f32 %v7208_v18, %v11048_v6  ;;  %v4215_v3 = vsel %vm4167_vm14, 1.0, %v11136_v58  ;;  %v2420_v57 = vpop.xlane.xlu0 %2419 }
 0x32a   : > { %v3450_v55 = vmul.f32 %v14210_v56, %v11164_v9  ;;  %vm4170_vm15 = vcmp.eq.f32.partialorder %v11164_v9, 0.0  ;;  %2491 = vadd.xlane.f32.xlu0 %v11054_v35  ;;  %vm3093_vm0 = vcmp.eq.f32.partialorder %v11048_v6, 0.0  ;;  %v2915_v44 = vmul.f32 %v11167_v34, %v11167_v34 }
 0x32b   : > { %7223 = vtanh.f32 %v5912_v28  ;;  %v3092_v40 = vsel %vm3091_vm11, %v11048_v6, %v3090_v8  ;;  %v4218_v61 = vsel %vm4170_vm15, 1.0, %v11164_v9  ;;  %3007 = vadd.xlane.f32.xlu1 %v11083_v4  ;;  %vm3112_vm2 = vcmp.eq.f32.partialorder %v11102_v46, inf }
 0x32c   : > { %7225 = vrcp.f32 %v4213_v53  ;;  %v3978_v52 = vmul.f32 %v10482_v11, %v3450_v55  ;;  %v11188_v42 = vsel %vm3093_vm0, %v3094_v54, %v3092_v40  ;;  %v11191_v35 = vpop.eup %7209  ;;  %vm3114_vm4 = vcmp.eq.f32.partialorder %v11102_v46, 0.0 }
 0x32d   : > { %7227 = vrcp.f32 %v4216_v39  ;;  %v3449_v6 = vmul.f32 %v14211_v21, %v11188_v42  ;;  %vm4169_vm1 = vcmp.eq.f32.partialorder %v11188_v42, 0.0  ;;  %v7212_v11 = vpop.eup %7211  ;;  %v11199_v63 = vmax.f32 %v11191_v35, 1e-05 }
 0x32e   : > { %7229 = vrcp.f32 %v4215_v3  ;;  %v5915_v41 = vclamps-f32 %v3978_v52, 15.0  ;;  %v4217_v4 = vsel %vm4169_vm1, 1.0, %v11188_v42  ;;  %3005 = vadd.xlane.f32.xlu0 %v11091_v43  ;;  %v3111_v25 = vmul.f32 %v7212_v11, %v11102_v46 }
 0x32f   : > { %7231 = vrcp.f32 %v4218_v61  ;;  %v3977_v18 = vmul.f32 %v10503_v29, %v3449_v6  ;;  %vm4406_vm3 = vcmp.gt.f32.partialorder %v11199_v63, 0.999  ;;  %v3115_v53 = vand.u32 2147483648, %v11102_v46  ;;  %2497 = vadd.xlane.f32.xlu1 %v11075_v37  ;;  %v14212_v6 = vld [vmem:[#allocation124_spill] sm:$0xff] }
 0x330   : > { %v11208_v54 = vpop.eup %7213  ;;  %7233 = vrcp.f32 %v4217_v4  ;;  %v4598_v43 = vsel %vm4406_vm3, 0.999, %v11199_v63  ;;  %vm3105_vm5 = vcmp.eq.f32.partialorder %v11126_v33, inf  ;;  %v3113_v39 = vsel %vm3112_vm2, %v11102_v46, %v3111_v25  ;;  %v2934_v46 = vpop.xlane.xlu0 %2933 }
 0x331   : > { %v11218_v29 = vmax.f32 %v11208_v54, 1e-05  ;;  %7235 = vtanh.f32 %v5915_v41  ;;  %v5959_v28 = vclamps-f32 %v4598_v43, 0.99999  ;;  %v5914_v8 = vclamps-f32 %v3977_v18, 15.0  ;;  %v14213_v41 = vld [vmem:[#allocation179_spill] sm:$0xff] }
 0x332   : > { %7237 = vrcp.f32 %v11199_v63  ;;  %2495 = vadd.xlane.f32.xlu0 %v11087_v60  ;;  %v7216_v56 = vpop.eup %7215  ;;  %v11225_v37 = vsel %vm3114_vm4, %v3115_v53, %v3113_v39  ;;  %v3108_v55 = vand.u32 2147483648, %v11126_v33  ;;  %vm3107_vm8 = vcmp.eq.f32.partialorder %v11126_v33, 0.0  ;;  %v2426_v39 = vpop.xlane.xlu1 %2425 }
 0x333   : > { %7239 = vrcp.f32 %v4598_v43  ;;  %vm4405_vm7 = vcmp.gt.f32.partialorder %v11218_v29, 0.999  ;;  %v7218_v3 = vpop.eup %7217  ;;  %v4742_v40 = vadd.f32 1.0, %v5959_v28  ;;  %v4886_v52 = vsub.f32 1.0, %v5959_v28  ;;  %3011 = vadd.xlane.f32.xlu1 %v11099_v0 }
 0x334   : > { %v4597_v61 = vsel %vm4405_vm7, 0.999, %v11218_v29  ;;  %7241 = vtanh.f32 %v5914_v8  ;;  %v11233_v60 = vpop.eup %7219  ;;  %v3452_v11 = vmul.f32 %v14212_v6, %v11225_v37  ;;  %v2507_v4 = vadd.f32 %v2420_v57, %v14213_v41  ;;  %v2424_v41 = vpop.xlane.xlu0 %2423 }
 0x335   : > { %7243 = vrcp.f32 %v11218_v29  ;;  %v5958_v21 = vclamps-f32 %v4597_v61, 0.99999  ;;  %v11240_v18 = vmax.f32 %v11233_v60, 1e-05  ;;  %v3104_v25 = vmul.f32 %v7216_v56, %v11126_v33  ;;  %v7222_v0 = vpop.eup %7221 }
 0x336   : > { %7245 = vlog2.f32 %v4742_v40  ;;  %vm3126_vm9 = vcmp.eq.f32.partialorder %v11151_v23, inf  ;;  %3009 = vadd.xlane.f32.xlu0 %v2915_v44  ;;  %v3980_v28 = vmul.f32 %v10525_v47, %v3452_v11  ;;  %vm3128_vm11 = vcmp.eq.f32.partialorder %v11151_v23, 0.0  ;;  %v2940_v22 = vpop.xlane.xlu1 %2939 }
 0x337   : > { %7247 = vlog2.f32 %v4886_v52  ;;  %v4741_v53 = vadd.f32 1.0, %v5958_v21  ;;  %v4885_v43 = vsub.f32 1.0, %v5958_v21  ;;  %vm4408_vm10 = vcmp.gt.f32.partialorder %v11240_v18, 0.999 }
 0x338   : > { %v7224_v8 = vpop.eup %7223  ;;  %7249 = vrcp.f32 %v11240_v18  ;;  %v3129_v57 = vand.u32 2147483648, %v11151_v23  ;;  %v4600_v44 = vsel %vm4408_vm10, 0.999, %v11240_v18  ;;  %v11254_v52 = vadd.f32 %v2934_v46, %v2507_v4 }
 0x339   : > { %v7226_v56 = vpop.eup %7225  ;;  %7251 = vlog2.f32 %v4741_v53  ;;  %v11252_v40 = vmax.f32 %v7224_v8, 1e-05  ;;  %v5961_v21 = vclamps-f32 %v4600_v44, 0.99999  ;;  %v3106_v6 = vsel %vm3105_vm5, %v11126_v33, %v3104_v25 }
 0x33a   : > { %v7228_v47 = vpop.eup %7227  ;;  %7253 = vlog2.f32 %v4885_v43  ;;  %v3125_v11 = vmul.f32 %v7222_v0, %v11151_v23  ;;  %v5917_v53 = vclamps-f32 %v3980_v28, 15.0  ;;  %v11262_v48 = vadd.f32 %v2426_v39, %v14214_v16  ;;  %v14215_v16 = vld [vmem:[#allocation191_spill] sm:$0xff] }
 0x33b   : > { %v7230_v34 = vpop.eup %7229  ;;  %7255 = vrcp.f32 %v4597_v61  ;;  %vm4407_vm0 = vcmp.gt.f32.partialorder %v11252_v40, 0.999  ;;  %v4744_v4 = vadd.f32 1.0, %v5961_v21  ;;  %v4888_v43 = vsub.f32 1.0, %v5961_v21 }
 0x33c   : > { %v11264_v46 = vpop.eup %7231  ;;  %7257 = vrcp.f32 %v4600_v44  ;;  %v4599_v25 = vsel %vm4407_vm0, 0.999, %v11252_v40  ;;  %v11274_v0 = vsel %vm3107_vm8, %v3108_v55, %v3106_v6  ;;  %v11277_v28 = vadd.f32 %v2424_v41, %v14215_v16 }
 0x33d   : > { %v11269_v5 = vpop.eup %7233  ;;  %7259 = vrcp.f32 %v11252_v40  ;;  %v5960_v61 = vclamps-f32 %v4599_v25, 0.99999  ;;  %v11282_v44 = vmul.f32 %v7218_v3, %v11191_v35  ;;  %vm4172_vm2 = vcmp.eq.f32.partialorder %v11225_v37, 0.0  ;;  %v14216_v35 = vld [vmem:[#allocation123_spill] sm:$0xff] }
 0x33e   : > { %v11279_v39 = vpop.eup %7235  ;;  %7261 = vlog2.f32 %v4744_v4  ;;  %v3127_v21 = vsel %vm3126_vm9, %v11151_v23, %v3125_v11  ;;  %v11289_v33 = vmul.f32 %v7226_v56, %v11208_v54  ;;  %v3451_v3 = vmul.f32 %v14216_v35, %v11274_v0 }
 0x33f   : > { %v7238_v27 = vpop.eup %7237  ;;  %7263 = vlog2.f32 %v4888_v43  ;;  %v4743_v55 = vadd.f32 1.0, %v5960_v61  ;;  %v4887_v6 = vsub.f32 1.0, %v5960_v61  ;;  %v11292_v16 = vmax.f32 %v11279_v39, 1e-05 }
 0x340   : > { %v7240_v41 = vpop.eup %7239  ;;  %7265 = vtanh.f32 %v5917_v53  ;;  %vm4171_vm4 = vcmp.eq.f32.partialorder %v11274_v0, 0.0  ;;  %v11300_v11 = vmul.f32 %v7228_v47, %v11233_v60  ;;  %v11305_v54 = vsel %vm4172_vm2, 1.0, %v11225_v37 }
 0x341   : > { %v11297_v4 = vpop.eup %7241  ;;  %7267 = vlog2.f32 %v4743_v55  ;;  %v11309_v56 = vsel %vm3128_vm11, %v3129_v57, %v3127_v21  ;;  %v11311_v43 = vmul.f32 %v7230_v34, %v7224_v8  ;;  %vm4410_vm5 = vcmp.gt.f32.partialorder %v11292_v16, 0.999  ;;  %v14217_v34 = vld [vmem:[#allocation132_spill] sm:$0xff] }
 0x342   : > { %v7244_v53 = vpop.eup %7243  ;;  %7269 = vlog2.f32 %v4887_v6  ;;  %v11315_v61 = vmax.f32 %v11297_v4, 1e-05  ;;  %v4602_v47 = vsel %vm4410_vm5, 0.999, %v11292_v16  ;;  %v11324_v23 = vsel %vm4171_vm4, 1.0, %v11274_v0 }
 0x343   : > { %v7246_v60 = vpop.eup %7245  ;;  %7271 = vrcp.f32 %v11292_v16  ;;  %v3454_v8 = vmul.f32 %v14217_v34, %v11309_v56  ;;  %v4502_v21 = vmul.f32 0.999, %v7238_v27  ;;  %v5963_v6 = vclamps-f32 %v4602_v47, 0.99999  ;;  %v14226_v16 = vld [vmem:[#allocation15_spill] sm:$0xff] }
 0x344   : > { %v7248_v57 = vpop.eup %7247  ;;  %v4792_v55 = vmul.f32 0.6931472, %v7246_v60  ;;  %v3979_v35 = vmul.f32 %v10541_v36, %v3451_v3  ;;  %v4501_v12 = vmul.f32 0.999, %v7244_v53  ;;  %7273 = vrcp.f32 %v4599_v25 }
 0x345   : > { %v7250_v51 = vpop.eup %7249  ;;  %v4936_v26 = vmul.f32 0.6931472, %v7248_v57  ;;  %vm4409_vm8 = vcmp.gt.f32.partialorder %v11315_v61, 0.999  ;;  %v4746_v13 = vadd.f32 1.0, %v5963_v6  ;;  %v4890_v50 = vsub.f32 1.0, %v5963_v6 }
 0x346   : > { %v7252_v2 = vpop.eup %7251  ;;  %7275 = vrcp.f32 %v11315_v61  ;;  %v4601_v34 = vsel %vm4409_vm8, 0.999, %v11315_v61  ;;  %v3982_v36 = vmul.f32 %v10564_v31, %v3454_v8  ;;  %v4550_v25 = vsel %vm4406_vm3, %v4502_v21, 1.0 }
 0x347   : > { %v7254_v27 = vpop.eup %7253  ;;  %v5030_v60 = vsub.f32 %v4792_v55, %v4936_v26  ;;  %v4790_v32 = vmul.f32 0.6931472, %v7252_v2  ;;  %v5962_v30 = vclamps-f32 %v4601_v34, 0.99999  ;;  %7277 = vlog2.f32 %v4746_v13 }
 0x348   : > { %v7256_v3 = vpop.eup %7255  ;;  %v4934_v53 = vmul.f32 0.6931472, %v7254_v27  ;;  %v5916_v57 = vclamps-f32 %v3979_v35, 15.0  ;;  %v4549_v24 = vsel %vm4405_vm7, %v4501_v12, 1.0  ;;  %7279 = vlog2.f32 %v4890_v50 }
 0x349   : > { %v7258_v6 = vpop.eup %7257  ;;  %v5078_v38 = vmul.f32 0.5, %v5030_v60  ;;  %v4745_v7 = vadd.f32 1.0, %v5962_v30  ;;  %v4504_v55 = vmul.f32 0.999, %v7250_v51  ;;  %7281 = vrcp.f32 %v4602_v47 }
 0x34a   : > { %v7260_v26 = vpop.eup %7259  ;;  %v5029_v2 = vsub.f32 %v4790_v32, %v4934_v53  ;;  %v4889_v31 = vsub.f32 1.0, %v5962_v30  ;;  %v5222_v63 = vmul.f32 %v4550_v25, %v11282_v44  ;;  %v5919_v13 = vclamps-f32 %v3982_v36, 15.0  ;;  %v14219_v36 = vld [vmem:[#allocation103_spill] sm:$0xff]  ;;  %v14220_v25 = vld [vmem:[#allocation106_spill] sm:$0xff] }
 0x34b   : > { %v7262_v8 = vpop.eup %7261  ;;  %v5174_v20 = vmul.f32 %v7240_v41, %v5078_v38  ;;  %7283 = vlog2.f32 %v4745_v7  ;;  %v11341_v12 = vadd.f32 %v2940_v22, %v11262_v48  ;;  %v5221_v51 = vmul.f32 %v4549_v24, %v11289_v33  ;;  %v14218_v33 = vld [vmem:[#allocation58_spill] sm:$0xff] }
 0x34c   : > { %v7264_v21 = vpop.eup %7263  ;;  %v5077_v35 = vmul.f32 0.5, %v5029_v2  ;;  %v4796_v27 = vmul.f32 0.6931472, %v7262_v8  ;;  %7285 = vlog2.f32 %v4889_v31  ;;  %v4552_v7 = vsel %vm4408_vm10, %v4504_v55, 1.0  ;;  %v14221_v8 = vld [vmem:[#allocation60_spill] sm:$0xff] }
 0x34d   : > { %v11343_v50 = vpop.eup %7265  ;;  %v5270_v29 = vmul.f32 %v5222_v63, %v5174_v20  ;;  %v4940_v32 = vmul.f32 0.6931472, %v7264_v21  ;;  %7287 = vtanh.f32 %v5916_v57  ;;  %v4503_v44 = vmul.f32 0.999, %v7260_v26 }
 0x34e   : > { %v7268_v30 = vpop.eup %7267  ;;  %v5173_v38 = vmul.f32 %v7256_v3, %v5077_v35  ;;  %v11349_v41 = vmax.f32 %v11343_v50, 1e-05  ;;  %7289 = vtanh.f32 %v5919_v13  ;;  %v5224_v26 = vmul.f32 %v4552_v7, %v11300_v11  ;;  %v14222_v13 = vld [vmem:[#allocation105_spill] sm:$0xff] }
 0x34f   : > { %v7270_v47 = vpop.eup %7269  ;;  %v5318_v22 = vsel %vm4166_vm6, 0.0, %v5270_v29  ;;  %v5032_v48 = vsub.f32 %v4796_v27, %v4940_v32  ;;  %v4794_v20 = vmul.f32 0.6931472, %v7268_v30  ;;  %7291 = vrcp.f32 %v4601_v34  ;;  %v14223_v35 = vld [vmem:[#allocation13_spill] sm:$0xff] }
 0x350   : > { %v7272_v24 = vpop.eup %7271  ;;  %v5366_v60 = vmul.f32 %v14218_v33, %v5318_v22  ;;  %v5462_v3 = vmul.f32 %v14219_v36, %v5318_v22  ;;  %v5558_v18 = vmul.f32 %v14220_v25, %v5318_v22  ;;  %v5269_v53 = vmul.f32 %v5221_v51, %v5173_v38 }
 0x351   : > { %v5080_v57 = vmul.f32 0.5, %v5032_v48  ;;  %v4938_v2 = vmul.f32 0.6931472, %v7270_v47  ;;  %v7274_v55 = vpop.eup %7273  ;;  %v4551_v11 = vsel %vm4407_vm0, %v4503_v44, 1.0  ;;  %v4506_v34 = vmul.f32 0.999, %v7272_v24 }
 0x352   : > { %5414 = vst [vmem:[%s11359_s21 + $0x18] sm:$0xff] %v5366_v60  ;;  %5510 = vst [vmem:[%s11359_s21 + $0x20] sm:$0xff] %v5462_v3  ;;  %v5317_v17 = vsel %vm4165_vm12, 0.0, %v5269_v53  ;;  %vm4412_vm6 = vcmp.gt.f32.partialorder %v11349_v41, 0.999  ;;  %v4314_v10 = vmul.f32 %v11279_v39, %v11264_v46  ;;  %7293 = vrcp.f32 %v11305_v54  ;;  %v14224_v24 = vld [vmem:[#allocation61_spill] sm:$0xff] }
 0x353   : > { %5606 = vst [vmem:[%s11359_s21 + $0x28] sm:$0xff] %v5558_v18  ;;  %v7276_v31 = vpop.eup %7275  ;;  %v5365_v63 = vmul.f32 %v5317_v17, %v14221_v8  ;;  %v5461_v21 = vmul.f32 %v5317_v17, %v14222_v13  ;;  %v5557_v27 = vmul.f32 %v5317_v17, %v14223_v35  ;;  %v5176_v29 = vmul.f32 %v7258_v6, %v5080_v57  ;;  %v14225_v60 = vld [vmem:[#allocation11_spill] sm:$0xff]  ;;  %v2938_v18 = vpop.xlane.xlu0 %2937 }
 0x354   : > { %v5031_v51 = vsub.f32 %v4794_v20, %v4938_v2  ;;  %v11378_v40 = vsel %vm4412_vm6, 0.999, %v11349_v41  ;;  %v7278_v32 = vpop.eup %7277  ;;  %v5223_v38 = vmul.f32 %v4551_v11, %v11311_v43  ;;  %7295 = vrcp.f32 %v11349_v41  ;;  %v14227_v35 = vld [vmem:[#allocation63_spill] sm:$0xff] }
 0x355   : > { %5413 = vst [vmem:[%s11359_s21] sm:$0xff] %v5365_v63  ;;  %5509 = vst [vmem:[%s11359_s21 + $0x8] sm:$0xff] %v5461_v21  ;;  %v5272_v30 = vmul.f32 %v5224_v26, %v5176_v29  ;;  %v5965_v6 = vclamps-f32 %v11378_v40, 0.99999  ;;  %v7280_v7 = vpop.eup %7279  ;;  %v4554_v39 = vsel %vm4410_vm5, %v4506_v34, 1.0  ;;  %v4800_v54 = vmul.f32 0.6931472, %v7278_v32 }
 0x356   : > { %5605 = vst [vmem:[%s11359_s21 + $0x10] sm:$0xff] %v5557_v27  ;;  %v5079_v46 = vmul.f32 0.5, %v5031_v51  ;;  %7297 = vrsqrt.f32 %v11254_v52  ;;  %v7282_v44 = vpop.eup %7281  ;;  %v4944_v22 = vmul.f32 0.6931472, %v7280_v7  ;;  %v4505_v43 = vmul.f32 0.999, %v7276_v31 }
 0x357   : > { %v5320_v47 = vsel %vm4168_vm13, 0.0, %v5272_v30  ;;  %v4748_v48 = vadd.f32 1.0, %v5965_v6  ;;  %v4313_v59 = vmul.f32 %v11297_v4, %v11269_v5  ;;  %v4892_v34 = vsub.f32 1.0, %v5965_v6  ;;  %v14228_v29 = vld [vmem:[#allocation12_spill] sm:$0xff] }
 0x358   : > { %v7284_v20 = vpop.eup %7283  ;;  %v5368_v33 = vmul.f32 %v14224_v24, %v5320_v47  ;;  %v5464_v36 = vmul.f32 %v14225_v60, %v5320_v47  ;;  %v5560_v3 = vmul.f32 %v14226_v16, %v5320_v47  ;;  %v5175_v25 = vmul.f32 %v7274_v55, %v5079_v46 }
 0x359   : > { %v7286_v53 = vpop.eup %7285  ;;  %v5034_v57 = vsub.f32 %v4800_v54, %v4944_v22  ;;  %v4798_v26 = vmul.f32 0.6931472, %v7284_v20  ;;  %7299 = vlog2.f32 %v4748_v48  ;;  %v5226_v55 = vmul.f32 %v4554_v39, %v4314_v10  ;;  %v14229_v10 = vld [vmem:[#allocation17_spill] sm:$0xff]  ;;  %v14231_v20 = vld [vmem:[#allocation14_spill] sm:$0xff] }
 0x35a   : > { %v11396_v2 = vpop.eup %7287  ;;  %5416 = vst [vmem:[%s11359_s21 + $0x48] sm:$0xff] %v5368_v33  ;;  %5512 = vst [vmem:[%s11359_s21 + $0x50] sm:$0xff] %v5464_v36  ;;  %v5271_v17 = vmul.f32 %v5223_v38, %v5175_v25  ;;  %v4942_v11 = vmul.f32 0.6931472, %v7286_v53  ;;  %7301 = vrsqrt.f32 %v11341_v12  ;;  %v11406_v63 = vadd.f32 %v2938_v18, %v11277_v28  ;;  %v14230_v48 = vld [vmem:[#allocation65_spill] sm:$0xff]  ;;  %v14232_v33 = vld [vmem:[#allocation19_spill] sm:$0xff]  ;;  %v2430_v36 = vpop.xlane.xlu1 %2429 }
 0x35b   : > { %5608 = vst [vmem:[%s11359_s21 + $0x58] sm:$0xff] %v5560_v3  ;;  %v5082_v31 = vmul.f32 0.5, %v5034_v57  ;;  %v11403_v8 = vmax.f32 %v11396_v2, 1e-05  ;;  %v11408_v5 = vpop.eup %7289  ;;  %v4553_v13 = vsel %vm4409_vm8, %v4505_v43, 1.0  ;;  %7303 = vlog2.f32 %v4892_v34  ;;  %v11450_v18 = vpop.xlane.xlu0 %2427 }
 0x35c   : > { %v5319_v4 = vsel %vm4167_vm14, 0.0, %v5271_v17  ;;  %v5033_v21 = vsub.f32 %v4798_v26, %v4942_v11  ;;  %vm3119_vm12 = vcmp.eq.f32.partialorder %v11254_v52, inf  ;;  %v7292_v30 = vpop.eup %7291  ;;  %vm4174_vm14 = vcmp.eq.f32.partialorder %v11309_v56, 0.0  ;;  %v14233_v26 = vld [vmem:[#allocation67_spill] sm:$0xff]  ;;  %v14234_v11 = vld [vmem:[#allocation16_spill] sm:$0xff] }
 0x35d   : > { %v5367_v27 = vmul.f32 %v5319_v4, %v14227_v35  ;;  %v5463_v51 = vmul.f32 %v5319_v4, %v14228_v29  ;;  %v5559_v28 = vmul.f32 %v5319_v4, %v14229_v10  ;;  %v5178_v32 = vmul.f32 %v7282_v44, %v5082_v31  ;;  %v14235_v31 = vld [vmem:[#allocation23_spill] sm:$0xff] }
 0x35e   : > { %v5081_v58 = vmul.f32 0.5, %v5033_v21  ;;  %vm4411_vm13 = vcmp.gt.f32.partialorder %v11403_v8, 0.999  ;;  %v11421_v61 = vmax.f32 %v11408_v5, 1e-05  ;;  %vm3121_vm3 = vcmp.eq.f32.partialorder %v11254_v52, 0.0 }
 0x35f   : > { %5415 = vst [vmem:[%s11359_s21 + $0x30] sm:$0xff] %v5367_v27  ;;  %5511 = vst [vmem:[%s11359_s21 + $0x38] sm:$0xff] %v5463_v51  ;;  %v5274_v38 = vmul.f32 %v5226_v55, %v5178_v32  ;;  %v11430_v6 = vsel %vm4411_vm13, 0.999, %v11403_v8  ;;  %v3122_v7 = vand.u32 2147483648, %v11254_v52  ;;  %7305 = vrsqrt.f32 %v11406_v63  ;;  %v7294_v44 = vpop.eup %7293 }
 0x360   : > { %5607 = vst [vmem:[%s11359_s21 + $0x40] sm:$0xff] %v5559_v28  ;;  %v5177_v46 = vmul.f32 %v7292_v30, %v5081_v58  ;;  %v5225_v39 = vmul.f32 %v4553_v13, %v4313_v59  ;;  %7307 = vrcp.f32 %v11324_v23  ;;  %v5964_v54 = vclamps-f32 %v11430_v6, 0.99999  ;;  %v14236_v28 = vld [vmem:[#allocation131_spill] sm:$0xff]  ;;  %v2944_v58 = vpop.xlane.xlu1 %2943 }
 0x361   : > { %v5322_v47 = vsel %vm4170_vm15, 0.0, %v5274_v38  ;;  %7309 = vrcp.f32 %v11378_v40  ;;  %v4222_v22 = vsel %vm4174_vm14, 1.0, %v11309_v56  ;;  %vm4414_vm7 = vcmp.gt.f32.partialorder %v11421_v61, 0.999  ;;  %v7296_v43 = vpop.eup %7295 }
 0x362   : > { %v5370_v23 = vmul.f32 %v14230_v48, %v5322_v47  ;;  %v5466_v24 = vmul.f32 %v14231_v20, %v5322_v47  ;;  %v5562_v60 = vmul.f32 %v14232_v33, %v5322_v47  ;;  %v5273_v9 = vmul.f32 %v5225_v39, %v5177_v46  ;;  %v14237_v39 = vld [vmem:[#allocation198_spill] sm:$0xff] }
 0x363   : > { %v7298_v16 = vpop.eup %7297  ;;  %7311 = vrcp.f32 %v11403_v8  ;;  %v4747_v40 = vadd.f32 1.0, %v5964_v54  ;;  %v4891_v3 = vsub.f32 1.0, %v5964_v54  ;;  %v4606_v25 = vsel %vm4414_vm7, 0.999, %v11421_v61 }
 0x364   : > { %5418 = vst [vmem:[%s11359_s21 + $0x78] sm:$0xff] %v5370_v23  ;;  %5514 = vst [vmem:[%s11359_s21 + $0x80] sm:$0xff] %v5466_v24  ;;  %v5321_v53 = vsel %vm4169_vm1, 0.0, %v5273_v9  ;;  %7313 = vrcp.f32 %v11421_v61  ;;  %v5967_v57 = vclamps-f32 %v4606_v25, 0.99999  ;;  %v3118_v59 = vmul.f32 %v7298_v16, %v11254_v52  ;;  %v2434_v16 = vpop.xlane.xlu1 %2433 }
 0x365   : > { %5610 = vst [vmem:[%s11359_s21 + $0x88] sm:$0xff] %v5562_v60  ;;  %v5369_v17 = vmul.f32 %v5321_v53, %v14233_v26  ;;  %v5465_v34 = vmul.f32 %v5321_v53, %v14234_v11  ;;  %v5561_v55 = vmul.f32 %v5321_v53, %v14235_v31  ;;  %7315 = vlog2.f32 %v4747_v40 }
 0x366   : > { %v7300_v4 = vpop.eup %7299  ;;  %7317 = vlog2.f32 %v4891_v3  ;;  %v4750_v13 = vadd.f32 1.0, %v5967_v57  ;;  %v4894_v21 = vsub.f32 1.0, %v5967_v57  ;;  %v3120_v42 = vsel %vm3119_vm12, %v11254_v52, %v3118_v59 }
 0x367   : > { %v7302_v35 = vpop.eup %7301  ;;  %5417 = vst [vmem:[%s11359_s21 + $0x60] sm:$0xff] %v5369_v17  ;;  %5513 = vst [vmem:[%s11359_s21 + $0x68] sm:$0xff] %v5465_v34  ;;  %v4508_v27 = vmul.f32 0.999, %v7296_v43  ;;  %7319 = vrcp.f32 %v4222_v22  ;;  %v11470_v29 = vsel %vm3121_vm3, %v3122_v7, %v3120_v42  ;;  %v3780_v51 = vsub.f32 1.0, %v10944_v1  ;;  %v2942_v7 = vpop.xlane.xlu0 %2941 }
 0x368   : > { %5609 = vst [vmem:[%s11359_s21 + $0x70] sm:$0xff] %v5561_v55  ;;  %v4804_v10 = vmul.f32 0.6931472, %v7300_v4  ;;  %7321 = vlog2.f32 %v4750_v13  ;;  %v3453_v32 = vmul.f32 %v14236_v28, %v11470_v29  ;;  %v3139_v30 = vmul.f32 %v7302_v35, %v11341_v12  ;;  %v7304_v38 = vpop.eup %7303  ;;  %v14240_v4 = vld [vmem:[#allocation201_spill] sm:$0xff] }
 0x369   : > { %7323 = vlog2.f32 %v4894_v21  ;;  %vm3140_vm15 = vcmp.eq.f32.partialorder %v11341_v12, inf  ;;  %v3143_v46 = vand.u32 2147483648, %v11341_v12  ;;  %v2512_v52 = vadd.f32 %v2430_v36, %v14237_v39  ;;  %v14243_v39 = vld [vmem:[#allocation24_spill] sm:$0xff] }
 0x36a   : > { %v4948_v54 = vmul.f32 0.6931472, %v7304_v38  ;;  %v3981_v1 = vmul.f32 %v10566_v45, %v3453_v32  ;;  %v3141_v47 = vsel %vm3140_vm15, %v11341_v12, %v3139_v30  ;;  %vm3142_vm1 = vcmp.eq.f32.partialorder %v11341_v12, 0.0  ;;  %v14238_v45 = vld [vmem:[#allocation139_spill] sm:$0xff]  ;;  %v14242_v38 = vld [vmem:[#allocation18_spill] sm:$0xff] }
 0x36b   : > { %v4316_v22 = vmul.f32 %v7294_v44, %v11343_v50  ;;  %7325 = vrcp.f32 %v11430_v6  ;;  %v11484_v43 = vsel %vm3142_vm1, %v3143_v46, %v3141_v47  ;;  %v11486_v48 = vadd.f32 %v2944_v58, %v2512_v52  ;;  %v2432_v40 = vpop.xlane.xlu0 %2431 }
 0x36c   : > { %v7306_v23 = vpop.eup %7305  ;;  %v4556_v20 = vsel %vm4412_vm6, %v4508_v27, 1.0  ;;  %v5036_v24 = vsub.f32 %v4804_v10, %v4948_v54  ;;  %v5918_v33 = vclamps-f32 %v3981_v1, 15.0  ;;  %v3456_v60 = vmul.f32 %v14238_v45, %v11484_v43 }
 0x36d   : > { %v7308_v9 = vpop.eup %7307  ;;  %vm4173_vm9 = vcmp.eq.f32.partialorder %v11470_v29, 0.0  ;;  %v3132_v12 = vmul.f32 %v7306_v23, %v11406_v63  ;;  %vm3133_vm10 = vcmp.eq.f32.partialorder %v11406_v63, inf  ;;  %7327 = vrsqrt.f32 %v11486_v48 }
 0x36e   : > { %v7310_v50 = vpop.eup %7309  ;;  %v5084_v6 = vmul.f32 0.5, %v5036_v24  ;;  %7329 = vtanh.f32 %v5918_v33  ;;  %v3984_v41 = vmul.f32 %v10586_v49, %v3456_v60  ;;  %v3136_v44 = vand.u32 2147483648, %v11406_v63 }
 0x36f   : > { %7331 = vrcp.f32 %v4606_v25  ;;  %v3134_v36 = vsel %vm3133_vm10, %v11406_v63, %v3132_v12  ;;  %vm3135_vm11 = vcmp.eq.f32.partialorder %v11406_v63, 0.0  ;;  %v11501_v3 = vadd.f32 1.0, %v11000_v15  ;;  %v14239_v63 = vld [vmem:[#allocation136_spill] sm:$0xff]  ;;  %v2946_v1 = vpop.xlane.xlu0 %2945 }
 0x370   : > { %v7312_v53 = vpop.eup %7311  ;;  %v5180_v57 = vmul.f32 %v7310_v50, %v5084_v6  ;;  %v5228_v59 = vmul.f32 %v4556_v20, %v4316_v22  ;;  %v5921_v26 = vclamps-f32 %v3984_v41, 15.0  ;;  %v11503_v17 = vsel %vm3135_vm11, %v3136_v44, %v3134_v36 }
 0x371   : > { %v7314_v11 = vpop.eup %7313  ;;  %v4315_v49 = vmul.f32 %v7308_v9, %v11396_v2  ;;  %v4221_v25 = vsel %vm4173_vm9, 1.0, %v11470_v29  ;;  %v3455_v34 = vmul.f32 %v14239_v63, %v11503_v17  ;;  %7333 = vlog2.f32 %v3780_v51 }
 0x372   : > { %v7316_v31 = vpop.eup %7315  ;;  %v5276_v55 = vmul.f32 %v5228_v59, %v5180_v57  ;;  %7335 = vtanh.f32 %v5921_v26  ;;  %v2511_v13 = vadd.f32 %v11450_v18, %v14240_v4  ;;  %v2514_v21 = vadd.f32 %v2434_v16, %v10562_v19  ;;  %v14241_v19 = vld [vmem:[#allocation49_spill] sm:$0xff]  ;;  %v14245_v4 = vld [vmem:[#allocation20_spill] sm:$0xff] }
 0x373   : > { %v7318_v42 = vpop.eup %7317  ;;  %v4507_v35 = vmul.f32 0.999, %v7312_v53  ;;  %v4802_v27 = vmul.f32 0.6931472, %v7316_v31  ;;  %vm4176_vm0 = vcmp.eq.f32.partialorder %v11484_v43, 0.0  ;;  %v3983_v2 = vmul.f32 %v10593_v62, %v3455_v34  ;;  %v2948_v62 = vpop.xlane.xlu1 %2947  ;;  %v14244_v31 = vld [vmem:[#allocation51_spill] sm:$0xff] }
 0x374   : > { %v7320_v10 = vpop.eup %7319  ;;  %v5324_v28 = vsel %vm4172_vm2, 0.0, %v5276_v55  ;;  %v4946_v51 = vmul.f32 0.6931472, %v7318_v42  ;;  %v4510_v32 = vmul.f32 0.999, %v7314_v11  ;;  %v11518_v30 = vadd.f32 %v2942_v7, %v2511_v13 }
 0x375   : > { %v7322_v18 = vpop.eup %7321  ;;  %v5372_v58 = vmul.f32 %v14241_v19, %v5324_v28  ;;  %v5468_v46 = vmul.f32 %v14242_v38, %v5324_v28  ;;  %v5564_v52 = vmul.f32 %v14243_v39, %v5324_v28  ;;  %v5920_v54 = vclamps-f32 %v3983_v2, 15.0  ;;  %v14249_v19 = vld [vmem:[#allocation26_spill] sm:$0xff] }
 0x376   : > { %v7324_v47 = vpop.eup %7323  ;;  %v5035_v37 = vsub.f32 %v4802_v27, %v4946_v51  ;;  %v4808_v22 = vmul.f32 0.6931472, %v7322_v18  ;;  %7337 = vrsqrt.f32 %v11518_v30  ;;  %v2513_v23 = vadd.f32 %v2432_v40, %v10577_v14  ;;  %v14247_v27 = vld [vmem:[#allocation146_spill] sm:$0xff] }
 0x377   : > { %5420 = vst [vmem:[%s11359_s21 + $0xa8] sm:$0xff] %v5372_v58  ;;  %5516 = vst [vmem:[%s11359_s21 + $0xb0] sm:$0xff] %v5468_v46  ;;  %v4555_v7 = vsel %vm4411_vm13, %v4507_v35, 1.0  ;;  %v4318_v20 = vmul.f32 %v7320_v10, %v11408_v5  ;;  %v4952_v24 = vmul.f32 0.6931472, %v7324_v47  ;;  %7339 = vtanh.f32 %v5920_v54  ;;  %v11586_v51 = vpop.xlane.xlu1 %2437  ;;  %v14250_v38 = vld [vmem:[#allocation30_spill] sm:$0xff] }
 0x378   : > { %5612 = vst [vmem:[%s11359_s21 + $0xb8] sm:$0xff] %v5564_v52  ;;  %v7326_v33 = vpop.eup %7325  ;;  %v5083_v45 = vmul.f32 0.5, %v5035_v37  ;;  %vm4175_vm2 = vcmp.eq.f32.partialorder %v11503_v17, 0.0  ;;  %v11532_v60 = vadd.f32 %v2948_v62, %v2514_v21  ;;  %v11534_v9 = vadd.f32 %v2946_v1, %v2513_v23  ;;  %v14246_v21 = vld [vmem:[#allocation21_spill] sm:$0xff]  ;;  %v11596_v62 = vpop.xlane.xlu0 %2435 }
 0x379   : > { %v5038_v12 = vsub.f32 %v4808_v22, %v4952_v24  ;;  %7341 = vrcp.f32 %v4221_v25  ;;  %v4224_v14 = vsel %vm4176_vm0, 1.0, %v11484_v43  ;;  %vm3154_vm5 = vcmp.eq.f32.partialorder %v11486_v48, inf  ;;  %v14251_v37 = vld [vmem:[#allocation213_spill] sm:$0xff] }
 0x37a   : > { %v7328_v8 = vpop.eup %7327  ;;  %v5179_v5 = vmul.f32 %v7326_v33, %v5083_v45  ;;  %v5227_v50 = vmul.f32 %v4555_v7, %v4315_v49  ;;  %v4558_v6 = vsel %vm4414_vm7, %v4510_v32, 1.0  ;;  %7343 = vrsqrt.f32 %v11532_v60  ;;  %v14248_v32 = vld [vmem:[#allocation71_spill] sm:$0xff] }
 0x37b   : > { %v11543_v41 = vpop.eup %7329  ;;  %v5086_v44 = vmul.f32 0.5, %v5038_v12  ;;  %v4223_v36 = vsel %vm4175_vm2, 1.0, %v11503_v17  ;;  %v3153_v16 = vmul.f32 %v7328_v8, %v11486_v48  ;;  %7345 = vrsqrt.f32 %v11534_v9 }
 0x37c   : > { %v7332_v40 = vpop.eup %7331  ;;  %v5275_v53 = vmul.f32 %v5227_v50, %v5179_v5  ;;  %v11551_v57 = vmax.f32 %v11543_v41, 1e-05  ;;  %7347 = vrcp.f32 %v4224_v14  ;;  %v3157_v61 = vand.u32 2147483648, %v11486_v48  ;;  %v2952_v50 = vpop.xlane.xlu1 %2951 }
 0x37d   : > { %v5182_v59 = vmul.f32 %v7332_v40, %v5086_v44  ;;  %v5230_v26 = vmul.f32 %v4558_v6, %v4318_v20  ;;  %v3155_v11 = vsel %vm3154_vm5, %v11486_v48, %v3153_v16  ;;  %vm3156_vm8 = vcmp.eq.f32.partialorder %v11486_v48, 0.0 }
 0x37e   : > { %v11558_v49 = vpop.eup %7333  ;;  %v5323_v25 = vsel %vm4171_vm4, 0.0, %v5275_v53  ;;  %vm4413_vm6 = vcmp.gt.f32.partialorder %v11551_v57, 0.999  ;;  %7349 = vrcp.f32 %v4223_v36  ;;  %v11563_v63 = vsel %vm3156_vm8, %v3157_v61, %v3155_v11  ;;  %v14252_v61 = vld [vmem:[#allocation143_spill] sm:$0xff] }
 0x37f   : > { %v11565_v34 = vpop.eup %7335  ;;  %v5371_v55 = vmul.f32 %v5323_v25, %v14244_v31  ;;  %v5467_v13 = vmul.f32 %v5323_v25, %v14245_v4  ;;  %v5563_v48 = vmul.f32 %v5323_v25, %v14246_v21  ;;  %v5278_v42 = vmul.f32 %v5230_v26, %v5182_v59  ;;  %v11629_v26 = vpop.xlane.xlu0 %2949  ;;  %v14253_v4 = vld [vmem:[#allocation216_spill] sm:$0xff] }
 0x380   : > { %v4605_v0 = vsel %vm4413_vm6, 0.999, %v11551_v57  ;;  %v11574_v35 = vmax.f32 %v11565_v34, 1e-05  ;;  %v3458_v2 = vmul.f32 %v14247_v27, %v11563_v63  ;;  %vm3147_vm4 = vcmp.eq.f32.partialorder %v11518_v30, inf  ;;  %v14254_v27 = vld [vmem:[#allocation152_spill] sm:$0xff] }
 0x381   : > { %5419 = vst [vmem:[%s11359_s21 + $0x90] sm:$0xff] %v5371_v55  ;;  %5515 = vst [vmem:[%s11359_s21 + $0x98] sm:$0xff] %v5467_v13  ;;  %v5326_v10 = vsel %vm4174_vm14, 0.0, %v5278_v42  ;;  %7351 = vrcp.f32 %v11551_v57  ;;  %v5966_v28 = vclamps-f32 %v4605_v0, 0.99999  ;;  %vm3149_vm12 = vcmp.eq.f32.partialorder %v11518_v30, 0.0 }
 0x382   : > { %5611 = vst [vmem:[%s11359_s21 + $0xa0] sm:$0xff] %v5563_v48  ;;  %v5374_v18 = vmul.f32 %v14248_v32, %v5326_v10  ;;  %v5470_v58 = vmul.f32 %v14249_v19, %v5326_v10  ;;  %v5566_v46 = vmul.f32 %v14250_v38, %v5326_v10  ;;  %vm4416_vm13 = vcmp.gt.f32.partialorder %v11574_v35, 0.999  ;;  %v2442_v10 = vpop.xlane.xlu1 %2441 }
 0x383   : > { %v7338_v56 = vpop.eup %7337  ;;  %v4749_v39 = vadd.f32 1.0, %v5966_v28  ;;  %v4893_v52 = vsub.f32 1.0, %v5966_v28  ;;  %7353 = vrcp.f32 %v11574_v35  ;;  %v4608_v54 = vsel %vm4416_vm13, 0.999, %v11574_v35 }
 0x384   : > { %v11598_v1 = vpop.eup %7339  ;;  %5422 = vst [vmem:[%s11359_s21 + $0xd8] sm:$0xff] %v5374_v18  ;;  %5518 = vst [vmem:[%s11359_s21 + $0xe0] sm:$0xff] %v5470_v58  ;;  %v5969_v47 = vclamps-f32 %v4608_v54, 0.99999  ;;  %v3986_v22 = vmul.f32 %v14251_v37, %v3458_v2  ;;  %v3150_v23 = vand.u32 2147483648, %v11518_v30  ;;  %vm3168_vm14 = vcmp.eq.f32.partialorder %v11532_v60, inf }
 0x385   : > { %5614 = vst [vmem:[%s11359_s21 + $0xe8] sm:$0xff] %v5566_v46  ;;  %7355 = vlog2.f32 %v4749_v39  ;;  %v11607_v7 = vmax.f32 %v11598_v1, 1e-05  ;;  %v3146_v20 = vmul.f32 %v7338_v56, %v11518_v30  ;;  %vm3170_vm3 = vcmp.eq.f32.partialorder %v11532_v60, 0.0  ;;  %v14255_v18 = vld [vmem:[#allocation218_spill] sm:$0xff]  ;;  %v14256_v58 = vld [vmem:[#allocation221_spill] sm:$0xff]  ;;  %v2440_v56 = vpop.xlane.xlu0 %2439 }
 0x386   : > { %v11611_v24 = vpop.eup %7341  ;;  %7357 = vlog2.f32 %v4893_v52  ;;  %v4752_v33 = vadd.f32 1.0, %v5969_v47  ;;  %v4896_v45 = vsub.f32 1.0, %v5969_v47  ;;  %v3171_v12 = vand.u32 2147483648, %v11532_v60  ;;  %v14257_v46 = vld [vmem:[#allocation151_spill] sm:$0xff]  ;;  %v14258_v52 = vld [vmem:[#allocation220_spill] sm:$0xff] }
 0x387   : > { %v7344_v14 = vpop.eup %7343  ;;  %7359 = vrcp.f32 %v4605_v0  ;;  %vm4415_vm7 = vcmp.gt.f32.partialorder %v11607_v7, 0.999  ;;  %v5923_v8 = vclamps-f32 %v3986_v22, 15.0  ;;  %v3148_v5 = vsel %vm3147_vm4, %v11518_v30, %v3146_v20  ;;  %v14259_v37 = vld [vmem:[#allocation231_spill] sm:$0xff]  ;;  %v14260_v20 = vld [vmem:[#allocation222_spill] sm:$0xff] }
 0x388   : > { %v7346_v6 = vpop.eup %7345  ;;  %7361 = vlog2.f32 %v4752_v33  ;;  %v4607_v44 = vsel %vm4415_vm7, 0.999, %v11607_v7  ;;  %v11623_v36 = vsel %vm3149_vm12, %v3150_v23, %v3148_v5  ;;  %v3167_v16 = vmul.f32 %v7344_v14, %v11532_v60 }
 0x389   : > { %v7348_v40 = vpop.eup %7347  ;;  %7363 = vlog2.f32 %v4896_v45  ;;  %v5968_v53 = vclamps-f32 %v4607_v44, 0.99999  ;;  %v3457_v59 = vmul.f32 %v14252_v61, %v11623_v36  ;;  %vm3161_vm15 = vcmp.eq.f32.partialorder %v11534_v9, inf }
 0x38a   : > { %7365 = vrcp.f32 %v11607_v7  ;;  %vm4178_vm1 = vcmp.eq.f32.partialorder %v11563_v63, 0.0  ;;  %v3169_v30 = vsel %vm3168_vm14, %v11532_v60, %v3167_v16  ;;  %v3160_v11 = vmul.f32 %v7346_v6, %v11534_v9 }
 0x38b   : > { %v7350_v25 = vpop.eup %7349  ;;  %v4751_v31 = vadd.f32 1.0, %v5968_v53  ;;  %v4895_v55 = vsub.f32 1.0, %v5968_v53  ;;  %7367 = vtanh.f32 %v5923_v8  ;;  %v3985_v13 = vmul.f32 %v14253_v4, %v3457_v59  ;;  %v2954_v4 = vpop.xlane.xlu0 %2953 }
 0x38c   : > { %7369 = vrcp.f32 %v4608_v54  ;;  %v11640_v21 = vsel %vm3170_vm3, %v3171_v12, %v3169_v30  ;;  %v3162_v48 = vsel %vm3161_vm15, %v11534_v9, %v3160_v11  ;;  %v3164_v42 = vand.u32 2147483648, %v11534_v9  ;;  %v2956_v11 = vpop.xlane.xlu1 %2955 }
 0x38d   : > { %7371 = vlog2.f32 %v4751_v31  ;;  %v5922_v0 = vclamps-f32 %v3985_v13, 15.0  ;;  %v3460_v2 = vmul.f32 %v14254_v27, %v11640_v21  ;;  %vm3163_vm10 = vcmp.eq.f32.partialorder %v11534_v9, 0.0 }
 0x38e   : > { %v7352_v28 = vpop.eup %7351  ;;  %7373 = vlog2.f32 %v4895_v55  ;;  %v4226_v60 = vsel %vm4178_vm1, 1.0, %v11563_v63  ;;  %v11650_v32 = vsel %vm3163_vm10, %v3164_v42, %v3162_v48  ;;  %v2516_v19 = vadd.f32 %v11586_v51, %v14255_v18 }
 0x38f   : > { %7375 = vtanh.f32 %v5922_v0  ;;  %vm4177_vm11 = vcmp.eq.f32.partialorder %v11623_v36, 0.0  ;;  %v3988_v38 = vmul.f32 %v14256_v58, %v3460_v2  ;;  %v3459_v9 = vmul.f32 %v14257_v46, %v11650_v32 }
 0x390   : > { %v7354_v39 = vpop.eup %7353  ;;  %v2515_v54 = vadd.f32 %v11596_v62, %v14258_v52  ;;  %v11660_v47 = vadd.f32 %v2952_v50, %v2516_v19  ;;  %v2518_v22 = vadd.f32 %v2442_v10, %v14259_v37  ;;  %7377 = vlog2.f32 %v11501_v3  ;;  %v14261_v62 = vld [vmem:[#allocation234_spill] sm:$0xff] }
 0x391   : > { %v4509_v51 = vmul.f32 0.999, %v7352_v28  ;;  %7379 = vrcp.f32 %v4607_v44  ;;  %v5925_v23 = vclamps-f32 %v3988_v38, 15.0  ;;  %v3987_v33 = vmul.f32 %v14260_v20, %v3459_v9 }
 0x392   : > { %v7356_v45 = vpop.eup %7355  ;;  %7381 = vrcp.f32 %v4226_v60  ;;  %v4225_v12 = vsel %vm4177_vm11, 1.0, %v11623_v36  ;;  %vm4180_vm5 = vcmp.eq.f32.partialorder %v11640_v21, 0.0  ;;  %v2517_v14 = vadd.f32 %v2440_v56, %v14261_v62  ;;  %v14262_v62 = vld [vmem:[#allocation73_spill] sm:$0xff] }
 0x393   : > { %v7358_v8 = vpop.eup %7357  ;;  %v4806_v5 = vmul.f32 0.6931472, %v7356_v45  ;;  %v4512_v50 = vmul.f32 0.999, %v7354_v39  ;;  %7383 = vtanh.f32 %v5925_v23  ;;  %v5924_v3 = vclamps-f32 %v3987_v33, 15.0 }
 0x394   : > { %v7360_v6 = vpop.eup %7359  ;;  %v4317_v44 = vmul.f32 %v11611_v24, %v11543_v41  ;;  %v4950_v16 = vmul.f32 0.6931472, %v7358_v8  ;;  %vm4179_vm8 = vcmp.eq.f32.partialorder %v11650_v32, 0.0  ;;  %7385 = vrsqrt.f32 %v11660_v47  ;;  %v14263_v8 = vld [vmem:[#allocation29_spill] sm:$0xff] }
 0x395   : > { %v7362_v53 = vpop.eup %7361  ;;  %v4557_v61 = vsel %vm4413_vm6, %v4509_v51, 1.0  ;;  %v4320_v59 = vmul.f32 %v7348_v40, %v11565_v34  ;;  %v4228_v30 = vsel %vm4180_vm5, 1.0, %v11640_v21  ;;  %7387 = vtanh.f32 %v5924_v3 }
 0x396   : > { %v7364_v31 = vpop.eup %7363  ;;  %v5037_v55 = vsub.f32 %v4806_v5, %v4950_v16  ;;  %v4812_v41 = vmul.f32 0.6931472, %v7362_v53  ;;  %v4319_v24 = vmul.f32 %v7350_v25, %v11598_v1  ;;  %7389 = vrcp.f32 %v4225_v12 }
 0x397   : > { %v7366_v13 = vpop.eup %7365  ;;  %v4560_v57 = vsel %vm4416_vm13, %v4512_v50, 1.0  ;;  %v4956_v48 = vmul.f32 0.6931472, %v7364_v31  ;;  %v4227_v34 = vsel %vm4179_vm8, 1.0, %v11650_v32  ;;  %v11687_v40 = vadd.f32 %v11629_v26, %v2515_v54  ;;  %v14264_v50 = vld [vmem:[#allocation34_spill] sm:$0xff]  ;;  %v14265_v31 = vld [vmem:[#allocation77_spill] sm:$0xff] }
 0x398   : > { %v11689_v42 = vpop.eup %7367  ;;  %v5085_v0 = vmul.f32 0.5, %v5037_v55  ;;  %v5229_v27 = vmul.f32 %v4557_v61, %v4317_v44  ;;  %7391 = vrcp.f32 %v4228_v30  ;;  %v11691_v1 = vadd.f32 %v2956_v11, %v2518_v22 }
 0x399   : > { %v7370_v25 = vpop.eup %7369  ;;  %v5040_v2 = vsub.f32 %v4812_v41, %v4956_v48  ;;  %v11694_v35 = vmax.f32 %v11689_v42, 1e-05  ;;  %v3185_v10 = vand.u32 2147483648, %v11660_v47  ;;  %v11697_v28 = vadd.f32 %v2954_v4, %v2517_v14  ;;  %v14266_v41 = vld [vmem:[#allocation33_spill] sm:$0xff]  ;;  %v2446_v48 = vpop.xlane.xlu1 %2445 }
 0x39a   : > { %v7372_v60 = vpop.eup %7371  ;;  %v5181_v18 = vmul.f32 %v7360_v6, %v5085_v0  ;;  %v5232_v26 = vmul.f32 %v4560_v57, %v4320_v59  ;;  %v4511_v19 = vmul.f32 0.999, %v7366_v13  ;;  %7393 = vrcp.f32 %v4227_v34  ;;  %v14267_v13 = vld [vmem:[#allocation38_spill] sm:$0xff] }
 0x39b   : > { %v7374_v58 = vpop.eup %7373  ;;  %v5088_v38 = vmul.f32 0.5, %v5040_v2  ;;  %v4810_v46 = vmul.f32 0.6931472, %v7372_v60  ;;  %vm4418_vm6 = vcmp.gt.f32.partialorder %v11694_v35, 0.999  ;;  %7395 = vrsqrt.f32 %v11687_v40 }
 0x39c   : > { %v11701_v9 = vpop.eup %7375  ;;  %v5277_v56 = vmul.f32 %v5229_v27, %v5181_v18  ;;  %v4954_v39 = vmul.f32 0.6931472, %v7374_v58  ;;  %v11706_v52 = vsel %vm4418_vm6, 0.999, %v11694_v35  ;;  %7397 = vrsqrt.f32 %v11691_v1  ;;  %v14268_v58 = vld [vmem:[#allocation35_spill] sm:$0xff] }
 0x39d   : > { %v11709_v54 = vpop.eup %7377  ;;  %v5184_v37 = vmul.f32 %v7370_v25, %v5088_v38  ;;  %v5971_v22 = vclamps-f32 %v11706_v52, 0.99999  ;;  %v11713_v51 = vmax.f32 %v11701_v9, 1e-05  ;;  %7399 = vrsqrt.f32 %v11697_v28 }
 0x39e   : > { %v7380_v23 = vpop.eup %7379  ;;  %v5325_v20 = vsel %vm4173_vm9, 0.0, %v5277_v56  ;;  %v4559_v33 = vsel %vm4415_vm7, %v4511_v19, 1.0  ;;  %v5039_v45 = vsub.f32 %v4810_v46, %v4954_v39  ;;  %7401 = vrcp.f32 %v11694_v35 }
 0x39f   : > { %v11721_v12 = vpop.eup %7381  ;;  %v5373_v14 = vmul.f32 %v5325_v20, %v14262_v62  ;;  %v5469_v5 = vmul.f32 %v5325_v20, %v14263_v8  ;;  %v5565_v3 = vmul.f32 %v5325_v20, %v14264_v50  ;;  %v5280_v6 = vmul.f32 %v5232_v26, %v5184_v37  ;;  %v14269_v37 = vld [vmem:[#allocation78_spill] sm:$0xff] }
 0x3a0   : > { %vm3182_vm9 = vcmp.eq.f32.partialorder %v11660_v47, inf  ;;  %v11727_v29 = vpop.eup %7383  ;;  %v5087_v7 = vmul.f32 0.5, %v5039_v45  ;;  %v4754_v44 = vadd.f32 1.0, %v5971_v22  ;;  %v4898_v16 = vsub.f32 1.0, %v5971_v22  ;;  %v14270_v22 = vld [vmem:[#allocation37_spill] sm:$0xff]  ;;  %v14271_v20 = vld [vmem:[#allocation42_spill] sm:$0xff] }
 0x3a1   : > { %vm4417_vm4 = vcmp.gt.f32.partialorder %v11713_v51, 0.999  ;;  %vm3184_vm12 = vcmp.eq.f32.partialorder %v11660_v47, 0.0  ;;  %v7386_v53 = vpop.eup %7385  ;;  %5421 = vst [vmem:[%s11359_s21 + $0xc0] sm:$0xff] %v5373_v14  ;;  %5517 = vst [vmem:[%s11359_s21 + $0xc8] sm:$0xff] %v5469_v5  ;;  %v5328_v61 = vsel %vm4176_vm0, 0.0, %v5280_v6  ;;  %v5231_v59 = vmul.f32 %v4559_v33, %v4319_v24 }
 0x3a2   : > { %5613 = vst [vmem:[%s11359_s21 + $0xd0] sm:$0xff] %v5565_v3  ;;  %7403 = vrcp.f32 %v11713_v51  ;;  %v4609_v30 = vsel %vm4417_vm4, 0.999, %v11713_v51  ;;  %v11740_v11 = vpop.eup %7387  ;;  %v5376_v55 = vmul.f32 %v14265_v31, %v5328_v61  ;;  %v5472_v4 = vmul.f32 %v14266_v41, %v5328_v61 }
 0x3a3   : > { %v5568_v57 = vmul.f32 %v14267_v13, %v5328_v61  ;;  %v5183_v43 = vmul.f32 %v7380_v23, %v5087_v7  ;;  %v7390_v34 = vpop.eup %7389  ;;  %7405 = vlog2.f32 %v4754_v44  ;;  %v5970_v24 = vclamps-f32 %v4609_v30, 0.99999 }
 0x3a4   : > { %v11746_v0 = vmax.f32 %v11727_v29, 1e-05  ;;  %v3178_v27 = vand.u32 2147483648, %v11687_v40  ;;  %5424 = vst [vmem:[%s11359_s21 + $0x108] sm:$0xff] %v5376_v55  ;;  %5520 = vst [vmem:[%s11359_s21 + $0x110] sm:$0xff] %v5472_v4  ;;  %7407 = vlog2.f32 %v4898_v16  ;;  %v3181_v60 = vmul.f32 %v7386_v53, %v11660_v47  ;;  %v14272_v16 = vld [vmem:[#allocation159_spill] sm:$0xff] }
 0x3a5   : > { %5616 = vst [vmem:[%s11359_s21 + $0x118] sm:$0xff] %v5568_v57  ;;  %v5279_v25 = vmul.f32 %v5231_v59, %v5183_v43  ;;  %v11753_v2 = vmax.f32 %v11740_v11, 1e-05  ;;  %v11756_v18 = vpop.eup %7391  ;;  %v4753_v26 = vadd.f32 1.0, %v5970_v24  ;;  %v4897_v19 = vsub.f32 1.0, %v5970_v24 }
 0x3a6   : > { %vm4420_vm0 = vcmp.gt.f32.partialorder %v11746_v0, 0.999  ;;  %v11760_v38 = vadd.f32 %v2446_v48, %v14268_v58  ;;  %7409 = vrcp.f32 %v11746_v0  ;;  %vm3175_vm14 = vcmp.eq.f32.partialorder %v11687_v40, inf  ;;  %v14274_v58 = vld [vmem:[#allocation156_spill] sm:$0xff] }
 0x3a7   : > { %v5327_v46 = vsel %vm4175_vm2, 0.0, %v5279_v25  ;;  %v11768_v56 = vsel %vm4420_vm0, 0.999, %v11746_v0  ;;  %vm4419_vm13 = vcmp.gt.f32.partialorder %v11753_v2, 0.999  ;;  %vm3196_vm3 = vcmp.eq.f32.partialorder %v11691_v1, inf  ;;  %v7394_v39 = vpop.eup %7393 }
 0x3a8   : > { %v5375_v17 = vmul.f32 %v5327_v46, %v14269_v37  ;;  %v5471_v23 = vmul.f32 %v5327_v46, %v14270_v22  ;;  %v5567_v33 = vmul.f32 %v5327_v46, %v14271_v20  ;;  %7411 = vlog2.f32 %v4753_v26  ;;  %v7396_v45 = vpop.eup %7395  ;;  %v14281_v0 = vld [vmem:[#allocation80_spill] sm:$0xff] }
 0x3a9   : > { %vm3177_vm2 = vcmp.eq.f32.partialorder %v11687_v40, 0.0  ;;  %7413 = vlog2.f32 %v4897_v19  ;;  %v5973_v62 = vclamps-f32 %v11768_v56, 0.99999  ;;  %v4611_v14 = vsel %vm4419_vm13, 0.999, %v11753_v2  ;;  %v7398_v5 = vpop.eup %7397 }
 0x3aa   : > { %v3183_v8 = vsel %vm3182_vm9, %v11660_v47, %v3181_v60  ;;  %5423 = vst [vmem:[%s11359_s21 + $0xf0] sm:$0xff] %v5375_v17  ;;  %5519 = vst [vmem:[%s11359_s21 + $0xf8] sm:$0xff] %v5471_v23  ;;  %7415 = vrcp.f32 %v11706_v52  ;;  %v5972_v50 = vclamps-f32 %v4611_v14, 0.99999  ;;  %vm3198_vm7 = vcmp.eq.f32.partialorder %v11691_v1, 0.0  ;;  %v7400_v6 = vpop.eup %7399 }
 0x3ab   : > { %5615 = vst [vmem:[%s11359_s21 + $0x100] sm:$0xff] %v5567_v33  ;;  %v11792_v3 = vsel %vm3184_vm12, %v3185_v10, %v3183_v8  ;;  %7417 = vrcp.f32 %v4609_v30  ;;  %v4756_v7 = vadd.f32 1.0, %v5973_v62  ;;  %v4900_v44 = vsub.f32 1.0, %v5973_v62  ;;  %v7402_v61 = vpop.eup %7401  ;;  %v14273_v10 = vld [vmem:[#allocation223_spill] sm:$0xff]  ;;  %v14277_v8 = vld [vmem:[#allocation228_spill] sm:$0xff] }
 0x3ac   : > { %v3462_v53 = vmul.f32 %v14272_v16, %v11792_v3  ;;  %7419 = vrcp.f32 %v11753_v2  ;;  %v4755_v52 = vadd.f32 1.0, %v5972_v50  ;;  %v4899_v59 = vsub.f32 1.0, %v5972_v50 }
 0x3ad   : > { %v3199_v31 = vand.u32 2147483648, %v11691_v1  ;;  %v4322_v47 = vmul.f32 %v11721_v12, %v11689_v42  ;;  %7421 = vlog2.f32 %v4756_v7  ;;  %vm3189_vm15 = vcmp.eq.f32.partialorder %v11697_v28, inf }
 0x3ae   : > { %v3990_v55 = vmul.f32 %v14273_v10, %v3462_v53  ;;  %7423 = vlog2.f32 %v4900_v44  ;;  %v3174_v30 = vmul.f32 %v7396_v45, %v11687_v40  ;;  %v3195_v41 = vmul.f32 %v7398_v5, %v11691_v1 }
 0x3af   : > { %vm3191_vm10 = vcmp.eq.f32.partialorder %v11697_v28, 0.0  ;;  %v7404_v4 = vpop.eup %7403  ;;  %v4321_v13 = vmul.f32 %v7390_v34, %v11701_v9  ;;  %7425 = vlog2.f32 %v4755_v52  ;;  %v3188_v43 = vmul.f32 %v7400_v6, %v11697_v28 }
 0x3b0   : > { %v5927_v57 = vclamps-f32 %v3990_v55, 15.0  ;;  %v4514_v42 = vmul.f32 0.999, %v7402_v61  ;;  %7427 = vlog2.f32 %v4899_v59  ;;  %v3176_v12 = vsel %vm3175_vm14, %v11687_v40, %v3174_v30  ;;  %v7406_v24 = vpop.eup %7405  ;;  %v2960_v55 = vpop.xlane.xlu1 %2959 }
 0x3b1   : > { %v3197_v48 = vsel %vm3196_vm3, %v11691_v1, %v3195_v41  ;;  %v11818_v9 = vsel %vm3177_vm2, %v3178_v27, %v3176_v12  ;;  %v3190_v25 = vsel %vm3189_vm15, %v11697_v28, %v3188_v43  ;;  %v7408_v60 = vpop.eup %7407  ;;  %v4816_v26 = vmul.f32 0.6931472, %v7406_v24  ;;  %v14275_v1 = vld [vmem:[#allocation166_spill] sm:$0xff] }
 0x3b2   : > { %7429 = vtanh.f32 %v5927_v57  ;;  %v11822_v34 = vsel %vm3198_vm7, %v3199_v31, %v3197_v48  ;;  %v11829_v19 = vmul.f32 %v11756_v18, %v11727_v29  ;;  %v3461_v46 = vmul.f32 %v14274_v58, %v11818_v9  ;;  %v14276_v29 = vld [vmem:[#allocation227_spill] sm:$0xff]  ;;  %v14279_v31 = vld [vmem:[#allocation230_spill] sm:$0xff] }
 0x3b3   : > { %v3192_v40 = vand.u32 2147483648, %v11697_v28  ;;  %v4960_v27 = vmul.f32 0.6931472, %v7408_v60  ;;  %v4513_v37 = vmul.f32 0.999, %v7404_v4  ;;  %vm4182_vm9 = vcmp.eq.f32.partialorder %v11792_v3, 0.0  ;;  %v7410_v22 = vpop.eup %7409 }
 0x3b4   : > { %v3464_v17 = vmul.f32 %v14275_v1, %v11822_v34  ;;  %7431 = vrcp.f32 %v11768_v56  ;;  %v11839_v23 = vmul.f32 %v7394_v39, %v11740_v11  ;;  %v3989_v18 = vmul.f32 %v14276_v29, %v3461_v46  ;;  %v14278_v39 = vld [vmem:[#allocation163_spill] sm:$0xff]  ;;  %v14282_v29 = vld [vmem:[#allocation41_spill] sm:$0xff] }
 0x3b5   : > { %v11844_v20 = vsel %vm3191_vm10, %v3192_v40, %v3190_v25  ;;  %v7412_v33 = vpop.eup %7411  ;;  %v4562_v45 = vsel %vm4418_vm6, %v4514_v42, 1.0  ;;  %v5042_v62 = vsub.f32 %v4816_v26, %v4960_v27  ;;  %7433 = vrcp.f32 %v4611_v14  ;;  %v2444_v14 = vpop.xlane.xlu0 %2443  ;;  %v14280_v42 = vld [vmem:[#allocation242_spill] sm:$0xff] }
 0x3b6   : > { %v3992_v5 = vmul.f32 %v14277_v8, %v3464_v17  ;;  %v7414_v50 = vpop.eup %7413  ;;  %v4814_v6 = vmul.f32 0.6931472, %v7412_v33  ;;  %v4230_v11 = vsel %vm4182_vm9, 1.0, %v11792_v3  ;;  %v5926_v56 = vclamps-f32 %v3989_v18, 15.0  ;;  %v14283_v33 = vld [vmem:[#allocation46_spill] sm:$0xff] }
 0x3b7   : > { %v3463_v28 = vmul.f32 %v14278_v39, %v11844_v20  ;;  %v7416_v7 = vpop.eup %7415  ;;  %v5090_v44 = vmul.f32 0.5, %v5042_v62  ;;  %v4561_v35 = vsel %vm4417_vm4, %v4513_v37, 1.0  ;;  %v4958_v16 = vmul.f32 0.6931472, %v7414_v50 }
 0x3b8   : > { %v5929_v53 = vclamps-f32 %v3992_v5, 15.0  ;;  %v7418_v61 = vpop.eup %7417  ;;  %v5234_v52 = vmul.f32 %v4562_v45, %v4322_v47  ;;  %v4516_v59 = vmul.f32 0.999, %v7410_v22  ;;  %7435 = vtanh.f32 %v5926_v56 }
 0x3b9   : > { %v3991_v10 = vmul.f32 %v14279_v31, %v3463_v28  ;;  %v7420_v30 = vpop.eup %7419  ;;  %v5186_v41 = vmul.f32 %v7416_v7, %v5090_v44  ;;  %v5041_v4 = vsub.f32 %v4814_v6, %v4958_v16  ;;  %vm4181_vm6 = vcmp.eq.f32.partialorder %v11818_v9, 0.0  ;;  %v14285_v16 = vld [vmem:[#allocation45_spill] sm:$0xff] }
 0x3ba   : > { %7437 = vtanh.f32 %v5929_v53  ;;  %v7422_v57 = vpop.eup %7421  ;;  %v5233_v43 = vmul.f32 %v4561_v35, %v4321_v13  ;;  %v2519_v12 = vadd.f32 %v2444_v14, %v14280_v42  ;;  %v11860_v60 = vadd.f32 %v2960_v55, %v11760_v38  ;;  %v14284_v35 = vld [vmem:[#allocation81_spill] sm:$0xff] }
 0x3bb   : > { %7439 = vrcp.f32 %v4230_v11  ;;  %v5928_v51 = vclamps-f32 %v3991_v10, 15.0  ;;  %v7424_v48 = vpop.eup %7423  ;;  %v5282_v24 = vmul.f32 %v5234_v52, %v5186_v41  ;;  %v5089_v47 = vmul.f32 0.5, %v5041_v4  ;;  %v2958_v11 = vpop.xlane.xlu0 %2957  ;;  %v14286_v14 = vld [vmem:[#allocation137_spill] sm:$0xff]  ;;  %v14287_v41 = vld [vmem:[#allocation55_spill] sm:$0xff] }
 0x3bc   : > { %v4820_v25 = vmul.f32 0.6931472, %v7422_v57  ;;  %v7426_v26 = vpop.eup %7425  ;;  %v4564_v58 = vsel %vm4420_vm0, %v4516_v59, 1.0  ;;  %v4964_v46 = vmul.f32 0.6931472, %v7424_v48  ;;  %v4229_v13 = vsel %vm4181_vm6, 1.0, %v11818_v9  ;;  %v11899_v10 = vpop.xlane.xlu1 %2449 }
 0x3bd   : > { %7441 = vtanh.f32 %v5928_v51  ;;  %v7428_v40 = vpop.eup %7427  ;;  %v5330_v27 = vsel %vm4178_vm1, 0.0, %v5282_v24  ;;  %v5185_v37 = vmul.f32 %v7418_v61, %v5089_v47  ;;  %v4515_v38 = vmul.f32 0.999, %v7420_v30 }
 0x3be   : > { %v4818_v1 = vmul.f32 0.6931472, %v7426_v26  ;;  %v5378_v22 = vmul.f32 %v14281_v0, %v5330_v27  ;;  %v5474_v18 = vmul.f32 %v14282_v29, %v5330_v27  ;;  %v5570_v45 = vmul.f32 %v14283_v33, %v5330_v27  ;;  %v14292_v29 = vld [vmem:[#allocation121_spill] sm:$0xff] }
 0x3bf   : > { %v11869_v17 = vpop.eup %7429  ;;  %v5044_v62 = vsub.f32 %v4820_v25, %v4964_v46  ;;  %v5281_v8 = vmul.f32 %v5233_v43, %v5185_v37  ;;  %v4962_v5 = vmul.f32 0.6931472, %v7428_v40  ;;  %7443 = vrsqrt.f32 %v11860_v60  ;;  %v14288_v25 = vld [vmem:[#allocation83_spill] sm:$0xff]  ;;  %v14290_v46 = vld [vmem:[#allocation144_spill] sm:$0xff] }
 0x3c0   : > { %v11875_v50 = vmax.f32 %v11869_v17, 1e-05  ;;  %5426 = vst [vmem:[%s11359_s21 + $0x138] sm:$0xff] %v5378_v22  ;;  %5522 = vst [vmem:[%s11359_s21 + $0x140] sm:$0xff] %v5474_v18  ;;  %v5236_v6 = vmul.f32 %v4564_v58, %v11829_v19  ;;  %7445 = vrcp.f32 %v4229_v13  ;;  %vm4184_vm1 = vcmp.eq.f32.partialorder %v11822_v34, 0.0  ;;  %v2964_v0 = vpop.xlane.xlu1 %2963  ;;  %v14291_v22 = vld [vmem:[#allocation118_spill] sm:$0xff] }
 0x3c1   : > { %5618 = vst [vmem:[%s11359_s21 + $0x148] sm:$0xff] %v5570_v45  ;;  %v5092_v63 = vmul.f32 0.5, %v5044_v62  ;;  %v7432_v56 = vpop.eup %7431  ;;  %v5329_v39 = vsel %vm4177_vm11, 0.0, %v5281_v8  ;;  %v4563_v28 = vsel %vm4419_vm13, %v4515_v38, 1.0  ;;  %v5043_v7 = vsub.f32 %v4818_v1, %v4962_v5  ;;  %v14294_v45 = vld [vmem:[#allocation264_spill] sm:$0xff]  ;;  %v14295_v8 = vld [vmem:[#allocation85_spill] sm:$0xff] }
 0x3c2   : > { %vm4422_vm4 = vcmp.gt.f32.partialorder %v11875_v50, 0.999  ;;  %v7434_v44 = vpop.eup %7433  ;;  %v5377_v19 = vmul.f32 %v5329_v39, %v14284_v35  ;;  %v5473_v53 = vmul.f32 %v5329_v39, %v14285_v16  ;;  %v5569_v61 = vmul.f32 %v5329_v39, %v14286_v14  ;;  %v14298_v39 = vld [vmem:[#allocation273_spill] sm:$0xff]  ;;  %v2448_v16 = vpop.xlane.xlu0 %2447 }
 0x3c3   : > { %v5188_v52 = vmul.f32 %v7432_v56, %v5092_v63  ;;  %v5091_v59 = vmul.f32 0.5, %v5043_v7  ;;  %v4614_v36 = vsel %vm4422_vm4, 0.999, %v11875_v50  ;;  %v4232_v2 = vsel %vm4184_vm1, 1.0, %v11822_v34  ;;  %v14296_v63 = vld [vmem:[#allocation142_spill] sm:$0xff] }
 0x3c4   : > { %v11897_v31 = vadd.f32 %v2958_v11, %v2519_v12  ;;  %5425 = vst [vmem:[%s11359_s21 + $0x120] sm:$0xff] %v5377_v19  ;;  %5521 = vst [vmem:[%s11359_s21 + $0x128] sm:$0xff] %v5473_v53  ;;  %7447 = vrcp.f32 %v11875_v50  ;;  %v5975_v30 = vclamps-f32 %v4614_v36, 0.99999  ;;  %v11906_v4 = vmul.f32 0.6931472, %v14287_v41  ;;  %v2454_v41 = vpop.xlane.xlu1 %2453 }
 0x3c5   : > { %5617 = vst [vmem:[%s11359_s21 + $0x130] sm:$0xff] %v5569_v61  ;;  %v5284_v55 = vmul.f32 %v5236_v6, %v5188_v52  ;;  %v11908_v57 = vpop.eup %7435  ;;  %v5187_v43 = vmul.f32 %v7434_v44, %v5091_v59  ;;  %v5235_v51 = vmul.f32 %v4563_v28, %v11839_v23  ;;  %vm4183_vm11 = vcmp.eq.f32.partialorder %v11844_v20, 0.0  ;;  %v14289_v23 = vld [vmem:[#allocation50_spill] sm:$0xff]  ;;  %v14297_v11 = vld [vmem:[#allocation56_spill] sm:$0xff] }
 0x3c6   : > { %7449 = vrsqrt.f32 %v11897_v31  ;;  %v4758_v48 = vadd.f32 1.0, %v5975_v30  ;;  %v4902_v24 = vsub.f32 1.0, %v5975_v30  ;;  %v11923_v27 = vmax.f32 %v11908_v57, 1e-05 }
 0x3c7   : > { %v11913_v42 = vpop.eup %7437  ;;  %v5332_v12 = vsel %vm4180_vm5, 0.0, %v5284_v55  ;;  %7451 = vrcp.f32 %v4232_v2  ;;  %v5283_v40 = vmul.f32 %v5235_v51, %v5187_v43  ;;  %v4231_v37 = vsel %vm4183_vm11, 1.0, %v11844_v20  ;;  %v14324_v20 = vld [vmem:[#allocation239_spill] sm:$0xff] }
 0x3c8   : > { %v11917_v47 = vpop.eup %7439  ;;  %v5380_v26 = vmul.f32 %v14288_v25, %v5332_v12  ;;  %v5476_v58 = vmul.f32 %v14289_v23, %v5332_v12  ;;  %v5572_v13 = vmul.f32 %v14290_v46, %v5332_v12  ;;  %7453 = vlog2.f32 %v4758_v48  ;;  %v14300_v23 = vld [vmem:[#allocation173_spill] sm:$0xff]  ;;  %v14301_v46 = vld [vmem:[#allocation44_spill] sm:$0xff] }
 0x3c9   : > { %v11926_v21 = vmax.f32 %v11913_v42, 1e-05  ;;  %v5331_v1 = vsel %vm4179_vm8, 0.0, %v5283_v40  ;;  %7455 = vlog2.f32 %v4902_v24  ;;  %v14293_v18 = vsub.f32 %v14291_v22, %v14292_v29  ;;  %v14299_v24 = vld [vmem:[#allocation266_spill] sm:$0xff]  ;;  %v2962_v40 = vpop.xlane.xlu0 %2961 }
 0x3ca   : > { %v11931_v38 = vpop.eup %7441  ;;  %5428 = vst [vmem:[%s11359_s21 + $0x168] sm:$0xff] %v5380_v26  ;;  %5524 = vst [vmem:[%s11359_s21 + $0x170] sm:$0xff] %v5476_v58  ;;  %v11944_v62 = vmul.f32 0.6931472, %v14294_v45  ;;  %v5379_v5 = vmul.f32 %v5331_v1, %v14295_v8  ;;  %v5475_v6 = vmul.f32 %v5331_v1, %v14296_v63  ;;  %v5571_v56 = vmul.f32 %v5331_v1, %v14297_v11  ;;  %v2968_v11 = vpop.xlane.xlu1 %2967 }
 0x3cb   : > { %5620 = vst [vmem:[%s11359_s21 + $0x178] sm:$0xff] %v5572_v13  ;;  %v11941_v33 = vmul.f32 0.5, %v14293_v18  ;;  %vm4421_vm5 = vcmp.gt.f32.partialorder %v11923_v27, 0.999  ;;  %vm4424_vm8 = vcmp.gt.f32.partialorder %v11926_v21, 0.999  ;;  %7457 = vrcp.f32 %v4231_v37 }
 0x3cc   : > { %v4613_v32 = vsel %vm4421_vm5, 0.999, %v11923_v27  ;;  %v3918_v28 = vsub.f32 %v14298_v39, %v11906_v4  ;;  %v7444_v7 = vpop.eup %7443  ;;  %5427 = vst [vmem:[%s11359_s21 + $0x150] sm:$0xff] %v5379_v5  ;;  %5523 = vst [vmem:[%s11359_s21 + $0x158] sm:$0xff] %v5475_v6  ;;  %7459 = vrcp.f32 %v11923_v27  ;;  %v4616_v35 = vsel %vm4424_vm8, 0.999, %v11926_v21 }
 0x3cd   : > { %5619 = vst [vmem:[%s11359_s21 + $0x160] sm:$0xff] %v5571_v56  ;;  %v5974_v44 = vclamps-f32 %v4613_v32, 0.99999  ;;  %v11964_v19 = vmax.f32 %v11931_v38, 1e-05  ;;  %v7446_v53 = vpop.eup %7445  ;;  %7461 = vrcp.f32 %v4614_v36  ;;  %v3209_v61 = vmul.f32 %v7444_v7, %v11860_v60  ;;  %v14302_v37 = vld [vmem:[#allocation134_spill] sm:$0xff] }
 0x3ce   : > { %v5977_v14 = vclamps-f32 %v4616_v35, 0.99999  ;;  %vm3210_vm12 = vcmp.eq.f32.partialorder %v11860_v60, inf  ;;  %7463 = vrcp.f32 %v11926_v21  ;;  %v3213_v30 = vand.u32 2147483648, %v11860_v60  ;;  %v14303_v18 = vld [vmem:[#allocation235_spill] sm:$0xff]  ;;  %v14372_v39 = vld [vmem:[#allocation260_spill] sm:$0xff] }
 0x3cf   : > { %v4757_v52 = vadd.f32 1.0, %v5974_v44  ;;  %v4901_v59 = vsub.f32 1.0, %v5974_v44  ;;  %vm4423_vm0 = vcmp.gt.f32.partialorder %v11964_v19, 0.999  ;;  %7465 = vrcp.f32 %v11964_v19 }
 0x3d0   : > { %v4760_v2 = vadd.f32 1.0, %v5977_v14  ;;  %v4904_v55 = vsub.f32 1.0, %v5977_v14  ;;  %v4615_v36 = vsel %vm4423_vm0, 0.999, %v11964_v19  ;;  %v3211_v43 = vsel %vm3210_vm12, %v11860_v60, %v3209_v61 }
 0x3d1   : > { %7467 = vlog2.f32 %v4757_v52  ;;  %vm3212_vm13 = vcmp.eq.f32.partialorder %v11860_v60, 0.0  ;;  %v7448_v51 = vpop.eup %7447  ;;  %v5976_v12 = vclamps-f32 %v4615_v36, 0.99999  ;;  %v11980_v25 = vmul.f32 0.6931472, %v14299_v24  ;;  %v14304_v52 = vld [vmem:[#allocation250_spill] sm:$0xff] }
 0x3d2   : > { %7469 = vlog2.f32 %v4901_v59  ;;  %v11977_v48 = vsel %vm3212_vm13, %v3213_v30, %v3211_v43  ;;  %v2522_v13 = vadd.f32 %v11899_v10, %v14301_v46  ;;  %v11987_v1 = vmul.f32 0.6931472, %v14302_v37  ;;  %v2452_v43 = vpop.xlane.xlu0 %2451 }
 0x3d3   : > { %v7450_v26 = vpop.eup %7449  ;;  %7471 = vlog2.f32 %v4760_v2  ;;  %v3466_v58 = vmul.f32 %v14300_v23, %v11977_v48  ;;  %v4759_v22 = vadd.f32 1.0, %v5976_v12  ;;  %v4903_v29 = vsub.f32 1.0, %v5976_v12 }
 0x3d4   : > { %v7452_v60 = vpop.eup %7451  ;;  %7473 = vlog2.f32 %v4904_v55  ;;  %vm3203_vm14 = vcmp.eq.f32.partialorder %v11897_v31, inf  ;;  %v3202_v8 = vmul.f32 %v7450_v26, %v11897_v31  ;;  %vm3205_vm3 = vcmp.eq.f32.partialorder %v11897_v31, 0.0 }
 0x3d5   : > { %7475 = vrcp.f32 %v4613_v32  ;;  %v3994_v45 = vmul.f32 %v14303_v18, %v3466_v58  ;;  %v7454_v5 = vpop.eup %7453  ;;  %v4518_v63 = vmul.f32 0.999, %v7448_v51  ;;  %v3206_v10 = vand.u32 2147483648, %v11897_v31  ;;  %v14306_v51 = vld [vmem:[#allocation274_spill] sm:$0xff] }
 0x3d6   : > { %7477 = vlog2.f32 %v4759_v22  ;;  %v11994_v6 = vadd.f32 %v2964_v0, %v2522_v13  ;;  %v7456_v56 = vpop.eup %7455  ;;  %v4824_v7 = vmul.f32 0.6931472, %v7454_v5  ;;  %v3204_v32 = vsel %vm3203_vm14, %v11897_v31, %v3202_v8  ;;  %v14305_v0 = vld [vmem:[#allocation172_spill] sm:$0xff]  ;;  %v14308_v58 = vld [vmem:[#allocation110_spill] sm:$0xff] }
 0x3d7   : > { %7479 = vlog2.f32 %v4903_v29  ;;  %v5931_v44 = vclamps-f32 %v3994_v45, 15.0  ;;  %v4968_v14 = vmul.f32 0.6931472, %v7456_v56  ;;  %v11997_v61 = vsel %vm3205_vm3, %v3206_v10, %v3204_v32  ;;  %v2966_v10 = vpop.xlane.xlu0 %2965 }
 0x3d8   : > { %7481 = vrcp.f32 %v4616_v35  ;;  %v2521_v59 = vadd.f32 %v2448_v16, %v14304_v52  ;;  %v7458_v2 = vpop.eup %7457  ;;  %v4326_v55 = vmul.f32 %v11917_v47, %v11869_v17  ;;  %v3465_v30 = vmul.f32 %v14305_v0, %v11997_v61  ;;  %v14307_v47 = vld [vmem:[#allocation236_spill] sm:$0xff] }
 0x3d9   : > { %7483 = vtanh.f32 %v5931_v44  ;;  %v12005_v12 = vmul.f32 0.6931472, %v14306_v51  ;;  %v7460_v24 = vpop.eup %7459  ;;  %v5046_v31 = vsub.f32 %v4824_v7, %v4968_v14  ;;  %v4325_v35 = vmul.f32 %v7446_v53, %v11908_v57  ;;  %v2458_v53 = vpop.xlane.xlu1 %2457 }
 0x3da   : > { %7485 = vrsqrt.f32 %v11994_v6  ;;  %v12009_v26 = vadd.f32 %v2962_v40, %v2521_v59  ;;  %v7462_v16 = vpop.eup %7461  ;;  %v4566_v17 = vsel %vm4422_vm4, %v4518_v63, 1.0  ;;  %vm4186_vm2 = vcmp.eq.f32.partialorder %v11977_v48, 0.0 }
 0x3db   : > { %v3993_v23 = vmul.f32 %v14307_v47, %v3465_v30  ;;  %v2524_v46 = vadd.f32 %v2454_v41, %v14308_v58  ;;  %v7464_v13 = vpop.eup %7463  ;;  %v5094_v37 = vmul.f32 0.5, %v5046_v31  ;;  %v4328_v22 = vmul.f32 %v7452_v60, %v11913_v42  ;;  %v14309_v60 = vld [vmem:[#allocation113_spill] sm:$0xff] }
 0x3dc   : > { %v12018_v57 = vmul.f32 %v7458_v2, %v11931_v38  ;;  %7487 = vrcp.f32 %v4615_v36  ;;  %v7466_v40 = vpop.eup %7465  ;;  %v4517_v29 = vmul.f32 0.999, %v7460_v24  ;;  %vm4185_vm7 = vcmp.eq.f32.partialorder %v11997_v61, 0.0  ;;  %v14310_v31 = vld [vmem:[#allocation89_spill] sm:$0xff] }
 0x3dd   : > { %v5930_v18 = vclamps-f32 %v3993_v23, 15.0  ;;  %v12021_v50 = vadd.f32 %v2968_v11, %v2524_v46  ;;  %v5190_v8 = vmul.f32 %v7462_v16, %v5094_v37  ;;  %v5238_v5 = vmul.f32 %v4566_v17, %v4326_v55  ;;  %v2972_v24 = vpop.xlane.xlu1 %2971  ;;  %v14311_v17 = vld [vmem:[#allocation150_spill] sm:$0xff]  ;;  %v14312_v23 = vld [vmem:[#allocation157_spill] sm:$0xff] }
 0x3de   : > { %v7468_v45 = vpop.eup %7467  ;;  %v4234_v41 = vsel %vm4186_vm2, 1.0, %v11977_v48  ;;  %7489 = vrsqrt.f32 %v12009_v26  ;;  %v3227_v36 = vand.u32 2147483648, %v11994_v6  ;;  %v2523_v63 = vadd.f32 %v2452_v43, %v14309_v60  ;;  %v14313_v46 = vld [vmem:[#allocation126_spill] sm:$0xff] }
 0x3df   : > { %v7470_v42 = vpop.eup %7469  ;;  %v4822_v38 = vmul.f32 0.6931472, %v7468_v45  ;;  %7491 = vtanh.f32 %v5930_v18  ;;  %v5286_v11 = vmul.f32 %v5238_v5, %v5190_v8  ;;  %v4520_v44 = vmul.f32 0.999, %v7464_v13 }
 0x3e0   : > { %v7472_v56 = vpop.eup %7471  ;;  %v4966_v7 = vmul.f32 0.6931472, %v7470_v42  ;;  %v4233_v32 = vsel %vm4185_vm7, 1.0, %v11997_v61  ;;  %v4565_v52 = vsel %vm4421_vm5, %v4517_v29, 1.0  ;;  %v4519_v2 = vmul.f32 0.999, %v7466_v40 }
 0x3e1   : > { %v7474_v14 = vpop.eup %7473  ;;  %v4828_v59 = vmul.f32 0.6931472, %v7472_v56  ;;  %vm3224_vm15 = vcmp.eq.f32.partialorder %v11994_v6, inf  ;;  %7493 = vrsqrt.f32 %v12021_v50  ;;  %v5334_v0 = vsel %vm4182_vm9, 0.0, %v5286_v11  ;;  %v14342_v61 = vld [vmem:[#allocation187_spill] sm:$0xff] }
 0x3e2   : > { %v7476_v55 = vpop.eup %7475  ;;  %v5045_v30 = vsub.f32 %v4822_v38, %v4966_v7  ;;  %v4972_v43 = vmul.f32 0.6931472, %v7474_v14  ;;  %v12038_v51 = vadd.f32 %v2966_v10, %v2523_v63  ;;  %v5382_v16 = vmul.f32 %v14310_v31, %v5334_v0 }
 0x3e3   : > { %v7478_v27 = vpop.eup %7477  ;;  %v5478_v47 = vmul.f32 %v14311_v17, %v5334_v0  ;;  %v5574_v58 = vmul.f32 %v14312_v23, %v5334_v0  ;;  %vm3226_vm10 = vcmp.eq.f32.partialorder %v11994_v6, 0.0  ;;  %v2526_v3 = vadd.f32 %v2458_v53, %v14313_v46  ;;  %v14315_v0 = vld [vmem:[#allocation155_spill] sm:$0xff]  ;;  %v14317_v23 = vld [vmem:[#allocation93_spill] sm:$0xff]  ;;  %v14318_v46 = vld [vmem:[#allocation162_spill] sm:$0xff] }
 0x3e4   : > { %v7480_v13 = vpop.eup %7479  ;;  %v5093_v37 = vmul.f32 0.5, %v5045_v30  ;;  %v4568_v40 = vsel %vm4424_vm8, %v4520_v44, 1.0  ;;  %v5048_v29 = vsub.f32 %v4828_v59, %v4972_v43  ;;  %v4826_v18 = vmul.f32 0.6931472, %v7478_v27  ;;  %5430 = vst [vmem:[%s11359_s21 + $0x198] sm:$0xff] %v5382_v16  ;;  %v14316_v30 = vld [vmem:[#allocation164_spill] sm:$0xff] }
 0x3e5   : > { %v7482_v45 = vpop.eup %7481  ;;  %5526 = vst [vmem:[%s11359_s21 + $0x1a0] sm:$0xff] %v5478_v47  ;;  %5622 = vst [vmem:[%s11359_s21 + $0x1a8] sm:$0xff] %v5574_v58  ;;  %v5237_v8 = vmul.f32 %v4565_v52, %v4325_v35  ;;  %v4970_v5 = vmul.f32 0.6931472, %v7480_v13  ;;  %7495 = vrcp.f32 %v4234_v41  ;;  %v12050_v42 = vadd.f32 %v2972_v24, %v2526_v3  ;;  %v14319_v3 = vld [vmem:[#allocation171_spill] sm:$0xff] }
 0x3e6   : > { %v12052_v38 = vpop.eup %7483  ;;  %v5189_v60 = vmul.f32 %v7476_v55, %v5093_v37  ;;  %v5096_v53 = vmul.f32 0.5, %v5048_v29  ;;  %v4567_v63 = vsel %vm4423_vm0, %v4519_v2, 1.0  ;;  %7497 = vrsqrt.f32 %v12038_v51  ;;  %v14314_v2 = vld [vmem:[#allocation90_spill] sm:$0xff] }
 0x3e7   : > { %v7486_v21 = vpop.eup %7485  ;;  %v5240_v10 = vmul.f32 %v4568_v40, %v4328_v22  ;;  %v5047_v56 = vsub.f32 %v4826_v18, %v4970_v5  ;;  %v12058_v11 = vmax.f32 %v12052_v38, 1e-05  ;;  %7499 = vrcp.f32 %v4233_v32  ;;  %v2456_v18 = vpop.xlane.xlu0 %2455 }
 0x3e8   : > { %v5285_v35 = vmul.f32 %v5237_v8, %v5189_v60  ;;  %v5192_v41 = vmul.f32 %v7482_v45, %v5096_v53  ;;  %v3223_v7 = vmul.f32 %v7486_v21, %v11994_v6  ;;  %7501 = vrsqrt.f32 %v12050_v42  ;;  %v14320_v8 = vld [vmem:[#allocation181_spill] sm:$0xff]  ;;  %v14321_v53 = vld [vmem:[#allocation94_spill] sm:$0xff] }
 0x3e9   : > { %v7488_v44 = vpop.eup %7487  ;;  %v5095_v14 = vmul.f32 0.5, %v5047_v56  ;;  %v5239_v19 = vmul.f32 %v4567_v63, %v12018_v57  ;;  %vm4426_vm9 = vcmp.gt.f32.partialorder %v12058_v11, 0.999  ;;  %7503 = vrcp.f32 %v12058_v11  ;;  %v14322_v21 = vld [vmem:[#allocation169_spill] sm:$0xff]  ;;  %v14323_v56 = vld [vmem:[#allocation178_spill] sm:$0xff] }
 0x3ea   : > { %vm3217_vm4 = vcmp.eq.f32.partialorder %v12009_v26, inf  ;;  %v5333_v22 = vsel %vm4181_vm6, 0.0, %v5285_v35  ;;  %v5288_v32 = vmul.f32 %v5240_v10, %v5192_v41  ;;  %v4618_v52 = vsel %vm4426_vm9, 0.999, %v12058_v11 }
 0x3eb   : > { %v3225_v57 = vsel %vm3224_vm15, %v11994_v6, %v3223_v7  ;;  %vm3219_vm5 = vcmp.eq.f32.partialorder %v12009_v26, 0.0  ;;  %v7490_v59 = vpop.eup %7489  ;;  %v5381_v55 = vmul.f32 %v5333_v22, %v14314_v2  ;;  %v5477_v9 = vmul.f32 %v5333_v22, %v14315_v0 }
 0x3ec   : > { %v5573_v43 = vmul.f32 %v5333_v22, %v14316_v30  ;;  %v5191_v24 = vmul.f32 %v7488_v44, %v5095_v14  ;;  %v12078_v27 = vpop.eup %7491  ;;  %v5336_v31 = vsel %vm4184_vm1, 0.0, %v5288_v32  ;;  %v5979_v16 = vclamps-f32 %v4618_v52, 0.99999  ;;  %v14325_v32 = vld [vmem:[#allocation129_spill] sm:$0xff]  ;;  %v14326_v30 = vld [vmem:[#allocation180_spill] sm:$0xff] }
 0x3ed   : > { %v12086_v17 = vsel %vm3226_vm10, %v3227_v36, %v3225_v57  ;;  %v3220_v47 = vand.u32 2147483648, %v12009_v26  ;;  %5429 = vst [vmem:[%s11359_s21 + $0x180] sm:$0xff] %v5381_v55  ;;  %5525 = vst [vmem:[%s11359_s21 + $0x188] sm:$0xff] %v5477_v9  ;;  %v5384_v58 = vmul.f32 %v14317_v23, %v5336_v31  ;;  %v5480_v34 = vmul.f32 %v14318_v46, %v5336_v31 }
 0x3ee   : > { %5621 = vst [vmem:[%s11359_s21 + $0x190] sm:$0xff] %v5573_v43  ;;  %v5576_v13 = vmul.f32 %v14319_v3, %v5336_v31  ;;  %v5287_v37 = vmul.f32 %v5239_v19, %v5191_v24  ;;  %v7494_v40 = vpop.eup %7493  ;;  %v4762_v29 = vadd.f32 1.0, %v5979_v16  ;;  %v4906_v6 = vsub.f32 1.0, %v5979_v16  ;;  %v2970_v31 = vpop.xlane.xlu0 %2969 }
 0x3ef   : > { %v12096_v36 = vmax.f32 %v12078_v27, 1e-05  ;;  %vm3238_vm6 = vcmp.eq.f32.partialorder %v12021_v50, inf  ;;  %5432 = vst [vmem:[%s11359_s21 + $0x1c8] sm:$0xff] %v5384_v58  ;;  %5528 = vst [vmem:[%s11359_s21 + $0x1d0] sm:$0xff] %v5480_v34  ;;  %v3468_v5 = vmul.f32 %v14320_v8, %v12086_v17  ;;  %v3216_v60 = vmul.f32 %v7490_v59, %v12009_v26 }
 0x3f0   : > { %5624 = vst [vmem:[%s11359_s21 + $0x1d8] sm:$0xff] %v5576_v13  ;;  %v5335_v45 = vsel %vm4183_vm11, 0.0, %v5287_v37  ;;  %vm3240_vm1 = vcmp.eq.f32.partialorder %v12021_v50, 0.0  ;;  %7505 = vlog2.f32 %v4762_v29  ;;  %v3241_v7 = vand.u32 2147483648, %v12021_v50  ;;  %v14328_v13 = vld [vmem:[#allocation107_spill] sm:$0xff] }
 0x3f1   : > { %v5383_v63 = vmul.f32 %v5335_v45, %v14321_v53  ;;  %v5479_v10 = vmul.f32 %v5335_v45, %v14322_v21  ;;  %v5575_v35 = vmul.f32 %v5335_v45, %v14323_v56  ;;  %7507 = vlog2.f32 %v4906_v6  ;;  %v14329_v45 = vld [vmem:[#allocation145_spill] sm:$0xff] }
 0x3f2   : > { %vm4425_vm8 = vcmp.gt.f32.partialorder %v12096_v36, 0.999  ;;  %v3996_v41 = vmul.f32 %v14324_v20, %v3468_v5  ;;  %v12114_v44 = vpop.eup %7495  ;;  %v3218_v19 = vsel %vm3217_vm4, %v12009_v26, %v3216_v60  ;;  %v3237_v22 = vmul.f32 %v7494_v40, %v12021_v50  ;;  %v2462_v26 = vpop.xlane.xlu1 %2461  ;;  %v14330_v5 = vld [vmem:[#allocation243_spill] sm:$0xff] }
 0x3f3   : > { %5431 = vst [vmem:[%s11359_s21 + $0x1b0] sm:$0xff] %v5383_v63  ;;  %5527 = vst [vmem:[%s11359_s21 + $0x1b8] sm:$0xff] %v5479_v10  ;;  %v4617_v14 = vsel %vm4425_vm8, 0.999, %v12096_v36  ;;  %v2525_v57 = vadd.f32 %v2456_v18, %v14325_v32  ;;  %v7498_v59 = vpop.eup %7497  ;;  %7509 = vrcp.f32 %v12096_v36  ;;  %v12130_v0 = vsel %vm3219_vm5, %v3220_v47, %v3218_v19  ;;  %v14331_v63 = vld [vmem:[#allocation127_spill] sm:$0xff]  ;;  %v2460_v20 = vpop.xlane.xlu0 %2459 }
 0x3f4   : > { %5623 = vst [vmem:[%s11359_s21 + $0x1c0] sm:$0xff] %v5575_v35  ;;  %v5978_v2 = vclamps-f32 %v4617_v14, 0.99999  ;;  %v5933_v55 = vclamps-f32 %v3996_v41, 15.0  ;;  %v12132_v9 = vpop.eup %7499  ;;  %7511 = vrcp.f32 %v4618_v52  ;;  %v3467_v43 = vmul.f32 %v14326_v30, %v12130_v0  ;;  %v14327_v52 = vld [vmem:[#allocation241_spill] sm:$0xff] }
 0x3f5   : > { %v3239_v24 = vsel %vm3238_vm6, %v12021_v50, %v3237_v22  ;;  %vm3231_vm11 = vcmp.eq.f32.partialorder %v12038_v51, inf  ;;  %v7502_v16 = vpop.eup %7501  ;;  %vm3233_vm12 = vcmp.eq.f32.partialorder %v12038_v51, 0.0  ;;  %vm4188_vm0 = vcmp.eq.f32.partialorder %v12086_v17, 0.0 }
 0x3f6   : > { %v4761_v23 = vadd.f32 1.0, %v5978_v2  ;;  %v4905_v58 = vsub.f32 1.0, %v5978_v2  ;;  %7513 = vtanh.f32 %v5933_v55  ;;  %v7504_v47 = vpop.eup %7503  ;;  %v3995_v46 = vmul.f32 %v14327_v52, %v3467_v43  ;;  %v2976_v32 = vpop.xlane.xlu1 %2975  ;;  %v14334_v52 = vld [vmem:[#allocation43_spill] sm:$0xff] }
 0x3f7   : > { %v12145_v34 = vsel %vm3240_vm1, %v3241_v7, %v3239_v24  ;;  %v3230_v3 = vmul.f32 %v7498_v59, %v12038_v51  ;;  %v3234_v40 = vand.u32 2147483648, %v12038_v51  ;;  %v12151_v29 = vadd.f32 %v2970_v31, %v2525_v57  ;;  %v14333_v31 = vld [vmem:[#allocation111_spill] sm:$0xff] }
 0x3f8   : > { %7515 = vlog2.f32 %v4761_v23  ;;  %v3470_v37 = vmul.f32 %v14328_v13, %v12145_v34  ;;  %v5932_v6 = vclamps-f32 %v3995_v46, 15.0  ;;  %v2528_v50 = vadd.f32 %v2462_v26, %v14329_v45 }
 0x3f9   : > { %7517 = vlog2.f32 %v4905_v58  ;;  %v3232_v18 = vsel %vm3231_vm11, %v12038_v51, %v3230_v3  ;;  %v4236_v8 = vsel %vm4188_vm0, 1.0, %v12086_v17  ;;  %vm3252_vm13 = vcmp.eq.f32.partialorder %v12050_v42, inf  ;;  %v14332_v51 = vld [vmem:[#allocation244_spill] sm:$0xff]  ;;  %v2974_v3 = vpop.xlane.xlu0 %2973 }
 0x3fa   : > { %v3998_v60 = vmul.f32 %v14330_v5, %v3470_v37  ;;  %v12163_v53 = vsel %vm3233_vm12, %v3234_v40, %v3232_v18  ;;  %7519 = vtanh.f32 %v5932_v6  ;;  %vm4187_vm14 = vcmp.eq.f32.partialorder %v12130_v0, 0.0 }
 0x3fb   : > { %v3469_v21 = vmul.f32 %v14331_v63, %v12163_v53  ;;  %vm3254_vm3 = vcmp.eq.f32.partialorder %v12050_v42, 0.0  ;;  %v4522_v10 = vmul.f32 0.999, %v7504_v47  ;;  %7521 = vrcp.f32 %v4617_v14 }
 0x3fc   : > { %v5935_v56 = vclamps-f32 %v3998_v60, 15.0  ;;  %v3251_v35 = vmul.f32 %v7502_v16, %v12050_v42  ;;  %7523 = vrcp.f32 %v4236_v8  ;;  %vm4190_vm15 = vcmp.eq.f32.partialorder %v12145_v34, 0.0 }
 0x3fd   : > { %v3997_v41 = vmul.f32 %v14332_v51, %v3469_v21  ;;  %v3255_v7 = vand.u32 2147483648, %v12050_v42  ;;  %v7506_v19 = vpop.eup %7505  ;;  %v4235_v22 = vsel %vm4187_vm14, 1.0, %v12130_v0  ;;  %vm4189_vm10 = vcmp.eq.f32.partialorder %v12163_v53, 0.0 }
 0x3fe   : > { %7525 = vtanh.f32 %v5935_v56  ;;  %v3253_v14 = vsel %vm3252_vm13, %v12050_v42, %v3251_v35  ;;  %v7508_v57 = vpop.eup %7507  ;;  %v4832_v59 = vmul.f32 0.6931472, %v7506_v19  ;;  %v4570_v30 = vsel %vm4426_vm9, %v4522_v10, 1.0  ;;  %v2466_v35 = vpop.xlane.xlu1 %2465 }
 0x3ff   : > { %v5934_v2 = vclamps-f32 %v3997_v41, 15.0  ;;  %v12183_v55 = vsel %vm3254_vm3, %v3255_v7, %v3253_v14  ;;  %7527 = vrsqrt.f32 %v12151_v29  ;;  %v4976_v43 = vmul.f32 0.6931472, %v7508_v57 }
 0x400   : > { %v4238_v24 = vsel %vm4190_vm15, 1.0, %v12145_v34  ;;  %v3472_v16 = vmul.f32 %v14333_v31, %v12183_v55  ;;  %v7510_v23 = vpop.eup %7509  ;;  %v4330_v58 = vmul.f32 %v12114_v44, %v12052_v38  ;;  %v4237_v42 = vsel %vm4189_vm10, 1.0, %v12163_v53  ;;  %v14335_v44 = vld [vmem:[#allocation148_spill] sm:$0xff]  ;;  %v14337_v31 = vld [vmem:[#allocation97_spill] sm:$0xff] }
 0x401   : > { %7529 = vtanh.f32 %v5934_v2  ;;  %v12198_v26 = vadd.f32 %v2976_v32, %v2528_v50  ;;  %v7512_v11 = vpop.eup %7511  ;;  %v5050_v47 = vsub.f32 %v4832_v59, %v4976_v43  ;;  %vm4192_vm9 = vcmp.eq.f32.partialorder %v12183_v55, 0.0 }
 0x402   : > { %7531 = vrcp.f32 %v4235_v22  ;;  %v4000_v46 = vmul.f32 %v14334_v52, %v3472_v16  ;;  %v5242_v37 = vmul.f32 %v4570_v30, %v4330_v58  ;;  %v4329_v38 = vmul.f32 %v12132_v9, %v12078_v27  ;;  %v14336_v30 = vld [vmem:[#allocation165_spill] sm:$0xff] }
 0x403   : > { %v7514_v13 = vpop.eup %7513  ;;  %7533 = vrcp.f32 %v4238_v24  ;;  %v2527_v40 = vadd.f32 %v2460_v20, %v14335_v44  ;;  %v5098_v6 = vmul.f32 0.5, %v5050_v47  ;;  %v4521_v18 = vmul.f32 0.999, %v7510_v23  ;;  %v14338_v23 = vld [vmem:[#allocation176_spill] sm:$0xff] }
 0x404   : > { %v12205_v45 = vmax.f32 %v7514_v13, 1e-05  ;;  %7535 = vrcp.f32 %v4237_v42  ;;  %v5937_v8 = vclamps-f32 %v4000_v46, 15.0  ;;  %v4240_v5 = vsel %vm4192_vm9, 1.0, %v12183_v55  ;;  %v14339_v42 = vld [vmem:[#allocation183_spill] sm:$0xff] }
 0x405   : > { %v7516_v50 = vpop.eup %7515  ;;  %7537 = vrsqrt.f32 %v12198_v26  ;;  %v12211_v60 = vadd.f32 %v2974_v3, %v2527_v40  ;;  %v5194_v27 = vmul.f32 %v7512_v11, %v5098_v6  ;;  %v3248_v56 = vand.u32 2147483648, %v12151_v29 }
 0x406   : > { %v7518_v63 = vpop.eup %7517  ;;  %v4830_v9 = vmul.f32 0.6931472, %v7516_v50  ;;  %vm4428_vm4 = vcmp.gt.f32.partialorder %v12205_v45, 0.999  ;;  %7539 = vrcp.f32 %v12205_v45  ;;  %v4569_v41 = vsel %vm4425_vm8, %v4521_v18, 1.0 }
 0x407   : > { %v4974_v21 = vmul.f32 0.6931472, %v7518_v63  ;;  %v4620_v10 = vsel %vm4428_vm4, 0.999, %v12205_v45  ;;  %7541 = vtanh.f32 %v5937_v8  ;;  %v12219_v20 = vpop.eup %7519  ;;  %v5290_v51 = vmul.f32 %v5242_v37, %v5194_v27 }
 0x408   : > { %v5981_v7 = vclamps-f32 %v4620_v10, 0.99999  ;;  %7543 = vrcp.f32 %v4240_v5  ;;  %vm3245_vm5 = vcmp.eq.f32.partialorder %v12151_v29, inf  ;;  %v7522_v19 = vpop.eup %7521  ;;  %v12225_v14 = vmax.f32 %v12219_v20, 1e-05 }
 0x409   : > { %v5049_v22 = vsub.f32 %v4830_v9, %v4974_v21  ;;  %v3269_v32 = vand.u32 2147483648, %v12198_v26  ;;  %7545 = vrsqrt.f32 %v12211_v60  ;;  %v7524_v57 = vpop.eup %7523  ;;  %v5338_v59 = vsel %vm4186_vm2, 0.0, %v5290_v51 }
 0x40a   : > { %v4764_v36 = vadd.f32 1.0, %v5981_v7  ;;  %v4908_v2 = vsub.f32 1.0, %v5981_v7  ;;  %v12232_v43 = vadd.f32 %v2466_v35, %v14336_v30  ;;  %v5386_v16 = vmul.f32 %v14337_v31, %v5338_v59 }
 0x40b   : > { %v12234_v24 = vpop.eup %7525  ;;  %v5482_v58 = vmul.f32 %v14338_v23, %v5338_v59  ;;  %v5578_v11 = vmul.f32 %v14339_v42, %v5338_v59  ;;  %v5097_v47 = vmul.f32 0.5, %v5049_v22  ;;  %vm3247_vm6 = vcmp.eq.f32.partialorder %v12151_v29, 0.0 }
 0x40c   : > { %v7528_v48 = vpop.eup %7527  ;;  %v5241_v52 = vmul.f32 %v4569_v41, %v4329_v38  ;;  %7547 = vlog2.f32 %v4764_v36  ;;  %vm4427_vm2 = vcmp.gt.f32.partialorder %v12225_v14, 0.999  ;;  %v12242_v46 = vmax.f32 %v12234_v24, 1e-05  ;;  %5434 = vst [vmem:[%s11359_s21 + $0x1f8] sm:$0xff] %v5386_v16  ;;  %v2464_v41 = vpop.xlane.xlu0 %2463 }
 0x40d   : > { %5530 = vst [vmem:[%s11359_s21 + $0x200] sm:$0xff] %v5482_v58  ;;  %5626 = vst [vmem:[%s11359_s21 + $0x208] sm:$0xff] %v5578_v11  ;;  %v5193_v3 = vmul.f32 %v7522_v19, %v5097_v47  ;;  %7549 = vlog2.f32 %v4908_v2  ;;  %v4619_v37 = vsel %vm4427_vm2, 0.999, %v12225_v14  ;;  %v3244_v44 = vmul.f32 %v7528_v48, %v12151_v29  ;;  %v14340_v19 = vld [vmem:[#allocation99_spill] sm:$0xff]  ;;  %v2980_v16 = vpop.xlane.xlu1 %2979 }
 0x40e   : > { %v12251_v40 = vpop.eup %7529  ;;  %v12253_v38 = vmul.f32 %v7524_v57, %v7514_v13  ;;  %7551 = vrcp.f32 %v12225_v14  ;;  %v5980_v6 = vclamps-f32 %v4619_v37, 0.99999  ;;  %vm4430_vm1 = vcmp.gt.f32.partialorder %v12242_v46, 0.999  ;;  %v14341_v57 = vld [vmem:[#allocation182_spill] sm:$0xff]  ;;  %v14343_v11 = vld [vmem:[#allocation167_spill] sm:$0xff] }
 0x40f   : > { %v7532_v18 = vpop.eup %7531  ;;  %v5289_v50 = vmul.f32 %v5241_v52, %v5193_v3  ;;  %7553 = vrcp.f32 %v4620_v10  ;;  %v4622_v8 = vsel %vm4430_vm1, 0.999, %v12242_v46  ;;  %v3262_v5 = vand.u32 2147483648, %v12211_v60 }
 0x410   : > { %v12261_v63 = vpop.eup %7533  ;;  %v4763_v27 = vadd.f32 1.0, %v5980_v6  ;;  %v4907_v9 = vsub.f32 1.0, %v5980_v6  ;;  %7555 = vrcp.f32 %v4619_v37  ;;  %v5983_v13 = vclamps-f32 %v4622_v8, 0.99999 }
 0x411   : > { %vm3266_vm8 = vcmp.eq.f32.partialorder %v12198_v26, inf  ;;  %v12264_v21 = vpop.eup %7535  ;;  %v5337_v35 = vsel %vm4185_vm7, 0.0, %v5289_v50  ;;  %7557 = vrcp.f32 %v12242_v46  ;;  %v12270_v10 = vmax.f32 %v12251_v40, 1e-05 }
 0x412   : > { %v3246_v51 = vsel %vm3245_vm5, %v12151_v29, %v3244_v44  ;;  %v7538_v7 = vpop.eup %7537  ;;  %v5385_v22 = vmul.f32 %v5337_v35, %v14340_v19  ;;  %v5481_v59 = vmul.f32 %v5337_v35, %v14341_v57  ;;  %v5577_v36 = vmul.f32 %v5337_v35, %v14342_v61  ;;  %v14344_v29 = vld [vmem:[#allocation109_spill] sm:$0xff]  ;;  %v14345_v35 = vld [vmem:[#allocation255_spill] sm:$0xff] }
 0x413   : > { %7559 = vlog2.f32 %v4763_v27  ;;  %vm3268_vm7 = vcmp.eq.f32.partialorder %v12198_v26, 0.0  ;;  %v7540_v2 = vpop.eup %7539  ;;  %v4766_v30 = vadd.f32 1.0, %v5983_v13  ;;  %v4910_v31 = vsub.f32 1.0, %v5983_v13 }
 0x414   : > { %7561 = vlog2.f32 %v4907_v9  ;;  %vm4429_vm11 = vcmp.gt.f32.partialorder %v12270_v10, 0.999  ;;  %v12280_v23 = vpop.eup %7541  ;;  %5433 = vst [vmem:[%s11359_s21 + $0x1e0] sm:$0xff] %v5385_v22  ;;  %5529 = vst [vmem:[%s11359_s21 + $0x1e8] sm:$0xff] %v5481_v59  ;;  %v12293_v42 = vsel %vm3247_vm6, %v3248_v56, %v3246_v51  ;;  %vm3259_vm12 = vcmp.eq.f32.partialorder %v12211_v60, inf }
 0x415   : > { %5625 = vst [vmem:[%s11359_s21 + $0x1f0] sm:$0xff] %v5577_v36  ;;  %7563 = vrcp.f32 %v12270_v10  ;;  %v4621_v58 = vsel %vm4429_vm11, 0.999, %v12270_v10  ;;  %v2529_v47 = vadd.f32 %v2464_v41, %v14343_v11  ;;  %v12297_v48 = vpop.eup %7543  ;;  %v12300_v3 = vmax.f32 %v12280_v23, 1e-05 }
 0x416   : > { %7565 = vlog2.f32 %v4766_v30  ;;  %v5982_v52 = vclamps-f32 %v4621_v58, 0.99999  ;;  %v3265_v37 = vmul.f32 %v7538_v7, %v12198_v26  ;;  %v7546_v44 = vpop.eup %7545  ;;  %v12304_v6 = vmul.f32 %v7532_v18, %v12219_v20 }
 0x417   : > { %7567 = vlog2.f32 %v4910_v31  ;;  %v3471_v56 = vmul.f32 %v14344_v29, %v12293_v42  ;;  %v12309_v50 = vadd.f32 %v2980_v16, %v12232_v43  ;;  %v4524_v27 = vmul.f32 0.999, %v7540_v2  ;;  %v2978_v2 = vpop.xlane.xlu0 %2977 }
 0x418   : > { %7569 = vrcp.f32 %v4622_v8  ;;  %v4765_v9 = vadd.f32 1.0, %v5982_v52  ;;  %v4909_v13 = vsub.f32 1.0, %v5982_v52  ;;  %vm3261_vm13 = vcmp.eq.f32.partialorder %v12211_v60, 0.0 }
 0x419   : > { %vm4432_vm3 = vcmp.gt.f32.partialorder %v12300_v3, 0.999  ;;  %7571 = vrcp.f32 %v12300_v3  ;;  %v3999_v20 = vmul.f32 %v14345_v35, %v3471_v56  ;;  %vm4191_vm5 = vcmp.eq.f32.partialorder %v12293_v42, 0.0  ;;  %v7548_v18 = vpop.eup %7547  ;;  %v14347_v35 = vld [vmem:[#allocation256_spill] sm:$0xff] }
 0x41a   : > { %7573 = vlog2.f32 %v4765_v9  ;;  %v4624_v43 = vsel %vm4432_vm3, 0.999, %v12300_v3  ;;  %v3267_v8 = vsel %vm3266_vm8, %v12198_v26, %v3265_v37  ;;  %v3258_v51 = vmul.f32 %v7546_v44, %v12211_v60  ;;  %v7550_v41 = vpop.eup %7549 }
 0x41b   : > { %v4836_v7 = vmul.f32 0.6931472, %v7548_v18  ;;  %7575 = vlog2.f32 %v4909_v13  ;;  %v5985_v19 = vclamps-f32 %v4624_v43, 0.99999  ;;  %v5936_v22 = vclamps-f32 %v3999_v20, 15.0  ;;  %v7552_v57 = vpop.eup %7551 }
 0x41c   : > { %v4572_v59 = vsel %vm4428_vm4, %v4524_v27, 1.0  ;;  %v4980_v61 = vmul.f32 0.6931472, %v7550_v41  ;;  %7577 = vrcp.f32 %v4621_v58  ;;  %v12329_v36 = vsel %vm3268_vm7, %v3269_v32, %v3267_v8  ;;  %v7554_v30 = vpop.eup %7553  ;;  %v14346_v58 = vld [vmem:[#allocation116_spill] sm:$0xff] }
 0x41d   : > { %v4768_v31 = vadd.f32 1.0, %v5985_v19  ;;  %v4912_v16 = vsub.f32 1.0, %v5985_v19  ;;  %7579 = vtanh.f32 %v5936_v22  ;;  %v4239_v11 = vsel %vm4191_vm5, 1.0, %v12293_v42  ;;  %v7556_v52 = vpop.eup %7555  ;;  %v14348_v22 = vld [vmem:[#allocation115_spill] sm:$0xff] }
 0x41e   : > { %v5052_v45 = vsub.f32 %v4836_v7, %v4980_v61  ;;  %7581 = vrcp.f32 %v4624_v43  ;;  %v3474_v37 = vmul.f32 %v14346_v58, %v12329_v36  ;;  %v3260_v26 = vsel %vm3259_vm12, %v12211_v60, %v3258_v51  ;;  %v7558_v32 = vpop.eup %7557 }
 0x41f   : > { %v4523_v44 = vmul.f32 0.999, %v7552_v57  ;;  %v4334_v29 = vmul.f32 %v12261_v63, %v12234_v24  ;;  %7583 = vlog2.f32 %v4768_v31  ;;  %v12341_v56 = vadd.f32 %v2978_v2, %v2529_v47 }
 0x420   : > { %v7560_v27 = vpop.eup %7559  ;;  %v5100_v9 = vmul.f32 0.5, %v5052_v45  ;;  %v5244_v13 = vmul.f32 %v4572_v59, %v12253_v38  ;;  %7585 = vlog2.f32 %v4912_v16  ;;  %v4002_v20 = vmul.f32 %v14347_v35, %v3474_v37  ;;  %v14349_v16 = vld [vmem:[#allocation257_spill] sm:$0xff] }
 0x421   : > { %v7562_v18 = vpop.eup %7561  ;;  %v4834_v43 = vmul.f32 0.6931472, %v7560_v27  ;;  %7587 = vrcp.f32 %v4239_v11  ;;  %vm4194_vm4 = vcmp.eq.f32.partialorder %v12329_v36, 0.0  ;;  %v12350_v24 = vsel %vm3261_vm13, %v3262_v5, %v3260_v26  ;;  %v14350_v26 = vld [vmem:[#allocation102_spill] sm:$0xff] }
 0x422   : > { %v7564_v63 = vpop.eup %7563  ;;  %v5196_v47 = vmul.f32 %v7554_v30, %v5100_v9  ;;  %v4978_v8 = vmul.f32 0.6931472, %v7562_v18  ;;  %v4526_v51 = vmul.f32 0.999, %v7558_v32  ;;  %v5939_v41 = vclamps-f32 %v4002_v20, 15.0  ;;  %v14352_v9 = vld [vmem:[#allocation190_spill] sm:$0xff] }
 0x423   : > { %v7566_v38 = vpop.eup %7565  ;;  %v4571_v7 = vsel %vm4427_vm2, %v4523_v44, 1.0  ;;  %v4333_v19 = vmul.f32 %v12264_v21, %v12251_v40  ;;  %v3473_v57 = vmul.f32 %v14348_v22, %v12350_v24  ;;  %7589 = vrsqrt.f32 %v12309_v50  ;;  %v14351_v44 = vld [vmem:[#allocation186_spill] sm:$0xff] }
 0x424   : > { %v7568_v60 = vpop.eup %7567  ;;  %v5292_v5 = vmul.f32 %v5244_v13, %v5196_v47  ;;  %v5051_v59 = vsub.f32 %v4834_v43, %v4978_v8  ;;  %v4840_v61 = vmul.f32 0.6931472, %v7566_v38  ;;  %7591 = vtanh.f32 %v5939_v41  ;;  %v12377_v41 = vpop.xlane.xlu1 %2469 }
 0x425   : > { %v7570_v2 = vpop.eup %7569  ;;  %v4984_v30 = vmul.f32 0.6931472, %v7568_v60  ;;  %v4525_v31 = vmul.f32 0.999, %v7564_v63  ;;  %v4242_v14 = vsel %vm4194_vm4, 1.0, %v12329_v36  ;;  %v4001_v11 = vmul.f32 %v14349_v16, %v3473_v57 }
 0x426   : > { %v7572_v40 = vpop.eup %7571  ;;  %v5340_v21 = vsel %vm4188_vm0, 0.0, %v5292_v5  ;;  %v5099_v45 = vmul.f32 0.5, %v5051_v59  ;;  %v4574_v58 = vsel %vm4430_vm1, %v4526_v51, 1.0  ;;  %vm4193_vm6 = vcmp.eq.f32.partialorder %v12350_v24, 0.0 }
 0x427   : > { %v7574_v37 = vpop.eup %7573  ;;  %v5388_v32 = vmul.f32 %v14350_v26, %v5340_v21  ;;  %v5484_v27 = vmul.f32 %v14351_v44, %v5340_v21  ;;  %v5580_v13 = vmul.f32 %v14352_v9, %v5340_v21  ;;  %v5054_v35 = vsub.f32 %v4840_v61, %v4984_v30  ;;  %v14355_v21 = vld [vmem:[#allocation193_spill] sm:$0xff] }
 0x428   : > { %v7576_v20 = vpop.eup %7575  ;;  %v5195_v17 = vmul.f32 %v7556_v52, %v5099_v45  ;;  %v5243_v18 = vmul.f32 %v4571_v7, %v12304_v6  ;;  %v4838_v43 = vmul.f32 0.6931472, %v7574_v37  ;;  %v5938_v63 = vclamps-f32 %v4001_v11, 15.0  ;;  %v14354_v11 = vld [vmem:[#allocation189_spill] sm:$0xff] }
 0x429   : > { %v7578_v47 = vpop.eup %7577  ;;  %5436 = vst [vmem:[%s11359_s21 + $0x228] sm:$0xff] %v5388_v32  ;;  %5532 = vst [vmem:[%s11359_s21 + $0x230] sm:$0xff] %v5484_v27  ;;  %v5102_v46 = vmul.f32 0.5, %v5054_v35  ;;  %v4573_v8 = vsel %vm4429_vm11, %v4525_v31, 1.0  ;;  %v4982_v51 = vmul.f32 0.6931472, %v7576_v20  ;;  %7593 = vrcp.f32 %v4242_v14  ;;  %v12392_v31 = vpop.xlane.xlu0 %2467 }
 0x42a   : > { %5628 = vst [vmem:[%s11359_s21 + $0x238] sm:$0xff] %v5580_v13  ;;  %v12379_v38 = vpop.eup %7579  ;;  %v5291_v22 = vmul.f32 %v5243_v18, %v5195_v17  ;;  %v5246_v52 = vmul.f32 %v4574_v58, %v4334_v29  ;;  %7595 = vtanh.f32 %v5938_v63  ;;  %v4241_v6 = vsel %vm4193_vm6, 1.0, %v12350_v24  ;;  %v14353_v14 = vld [vmem:[#allocation104_spill] sm:$0xff]  ;;  %v12408_v32 = vpop.xlane.xlu1 %2983  ;;  %v14356_v27 = vld [vmem:[#allocation59_spill] sm:$0xff]  ;;  %v14358_v20 = vld [vmem:[#allocation197_spill] sm:$0xff] }
 0x42b   : > { %v7582_v7 = vpop.eup %7581  ;;  %v5198_v57 = vmul.f32 %v7570_v2, %v5102_v46  ;;  %v5053_v60 = vsub.f32 %v4838_v43, %v4982_v51  ;;  %v4528_v5 = vmul.f32 0.999, %v7572_v40  ;;  %v12385_v10 = vmax.f32 %v12379_v38, 1e-05  ;;  %v14357_v13 = vld [vmem:[#allocation192_spill] sm:$0xff] }
 0x42c   : > { %v7584_v59 = vpop.eup %7583  ;;  %v5339_v61 = vsel %vm4187_vm14, 0.0, %v5291_v22  ;;  %v5245_v30 = vmul.f32 %v4573_v8, %v4333_v19  ;;  %v4336_v29 = vmul.f32 %v12297_v48, %v12280_v23  ;;  %7597 = vrsqrt.f32 %v12341_v56 }
 0x42d   : > { %v7586_v2 = vpop.eup %7585  ;;  %v5387_v16 = vmul.f32 %v5339_v61, %v14353_v14  ;;  %v5483_v40 = vmul.f32 %v5339_v61, %v14354_v11  ;;  %v5579_v45 = vmul.f32 %v5339_v61, %v14355_v21  ;;  %v5294_v0 = vmul.f32 %v5246_v52, %v5198_v57  ;;  %v12425_v51 = vpop.xlane.xlu0 %2981 }
 0x42e   : > { %v12397_v58 = vpop.eup %7587  ;;  %v5101_v37 = vmul.f32 0.5, %v5053_v60  ;;  %v4844_v19 = vmul.f32 0.6931472, %v7584_v59  ;;  %v4988_v26 = vmul.f32 0.6931472, %v7586_v2  ;;  %7599 = vrcp.f32 %v4241_v6  ;;  %v14360_v2 = vld [vmem:[#allocation196_spill] sm:$0xff]  ;;  %v12442_v21 = vpop.xlane.xlu1 %2473 }
 0x42f   : > { %5435 = vst [vmem:[%s11359_s21 + $0x210] sm:$0xff] %v5387_v16  ;;  %5531 = vst [vmem:[%s11359_s21 + $0x218] sm:$0xff] %v5483_v40  ;;  %v5342_v23 = vsel %vm4190_vm15, 0.0, %v5294_v0  ;;  %v4576_v48 = vsel %vm4432_vm3, %v4528_v5, 1.0  ;;  %vm4431_vm0 = vcmp.gt.f32.partialorder %v12385_v10, 0.999  ;;  %7601 = vrcp.f32 %v12385_v10 }
 0x430   : > { %5627 = vst [vmem:[%s11359_s21 + $0x220] sm:$0xff] %v5579_v45  ;;  %vm3280_vm14 = vcmp.eq.f32.partialorder %v12309_v50, inf  ;;  %v7590_v44 = vpop.eup %7589  ;;  %v5390_v9 = vmul.f32 %v14356_v27, %v5342_v23  ;;  %v5486_v35 = vmul.f32 %v14357_v13, %v5342_v23  ;;  %v5582_v34 = vmul.f32 %v14358_v20, %v5342_v23  ;;  %v14361_v16 = vld [vmem:[#allocation200_spill] sm:$0xff]  ;;  %v14362_v45 = vld [vmem:[#allocation122_spill] sm:$0xff]  ;;  %v14364_v13 = vld [vmem:[#allocation259_spill] sm:$0xff] }
 0x431   : > { %v5197_v17 = vmul.f32 %v7578_v47, %v5101_v37  ;;  %v12413_v18 = vpop.eup %7591  ;;  %v5056_v3 = vsub.f32 %v4844_v19, %v4988_v26  ;;  %v4623_v43 = vsel %vm4431_vm0, 0.999, %v12385_v10  ;;  %v3279_v63 = vmul.f32 %v7590_v44, %v12309_v50  ;;  %v14363_v26 = vld [vmem:[#allocation138_spill] sm:$0xff]  ;;  %v12463_v27 = vpop.xlane.xlu0 %2471  ;;  %v14365_v20 = vld [vmem:[#allocation276_spill] sm:$0xff] }
 0x432   : > { %vm3282_vm15 = vcmp.eq.f32.partialorder %v12309_v50, 0.0  ;;  %5438 = vst [vmem:[%s11359_s21 + $0x258] sm:$0xff] %v5390_v9  ;;  %5534 = vst [vmem:[%s11359_s21 + $0x260] sm:$0xff] %v5486_v35  ;;  %v5984_v8 = vclamps-f32 %v4623_v43, 0.99999  ;;  %v3283_v47 = vand.u32 2147483648, %v12309_v50  ;;  %v5248_v52 = vmul.f32 %v4576_v48, %v4336_v29 }
 0x433   : > { %5630 = vst [vmem:[%s11359_s21 + $0x268] sm:$0xff] %v5582_v34  ;;  %v5293_v46 = vmul.f32 %v5245_v30, %v5197_v17  ;;  %v5104_v22 = vmul.f32 0.5, %v5056_v3  ;;  %v12428_v6 = vmax.f32 %v12413_v18, 1e-05  ;;  %v3281_v57 = vsel %vm3280_vm14, %v12309_v50, %v3279_v63  ;;  %v14359_v30 = vld [vmem:[#allocation62_spill] sm:$0xff]  ;;  %v14366_v17 = vld [vmem:[#allocation64_spill] sm:$0xff] }
 0x434   : > { %v4767_v5 = vadd.f32 1.0, %v5984_v8  ;;  %v4911_v59 = vsub.f32 1.0, %v5984_v8  ;;  %v12437_v61 = vsel %vm3282_vm15, %v3283_v47, %v3281_v57  ;;  %v3917_v50 = vsub.f32 %v11944_v62, %v11980_v25 }
 0x435   : > { %v5341_v60 = vsel %vm4189_vm10, 0.0, %v5293_v46  ;;  %v5200_v40 = vmul.f32 %v7582_v7, %v5104_v22  ;;  %vm4434_vm10 = vcmp.gt.f32.partialorder %v12428_v6, 0.999  ;;  %v3476_v0 = vmul.f32 %v14362_v45, %v12437_v61  ;;  %v14368_v46 = vld [vmem:[#allocation203_spill] sm:$0xff]  ;;  %v2988_v22 = vpop.xlane.xlu1 %2987 }
 0x436   : > { %v5389_v29 = vmul.f32 %v5341_v60, %v14359_v30  ;;  %v5485_v14 = vmul.f32 %v5341_v60, %v14360_v2  ;;  %v5581_v11 = vmul.f32 %v5341_v60, %v14361_v16  ;;  %v12444_v53 = vpop.eup %7593  ;;  %7603 = vlog2.f32 %v4767_v5  ;;  %v14369_v2 = vld [vmem:[#allocation184_spill] sm:$0xff]  ;;  %v2986_v16 = vpop.xlane.xlu0 %2985 }
 0x437   : > { %v12451_v37 = vpop.eup %7595  ;;  %v5296_v19 = vmul.f32 %v5248_v52, %v5200_v40  ;;  %7605 = vlog2.f32 %v4911_v59  ;;  %v4626_v7 = vsel %vm4434_vm10, 0.999, %v12428_v6  ;;  %v3722_v23 = vmul.f32 0.6931472, %v14363_v26 }
 0x438   : > { %5437 = vst [vmem:[%s11359_s21 + $0x240] sm:$0xff] %v5389_v29  ;;  %5533 = vst [vmem:[%s11359_s21 + $0x248] sm:$0xff] %v5485_v14  ;;  %7607 = vrcp.f32 %v4623_v43  ;;  %v5987_v48 = vclamps-f32 %v4626_v7, 0.99999  ;;  %v12461_v44 = vmax.f32 %v12451_v37, 1e-05  ;;  %v3920_v62 = vsub.f32 %v11987_v1, %v12005_v12 }
 0x439   : > { %5629 = vst [vmem:[%s11359_s21 + $0x250] sm:$0xff] %v5581_v11  ;;  %v7598_v25 = vpop.eup %7597  ;;  %v5344_v9 = vsel %vm4192_vm9, 0.0, %v5296_v19  ;;  %7609 = vrcp.f32 %v12428_v6  ;;  %v4004_v35 = vmul.f32 %v14364_v13, %v3476_v0  ;;  %v3866_v34 = vmul.f32 0.6931472, %v14365_v20  ;;  %v14367_v43 = vld [vmem:[#allocation199_spill] sm:$0xff] }
 0x43a   : > { %v5392_v3 = vmul.f32 %v14366_v17, %v5344_v9  ;;  %v5488_v63 = vmul.f32 %v14367_v43, %v5344_v9  ;;  %v5584_v8 = vmul.f32 %v14368_v46, %v5344_v9  ;;  %v4770_v1 = vadd.f32 1.0, %v5987_v48 }
 0x43b   : > { %v12475_v12 = vpop.eup %7599  ;;  %v4914_v47 = vsub.f32 1.0, %v5987_v48  ;;  %vm4433_vm2 = vcmp.gt.f32.partialorder %v12461_v44, 0.999  ;;  %7611 = vrcp.f32 %v12461_v44  ;;  %v5941_v55 = vclamps-f32 %v4004_v35, 15.0  ;;  %v14373_v35 = vld [vmem:[#allocation278_spill] sm:$0xff] }
 0x43c   : > { %5440 = vst [vmem:[%s11359_s21 + $0x288] sm:$0xff] %v5392_v3  ;;  %5536 = vst [vmem:[%s11359_s21 + $0x290] sm:$0xff] %v5488_v63  ;;  %7613 = vlog2.f32 %v4770_v1  ;;  %v4625_v52 = vsel %vm4433_vm2, 0.999, %v12461_v44  ;;  %v3272_v57 = vmul.f32 %v7598_v25, %v12341_v56  ;;  %v3779_v60 = vsub.f32 1.0, %v11000_v15  ;;  %v7602_v11 = vpop.eup %7601  ;;  %v14370_v15 = vld [vmem:[#allocation185_spill] sm:$0xff]  ;;  %v2478_v25 = vpop.xlane.xlu1 %2477 }
 0x43d   : > { %5632 = vst [vmem:[%s11359_s21 + $0x298] sm:$0xff] %v5584_v8  ;;  %7615 = vlog2.f32 %v4914_v47  ;;  %v5986_v5 = vclamps-f32 %v4625_v52, 0.99999  ;;  %vm3273_vm9 = vcmp.eq.f32.partialorder %v12341_v56, inf  ;;  %v3919_v59 = vsub.f32 %v3722_v23, %v3866_v34  ;;  %v2476_v3 = vpop.xlane.xlu0 %2475 }
 0x43e   : > { %v3274_v30 = vsel %vm3273_vm9, %v12341_v56, %v3272_v57  ;;  %vm3275_vm1 = vcmp.eq.f32.partialorder %v12341_v56, 0.0  ;;  %v3276_v29 = vand.u32 2147483648, %v12341_v56  ;;  %v2532_v14 = vadd.f32 %v12377_v41, %v14369_v2  ;;  %v14371_v41 = vld [vmem:[#allocation120_spill] sm:$0xff] }
 0x43f   : > { %v4769_v40 = vadd.f32 1.0, %v5986_v5  ;;  %v4913_v45 = vsub.f32 1.0, %v5986_v5  ;;  %7617 = vtanh.f32 %v5941_v55  ;;  %v2531_v0 = vadd.f32 %v12392_v31, %v14370_v15 }
 0x440   : > { %v12495_v19 = vsel %vm3275_vm1, %v3276_v29, %v3274_v30  ;;  %v12498_v26 = vadd.f32 %v12408_v32, %v2532_v14  ;;  %v12503_v56 = vmul.f32 0.5, %v3918_v28  ;;  %7619 = vlog2.f32 %v3779_v60  ;;  %v2992_v10 = vpop.xlane.xlu1 %2991 }
 0x441   : > { %7621 = vlog2.f32 %v4769_v40  ;;  %v3475_v23 = vmul.f32 %v14371_v41, %v12495_v19  ;;  %v12508_v48 = vadd.f32 %v12425_v51, %v2531_v0  ;;  %v12510_v31 = vmul.f32 0.5, %v3917_v50 }
 0x442   : > { %v4527_v9 = vmul.f32 0.999, %v7602_v11  ;;  %7623 = vlog2.f32 %v4913_v45  ;;  %v12512_v32 = vmul.f32 0.5, %v3920_v62  ;;  %v12514_v13 = vmul.f32 0.5, %v3919_v59  ;;  %v14374_v62 = vld [vmem:[#allocation194_spill] sm:$0xff] }
 0x443   : > { %v7604_v4 = vpop.eup %7603  ;;  %7625 = vrcp.f32 %v4626_v7  ;;  %vm4196_vm8 = vcmp.eq.f32.partialorder %v12437_v61, 0.0  ;;  %v4003_v28 = vmul.f32 %v14372_v39, %v3475_v23  ;;  %v12519_v20 = vmul.f32 0.6931472, %v14373_v35 }
 0x444   : > { %v7606_v51 = vpop.eup %7605  ;;  %v4335_v50 = vmul.f32 %v12397_v58, %v12379_v38  ;;  %v4842_v34 = vmul.f32 0.6931472, %v7604_v4  ;;  %7627 = vrsqrt.f32 %v12498_v26  ;;  %v2534_v17 = vadd.f32 %v12442_v21, %v14374_v62  ;;  %v14375_v58 = vld [vmem:[#allocation195_spill] sm:$0xff] }
 0x445   : > { %v7608_v43 = vpop.eup %7607  ;;  %v4986_v7 = vmul.f32 0.6931472, %v7606_v51  ;;  %v5940_v63 = vclamps-f32 %v4003_v28, 15.0  ;;  %vm4195_vm7 = vcmp.eq.f32.partialorder %v12495_v19, 0.0  ;;  %7629 = vrsqrt.f32 %v12508_v48 }
 0x446   : > { %v7610_v46 = vpop.eup %7609  ;;  %v4575_v8 = vsel %vm4431_vm0, %v4527_v9, 1.0  ;;  %v4244_v38 = vsel %vm4196_vm8, 1.0, %v12437_v61  ;;  %v2533_v1 = vadd.f32 %v12463_v27, %v14375_v58  ;;  %v12535_v21 = vadd.f32 %v2988_v22, %v2534_v17  ;;  %v14376_v27 = vld [vmem:[#allocation204_spill] sm:$0xff] }
 0x447   : > { %v5055_v47 = vsub.f32 %v4842_v34, %v4986_v7  ;;  %v4338_v55 = vmul.f32 %v12444_v53, %v12413_v18  ;;  %v12541_v57 = vmul.f32 %v12475_v12, %v12451_v37  ;;  %7631 = vtanh.f32 %v5940_v63  ;;  %v14378_v7 = vld [vmem:[#allocation66_spill] sm:$0xff] }
 0x448   : > { %v7612_v60 = vpop.eup %7611  ;;  %7633 = vrcp.f32 %v4625_v52  ;;  %v4243_v5 = vsel %vm4195_vm7, 1.0, %v12495_v19  ;;  %v12546_v59 = vadd.f32 %v2986_v16, %v2533_v1  ;;  %v2536_v22 = vadd.f32 %v2478_v25, %v14376_v27  ;;  %v2990_v52 = vpop.xlane.xlu0 %2989  ;;  %v14377_v16 = vld [vmem:[#allocation205_spill] sm:$0xff]  ;;  %v14379_v63 = vld [vmem:[#allocation202_spill] sm:$0xff] }
 0x449   : > { %v7614_v30 = vpop.eup %7613  ;;  %v5103_v29 = vmul.f32 0.5, %v5055_v47  ;;  %v5247_v2 = vmul.f32 %v4575_v8, %v4335_v50  ;;  %v4530_v18 = vmul.f32 0.999, %v7610_v46  ;;  %7635 = vrcp.f32 %v4244_v38  ;;  %v14380_v8 = vld [vmem:[#allocation207_spill] sm:$0xff] }
 0x44a   : > { %v7616_v53 = vpop.eup %7615  ;;  %v4848_v37 = vmul.f32 0.6931472, %v7614_v30  ;;  %v4529_v12 = vmul.f32 0.999, %v7612_v60  ;;  %7637 = vrsqrt.f32 %v12535_v21  ;;  %v12550_v14 = vadd.f32 %v2992_v10, %v2536_v22 }
 0x44b   : > { %v5199_v11 = vmul.f32 %v7608_v43, %v5103_v29  ;;  %v4992_v40 = vmul.f32 0.6931472, %v7616_v53  ;;  %7639 = vrcp.f32 %v4243_v5  ;;  %vm3294_vm11 = vcmp.eq.f32.partialorder %v12498_v26, inf  ;;  %v2482_v43 = vpop.xlane.xlu1 %2481  ;;  %v14381_v29 = vld [vmem:[#allocation212_spill] sm:$0xff] }
 0x44c   : > { %v2535_v45 = vadd.f32 %v2476_v3, %v14377_v16  ;;  %v12554_v15 = vpop.eup %7617  ;;  %vm3296_vm12 = vcmp.eq.f32.partialorder %v12498_v26, 0.0  ;;  %v3297_v0 = vand.u32 2147483648, %v12498_v26  ;;  %v3290_v41 = vand.u32 2147483648, %v12508_v48  ;;  %v2480_v61 = vpop.xlane.xlu0 %2479 }
 0x44d   : > { %7641 = vrsqrt.f32 %v12546_v59  ;;  %v12560_v23 = vpop.eup %7619  ;;  %v5295_v25 = vmul.f32 %v5247_v2, %v5199_v11  ;;  %v5058_v9 = vsub.f32 %v4848_v37, %v4992_v40  ;;  %v12563_v4 = vmax.f32 %v12554_v15, 1e-05 }
 0x44e   : > { %v12565_v39 = vadd.f32 %v2990_v52, %v2535_v45  ;;  %v7622_v28 = vpop.eup %7621  ;;  %v4578_v35 = vsel %vm4434_vm10, %v4530_v18, 1.0  ;;  %v4577_v51 = vsel %vm4433_vm2, %v4529_v12, 1.0  ;;  %v3311_v50 = vand.u32 2147483648, %v12535_v21 }
 0x44f   : > { %7643 = vrsqrt.f32 %v12550_v14  ;;  %v7624_v34 = vpop.eup %7623  ;;  %v5343_v62 = vsel %vm4191_vm5, 0.0, %v5295_v25  ;;  %v5106_v17 = vmul.f32 0.5, %v5058_v9  ;;  %v4846_v3 = vmul.f32 0.6931472, %v7622_v28  ;;  %v2996_v25 = vpop.xlane.xlu1 %2995  ;;  %v14382_v28 = vld [vmem:[#allocation68_spill] sm:$0xff] }
 0x450   : > { %vm4436_vm13 = vcmp.gt.f32.partialorder %v12563_v4, 0.999  ;;  %v7626_v6 = vpop.eup %7625  ;;  %v5391_v44 = vmul.f32 %v5343_v62, %v14378_v7  ;;  %v5487_v46 = vmul.f32 %v5343_v62, %v14379_v63  ;;  %v5583_v38 = vmul.f32 %v5343_v62, %v14380_v8  ;;  %v2994_v19 = vpop.xlane.xlu0 %2993 }
 0x451   : > { %v4990_v58 = vmul.f32 0.6931472, %v7624_v34  ;;  %vm3287_vm3 = vcmp.eq.f32.partialorder %v12508_v48, inf  ;;  %v7628_v42 = vpop.eup %7627  ;;  %v5202_v1 = vmul.f32 %v7626_v6, %v5106_v17  ;;  %v5250_v47 = vmul.f32 %v4578_v35, %v4338_v55  ;;  %v14383_v35 = vld [vmem:[#allocation206_spill] sm:$0xff]  ;;  %v14384_v34 = vld [vmem:[#allocation209_spill] sm:$0xff] }
 0x452   : > { %v4628_v10 = vsel %vm4436_vm13, 0.999, %v12563_v4  ;;  %vm3289_vm5 = vcmp.eq.f32.partialorder %v12508_v48, 0.0  ;;  %7645 = vrsqrt.f32 %v12565_v39  ;;  %v7630_v60 = vpop.eup %7629  ;;  %5439 = vst [vmem:[%s11359_s21 + $0x270] sm:$0xff] %v5391_v44  ;;  %5535 = vst [vmem:[%s11359_s21 + $0x278] sm:$0xff] %v5487_v46  ;;  %v3293_v22 = vmul.f32 %v7628_v42, %v12498_v26 }
 0x453   : > { %5631 = vst [vmem:[%s11359_s21 + $0x280] sm:$0xff] %v5583_v38  ;;  %v5057_v5 = vsub.f32 %v4846_v3, %v4990_v58  ;;  %7647 = vrcp.f32 %v12563_v4  ;;  %v5989_v27 = vclamps-f32 %v4628_v10, 0.99999  ;;  %v5298_v30 = vmul.f32 %v5250_v47, %v5202_v1  ;;  %v14386_v38 = vld [vmem:[#allocation261_spill] sm:$0xff] }
 0x454   : > { %v5249_v55 = vmul.f32 %v4577_v51, %v12541_v57  ;;  %7649 = vrcp.f32 %v4628_v10  ;;  %v2538_v2 = vadd.f32 %v2482_v43, %v14381_v29  ;;  %v12592_v18 = vpop.eup %7631  ;;  %v3295_v52 = vsel %vm3294_vm11, %v12498_v26, %v3293_v22  ;;  %v14388_v22 = vld [vmem:[#allocation208_spill] sm:$0xff] }
 0x455   : > { %v5105_v53 = vmul.f32 0.5, %v5057_v5  ;;  %v4772_v37 = vadd.f32 1.0, %v5989_v27  ;;  %v4916_v12 = vsub.f32 1.0, %v5989_v27  ;;  %vm3308_vm0 = vcmp.eq.f32.partialorder %v12535_v21, inf  ;;  %v7634_v11 = vpop.eup %7633  ;;  %v14387_v5 = vld [vmem:[#allocation69_spill] sm:$0xff] }
 0x456   : > { %v5346_v40 = vsel %vm4194_vm4, 0.0, %v5298_v30  ;;  %v12601_v57 = vmax.f32 %v12592_v18, 1e-05  ;;  %v12605_v16 = vsel %vm3296_vm12, %v3297_v0, %v3295_v52  ;;  %v3286_v45 = vmul.f32 %v7630_v60, %v12508_v48  ;;  %v12609_v9 = vpop.eup %7635  ;;  %v14385_v0 = vld [vmem:[#allocation130_spill] sm:$0xff] }
 0x457   : > { %vm3310_vm14 = vcmp.eq.f32.partialorder %v12535_v21, 0.0  ;;  %v5394_v36 = vmul.f32 %v14382_v28, %v5346_v40  ;;  %v5490_v51 = vmul.f32 %v14383_v35, %v5346_v40  ;;  %v5586_v62 = vmul.f32 %v14384_v34, %v5346_v40  ;;  %v7638_v26 = vpop.eup %7637  ;;  %v14391_v40 = vld [vmem:[#allocation25_spill] sm:$0xff] }
 0x458   : > { %v5201_v17 = vmul.f32 %v7634_v11, %v5105_v53  ;;  %7651 = vlog2.f32 %v4772_v37  ;;  %vm4435_vm4 = vcmp.gt.f32.partialorder %v12601_v57, 0.999  ;;  %v3478_v3 = vmul.f32 %v14385_v0, %v12605_v16  ;;  %v12619_v6 = vpop.eup %7639  ;;  %v14390_v37 = vld [vmem:[#allocation128_spill] sm:$0xff]  ;;  %v14394_v0 = vld [vmem:[#allocation133_spill] sm:$0xff] }
 0x459   : > { %vm3301_vm15 = vcmp.eq.f32.partialorder %v12546_v59, inf  ;;  %v3304_v43 = vand.u32 2147483648, %v12546_v59  ;;  %5442 = vst [vmem:[%s11359_s21 + $0x2b8] sm:$0xff] %v5394_v36  ;;  %5538 = vst [vmem:[%s11359_s21 + $0x2c0] sm:$0xff] %v5490_v51  ;;  %7653 = vlog2.f32 %v4916_v12  ;;  %v4627_v44 = vsel %vm4435_vm4, 0.999, %v12601_v57 }
 0x45a   : > { %5634 = vst [vmem:[%s11359_s21 + $0x2c8] sm:$0xff] %v5586_v62  ;;  %v5297_v7 = vmul.f32 %v5249_v55, %v5201_v17  ;;  %vm3303_vm10 = vcmp.eq.f32.partialorder %v12546_v59, 0.0  ;;  %v12628_v63 = vadd.f32 %v2996_v25, %v2538_v2  ;;  %v7642_v46 = vpop.eup %7641  ;;  %v5988_v8 = vclamps-f32 %v4627_v44, 0.99999  ;;  %v14389_v55 = vld [vmem:[#allocation211_spill] sm:$0xff] }
 0x45b   : > { %v4006_v58 = vmul.f32 %v14386_v38, %v3478_v3  ;;  %vm4198_vm2 = vcmp.eq.f32.partialorder %v12605_v16, 0.0  ;;  %v3288_v42 = vsel %vm3287_vm3, %v12508_v48, %v3286_v45  ;;  %7655 = vrcp.f32 %v12601_v57  ;;  %v14392_v36 = vld [vmem:[#allocation135_spill] sm:$0xff] }
 0x45c   : > { %v5345_v1 = vsel %vm4193_vm6, 0.0, %v5297_v7  ;;  %v12642_v47 = vsel %vm3289_vm5, %v3290_v41, %v3288_v42  ;;  %v3307_v10 = vmul.f32 %v7638_v26, %v12535_v21  ;;  %v7644_v60 = vpop.eup %7643  ;;  %v4771_v24 = vadd.f32 1.0, %v5988_v8 }
 0x45d   : > { %v5393_v27 = vmul.f32 %v5345_v1, %v14387_v5  ;;  %v5489_v30 = vmul.f32 %v5345_v1, %v14388_v22  ;;  %v5585_v29 = vmul.f32 %v5345_v1, %v14389_v55  ;;  %v4915_v2 = vsub.f32 1.0, %v5988_v8 }
 0x45e   : > { %v5943_v53 = vclamps-f32 %v4006_v58, 15.0  ;;  %v3477_v12 = vmul.f32 %v14390_v37, %v12642_v47  ;;  %7657 = vrsqrt.f32 %v12628_v63  ;;  %v3309_v48 = vsel %vm3308_vm0, %v12535_v21, %v3307_v10  ;;  %v14393_v21 = vld [vmem:[#allocation265_spill] sm:$0xff] }
 0x45f   : > { %5441 = vst [vmem:[%s11359_s21 + $0x2a0] sm:$0xff] %v5393_v27  ;;  %5537 = vst [vmem:[%s11359_s21 + $0x2a8] sm:$0xff] %v5489_v30  ;;  %7659 = vlog2.f32 %v4771_v24  ;;  %v3300_v41 = vmul.f32 %v7642_v46, %v12546_v59  ;;  %vm3322_vm6 = vcmp.eq.f32.partialorder %v12550_v14, inf  ;;  %v7646_v52 = vpop.eup %7645  ;;  %v4246_v11 = vsel %vm4198_vm2, 1.0, %v12605_v16 }
 0x460   : > { %5633 = vst [vmem:[%s11359_s21 + $0x2b0] sm:$0xff] %v5585_v29  ;;  %7661 = vlog2.f32 %v4915_v2  ;;  %v4005_v45 = vmul.f32 %v14391_v40, %v3477_v12  ;;  %v12667_v25 = vsel %vm3310_vm14, %v3311_v50, %v3309_v48  ;;  %v7648_v28 = vpop.eup %7647  ;;  %vm3324_vm9 = vcmp.eq.f32.partialorder %v12550_v14, 0.0  ;;  %v14397_v12 = vld [vmem:[#allocation140_spill] sm:$0xff]  ;;  %v14399_v40 = vld [vmem:[#allocation269_spill] sm:$0xff] }
 0x461   : > { %7663 = vtanh.f32 %v5943_v53  ;;  %v3480_v35 = vmul.f32 %v14392_v36, %v12667_v25  ;;  %v3325_v51 = vand.u32 2147483648, %v12550_v14  ;;  %v7650_v34 = vpop.eup %7649  ;;  %v3302_v17 = vsel %vm3301_vm15, %v12546_v59, %v3300_v41  ;;  %v14396_v53 = vld [vmem:[#allocation141_spill] sm:$0xff] }
 0x462   : > { %7665 = vrcp.f32 %v4627_v44  ;;  %v5942_v62 = vclamps-f32 %v4005_v45, 15.0  ;;  %vm3315_vm1 = vcmp.eq.f32.partialorder %v12565_v39, inf  ;;  %vm4197_vm11 = vcmp.eq.f32.partialorder %v12642_v47, 0.0  ;;  %v14398_v41 = vld [vmem:[#allocation153_spill] sm:$0xff] }
 0x463   : > { %7667 = vrcp.f32 %v4246_v11  ;;  %v4008_v50 = vmul.f32 %v14393_v21, %v3480_v35  ;;  %v12681_v26 = vsel %vm3303_vm10, %v3304_v43, %v3302_v17  ;;  %vm3317_vm12 = vcmp.eq.f32.partialorder %v12565_v39, 0.0  ;;  %v14395_v43 = vld [vmem:[#allocation267_spill] sm:$0xff] }
 0x464   : > { %7669 = vtanh.f32 %v5942_v62  ;;  %v3479_v3 = vmul.f32 %v14394_v0, %v12681_v26  ;;  %v3318_v7 = vand.u32 2147483648, %v12565_v39  ;;  %v4532_v44 = vmul.f32 0.999, %v7648_v28  ;;  %v14400_v28 = vld [vmem:[#allocation270_spill] sm:$0xff] }
 0x465   : > { %v5945_v46 = vclamps-f32 %v4008_v50, 15.0  ;;  %v3321_v8 = vmul.f32 %v7644_v60, %v12550_v14  ;;  %v3314_v38 = vmul.f32 %v7646_v52, %v12565_v39  ;;  %v7652_v58 = vpop.eup %7651  ;;  %v4245_v59 = vsel %vm4197_vm11, 1.0, %v12642_v47 }
 0x466   : > { %vm4200_vm3 = vcmp.eq.f32.partialorder %v12667_v25, 0.0  ;;  %v4007_v42 = vmul.f32 %v14395_v43, %v3479_v3  ;;  %vm4199_vm5 = vcmp.eq.f32.partialorder %v12681_v26, 0.0  ;;  %v7654_v1 = vpop.eup %7653  ;;  %v4852_v10 = vmul.f32 0.6931472, %v7652_v58 }
 0x467   : > { %7671 = vtanh.f32 %v5945_v46  ;;  %v3323_v60 = vsel %vm3322_vm6, %v12550_v14, %v3321_v8  ;;  %v3316_v5 = vsel %vm3315_vm1, %v12565_v39, %v3314_v38  ;;  %v4996_v27 = vmul.f32 0.6931472, %v7654_v1 }
 0x468   : > { %v5944_v22 = vclamps-f32 %v4007_v42, 15.0  ;;  %v12703_v30 = vsel %vm3324_vm9, %v3325_v51, %v3323_v60  ;;  %v12707_v55 = vsel %vm3317_vm12, %v3318_v7, %v3316_v5  ;;  %v7656_v29 = vpop.eup %7655  ;;  %v4580_v24 = vsel %vm4436_vm13, %v4532_v44, 1.0 }
 0x469   : > { %v4248_v2 = vsel %vm4200_vm3, 1.0, %v12667_v25  ;;  %v3482_v37 = vmul.f32 %v14396_v53, %v12703_v30  ;;  %v3481_v14 = vmul.f32 %v14397_v12, %v12707_v55  ;;  %v4340_v48 = vmul.f32 %v12609_v9, %v12554_v15  ;;  %v14401_v15 = vld [vmem:[#allocation125_spill] sm:$0xff] }
 0x46a   : > { %v5060_v39 = vsub.f32 %v4852_v10, %v4996_v27  ;;  %7673 = vrcp.f32 %v4245_v59  ;;  %v12721_v52 = vmul.f32 0.6931472, %v14398_v41  ;;  %v4247_v11 = vsel %vm4199_vm5, 1.0, %v12681_v26  ;;  %v14402_v27 = vld [vmem:[#allocation70_spill] sm:$0xff] }
 0x46b   : > { %v7658_v4 = vpop.eup %7657  ;;  %7675 = vtanh.f32 %v5944_v22  ;;  %v4010_v45 = vmul.f32 %v14399_v40, %v3482_v37  ;;  %v4009_v36 = vmul.f32 %v14400_v28, %v3481_v14  ;;  %v5252_v62 = vmul.f32 %v4580_v24, %v4340_v48 }
 0x46c   : > { %v7660_v35 = vpop.eup %7659  ;;  %v5108_v51 = vmul.f32 0.5, %v5060_v39  ;;  %7677 = vrcp.f32 %v4248_v2  ;;  %v12729_v9 = vmul.f32 0.6931472, %v14401_v15  ;;  %v4531_v21 = vmul.f32 0.999, %v7656_v29  ;;  %v14403_v29 = vld [vmem:[#allocation210_spill] sm:$0xff] }
 0x46d   : > { %v7662_v17 = vpop.eup %7661  ;;  %v4850_v50 = vmul.f32 0.6931472, %v7660_v35  ;;  %v5947_v0 = vclamps-f32 %v4010_v45, 15.0  ;;  %v5946_v3 = vclamps-f32 %v4009_v36, 15.0  ;;  %vm3336_vm13 = vcmp.eq.f32.partialorder %v12628_v63, inf  ;;  %v14404_v2 = vld [vmem:[#allocation217_spill] sm:$0xff] }
 0x46e   : > { %v12732_v7 = vpop.eup %7663  ;;  %v5204_v44 = vmul.f32 %v7650_v34, %v5108_v51  ;;  %v4994_v46 = vmul.f32 0.6931472, %v7662_v17  ;;  %7679 = vrcp.f32 %v4247_v11  ;;  %vm4202_vm0 = vcmp.eq.f32.partialorder %v12703_v30, 0.0 }
 0x46f   : > { %v7666_v8 = vpop.eup %7665  ;;  %v4339_v38 = vmul.f32 %v12619_v6, %v12592_v18  ;;  %v12738_v58 = vmax.f32 %v12732_v7, 1e-05  ;;  %7681 = vtanh.f32 %v5947_v0  ;;  %vm4201_vm14 = vcmp.eq.f32.partialorder %v12707_v55, 0.0 }
 0x470   : > { %v12741_v59 = vpop.eup %7667  ;;  %v5300_v43 = vmul.f32 %v5252_v62, %v5204_v44  ;;  %v5059_v42 = vsub.f32 %v4850_v50, %v4994_v46  ;;  %7683 = vtanh.f32 %v5946_v3  ;;  %v3335_v34 = vmul.f32 %v7658_v4, %v12628_v63  ;;  %v14405_v50 = vld [vmem:[#allocation72_spill] sm:$0xff]  ;;  %v14406_v3 = vld [vmem:[#allocation215_spill] sm:$0xff] }
 0x471   : > { %v12744_v1 = vpop.eup %7669  ;;  %v4579_v10 = vsel %vm4435_vm4, %v4531_v21, 1.0  ;;  %vm4438_vm15 = vcmp.gt.f32.partialorder %v12738_v58, 0.999  ;;  %7685 = vrcp.f32 %v12738_v58  ;;  %v4250_v18 = vsel %vm4202_vm0, 1.0, %v12703_v30  ;;  %v14407_v46 = vld [vmem:[#allocation219_spill] sm:$0xff]  ;;  %v14429_v30 = vld [vmem:[#allocation36_spill] sm:$0xff] }
 0x472   : > { %v5348_v6 = vsel %vm4196_vm8, 0.0, %v5300_v43  ;;  %v5107_v60 = vmul.f32 0.5, %v5059_v42  ;;  %v4630_v57 = vsel %vm4438_vm15, 0.999, %v12738_v58  ;;  %v4249_v5 = vsel %vm4201_vm14, 1.0, %v12707_v55 }
 0x473   : > { %v5396_v22 = vmul.f32 %v14402_v27, %v5348_v6  ;;  %v5492_v24 = vmul.f32 %v14403_v29, %v5348_v6  ;;  %v5588_v53 = vmul.f32 %v14404_v2, %v5348_v6  ;;  %v5991_v37 = vclamps-f32 %v4630_v57, 0.99999  ;;  %v14409_v2 = vld [vmem:[#allocation158_spill] sm:$0xff] }
 0x474   : > { %v12764_v12 = vpop.eup %7671  ;;  %v5203_v14 = vmul.f32 %v7666_v8, %v5107_v60  ;;  %v5251_v48 = vmul.f32 %v4579_v10, %v4339_v38  ;;  %v12767_v39 = vmax.f32 %v12744_v1, 1e-05  ;;  %7687 = vrcp.f32 %v4250_v18  ;;  %v14408_v18 = vld [vmem:[#allocation214_spill] sm:$0xff]  ;;  %v2486_v60 = vpop.xlane.xlu1 %2485 }
 0x475   : > { %5444 = vst [vmem:[%s11359_s21 + $0x2e8] sm:$0xff] %v5396_v22  ;;  %5540 = vst [vmem:[%s11359_s21 + $0x2f0] sm:$0xff] %v5492_v24  ;;  %v4774_v41 = vadd.f32 1.0, %v5991_v37  ;;  %v4918_v4 = vsub.f32 1.0, %v5991_v37  ;;  %v12773_v11 = vmax.f32 %v12764_v12, 1e-05  ;;  %7689 = vrcp.f32 %v4249_v5 }
 0x476   : > { %5636 = vst [vmem:[%s11359_s21 + $0x2f8] sm:$0xff] %v5588_v53  ;;  %v5299_v40 = vmul.f32 %v5251_v48, %v5203_v14  ;;  %vm4437_vm8 = vcmp.gt.f32.partialorder %v12767_v39, 0.999  ;;  %7691 = vrcp.f32 %v12767_v39  ;;  %v3337_v45 = vsel %vm3336_vm13, %v12628_v63, %v3335_v34 }
 0x477   : > { %v12780_v28 = vpop.eup %7673  ;;  %7693 = vlog2.f32 %v4774_v41  ;;  %v4629_v36 = vsel %vm4437_vm8, 0.999, %v12767_v39  ;;  %vm4440_vm4 = vcmp.gt.f32.partialorder %v12773_v11, 0.999  ;;  %v3339_v35 = vand.u32 2147483648, %v12628_v63  ;;  %v14410_v41 = vld [vmem:[#allocation149_spill] sm:$0xff] }
 0x478   : > { %v12787_v51 = vpop.eup %7675  ;;  %v5347_v62 = vsel %vm4195_vm7, 0.0, %v5299_v40  ;;  %7695 = vlog2.f32 %v4918_v4  ;;  %v5990_v15 = vclamps-f32 %v4629_v36, 0.99999  ;;  %v4632_v17 = vsel %vm4440_vm4, 0.999, %v12773_v11  ;;  %v2484_v40 = vpop.xlane.xlu0 %2483 }
 0x479   : > { %v12794_v21 = vpop.eup %7677  ;;  %v5395_v0 = vmul.f32 %v5347_v62, %v14405_v50  ;;  %v5491_v44 = vmul.f32 %v5347_v62, %v14406_v3  ;;  %v5587_v8 = vmul.f32 %v5347_v62, %v14407_v46  ;;  %7697 = vrcp.f32 %v4630_v57 }
 0x47a   : > { %v4773_v38 = vadd.f32 1.0, %v5990_v15  ;;  %v4917_v43 = vsub.f32 1.0, %v5990_v15  ;;  %7699 = vrcp.f32 %v4629_v36  ;;  %v5993_v42 = vclamps-f32 %v4632_v17, 0.99999 }
 0x47b   : > { %v12799_v34 = vpop.eup %7679  ;;  %5443 = vst [vmem:[%s11359_s21 + $0x2d0] sm:$0xff] %v5395_v0  ;;  %5539 = vst [vmem:[%s11359_s21 + $0x2d8] sm:$0xff] %v5491_v44  ;;  %7701 = vrcp.f32 %v12773_v11  ;;  %v12806_v10 = vmax.f32 %v12787_v51, 1e-05  ;;  %v2537_v6 = vadd.f32 %v2480_v61, %v14408_v18  ;;  %vm3338_vm7 = vcmp.eq.f32.partialorder %v12628_v63, 0.0  ;;  %v3000_v0 = vpop.xlane.xlu1 %2999 }
 0x47c   : > { %5635 = vst [vmem:[%s11359_s21 + $0x2e0] sm:$0xff] %v5587_v8  ;;  %v12810_v57 = vpop.eup %7681  ;;  %7703 = vlog2.f32 %v4773_v38  ;;  %v4776_v5 = vadd.f32 1.0, %v5993_v42  ;;  %v4920_v27 = vsub.f32 1.0, %v5993_v42  ;;  %v12812_v22 = vsel %vm3338_vm7, %v3339_v35, %v3337_v45  ;;  %v14412_v38 = vld [vmem:[#allocation272_spill] sm:$0xff] }
 0x47d   : > { %v12814_v29 = vpop.eup %7683  ;;  %7705 = vlog2.f32 %v4917_v43  ;;  %vm4439_vm10 = vcmp.gt.f32.partialorder %v12806_v10, 0.999  ;;  %v12818_v24 = vmax.f32 %v12810_v57, 1e-05  ;;  %v12821_v53 = vmul.f32 0.6931472, %v14409_v2 }
 0x47e   : > { %v7686_v63 = vpop.eup %7685  ;;  %7707 = vlog2.f32 %v4776_v5  ;;  %v4631_v37 = vsel %vm4439_vm10, 0.999, %v12806_v10  ;;  %v12827_v61 = vmax.f32 %v12814_v29, 1e-05  ;;  %v12829_v14 = vadd.f32 %v2994_v19, %v2537_v6 }
 0x47f   : > { %7709 = vlog2.f32 %v4920_v27  ;;  %v5992_v48 = vclamps-f32 %v4631_v37, 0.99999  ;;  %vm4442_vm6 = vcmp.gt.f32.partialorder %v12818_v24, 0.999  ;;  %v3484_v4 = vmul.f32 %v14410_v41, %v12812_v22 }
 0x480   : > { %v4342_v45 = vmul.f32 %v12741_v59, %v12732_v7  ;;  %7711 = vrcp.f32 %v12806_v10  ;;  %v4634_v36 = vsel %vm4442_vm6, 0.999, %v12818_v24  ;;  %vm4441_vm9 = vcmp.gt.f32.partialorder %v12827_v61, 0.999  ;;  %v14411_v59 = vld [vmem:[#allocation226_spill] sm:$0xff] }
 0x481   : > { %v7688_v35 = vpop.eup %7687  ;;  %v4534_v62 = vmul.f32 0.999, %v7686_v63  ;;  %7713 = vrcp.f32 %v4632_v17  ;;  %v4775_v15 = vadd.f32 1.0, %v5992_v48  ;;  %v4919_v50 = vsub.f32 1.0, %v5992_v48  ;;  %v2998_v63 = vpop.xlane.xlu0 %2997 }
 0x482   : > { %v7690_v3 = vpop.eup %7689  ;;  %7715 = vrcp.f32 %v12818_v24  ;;  %v5995_v44 = vclamps-f32 %v4634_v36, 0.99999  ;;  %v4633_v7 = vsel %vm4441_vm9, 0.999, %v12827_v61  ;;  %v2540_v46 = vadd.f32 %v2486_v60, %v14411_v59 }
 0x483   : > { %v7692_v8 = vpop.eup %7691  ;;  %7717 = vlog2.f32 %v4775_v15  ;;  %v5994_v19 = vclamps-f32 %v4633_v7, 0.99999  ;;  %v4012_v43 = vmul.f32 %v14412_v38, %v3484_v4  ;;  %vm4204_vm1 = vcmp.eq.f32.partialorder %v12812_v22, 0.0  ;;  %v14413_v38 = vld [vmem:[#allocation27_spill] sm:$0xff] }
 0x484   : > { %v7694_v17 = vpop.eup %7693  ;;  %v4341_v42 = vmul.f32 %v12780_v28, %v12744_v1  ;;  %7719 = vlog2.f32 %v4919_v50  ;;  %v4778_v18 = vadd.f32 1.0, %v5995_v44  ;;  %v4922_v6 = vsub.f32 1.0, %v5995_v44 }
 0x485   : > { %v7696_v5 = vpop.eup %7695  ;;  %v4582_v27 = vsel %vm4438_vm15, %v4534_v62, 1.0  ;;  %v4856_v2 = vmul.f32 0.6931472, %v7694_v17  ;;  %7721 = vrcp.f32 %v4631_v37  ;;  %v4777_v60 = vadd.f32 1.0, %v5994_v19  ;;  %v2490_v37 = vpop.xlane.xlu1 %2489 }
 0x486   : > { %v7698_v48 = vpop.eup %7697  ;;  %v5000_v41 = vmul.f32 0.6931472, %v7696_v5  ;;  %v4533_v4 = vmul.f32 0.999, %v7692_v8  ;;  %7723 = vlog2.f32 %v4778_v18  ;;  %v4921_v15 = vsub.f32 1.0, %v5994_v19 }
 0x487   : > { %v7700_v59 = vpop.eup %7699  ;;  %v12854_v1 = vmul.f32 %v12794_v21, %v12764_v12  ;;  %7725 = vlog2.f32 %v4922_v6  ;;  %v5949_v28 = vclamps-f32 %v4012_v43, 15.0  ;;  %v12859_v58 = vsel %vm4204_vm1, 1.0, %v12812_v22 }
 0x488   : > { %v7702_v62 = vpop.eup %7701  ;;  %v5062_v50 = vsub.f32 %v4856_v2, %v5000_v41  ;;  %v12863_v44 = vmul.f32 %v12799_v34, %v12787_v51  ;;  %v12866_v8 = vmul.f32 %v7688_v35, %v12810_v57  ;;  %7727 = vrcp.f32 %v12827_v61  ;;  %v14425_v61 = vld [vmem:[#allocation79_spill] sm:$0xff] }
 0x489   : > { %v7704_v12 = vpop.eup %7703  ;;  %v5254_v21 = vmul.f32 %v4582_v27, %v4342_v45  ;;  %v12870_v19 = vmul.f32 %v7690_v3, %v12814_v29  ;;  %7729 = vlog2.f32 %v4777_v60  ;;  %v2539_v43 = vadd.f32 %v2484_v40, %v14413_v38  ;;  %v2488_v45 = vpop.xlane.xlu0 %2487 }
 0x48a   : > { %v7706_v17 = vpop.eup %7705  ;;  %v5110_v18 = vmul.f32 0.5, %v5062_v50  ;;  %v4581_v6 = vsel %vm4437_vm8, %v4533_v4, 1.0  ;;  %v4854_v51 = vmul.f32 0.6931472, %v7704_v12  ;;  %7731 = vlog2.f32 %v4921_v15  ;;  %v3004_v4 = vpop.xlane.xlu1 %3003 }
 0x48b   : > { %v7708_v34 = vpop.eup %7707  ;;  %v4998_v57 = vmul.f32 0.6931472, %v7706_v17  ;;  %v4536_v35 = vmul.f32 0.999, %v7702_v62  ;;  %7733 = vrcp.f32 %v4634_v36  ;;  %v12875_v5 = vadd.f32 %v3000_v0, %v2540_v46  ;;  %v14414_v36 = vld [vmem:[#allocation31_spill] sm:$0xff] }
 0x48c   : > { %v7710_v27 = vpop.eup %7709  ;;  %v5206_v29 = vmul.f32 %v7698_v48, %v5110_v18  ;;  %v4860_v3 = vmul.f32 0.6931472, %v7708_v34  ;;  %7735 = vtanh.f32 %v5949_v28  ;;  %v12877_v2 = vadd.f32 %v2998_v63, %v2539_v43  ;;  %v14415_v63 = vld [vmem:[#allocation238_spill] sm:$0xff]  ;;  %v14417_v18 = vld [vmem:[#allocation28_spill] sm:$0xff] }
 0x48d   : > { %v7712_v40 = vpop.eup %7711  ;;  %v5061_v60 = vsub.f32 %v4854_v51, %v4998_v57  ;;  %v5253_v41 = vmul.f32 %v4581_v6, %v4341_v42  ;;  %v5004_v39 = vmul.f32 0.6931472, %v7710_v27  ;;  %7737 = vrcp.f32 %v4633_v7  ;;  %v14416_v43 = vld [vmem:[#allocation74_spill] sm:$0xff]  ;;  %v14418_v51 = vld [vmem:[#allocation225_spill] sm:$0xff]  ;;  %v3002_v16 = vpop.xlane.xlu0 %3001 }
 0x48e   : > { %v7714_v15 = vpop.eup %7713  ;;  %v5302_v50 = vmul.f32 %v5254_v21, %v5206_v29  ;;  %v4535_v12 = vmul.f32 0.999, %v7712_v40  ;;  %7739 = vrsqrt.f32 %v12829_v14  ;;  %v2542_v0 = vadd.f32 %v2490_v37, %v14414_v36 }
 0x48f   : > { %v7716_v46 = vpop.eup %7715  ;;  %v5109_v62 = vmul.f32 0.5, %v5061_v60  ;;  %v5064_v48 = vsub.f32 %v4860_v3, %v5004_v39  ;;  %7741 = vrsqrt.f32 %v12875_v5  ;;  %v2541_v28 = vadd.f32 %v2488_v45, %v14415_v63 }
 0x490   : > { %v7718_v38 = vpop.eup %7717  ;;  %v5350_v42 = vsel %vm4198_vm2, 0.0, %v5302_v50  ;;  %v4584_v7 = vsel %vm4440_vm4, %v4536_v35, 1.0  ;;  %7743 = vrsqrt.f32 %v12877_v2  ;;  %v12888_v37 = vadd.f32 %v3004_v4, %v2542_v0 }
 0x491   : > { %v7720_v21 = vpop.eup %7719  ;;  %v5398_v17 = vmul.f32 %v14416_v43, %v5350_v42  ;;  %v5494_v6 = vmul.f32 %v14417_v18, %v5350_v42  ;;  %v5590_v34 = vmul.f32 %v14418_v51, %v5350_v42  ;;  %v5205_v57 = vmul.f32 %v7700_v59, %v5109_v62  ;;  %v14421_v42 = vld [vmem:[#allocation229_spill] sm:$0xff] }
 0x492   : > { %v7722_v45 = vpop.eup %7721  ;;  %v5112_v27 = vmul.f32 0.5, %v5064_v48  ;;  %v4583_v11 = vsel %vm4439_vm10, %v4535_v12, 1.0  ;;  %v4858_v35 = vmul.f32 0.6931472, %v7718_v38  ;;  %v5002_v29 = vmul.f32 0.6931472, %v7720_v21 }
 0x493   : > { %v7724_v3 = vpop.eup %7723  ;;  %5446 = vst [vmem:[%s11359_s21 + $0x318] sm:$0xff] %v5398_v17  ;;  %5542 = vst [vmem:[%s11359_s21 + $0x320] sm:$0xff] %v5494_v6  ;;  %v5301_v40 = vmul.f32 %v5253_v41, %v5205_v57  ;;  %v5256_v60 = vmul.f32 %v4584_v7, %v12854_v1  ;;  %v4538_v39 = vmul.f32 0.999, %v7716_v46  ;;  %v3332_v4 = vand.u32 2147483648, %v12829_v14  ;;  %v14419_v41 = vld [vmem:[#allocation75_spill] sm:$0xff] }
 0x494   : > { %5638 = vst [vmem:[%s11359_s21 + $0x328] sm:$0xff] %v5590_v34  ;;  %v7726_v50 = vpop.eup %7725  ;;  %v5208_v59 = vmul.f32 %v7714_v15, %v5112_v27  ;;  %v5063_v36 = vsub.f32 %v4858_v35, %v5002_v29  ;;  %v4864_v0 = vmul.f32 0.6931472, %v7724_v3  ;;  %v12900_v62 = vadd.f32 %v3002_v16, %v2541_v28  ;;  %v14420_v15 = vld [vmem:[#allocation224_spill] sm:$0xff]  ;;  %v14424_v35 = vld [vmem:[#allocation233_spill] sm:$0xff] }
 0x495   : > { %v7728_v10 = vpop.eup %7727  ;;  %v5349_v12 = vsel %vm4197_vm11, 0.0, %v5301_v40  ;;  %v5255_v48 = vmul.f32 %v4583_v11, %v12863_v44  ;;  %v5008_v63 = vmul.f32 0.6931472, %v7726_v50  ;;  %7745 = vrsqrt.f32 %v12888_v37  ;;  %v14422_v57 = vld [vmem:[#allocation76_spill] sm:$0xff] }
 0x496   : > { %v7730_v1 = vpop.eup %7729  ;;  %v5397_v46 = vmul.f32 %v5349_v12, %v14419_v41  ;;  %v5493_v38 = vmul.f32 %v5349_v12, %v14420_v15  ;;  %v5589_v28 = vmul.f32 %v5349_v12, %v14421_v42  ;;  %v5304_v7 = vmul.f32 %v5256_v60, %v5208_v59  ;;  %v14423_v27 = vld [vmem:[#allocation32_spill] sm:$0xff] }
 0x497   : > { %vm3329_vm2 = vcmp.eq.f32.partialorder %v12829_v14, inf  ;;  %v7732_v47 = vpop.eup %7731  ;;  %v5111_v21 = vmul.f32 0.5, %v5063_v36  ;;  %v4586_v44 = vsel %vm4442_vm6, %v4538_v39, 1.0  ;;  %v5066_v43 = vsub.f32 %v4864_v0, %v5008_v63 }
 0x498   : > { %v4862_v17 = vmul.f32 0.6931472, %v7730_v1  ;;  %vm3331_vm11 = vcmp.eq.f32.partialorder %v12829_v14, 0.0  ;;  %vm3350_vm12 = vcmp.eq.f32.partialorder %v12875_v5, inf  ;;  %v7734_v18 = vpop.eup %7733  ;;  %5445 = vst [vmem:[%s11359_s21 + $0x300] sm:$0xff] %v5397_v46  ;;  %5541 = vst [vmem:[%s11359_s21 + $0x308] sm:$0xff] %v5493_v38  ;;  %7747 = vrsqrt.f32 %v12900_v62 }
 0x499   : > { %5637 = vst [vmem:[%s11359_s21 + $0x310] sm:$0xff] %v5589_v28  ;;  %v5352_v6 = vsel %vm4200_vm3, 0.0, %v5304_v7  ;;  %v4537_v51 = vmul.f32 0.999, %v7728_v10  ;;  %v5006_v34 = vmul.f32 0.6931472, %v7732_v47  ;;  %v12920_v24 = vpop.eup %7735  ;;  %v5207_v3 = vmul.f32 %v7722_v45, %v5111_v21 }
 0x49a   : > { %v5400_v16 = vmul.f32 %v14422_v57, %v5352_v6  ;;  %v5496_v11 = vmul.f32 %v14423_v27, %v5352_v6  ;;  %v5592_v29 = vmul.f32 %v14424_v35, %v5352_v6  ;;  %v7738_v40 = vpop.eup %7737  ;;  %v5114_v60 = vmul.f32 0.5, %v5066_v43  ;;  %v14426_v38 = vld [vmem:[#allocation232_spill] sm:$0xff]  ;;  %v14427_v28 = vld [vmem:[#allocation237_spill] sm:$0xff] }
 0x49b   : > { %v5065_v25 = vsub.f32 %v4862_v17, %v5006_v34  ;;  %v12926_v39 = vmax.f32 %v12920_v24, 1e-05  ;;  %vm3352_vm3 = vcmp.eq.f32.partialorder %v12875_v5, 0.0  ;;  %v7740_v50 = vpop.eup %7739  ;;  %v5303_v59 = vmul.f32 %v5255_v48, %v5207_v3  ;;  %v14428_v34 = vld [vmem:[#allocation82_spill] sm:$0xff]  ;;  %v14430_v27 = vld [vmem:[#allocation40_spill] sm:$0xff] }
 0x49c   : > { %5448 = vst [vmem:[%s11359_s21 + $0x348] sm:$0xff] %v5400_v16  ;;  %5544 = vst [vmem:[%s11359_s21 + $0x350] sm:$0xff] %v5496_v11  ;;  %v5258_v36 = vmul.f32 %v4586_v44, %v12866_v8  ;;  %v3353_v0 = vand.u32 2147483648, %v12875_v5  ;;  %vm3343_vm13 = vcmp.eq.f32.partialorder %v12877_v2, inf  ;;  %v7742_v45 = vpop.eup %7741  ;;  %v5210_v10 = vmul.f32 %v7734_v18, %v5114_v60 }
 0x49d   : > { %5640 = vst [vmem:[%s11359_s21 + $0x358] sm:$0xff] %v5592_v29  ;;  %v4585_v12 = vsel %vm4441_vm9, %v4537_v51, 1.0  ;;  %v5113_v63 = vmul.f32 0.5, %v5065_v25  ;;  %vm4444_vm15 = vcmp.gt.f32.partialorder %v12926_v39, 0.999  ;;  %v7744_v1 = vpop.eup %7743  ;;  %v5351_v48 = vsel %vm4199_vm5, 0.0, %v5303_v59  ;;  %v2494_v51 = vpop.xlane.xlu1 %2493 }
 0x49e   : > { %v4636_v8 = vsel %vm4444_vm15, 0.999, %v12926_v39  ;;  %v3328_v41 = vmul.f32 %v7740_v50, %v12829_v14  ;;  %v3349_v46 = vmul.f32 %v7742_v45, %v12875_v5  ;;  %v5399_v15 = vmul.f32 %v5351_v48, %v14425_v61  ;;  %v2492_v29 = vpop.xlane.xlu0 %2491  ;;  %v14432_v45 = vld [vmem:[#allocation84_spill] sm:$0xff] }
 0x49f   : > { %v5495_v42 = vmul.f32 %v5351_v48, %v14426_v38  ;;  %v5591_v7 = vmul.f32 %v5351_v48, %v14427_v28  ;;  %v5306_v47 = vmul.f32 %v5258_v36, %v5210_v10  ;;  %v5209_v21 = vmul.f32 %v7738_v40, %v5113_v63  ;;  %v14431_v40 = vld [vmem:[#allocation147_spill] sm:$0xff] }
 0x4a0   : > { %v5257_v44 = vmul.f32 %v4585_v12, %v12870_v19  ;;  %v5997_v26 = vclamps-f32 %v4636_v8, 0.99999  ;;  %v3330_v43 = vsel %vm3329_vm2, %v12829_v14, %v3328_v41  ;;  %5447 = vst [vmem:[%s11359_s21 + $0x330] sm:$0xff] %v5399_v15  ;;  %v3351_v19 = vsel %vm3350_vm12, %v12875_v5, %v3349_v46  ;;  %v14433_v12 = vld [vmem:[#allocation240_spill] sm:$0xff]  ;;  %v14435_v5 = vld [vmem:[#allocation154_spill] sm:$0xff] }
 0x4a1   : > { %5543 = vst [vmem:[%s11359_s21 + $0x338] sm:$0xff] %v5495_v42  ;;  %5639 = vst [vmem:[%s11359_s21 + $0x340] sm:$0xff] %v5591_v7  ;;  %v5354_v17 = vsel %vm4202_vm0, 0.0, %v5306_v47  ;;  %v12961_v18 = vsel %vm3331_vm11, %v3332_v4, %v3330_v43  ;;  %v3342_v6 = vmul.f32 %v7744_v1, %v12877_v2  ;;  %7749 = vrcp.f32 %v12926_v39  ;;  %v14434_v1 = vld [vmem:[#allocation39_spill] sm:$0xff]  ;;  %v3008_v15 = vpop.xlane.xlu1 %3007  ;;  %v14436_v42 = vld [vmem:[#allocation57_spill] sm:$0xff] }
 0x4a2   : > { %v5402_v57 = vmul.f32 %v14428_v34, %v5354_v17  ;;  %v5498_v16 = vmul.f32 %v14429_v30, %v5354_v17  ;;  %v5594_v11 = vmul.f32 %v14430_v27, %v5354_v17  ;;  %v5305_v35 = vmul.f32 %v5257_v44, %v5209_v21  ;;  %v7746_v14 = vpop.eup %7745 }
 0x4a3   : > { %v4780_v4 = vadd.f32 1.0, %v5997_v26  ;;  %v4924_v3 = vsub.f32 1.0, %v5997_v26  ;;  %v3483_v60 = vmul.f32 %v14431_v40, %v12961_v18  ;;  %v12980_v50 = vsel %vm3352_vm3, %v3353_v0, %v3351_v19 }
 0x4a4   : > { %5450 = vst [vmem:[%s11359_s21 + $0x378] sm:$0xff] %v5402_v57  ;;  %5546 = vst [vmem:[%s11359_s21 + $0x380] sm:$0xff] %v5498_v16  ;;  %v5353_v25 = vsel %vm4201_vm14, 0.0, %v5305_v35  ;;  %v3344_v59 = vsel %vm3343_vm13, %v12877_v2, %v3342_v6  ;;  %v3346_v36 = vand.u32 2147483648, %v12877_v2  ;;  %v3486_v0 = vmul.f32 %v14435_v5, %v12980_v50 }
 0x4a5   : > { %5642 = vst [vmem:[%s11359_s21 + $0x388] sm:$0xff] %v5594_v11  ;;  %v5401_v10 = vmul.f32 %v5353_v25, %v14432_v45  ;;  %v5497_v63 = vmul.f32 %v5353_v25, %v14433_v12  ;;  %v5593_v48 = vmul.f32 %v5353_v25, %v14434_v1  ;;  %7751 = vlog2.f32 %v4780_v4  ;;  %v7748_v55 = vpop.eup %7747  ;;  %v2498_v30 = vpop.xlane.xlu1 %2497 }
 0x4a6   : > { %7753 = vlog2.f32 %v4924_v3  ;;  %v4011_v41 = vmul.f32 %v11941_v33, %v3483_v60  ;;  %vm3345_vm5 = vcmp.eq.f32.partialorder %v12877_v2, 0.0  ;;  %v3363_v61 = vmul.f32 %v7746_v14, %v12888_v37  ;;  %v3006_v2 = vpop.xlane.xlu0 %3005 }
 0x4a7   : > { %5449 = vst [vmem:[%s11359_s21 + $0x360] sm:$0xff] %v5401_v10  ;;  %5545 = vst [vmem:[%s11359_s21 + $0x368] sm:$0xff] %v5497_v63  ;;  %7755 = vrcp.f32 %v12859_v58  ;;  %v12997_v46 = vsel %vm3345_vm5, %v3346_v36, %v3344_v59  ;;  %vm3364_vm0 = vcmp.eq.f32.partialorder %v12888_v37, inf  ;;  %v4014_v33 = vmul.f32 %v12503_v56, %v3486_v0  ;;  %v14442_v63 = vld [vmem:[#allocation251_spill] sm:$0xff] }
 0x4a8   : > { %5641 = vst [vmem:[%s11359_s21 + $0x370] sm:$0xff] %v5593_v48  ;;  %v5948_v38 = vclamps-f32 %v4011_v41, 15.0  ;;  %v3485_v28 = vmul.f32 %v14436_v42, %v12997_v46  ;;  %vm3366_vm14 = vcmp.eq.f32.partialorder %v12888_v37, 0.0  ;;  %7757 = vrcp.f32 %v4636_v8  ;;  %v14443_v41 = vld [vmem:[#allocation254_spill] sm:$0xff] }
 0x4a9   : > { %v3365_v7 = vsel %vm3364_vm0, %v12888_v37, %v3363_v61  ;;  %v3367_v58 = vand.u32 2147483648, %v12888_v37  ;;  %v3356_v47 = vmul.f32 %v7748_v55, %v12900_v62  ;;  %v5951_v21 = vclamps-f32 %v4014_v33, 15.0  ;;  %v14437_v37 = vld [vmem:[#allocation161_spill] sm:$0xff] }
 0x4aa   : > { %7759 = vtanh.f32 %v5948_v38  ;;  %v4013_v44 = vmul.f32 %v12510_v31, %v3485_v28  ;;  %vm3357_vm8 = vcmp.eq.f32.partialorder %v12900_v62, inf  ;;  %vm4203_vm4 = vcmp.eq.f32.partialorder %v12961_v18, 0.0  ;;  %v14438_v31 = vld [vmem:[#allocation245_spill] sm:$0xff]  ;;  %v2496_v35 = vpop.xlane.xlu0 %2495 }
 0x4ab   : > { %v13011_v56 = vsel %vm3366_vm14, %v3367_v58, %v3365_v7  ;;  %v3358_v26 = vsel %vm3357_vm8, %v12900_v62, %v3356_v47  ;;  %v3360_v8 = vand.u32 2147483648, %v12900_v62  ;;  %7761 = vtanh.f32 %v5951_v21 }
 0x4ac   : > { %v5950_v43 = vclamps-f32 %v4013_v44, 15.0  ;;  %v3488_v17 = vmul.f32 %v14437_v37, %v13011_v56  ;;  %vm3359_vm7 = vcmp.eq.f32.partialorder %v12900_v62, 0.0  ;;  %v2544_v6 = vadd.f32 %v2494_v51, %v14438_v31  ;;  %v14439_v62 = vld [vmem:[#allocation160_spill] sm:$0xff]  ;;  %v14440_v51 = vld [vmem:[#allocation247_spill] sm:$0xff] }
 0x4ad   : > { %v13018_v19 = vsel %vm3359_vm7, %v3360_v8, %v3358_v26  ;;  %v3922_v34 = vsub.f32 %v12519_v20, %v12721_v52  ;;  %v3921_v57 = vsub.f32 %v12729_v9, %v12821_v53  ;;  %v4251_v16 = vsel %vm4203_vm4, 1.0, %v12961_v18  ;;  %v14441_v52 = vld [vmem:[#allocation279_spill] sm:$0xff] }
 0x4ae   : > { %7763 = vtanh.f32 %v5950_v43  ;;  %v4016_v27 = vmul.f32 %v12512_v32, %v3488_v17  ;;  %v3487_v11 = vmul.f32 %v14439_v62, %v13018_v19  ;;  %vm4206_vm10 = vcmp.eq.f32.partialorder %v12980_v50, 0.0  ;;  %v7750_v53 = vpop.eup %7749  ;;  %v3010_v48 = vpop.xlane.xlu0 %3009 }
 0x4af   : > { %v2543_v14 = vadd.f32 %v2492_v29, %v14440_v51  ;;  %v13033_v20 = vadd.f32 %v3008_v15, %v2544_v6  ;;  %v3732_v9 = vmul.f32 0.6931472, %v14441_v52  ;;  %v3876_v40 = vmul.f32 0.6931472, %v11558_v49  ;;  %v14444_v52 = vld [vmem:[#allocation86_spill] sm:$0xff] }
 0x4b0   : > { %v5953_v4 = vclamps-f32 %v4016_v27, 15.0  ;;  %v4015_v3 = vmul.f32 %v12514_v13, %v3487_v11  ;;  %v3730_v32 = vmul.f32 0.6931472, %v11709_v54  ;;  %7765 = vrcp.f32 %v4251_v16  ;;  %v3012_v54 = vpop.xlane.xlu1 %3011 }
 0x4b1   : > { %vm4205_vm6 = vcmp.eq.f32.partialorder %v12997_v46, 0.0  ;;  %v13040_v60 = vadd.f32 %v3006_v2, %v2543_v14  ;;  %v3874_v25 = vmul.f32 0.6931472, %v12560_v23  ;;  %v4254_v59 = vsel %vm4206_vm10, 1.0, %v12980_v50 }
 0x4b2   : > { %v7752_v29 = vpop.eup %7751  ;;  %7767 = vtanh.f32 %v5953_v4  ;;  %vm4208_vm9 = vcmp.eq.f32.partialorder %v13011_v56, 0.0  ;;  %v5952_v13 = vclamps-f32 %v4015_v3, 15.0  ;;  %v4540_v49 = vmul.f32 0.999, %v7750_v53  ;;  %v14445_v53 = vld [vmem:[#allocation246_spill] sm:$0xff]  ;;  %v14446_v3 = vld [vmem:[#allocation249_spill] sm:$0xff] }
 0x4b3   : > { %v7754_v36 = vpop.eup %7753  ;;  %v4868_v45 = vmul.f32 0.6931472, %v7752_v29  ;;  %vm4207_vm2 = vcmp.eq.f32.partialorder %v13018_v19, 0.0  ;;  %7769 = vrsqrt.f32 %v13033_v20  ;;  %v4253_v23 = vsel %vm4205_vm6, 1.0, %v12997_v46 }
 0x4b4   : > { %v7756_v10 = vpop.eup %7755  ;;  %v5012_v12 = vmul.f32 0.6931472, %v7754_v36  ;;  %7771 = vtanh.f32 %v5952_v13  ;;  %v2546_v1 = vadd.f32 %v2498_v30, %v14442_v63  ;;  %v4256_v55 = vsel %vm4208_vm9, 1.0, %v13011_v56 }
 0x4b5   : > { %7773 = vrsqrt.f32 %v13040_v60  ;;  %v2545_v5 = vadd.f32 %v2496_v35, %v14443_v41  ;;  %v3924_v0 = vsub.f32 %v3732_v9, %v3876_v40  ;;  %v7758_v61 = vpop.eup %7757  ;;  %v4255_v38 = vsel %vm4207_vm2, 1.0, %v13018_v19 }
 0x4b6   : > { %v5068_v15 = vsub.f32 %v4868_v45, %v5012_v12  ;;  %7775 = vrcp.f32 %v4254_v59  ;;  %v13061_v33 = vadd.f32 %v3012_v54, %v2546_v1  ;;  %v4588_v28 = vsel %vm4444_vm15, %v4540_v49, 1.0 }
 0x4b7   : > { %v13063_v42 = vpop.eup %7759  ;;  %7777 = vrcp.f32 %v4253_v23  ;;  %v3923_v2 = vsub.f32 %v3730_v32, %v3874_v25  ;;  %v13067_v7 = vadd.f32 %v3010_v48, %v2545_v5  ;;  %v4348_v58 = vmul.f32 %v7756_v10, %v12920_v24 }
 0x4b8   : > { %v5116_v47 = vmul.f32 0.5, %v5068_v15  ;;  %v13071_v21 = vmax.f32 %v13063_v42, 1e-05  ;;  %7779 = vrcp.f32 %v4256_v55  ;;  %v13073_v44 = vpop.eup %7761  ;;  %v13075_v26 = vmul.f32 0.5, %v3922_v34 }
 0x4b9   : > { %7781 = vrcp.f32 %v4255_v38  ;;  %v13077_v8 = vmul.f32 0.5, %v3921_v57  ;;  %v13079_v39 = vmul.f32 0.5, %v3924_v0  ;;  %v5260_v37 = vmul.f32 %v4588_v28, %v4348_v58 }
 0x4ba   : > { %v5212_v43 = vmul.f32 %v7758_v61, %v5116_v47  ;;  %vm4443_vm11 = vcmp.gt.f32.partialorder %v13071_v21, 0.999  ;;  %7783 = vrsqrt.f32 %v13061_v33  ;;  %v13089_v31 = vmax.f32 %v13073_v44, 1e-05 }
 0x4bb   : > { %v13083_v24 = vpop.eup %7763  ;;  %v4635_v17 = vsel %vm4443_vm11, 0.999, %v13071_v21  ;;  %v13091_v6 = vmul.f32 0.5, %v3923_v2  ;;  %7785 = vrsqrt.f32 %v13067_v7  ;;  %vm3378_vm12 = vcmp.eq.f32.partialorder %v13033_v20, inf }
 0x4bc   : > { %v5308_v34 = vmul.f32 %v5260_v37, %v5212_v43  ;;  %7787 = vrcp.f32 %v13071_v21  ;;  %v5996_v57 = vclamps-f32 %v4635_v17, 0.99999  ;;  %vm4446_vm3 = vcmp.gt.f32.partialorder %v13089_v31, 0.999 }
 0x4bd   : > { %7789 = vrcp.f32 %v13089_v31  ;;  %v13099_v30 = vmax.f32 %v13083_v24, 1e-05  ;;  %v3381_v16 = vand.u32 2147483648, %v13033_v20  ;;  %v13102_v27 = vpop.eup %7765  ;;  %v4638_v51 = vsel %vm4446_vm3, 0.999, %v13089_v31 }
 0x4be   : > { %v5356_v62 = vsel %vm4204_vm1, 0.0, %v5308_v34  ;;  %v4779_v11 = vadd.f32 1.0, %v5996_v57  ;;  %v4923_v35 = vsub.f32 1.0, %v5996_v57  ;;  %vm3380_vm13 = vcmp.eq.f32.partialorder %v13033_v20, 0.0 }
 0x4bf   : > { %v13110_v14 = vpop.eup %7767  ;;  %v5404_v9 = vmul.f32 %v14444_v52, %v5356_v62  ;;  %v5500_v4 = vmul.f32 %v14445_v53, %v5356_v62  ;;  %v5596_v22 = vmul.f32 %v14446_v3, %v5356_v62  ;;  %v5999_v40 = vclamps-f32 %v4638_v51, 0.99999  ;;  %v14448_v53 = vld [vmem:[#allocation168_spill] sm:$0xff] }
 0x4c0   : > { %v7770_v32 = vpop.eup %7769  ;;  %7791 = vlog2.f32 %v4779_v11  ;;  %vm4445_vm1 = vcmp.gt.f32.partialorder %v13099_v30, 0.999  ;;  %v13117_v25 = vmax.f32 %v13110_v14, 1e-05  ;;  %vm3371_vm15 = vcmp.eq.f32.partialorder %v13040_v60, inf }
 0x4c1   : > { %v13120_v29 = vpop.eup %7771  ;;  %5452 = vst [vmem:[%s11359_s21 + $0x3a8] sm:$0xff] %v5404_v9  ;;  %5548 = vst [vmem:[%s11359_s21 + $0x3b0] sm:$0xff] %v5500_v4  ;;  %7793 = vlog2.f32 %v4923_v35  ;;  %v4782_v59 = vadd.f32 1.0, %v5999_v40  ;;  %v4926_v13 = vsub.f32 1.0, %v5999_v40  ;;  %v4637_v36 = vsel %vm4445_vm1, 0.999, %v13099_v30 }
 0x4c2   : > { %5644 = vst [vmem:[%s11359_s21 + $0x3b8] sm:$0xff] %v5596_v22  ;;  %v7774_v49 = vpop.eup %7773  ;;  %7795 = vrcp.f32 %v4635_v17  ;;  %v5998_v45 = vclamps-f32 %v4637_v36, 0.99999  ;;  %vm4448_vm5 = vcmp.gt.f32.partialorder %v13117_v25, 0.999  ;;  %vm3373_vm0 = vcmp.eq.f32.partialorder %v13040_v60, 0.0 }
 0x4c3   : > { %v7776_v54 = vpop.eup %7775  ;;  %7797 = vlog2.f32 %v4782_v59  ;;  %v13133_v10 = vsel %vm4448_vm5, 0.999, %v13117_v25  ;;  %v13136_v12 = vmax.f32 %v13120_v29, 1e-05  ;;  %v3377_v23 = vmul.f32 %v7770_v32, %v13033_v20  ;;  %v14447_v17 = vld [vmem:[#allocation170_spill] sm:$0xff] }
 0x4c4   : > { %v7778_v63 = vpop.eup %7777  ;;  %7799 = vlog2.f32 %v4926_v13  ;;  %v4781_v1 = vadd.f32 1.0, %v5998_v45  ;;  %v4925_v48 = vsub.f32 1.0, %v5998_v45  ;;  %v6001_v55 = vclamps-f32 %v13133_v10, 0.99999 }
 0x4c5   : > { %v7780_v41 = vpop.eup %7779  ;;  %7801 = vrcp.f32 %v13099_v30  ;;  %vm4447_vm14 = vcmp.gt.f32.partialorder %v13136_v12, 0.999  ;;  %v3379_v5 = vsel %vm3378_vm12, %v13033_v20, %v3377_v23  ;;  %v3370_v0 = vmul.f32 %v7774_v49, %v13040_v60 }
 0x4c6   : > { %v13146_v61 = vpop.eup %7781  ;;  %7803 = vlog2.f32 %v4781_v1  ;;  %v4784_v15 = vadd.f32 1.0, %v6001_v55  ;;  %v4928_v38 = vsub.f32 1.0, %v6001_v55  ;;  %v13151_v28 = vsel %vm4447_vm14, 0.999, %v13136_v12 }
 0x4c7   : > { %v7784_v2 = vpop.eup %7783  ;;  %7805 = vlog2.f32 %v4925_v48  ;;  %v6000_v58 = vclamps-f32 %v13151_v28, 0.99999  ;;  %v13156_v47 = vsel %vm3380_vm13, %v3381_v16, %v3379_v5  ;;  %v3372_v43 = vsel %vm3371_vm15, %v13040_v60, %v3370_v0  ;;  %v14449_v48 = vld [vmem:[#allocation177_spill] sm:$0xff] }
 0x4c8   : > { %v7786_v37 = vpop.eup %7785  ;;  %7807 = vrcp.f32 %v4638_v51  ;;  %v3490_v34 = vmul.f32 %v14447_v17, %v13156_v47  ;;  %v3374_v57 = vand.u32 2147483648, %v13040_v60  ;;  %vm3392_vm8 = vcmp.eq.f32.partialorder %v13061_v33, inf }
 0x4c9   : > { %v7788_v62 = vpop.eup %7787  ;;  %7809 = vrcp.f32 %v13117_v25  ;;  %vm3394_vm7 = vcmp.eq.f32.partialorder %v13061_v33, 0.0  ;;  %v3395_v20 = vand.u32 2147483648, %v13061_v33  ;;  %vm3385_vm12 = vcmp.eq.f32.partialorder %v13067_v7, inf  ;;  %v14456_v25 = vld [vmem:[#allocation258_spill] sm:$0xff] }
 0x4ca   : > { %v7790_v16 = vpop.eup %7789  ;;  %7811 = vlog2.f32 %v4784_v15  ;;  %v4783_v11 = vadd.f32 1.0, %v6000_v58  ;;  %v4018_v35 = vmul.f32 %v13075_v26, %v3490_v34  ;;  %v13172_v51 = vsel %vm3373_vm0, %v3374_v57, %v3372_v43 }
 0x4cb   : > { %vm3387_vm13 = vcmp.eq.f32.partialorder %v13067_v7, 0.0  ;;  %v4347_v52 = vmul.f32 %v13102_v27, %v13063_v42  ;;  %7813 = vlog2.f32 %v4928_v38  ;;  %v4927_v9 = vsub.f32 1.0, %v6000_v58 }
 0x4cc   : > { %v3489_v4 = vmul.f32 %v14448_v53, %v13172_v51  ;;  %v4350_v3 = vmul.f32 %v7776_v54, %v13073_v44  ;;  %7815 = vrcp.f32 %v4637_v36  ;;  %v3391_v22 = vmul.f32 %v7784_v2, %v13061_v33 }
 0x4cd   : > { %v3388_v26 = vand.u32 2147483648, %v13067_v7  ;;  %v7792_v60 = vpop.eup %7791  ;;  %v4539_v40 = vmul.f32 0.999, %v7788_v62  ;;  %7817 = vrcp.f32 %v13136_v12  ;;  %v5955_v32 = vclamps-f32 %v4018_v35, 15.0 }
 0x4ce   : > { %v4017_v59 = vmul.f32 %v13077_v8, %v3489_v4  ;;  %v7794_v42 = vpop.eup %7793  ;;  %v4866_v27 = vmul.f32 0.6931472, %v7792_v60  ;;  %v4542_v13 = vmul.f32 0.999, %v7790_v16  ;;  %7819 = vlog2.f32 %v4783_v11 }
 0x4cf   : > { %v3393_v44 = vsel %vm3392_vm8, %v13061_v33, %v3391_v22  ;;  %v7796_v36 = vpop.eup %7795  ;;  %v5010_v49 = vmul.f32 0.6931472, %v7794_v42  ;;  %7821 = vlog2.f32 %v4927_v9  ;;  %v4349_v1 = vmul.f32 %v7778_v63, %v13083_v24  ;;  %v14450_v9 = vld [vmem:[#allocation175_spill] sm:$0xff] }
 0x4d0   : > { %v5954_v45 = vclamps-f32 %v4017_v59, 15.0  ;;  %v13189_v54 = vsel %vm3394_vm7, %v3395_v20, %v3393_v44  ;;  %v7798_v23 = vpop.eup %7797  ;;  %v13193_v8 = vmul.f32 %v7780_v41, %v13110_v14  ;;  %v3384_v5 = vmul.f32 %v7786_v37, %v13067_v7  ;;  %v14451_v44 = vld [vmem:[#allocation87_spill] sm:$0xff] }
 0x4d1   : > { %v3492_v55 = vmul.f32 %v14449_v48, %v13189_v54  ;;  %v7800_v0 = vpop.eup %7799  ;;  %v4587_v15 = vsel %vm4443_vm11, %v4539_v40, 1.0  ;;  %v5067_v38 = vsub.f32 %v4866_v27, %v5010_v49  ;;  %v4872_v2 = vmul.f32 0.6931472, %v7798_v23  ;;  %v14452_v49 = vld [vmem:[#allocation248_spill] sm:$0xff] }
 0x4d2   : > { %7823 = vtanh.f32 %v5955_v32  ;;  %v7802_v33 = vpop.eup %7801  ;;  %v5016_v58 = vmul.f32 0.6931472, %v7800_v0  ;;  %v3386_v14 = vsel %vm3385_vm12, %v13067_v7, %v3384_v5  ;;  %v4590_v43 = vsel %vm4446_vm3, %v4542_v13, 1.0 }
 0x4d3   : > { %7825 = vrcp.f32 %v13133_v10  ;;  %v4020_v24 = vmul.f32 %v13079_v39, %v3492_v55  ;;  %v7804_v63 = vpop.eup %7803  ;;  %v5115_v41 = vmul.f32 0.5, %v5067_v38  ;;  %v13209_v21 = vsel %vm3387_vm13, %v3388_v26, %v3386_v14 }
 0x4d4   : > { %7827 = vtanh.f32 %v5954_v45  ;;  %v7806_v37 = vpop.eup %7805  ;;  %v5070_v17 = vsub.f32 %v4872_v2, %v5016_v58  ;;  %v4541_v34 = vmul.f32 0.999, %v7802_v33  ;;  %v4870_v10 = vmul.f32 0.6931472, %v7804_v63  ;;  %v14453_v45 = vld [vmem:[#allocation253_spill] sm:$0xff] }
 0x4d5   : > { %v5957_v57 = vclamps-f32 %v4020_v24, 15.0  ;;  %v7808_v39 = vpop.eup %7807  ;;  %v5211_v62 = vmul.f32 %v7796_v36, %v5115_v41  ;;  %v5259_v20 = vmul.f32 %v4587_v15, %v4347_v52  ;;  %v5014_v16 = vmul.f32 0.6931472, %v7806_v37  ;;  %v14454_v24 = vld [vmem:[#allocation88_spill] sm:$0xff] }
 0x4d6   : > { %vm4210_vm11 = vcmp.eq.f32.partialorder %v13156_v47, 0.0  ;;  %v7810_v11 = vpop.eup %7809  ;;  %v5118_v35 = vmul.f32 0.5, %v5070_v17  ;;  %v5262_v31 = vmul.f32 %v4590_v43, %v4350_v3  ;;  %v3491_v7 = vmul.f32 %v14450_v9, %v13209_v21 }
 0x4d7   : > { %7829 = vtanh.f32 %v5957_v57  ;;  %v7812_v53 = vpop.eup %7811  ;;  %v5307_v4 = vmul.f32 %v5259_v20, %v5211_v62  ;;  %v5069_v22 = vsub.f32 %v4870_v10, %v5014_v16  ;;  %v4544_v26 = vmul.f32 0.999, %v7810_v11  ;;  %v14457_v11 = vld [vmem:[#allocation91_spill] sm:$0xff] }
 0x4d8   : > { %7831 = vrcp.f32 %v13151_v28  ;;  %v7814_v60 = vpop.eup %7813  ;;  %v5214_v40 = vmul.f32 %v7808_v39, %v5118_v35  ;;  %v4589_v52 = vsel %vm4445_vm1, %v4541_v34, 1.0  ;;  %v4876_v32 = vmul.f32 0.6931472, %v7812_v53 }
 0x4d9   : > { %v4019_v59 = vmul.f32 %v13091_v6, %v3491_v7  ;;  %v7816_v42 = vpop.eup %7815  ;;  %v5355_v3 = vsel %vm4203_vm4, 0.0, %v5307_v4  ;;  %v5117_v27 = vmul.f32 0.5, %v5069_v22  ;;  %v5020_v13 = vmul.f32 0.6931472, %v7814_v60  ;;  %v14459_v7 = vld [vmem:[#allocation262_spill] sm:$0xff] }
 0x4da   : > { %vm4209_vm3 = vcmp.eq.f32.partialorder %v13172_v51, 0.0  ;;  %v7818_v28 = vpop.eup %7817  ;;  %v5403_v36 = vmul.f32 %v5355_v3, %v14451_v44  ;;  %v5499_v30 = vmul.f32 %v5355_v3, %v14452_v49  ;;  %v5595_v23 = vmul.f32 %v5355_v3, %v14453_v45 }
 0x4db   : > { %v5310_v48 = vmul.f32 %v5262_v31, %v5214_v40  ;;  %v7820_v6 = vpop.eup %7819  ;;  %v5213_v55 = vmul.f32 %v7816_v42, %v5117_v27  ;;  %v5261_v5 = vmul.f32 %v4589_v52, %v4349_v1  ;;  %v4592_v18 = vsel %vm4448_vm5, %v4544_v26, 1.0  ;;  %v14455_v1 = vld [vmem:[#allocation252_spill] sm:$0xff]  ;;  %v14461_v27 = vld [vmem:[#allocation47_spill] sm:$0xff] }
 0x4dc   : > { %v5072_v0 = vsub.f32 %v4876_v32, %v5020_v13  ;;  %v7822_v15 = vpop.eup %7821  ;;  %5451 = vst [vmem:[%s11359_s21 + $0x390] sm:$0xff] %v5403_v36  ;;  %5547 = vst [vmem:[%s11359_s21 + $0x398] sm:$0xff] %v5499_v30  ;;  %v4543_v2 = vmul.f32 0.999, %v7818_v28  ;;  %v4874_v33 = vmul.f32 0.6931472, %v7820_v6  ;;  %v5264_v39 = vmul.f32 %v4592_v18, %v13193_v8 }
 0x4dd   : > { %5643 = vst [vmem:[%s11359_s21 + $0x3a0] sm:$0xff] %v5595_v23  ;;  %v5358_v38 = vsel %vm4206_vm10, 0.0, %v5310_v48  ;;  %v5956_v58 = vclamps-f32 %v4019_v59, 15.0  ;;  %v5309_v43 = vmul.f32 %v5261_v5, %v5213_v55  ;;  %v5018_v34 = vmul.f32 0.6931472, %v7822_v15  ;;  %v14458_v31 = vld [vmem:[#allocation48_spill] sm:$0xff] }
 0x4de   : > { %v5406_v14 = vmul.f32 %v14454_v24, %v5358_v38  ;;  %v5502_v63 = vmul.f32 %v14455_v1, %v5358_v38  ;;  %v5598_v41 = vmul.f32 %v14456_v25, %v5358_v38  ;;  %v5120_v17 = vmul.f32 0.5, %v5072_v0  ;;  %v14460_v42 = vld [vmem:[#allocation92_spill] sm:$0xff]  ;;  %v14462_v28 = vld [vmem:[#allocation53_spill] sm:$0xff]  ;;  %v14463_v0 = vld [vmem:[#allocation95_spill] sm:$0xff] }
 0x4df   : > { %v13234_v37 = vpop.eup %7823  ;;  %v4258_v50 = vsel %vm4210_vm11, 1.0, %v13156_v47  ;;  %7833 = vtanh.f32 %v5956_v58  ;;  %v5357_v57 = vsel %vm4205_vm6, 0.0, %v5309_v43  ;;  %v4257_v20 = vsel %vm4209_vm3, 1.0, %v13172_v51  ;;  %v14464_v38 = vld [vmem:[#allocation22_spill] sm:$0xff] }
 0x4e0   : > { %v7826_v10 = vpop.eup %7825  ;;  %5454 = vst [vmem:[%s11359_s21 + $0x3d8] sm:$0xff] %v5406_v14  ;;  %5550 = vst [vmem:[%s11359_s21 + $0x3e0] sm:$0xff] %v5502_v63  ;;  %v13246_v62 = vmax.f32 %v13234_v37, 1e-05  ;;  %v5405_v35 = vmul.f32 %v5357_v57, %v14457_v11  ;;  %v5501_v9 = vmul.f32 %v5357_v57, %v14458_v31  ;;  %v5597_v53 = vmul.f32 %v5357_v57, %v14459_v7 }
 0x4e1   : > { %5646 = vst [vmem:[%s11359_s21 + $0x3e8] sm:$0xff] %v5598_v41  ;;  %v13251_v16 = vpop.eup %7827  ;;  %v5216_v46 = vmul.f32 %v7826_v10, %v5120_v17  ;;  %v4351_v4 = vmul.f32 %v13146_v61, %v13120_v29  ;;  %v4591_v8 = vsel %vm4447_vm14, %v4543_v2, 1.0  ;;  %v5071_v22 = vsub.f32 %v4874_v33, %v5018_v34  ;;  %v14465_v33 = vld [vmem:[#allocation263_spill] sm:$0xff] }
 0x4e2   : > { %vm4450_vm4 = vcmp.gt.f32.partialorder %v13246_v62, 0.999  ;;  %5453 = vst [vmem:[%s11359_s21 + $0x3c0] sm:$0xff] %v5405_v35  ;;  %5549 = vst [vmem:[%s11359_s21 + $0x3c8] sm:$0xff] %v5501_v9  ;;  %7835 = vrcp.f32 %v4258_v50  ;;  %v13268_v40 = vmax.f32 %v13251_v16, 1e-05 }
 0x4e3   : > { %5645 = vst [vmem:[%s11359_s21 + $0x3d0] sm:$0xff] %v5597_v53  ;;  %v5312_v26 = vmul.f32 %v5264_v39, %v5216_v46  ;;  %v4642_v60 = vsel %vm4450_vm4, 0.999, %v13246_v62  ;;  %v5119_v29 = vmul.f32 0.5, %v5071_v22  ;;  %7837 = vrcp.f32 %v4257_v20 }
 0x4e4   : > { %v13270_v52 = vpop.eup %7829  ;;  %v6003_v12 = vclamps-f32 %v4642_v60, 0.99999  ;;  %vm4212_vm10 = vcmp.eq.f32.partialorder %v13189_v54, 0.0  ;;  %v5263_v59 = vmul.f32 %v4591_v8, %v4351_v4  ;;  %7839 = vrcp.f32 %v13246_v62 }
 0x4e5   : > { %v7832_v61 = vpop.eup %7831  ;;  %v5360_v32 = vsel %vm4208_vm9, 0.0, %v5312_v26  ;;  %vm4449_vm6 = vcmp.gt.f32.partialorder %v13268_v40, 0.999  ;;  %v13284_v56 = vmax.f32 %v13270_v52, 1e-05  ;;  %7841 = vrcp.f32 %v13268_v40 }
 0x4e6   : > { %v5408_v3 = vmul.f32 %v14460_v42, %v5360_v32  ;;  %v5504_v13 = vmul.f32 %v14461_v27, %v5360_v32  ;;  %v5600_v44 = vmul.f32 %v14462_v28, %v5360_v32  ;;  %v5215_v36 = vmul.f32 %v7832_v61, %v5119_v29 }
 0x4e7   : > { %v4786_v49 = vadd.f32 1.0, %v6003_v12  ;;  %v4930_v30 = vsub.f32 1.0, %v6003_v12  ;;  %v4641_v45 = vsel %vm4449_vm6, 0.999, %v13268_v40  ;;  %v4260_v6 = vsel %vm4212_vm10, 1.0, %v13189_v54 }
 0x4e8   : > { %5456 = vst [vmem:[%s11359_s21 + $0x408] sm:$0xff] %v5408_v3  ;;  %5552 = vst [vmem:[%s11359_s21 + $0x410] sm:$0xff] %v5504_v13  ;;  %v5311_v23 = vmul.f32 %v5263_v59, %v5215_v36  ;;  %v6002_v48 = vclamps-f32 %v4641_v45, 0.99999  ;;  %vm4452_vm9 = vcmp.gt.f32.partialorder %v13284_v56, 0.999 }
 0x4e9   : > { %5648 = vst [vmem:[%s11359_s21 + $0x418] sm:$0xff] %v5600_v44  ;;  %7843 = vlog2.f32 %v4786_v49  ;;  %v4644_v14 = vsel %vm4452_vm9, 0.999, %v13284_v56  ;;  %vm4211_vm1 = vcmp.eq.f32.partialorder %v13209_v21, 0.0 }
 0x4ea   : > { %v5359_v55 = vsel %vm4207_vm2, 0.0, %v5311_v23  ;;  %7845 = vlog2.f32 %v4930_v30  ;;  %v4785_v5 = vadd.f32 1.0, %v6002_v48  ;;  %v4929_v18 = vsub.f32 1.0, %v6002_v48 }
 0x4eb   : > { %v5407_v15 = vmul.f32 %v5359_v55, %v14463_v0  ;;  %v5503_v2 = vmul.f32 %v5359_v55, %v14464_v38  ;;  %v5599_v58 = vmul.f32 %v5359_v55, %v14465_v33  ;;  %7847 = vrcp.f32 %v4260_v6 }
 0x4ec   : > { %v13299_v24 = vpop.eup %7833  ;;  %7849 = vlog2.f32 %v4785_v5  ;;  %v6005_v19 = vclamps-f32 %v4644_v14, 0.99999  ;;  %v4259_v9 = vsel %vm4211_vm1, 1.0, %v13209_v21 }
 0x4ed   : > { %5455 = vst [vmem:[%s11359_s21 + $0x3f0] sm:$0xff] %v5407_v15  ;;  %5551 = vst [vmem:[%s11359_s21 + $0x3f8] sm:$0xff] %v5503_v2  ;;  %7851 = vlog2.f32 %v4929_v18  ;;  %v13308_v1 = vmax.f32 %v13299_v24, 1e-05  ;;  %v14466_v2 = vld [vmem:[#allocation96_spill] sm:$0xff] }
 0x4ee   : > { %5647 = vst [vmem:[%s11359_s21 + $0x400] sm:$0xff] %v5599_v58  ;;  %7853 = vrcp.f32 %v13284_v56  ;;  %v4788_v63 = vadd.f32 1.0, %v6005_v19  ;;  %v4932_v25 = vsub.f32 1.0, %v6005_v19  ;;  %v14467_v58 = vld [vmem:[#allocation52_spill] sm:$0xff]  ;;  %v14468_v19 = vld [vmem:[#allocation271_spill] sm:$0xff] }
 0x4ef   : > { %7855 = vrcp.f32 %v4642_v60  ;;  %vm4451_vm2 = vcmp.gt.f32.partialorder %v13308_v1, 0.999  ;;  %v7836_v41 = vpop.eup %7835 }
 0x4f0   : > { %7857 = vrcp.f32 %v13308_v1  ;;  %v4643_v43 = vsel %vm4451_vm2, 0.999, %v13308_v1  ;;  %v7838_v17 = vpop.eup %7837  ;;  %v4354_v32 = vmul.f32 %v7836_v41, %v13234_v37  ;;  %v14472_v1 = vld [vmem:[#allocation100_spill] sm:$0xff] }
 0x4f1   : > { %7859 = vlog2.f32 %v4788_v63  ;;  %v6004_v34 = vclamps-f32 %v4643_v43, 0.99999  ;;  %v7840_v50 = vpop.eup %7839  ;;  %v4353_v30 = vmul.f32 %v7838_v17, %v13251_v16 }
 0x4f2   : > { %7861 = vlog2.f32 %v4932_v25  ;;  %v7842_v39 = vpop.eup %7841  ;;  %v4546_v35 = vmul.f32 0.999, %v7840_v50 }
 0x4f3   : > { %7863 = vrcp.f32 %v4641_v45  ;;  %v4787_v10 = vadd.f32 1.0, %v6004_v34  ;;  %v4931_v57 = vsub.f32 1.0, %v6004_v34  ;;  %v4545_v22 = vmul.f32 0.999, %v7842_v39  ;;  %v14469_v34 = vld [vmem:[#allocation98_spill] sm:$0xff]  ;;  %v14471_v39 = vld [vmem:[#allocation275_spill] sm:$0xff] }
 0x4f4   : > { %v4594_v29 = vsel %vm4450_vm4, %v4546_v35, 1.0 }
 0x4f5   : > { %7865 = vlog2.f32 %v4787_v10  ;;  %v5266_v28 = vmul.f32 %v4594_v29, %v4354_v32  ;;  %v4593_v44 = vsel %vm4449_vm6, %v4545_v22, 1.0  ;;  %v14470_v10 = vld [vmem:[#allocation268_spill] sm:$0xff]  ;;  %v14475_v32 = vld [vmem:[#allocation101_spill] sm:$0xff] }
 0x4f6   : > { %v7844_v20 = vpop.eup %7843  ;;  %7867 = vlog2.f32 %v4931_v57  ;;  %v5265_v55 = vmul.f32 %v4593_v44, %v4353_v30  ;;  %v14474_v29 = vld [vmem:[#allocation108_spill] sm:$0xff] }
 0x4f7   : > { %v7846_v11 = vpop.eup %7845  ;;  %v4880_v31 = vmul.f32 0.6931472, %v7844_v20  ;;  %7869 = vrcp.f32 %v4644_v14 }
 0x4f8   : > { %v7848_v7 = vpop.eup %7847  ;;  %v5024_v53 = vmul.f32 0.6931472, %v7846_v11  ;;  %7871 = vrcp.f32 %v4259_v9 }
 0x4f9   : > { %v7850_v46 = vpop.eup %7849  ;;  %7873 = vrcp.f32 %v4643_v43  ;;  %v4356_v5 = vmul.f32 %v7848_v7, %v13270_v52 }
 0x4fa   : > { %v7852_v4 = vpop.eup %7851  ;;  %v5074_v8 = vsub.f32 %v4880_v31, %v5024_v53  ;;  %v4878_v26 = vmul.f32 0.6931472, %v7850_v46 }
 0x4fb   : > { %v7854_v60 = vpop.eup %7853  ;;  %v5022_v12 = vmul.f32 0.6931472, %v7852_v4 }
 0x4fc   : > { %v7856_v61 = vpop.eup %7855  ;;  %v5122_v59 = vmul.f32 0.5, %v5074_v8  ;;  %v4548_v36 = vmul.f32 0.999, %v7854_v60 }
 0x4fd   : > { %v7858_v42 = vpop.eup %7857  ;;  %v5073_v3 = vsub.f32 %v4878_v26, %v5022_v12  ;;  %v14473_v26 = vld [vmem:[#allocation54_spill] sm:$0xff] }
 0x4fe   : > { %v7860_v27 = vpop.eup %7859  ;;  %v5218_v13 = vmul.f32 %v7856_v61, %v5122_v59  ;;  %v4596_v0 = vsel %vm4452_vm9, %v4548_v36, 1.0  ;;  %v4547_v15 = vmul.f32 0.999, %v7858_v42  ;;  %v14476_v42 = vld [vmem:[#allocation277_spill] sm:$0xff] }
 0x4ff   : > { %v7862_v49 = vpop.eup %7861  ;;  %v5121_v62 = vmul.f32 0.5, %v5073_v3  ;;  %v4884_v45 = vmul.f32 0.6931472, %v7860_v27  ;;  %v5268_v17 = vmul.f32 %v4596_v0, %v4356_v5  ;;  %v14477_v27 = vld [vmem:[#allocation114_spill] sm:$0xff] }
 0x500   : > { %v7864_v23 = vpop.eup %7863  ;;  %v5314_v48 = vmul.f32 %v5266_v28, %v5218_v13  ;;  %v5028_v6 = vmul.f32 0.6931472, %v7862_v49  ;;  %v4595_v31 = vsel %vm4451_vm2, %v4547_v15, 1.0 }
 0x501   : > { %v5217_v37 = vmul.f32 %v7864_v23, %v5121_v62 }
 0x502   : > { %v7866_v18 = vpop.eup %7865  ;;  %v5362_v40 = vsel %vm4210_vm11, 0.0, %v5314_v48  ;;  %v5076_v16 = vsub.f32 %v4884_v45, %v5028_v6 }
 0x503   : > { %v7868_v38 = vpop.eup %7867  ;;  %v5410_v33 = vmul.f32 %v14466_v2, %v5362_v40  ;;  %v5506_v14 = vmul.f32 %v14467_v58, %v5362_v40  ;;  %v5602_v63 = vmul.f32 %v14468_v19, %v5362_v40  ;;  %v5313_v25 = vmul.f32 %v5265_v55, %v5217_v37 }
 0x504   : > { %v5124_v52 = vmul.f32 0.5, %v5076_v16  ;;  %v4882_v41 = vmul.f32 0.6931472, %v7866_v18  ;;  %v5026_v47 = vmul.f32 0.6931472, %v7868_v38  ;;  %v7870_v43 = vpop.eup %7869 }
 0x505   : > { %5458 = vst [vmem:[%s11359_s21 + $0x438] sm:$0xff] %v5410_v33  ;;  %5554 = vst [vmem:[%s11359_s21 + $0x440] sm:$0xff] %v5506_v14  ;;  %v5361_v56 = vsel %vm4209_vm3, 0.0, %v5313_v25  ;;  %v7872_v35 = vpop.eup %7871 }
 0x506   : > { %5650 = vst [vmem:[%s11359_s21 + $0x448] sm:$0xff] %v5602_v63  ;;  %v5409_v50 = vmul.f32 %v5361_v56, %v14469_v34  ;;  %v5505_v57 = vmul.f32 %v5361_v56, %v14470_v10  ;;  %v5601_v20 = vmul.f32 %v5361_v56, %v14471_v39  ;;  %v5220_v11 = vmul.f32 %v7870_v43, %v5124_v52  ;;  %v7874_v46 = vpop.eup %7873 }
 0x507   : > { %v5075_v9 = vsub.f32 %v4882_v41, %v5026_v47  ;;  %v4355_v7 = vmul.f32 %v7872_v35, %v13299_v24 }
 0x508   : > { %5457 = vst [vmem:[%s11359_s21 + $0x420] sm:$0xff] %v5409_v50  ;;  %5553 = vst [vmem:[%s11359_s21 + $0x428] sm:$0xff] %v5505_v57  ;;  %v5316_v51 = vmul.f32 %v5268_v17, %v5220_v11 }
 0x509   : > { %5649 = vst [vmem:[%s11359_s21 + $0x430] sm:$0xff] %v5601_v20  ;;  %v5123_v53 = vmul.f32 0.5, %v5075_v9  ;;  %v5267_v8 = vmul.f32 %v4595_v31, %v4355_v7 }
 0x50a   : > { %v5364_v4 = vsel %vm4212_vm10, 0.0, %v5316_v51 }
 0x50b   : > { %v5412_v22 = vmul.f32 %v14472_v1, %v5364_v4  ;;  %v5508_v60 = vmul.f32 %v14473_v26, %v5364_v4  ;;  %v5604_v12 = vmul.f32 %v14474_v29, %v5364_v4  ;;  %v5219_v61 = vmul.f32 %v7874_v46, %v5123_v53 }
 0x50d   : > { %5460 = vst [vmem:[%s11359_s21 + $0x468] sm:$0xff] %v5412_v22  ;;  %5556 = vst [vmem:[%s11359_s21 + $0x470] sm:$0xff] %v5508_v60  ;;  %v5315_v54 = vmul.f32 %v5267_v8, %v5219_v61 }
 0x50e   : > { %5652 = vst [vmem:[%s11359_s21 + $0x478] sm:$0xff] %v5604_v12 }
 0x50f   : > { %v5363_v24 = vsel %vm4211_vm1, 0.0, %v5315_v54 }
 0x510   : > { %v5411_v59 = vmul.f32 %v5363_v24, %v14475_v32  ;;  %v5507_v3 = vmul.f32 %v5363_v24, %v14476_v42  ;;  %v5603_v13 = vmul.f32 %v5363_v24, %v14477_v27 }
 0x512   : > { %5459 = vst [vmem:[%s11359_s21 + $0x450] sm:$0xff] %v5411_v59  ;;  %5555 = vst [vmem:[%s11359_s21 + $0x458] sm:$0xff] %v5507_v3 }
 0x513   : > { %5651 = vst [vmem:[%s11359_s21 + $0x460] sm:$0xff] %v5603_v13 }
 0x514   : > { %8088 = shalt.err (!%p8085_p3)
}
 0x515   : > { %s8089_s19 = scalar_lea.hbm %s13363_s16, 18432  ;;  %s8093_s29 = scalar_lea.hbm %s13420_s2, 55296 }
 0x516   : > { %p8090_p4 = scmp.ne.s32.totalorder %s13363_s16, %s8089_s19  ;;  %p8094_p7 = scmp.lt.s32.totalorder %s13363_s16, %s13420_s2 }
 0x517   : > { %p8095_p10 = scmp.lt.s32.totalorder %s8093_s29, %s8089_s19 }
 0x518   : > { %p8091_p5 = pnand %p8090_p4, %p8236_p9 }
 0x519   : > { %p8096_p8 = por %p8095_p10, %p8094_p7 }
 0x51a   : > { %p8092_p6 = pneg %p8091_p5 }
 0x51c   : > { %p8097_p13 = pnand %p8096_p8, %p8092_p6 }
 0x51e   : > { %8100 = shalt.err (!%p8097_p13)
}
 0x51f   : > { %s8168_s3 = smov 384   ;;  %s8169_s21 = smov 24  }
 0x520   : > { %6556 = dma.vmem_to_hbm [thread:$0]  (%p8236_p9), %s13365_s7, 18432, %s13363_s16, %s5654_s12, %s8168_s3, %s8168_s3, %s8169_s21  }
 0x521 PF: > { %p6572_p0 = scmp.ge.s32.totalorder %s8159_s14, 2  ;;  %s5684_s4 = sand.u32 1, %s8139_s9  }
 0x522   : > { %s5685_s8 = scalar_lea.sflag [#allocation4], %s5684_s4 }
 0x523   : > { %p6566_p12 = pnand %p6572_p0, %p8243_p11 }
 0x525   : > { %p6567_p1 = pneg %p6566_p12 }
 0x527   : > { %8134 = dma.done.wait (%p6567_p1), %s5685_s8, 18432  }
 0x528   : > { %8136 = vsyncadd (%p6567_p1), %s5685_s8, 4294948864  ;;  %s21_s14 = sadd.s32 1, %s8159_s14   ;;  %s14478_s9 = smov %s8143_s10 }
 0x529   : > { %p18_p2 = scmp.ge.s32.totalorder %s21_s14, 5   ;;  %s14479_s10 = smov %s8147_s11 }
 0x52a   : > { %s14480_s11 = smov %s8241_s23  ;;  %s14481_s12 = smov %s8155_s13 }
 0x52b   : > { %s14482_s13 = smov %s14484_s17  ;;  %20 = sbr.rel (!%p18_p2) target bundleno = 8 (0x8), region = 88 }
 0x530   :  { %5690 = vsyncpa [#allocation3], 1 }
 0x531   :  { %5692 = vsyncpa [#allocation3 + $0x1], 1 }
 0x532   :  { %5693 = vsyncpa [#allocation6], 1 }
 0x533   :  { %5695 = vsyncpa [#allocation6 + $0x1], 1 }
 0x534   :  { %5696 = vsyncpa [#allocation4], 1 }
 0x535   :  { %5698 = vsyncpa [#allocation4 + $0x1], 1 }

</bundles_post_ra>
